<compile_context>
chip_gen: v6e
topology: v6e:2x2x1
jax: 0.10.0
libtpu: 0.0.40
codegen_flags: <defaults>
</compile_context>

<pallas_src>
import functools

import jax
import jax.numpy as jnp
from jax import lax
from jax.experimental import pallas as pl
from jax.experimental.pallas import tpu as pltpu


# ----------------------------------------------------------------------------
# Fused Pallas kernel (built per layer-count; all refs are whole-array VMEM)
# ----------------------------------------------------------------------------
def _make_fused_lstm_kernel(num_layers, vocab_size):
    """Fused kernel for `num_layers` chained LSTM layers + Linear + LogSoftmax.

    Ref order:
      inputs : x(T,Bp,D), [wih(Din,4H), whh(H,4H), b(1,4H)] * L,
               wlin(T,H_last,Vp), blin(1,Vp)
      outputs: out(Bp,Vp)
      scratch: [pre(T,Bp,4H)] * L, [hseq(T,Bp,H)] * (L-1)
    """
    L = num_layers
    V = vocab_size

    def kernel(*refs):
        idx = 0
        x_ref = refs[idx]; idx += 1
        layers = []
        for _ in range(L):
            layers.append((refs[idx], refs[idx + 1], refs[idx + 2]))
            idx += 3
        wlin_ref = refs[idx]; idx += 1
        blin_ref = refs[idx]; idx += 1
        out_ref = refs[idx]; idx += 1
        pre_scr = list(refs[idx:idx + L]); idx += L
        hseq_scr = list(refs[idx:idx + L - 1]); idx += L - 1

        T, Bp, _ = x_ref.shape
        Vp = out_ref.shape[1]

        # Logits accumulator carried in vregs (Bp x Vp = 1 vreg at 8x128).
        logits = jnp.zeros((Bp, Vp), jnp.float32)

        for l in range(L):
            wih_ref, whh_ref, b_ref = layers[l]
            H4 = whh_ref.shape[1]
            H = H4 // 4
            last = (l == L - 1)

            # Hoisted input projection for the whole sequence: ONE fused
            # (T*Bp, Din) x (Din, 4H) matmul, off the serial dependency chain.
            if l == 0:
                src = x_ref[...]
            else:
                src = hseq_scr[l - 1][...]
            in_flat = src.reshape(T * Bp, src.shape[-1])
            pre_scr[l][...] = (
                jnp.dot(in_flat, wih_ref[...],
                        preferred_element_type=jnp.float32)
                + b_ref[...]
            ).reshape(T, Bp, H4)

            # Recurrent weight resident across the loop (few vregs).
            whh = whh_ref[...]
            pre_l = pre_scr[l]

            h0 = jnp.zeros((Bp, H), jnp.float32)
            c0 = jnp.zeros((Bp, H), jnp.float32)

            if last:
                def step(t, carry, whh=whh, pre_l=pre_l, H=H):
                    h, c, acc = carry
                    pre = pre_l[t] + jnp.dot(
                        h, whh, preferred_element_type=jnp.float32)
                    sig = jax.nn.sigmoid(pre)   # one EUP pass over (Bp, 4H)
                    th = jnp.tanh(pre)          # one EUP pass over (Bp, 4H)
                    i_g = sig[:, 0 * H:1 * H]
                    f_g = sig[:, 1 * H:2 * H]
                    g_g = th[:, 2 * H:3 * H]
                    o_g = sig[:, 3 * H:4 * H]
                    c_new = f_g * c + i_g * g_g
                    h_new = o_g * jnp.tanh(c_new)
                    # Linear head folded into the recurrence (lane-dense Vp).
                    acc = acc + jnp.dot(
                        h_new, wlin_ref[t], preferred_element_type=jnp.float32)
                    return h_new, c_new, acc

                _, _, logits = lax.fori_loop(
                    0, T, step, (h0, c0, logits), unroll=True)
            else:
                hseq_l = hseq_scr[l]

                def step(t, carry, whh=whh, pre_l=pre_l, hseq_l=hseq_l, H=H):
                    h, c = carry
                    pre = pre_l[t] + jnp.dot(
                        h, whh, preferred_element_type=jnp.float32)
                    sig = jax.nn.sigmoid(pre)
                    th = jnp.tanh(pre)
                    i_g = sig[:, 0 * H:1 * H]
                    f_g = sig[:, 1 * H:2 * H]
                    g_g = th[:, 2 * H:3 * H]
                    o_g = sig[:, 3 * H:4 * H]
                    c_new = f_g * c + i_g * g_g
                    h_new = o_g * jnp.tanh(c_new)
                    hseq_l[t] = h_new
                    return h_new, c_new

                lax.fori_loop(0, T, step, (h0, c0), unroll=True)

        # Linear bias + masked (lane-padded V), numerically stable LogSoftmax.
        logits = logits + blin_ref[...]
        lane = lax.broadcasted_iota(jnp.int32, (Bp, Vp), 1)
        logits = jnp.where(lane < V, logits, jnp.float32(-1e30))
        m = jnp.max(logits, axis=1, keepdims=True)
        s = logits - m
        lse = jnp.log(jnp.sum(jnp.exp(s), axis=1, keepdims=True))
        out_ref[...] = (s - lse).astype(out_ref.dtype)

    return kernel


# ----------------------------------------------------------------------------
# Wrappers
# ----------------------------------------------------------------------------
def embedding_max_norm(idx, table, max_norm=1.0):
    """nn.Embedding(..., max_norm=1) forward: rows with ||e||_2 > max_norm are
    scaled to exactly max_norm."""
    # TODO(synk): PyTorch additionally renormalizes the stored table in place;
    # a functional forward only scales the looked-up rows.
    emb = jnp.take(table, idx, axis=0)                         # (B, T, D)
    norms = jnp.sqrt(jnp.sum(emb * emb, axis=-1, keepdims=True))
    return emb * (max_norm / jnp.maximum(norms, max_norm))


def _fused_gate_lstm_params(w_ih, w_hh, b_ih, b_hh):
    """PyTorch (4H, Din)/(4H, H) weights (gate order i,f,g,o) -> lane-
    concatenated right-multiply layout (Din, 4H)/(H, 4H) + combined (1, 4H)
    bias, so one matmul produces all four gates side by side along lanes."""
    wih = jnp.transpose(w_ih).astype(jnp.float32)              # (Din, 4H)
    whh = jnp.transpose(w_hh).astype(jnp.float32)              # (H, 4H)
    b = (b_ih + b_hh).reshape(1, -1).astype(jnp.float32)       # (1, 4H)
    return wih, whh, b


def lstm_model_forward(x_idx, params):
    emb = embedding_max_norm(x_idx, params["embed"])           # (B, T, D)
    B, T, D = emb.shape
    Bp = ((B + 7) // 8) * 8                                    # sublane-pad batch

    x_tbd = jnp.transpose(emb, (1, 0, 2)).astype(jnp.float32)  # (T, B, D)
    if Bp != B:
        x_tbd = jnp.pad(x_tbd, ((0, 0), (0, Bp - B), (0, 0)))

    # Flatten the two stacked LSTM modules into one chain of single layers.
    layer_params = [
        _fused_gate_lstm_params(*p) for p in (params["lstm1"] + params["lstm2"])
    ]
    L = len(layer_params)
    H_last = layer_params[-1][1].shape[1] // 4

    V = params["line_w"].shape[0]
    assert params["line_w"].shape[1] == T * H_last
    Vp = ((V + 127) // 128) * 128                              # lane-dense output

    # View the Linear weight per timestep: flattened feature f = t*H_last + h.
    wlin = jnp.transpose(params["line_w"]).reshape(T, H_last, V).astype(jnp.float32)
    blin = params["line_b"].reshape(1, V).astype(jnp.float32)
    if Vp != V:
        wlin = jnp.pad(wlin, ((0, 0), (0, 0), (0, Vp - V)))
        blin = jnp.pad(blin, ((0, 0), (0, Vp - V)))

    inputs = [x_tbd]
    for trip in layer_params:
        inputs.extend(trip)
    inputs.extend([wlin, blin])

    scratch = []
    for (_, whh, _) in layer_params:
        scratch.append(pltpu.VMEM((T, Bp, whh.shape[1]), jnp.float32))       # pre-acts (T,Bp,4H)
    for (_, whh, _) in layer_params[:-1]:
        scratch.append(pltpu.VMEM((T, Bp, whh.shape[1] // 4), jnp.float32))  # layer out seq

    out = pl.pallas_call(
        _make_fused_lstm_kernel(L, V),
        out_shape=jax.ShapeDtypeStruct((Bp, Vp), jnp.float32),
        scratch_shapes=scratch,
    )(*inputs)
    return out[:B, :V]


# ----------------------------------------------------------------------------
# Pure-JAX reference (matches the PyTorch module's forward semantics)
# ----------------------------------------------------------------------------
def reference_forward(x_idx, params):
    emb = embedding_max_norm(x_idx, params["embed"])
    out = emb
    for (w_ih, w_hh, b_ih, b_hh) in params["lstm1"] + params["lstm2"]:
        B, T, _ = out.shape
        H = w_hh.shape[1]
        h = jnp.zeros((B, H), jnp.float32)
        c = jnp.zeros((B, H), jnp.float32)
        hs = []
        for t in range(T):
            gates = out[:, t, :] @ w_ih.T + b_ih + h @ w_hh.T + b_hh
            i = jax.nn.sigmoid(gates[:, 0 * H:1 * H])
            f = jax.nn.sigmoid(gates[:, 1 * H:2 * H])
            g = jnp.tanh(gates[:, 2 * H:3 * H])
            o = jax.nn.sigmoid(gates[:, 3 * H:4 * H])
            c = f * c + i * g
            h = o * jnp.tanh(c)
            hs.append(h)
        out = jnp.stack(hs, axis=1)
    flat = out.reshape(out.shape[0], -1)
    logits = flat @ params["line_w"].T + params["line_b"]
    m = jnp.max(logits, axis=1, keepdims=True)
    return logits - m - jnp.log(jnp.sum(jnp.exp(logits - m), axis=1, keepdims=True))


# ----------------------------------------------------------------------------
# Deterministic parameter init (PyTorch-style uniform(-k, k))
# ----------------------------------------------------------------------------
def init_params(key, vocab_size, input_size, hidden1, hidden2, num_layers, max_len):
    keys = iter(jax.random.split(key, 64))

    def uni(shape, k):
        return jax.random.uniform(next(keys), shape, jnp.float32, -k, k)

    params = {}
    params["embed"] = jax.random.normal(next(keys), (vocab_size, input_size),
                                        jnp.float32)

    def make_lstm(in_size, hidden, layers):
        k = 1.0 / jnp.sqrt(hidden)
        ps = []
        d = in_size
        for _ in range(layers):
            w_ih = uni((4 * hidden, d), k)
            w_hh = uni((4 * hidden, hidden), k)
            b_ih = uni((4 * hidden,), k)
            b_hh = uni((4 * hidden,), k)
            ps.append((w_ih, w_hh, b_ih, b_hh))
            d = hidden
        return ps

    params["lstm1"] = make_lstm(input_size, hidden1, num_layers)
    params["lstm2"] = make_lstm(hidden1, hidden2, num_layers)

    k_lin = 1.0 / jnp.sqrt(hidden2 * max_len)
    params["line_w"] = uni((vocab_size, hidden2 * max_len), k_lin)
    params["line_b"] = uni((vocab_size,), k_lin)
    return params


# TODO(synk): self.dropout is defined in __init__ but never used in forward(),
# so it is intentionally not implemented.

if __name__ == "__main__":
    vocab_size = 50
    input_size = 16
    hidden1 = 32
    hidden2 = 16
    num_layers = 1
    max_len = 30     # model's fixed sequence length (self.max_len)
    batch = 2

    key = jax.random.PRNGKey(0)
    k_par, k_idx = jax.random.split(key)
    params = init_params(k_par, vocab_size, input_size, hidden1, hidden2,
                         num_layers, max_len)

    x = jax.random.randint(k_idx, (batch, max_len), 0, vocab_size, jnp.int32)

    fwd = jax.jit(functools.partial(lstm_model_forward, params=params))
    pred = fwd(x)
    jax.block_until_ready(pred)

    assert pred.shape == (batch, vocab_size)
    assert bool(jnp.all(jnp.isfinite(pred)))
    # log-softmax rows should (approximately) exponentiate-sum to 1
    assert bool(jnp.allclose(jnp.sum(jnp.exp(pred), axis=1), 1.0, atol=1e-4))

    # Cross-check against a pure-JAX reference of the PyTorch forward.
    with jax.default_matmul_precision("float32"):
        ref = reference_forward(x, params)
    max_err = float(jnp.max(jnp.abs(pred - ref)))
    assert max_err < 2e-3, f"mismatch vs reference: {max_err}"

    print("KERNEL_OK")
</pallas_src>

<mosaic_0001>
module attributes {stable_mosaic.version = 11 : i64} {
  func.func @kernel(%arg0: memref<30x8x16xf32, #tpu.memory_space<vmem>>, %arg1: memref<16x128xf32, #tpu.memory_space<vmem>>, %arg2: memref<32x128xf32, #tpu.memory_space<vmem>>, %arg3: memref<1x128xf32, #tpu.memory_space<vmem>>, %arg4: memref<32x64xf32, #tpu.memory_space<vmem>>, %arg5: memref<16x64xf32, #tpu.memory_space<vmem>>, %arg6: memref<1x64xf32, #tpu.memory_space<vmem>>, %arg7: memref<30x16x128xf32, #tpu.memory_space<vmem>>, %arg8: memref<1x128xf32, #tpu.memory_space<vmem>>, %arg9: memref<8x128xf32, #tpu.memory_space<vmem>>, %arg10: memref<30x8x128xf32, #tpu.memory_space<vmem>>, %arg11: memref<30x8x64xf32, #tpu.memory_space<vmem>>, %arg12: memref<30x8x32xf32, #tpu.memory_space<vmem>>) attributes {dimension_semantics = [], scalar_prefetch = 0 : i64, scratch_operands = 3 : i64, tpu.core_type = #tpu.core_type<tc>} {
    %cst = arith.constant 0.000000e+00 : f32
    %0 = vector.broadcast %cst : f32 to vector<8x128xf32>
    %c0 = arith.constant 0 : index
    %c0_0 = arith.constant 0 : index
    %c0_1 = arith.constant 0 : index
    %1 = vector.load %arg0[%c0, %c0_0, %c0_1] : memref<30x8x16xf32, #tpu.memory_space<vmem>>, vector<30x8x16xf32>
    %2 = vector.shape_cast %1 : vector<30x8x16xf32> to vector<240x16xf32>
    %c0_2 = arith.constant 0 : index
    %c0_3 = arith.constant 0 : index
    %3 = vector.load %arg1[%c0_2, %c0_3] : memref<16x128xf32, #tpu.memory_space<vmem>>, vector<16x128xf32>
    %cst_4 = arith.constant dense<0.000000e+00> : vector<240x128xf32>
    %4 = tpu.matmul %2, %3, %cst_4 {dimension_numbers = #tpu.dot_dimension_numbers<[1], [0], [0], [1], [0, 0, 1, 1], [], []>} : vector<240x16xf32>, vector<16x128xf32>, vector<240x128xf32> -> vector<240x128xf32>
    %c0_5 = arith.constant 0 : index
    %c0_6 = arith.constant 0 : index
    %5 = vector.load %arg3[%c0_5, %c0_6] : memref<1x128xf32, #tpu.memory_space<vmem>>, vector<1x128xf32>
    %6 = vector.broadcast %5 : vector<1x128xf32> to vector<240x128xf32>
    %7 = arith.addf %4, %6 : vector<240x128xf32>
    %8 = vector.shape_cast %7 : vector<240x128xf32> to vector<30x8x128xf32>
    %c0_7 = arith.constant 0 : index
    %c0_8 = arith.constant 0 : index
    %c0_9 = arith.constant 0 : index
    %9 = vector.load %arg10[%c0_7, %c0_8, %c0_9] : memref<30x8x128xf32, #tpu.memory_space<vmem>>, vector<30x8x128xf32>
    tpu.vector_store %arg10[%c0_7, %c0_8, %c0_9], %8 {strides = array<i32>} : memref<30x8x128xf32, #tpu.memory_space<vmem>>, vector<30x8x128xf32>,
    %c0_10 = arith.constant 0 : index
    %c0_11 = arith.constant 0 : index
    %10 = vector.load %arg2[%c0_10, %c0_11] : memref<32x128xf32, #tpu.memory_space<vmem>>, vector<32x128xf32>
    %cst_12 = arith.constant 0.000000e+00 : f32
    %11 = vector.broadcast %cst_12 : f32 to vector<8x32xf32>
    %cst_13 = arith.constant 0.000000e+00 : f32
    %12 = vector.broadcast %cst_13 : f32 to vector<8x32xf32>
    %c0_i32 = arith.constant 0 : i32
    %13 = arith.index_cast %c0_i32 : i32 to index
    %c0_14 = arith.constant 0 : index
    %c0_15 = arith.constant 0 : index
    %14 = vector.load %arg10[%13, %c0_14, %c0_15] : memref<30x8x128xf32, #tpu.memory_space<vmem>>, vector<1x8x128xf32>
    %15 = vector.shape_cast %14 : vector<1x8x128xf32> to vector<8x128xf32>
    %cst_16 = arith.constant dense<0.000000e+00> : vector<8x128xf32>
    %16 = tpu.matmul %11, %10, %cst_16 {dimension_numbers = #tpu.dot_dimension_numbers<[1], [0], [0], [1], [0, 0, 1, 1], [], []>} : vector<8x32xf32>, vector<32x128xf32>, vector<8x128xf32> -> vector<8x128xf32>
    %17 = arith.addf %15, %16 : vector<8x128xf32>
    %18 = arith.negf %17 : vector<8x128xf32>
    %19 = math.exp %18 : vector<8x128xf32>
    %cst_17 = arith.constant 1.000000e+00 : f32
    %20 = vector.broadcast %cst_17 : f32 to vector<8x128xf32>
    %21 = arith.addf %20, %19 : vector<8x128xf32>
    %22 = arith.divf %20, %21 : vector<8x128xf32>
    %23 = math.tanh %17 : vector<8x128xf32>
    %24 = vector.extract_strided_slice %22 {offsets = [0, 0], sizes = [8, 32], strides = [1, 1]} : vector<8x128xf32> to vector<8x32xf32>
    %25 = vector.extract_strided_slice %22 {offsets = [0, 32], sizes = [8, 32], strides = [1, 1]} : vector<8x128xf32> to vector<8x32xf32>
    %26 = vector.extract_strided_slice %23 {offsets = [0, 64], sizes = [8, 32], strides = [1, 1]} : vector<8x128xf32> to vector<8x32xf32>
    %27 = vector.extract_strided_slice %22 {offsets = [0, 96], sizes = [8, 32], strides = [1, 1]} : vector<8x128xf32> to vector<8x32xf32>
    %28 = arith.mulf %25, %12 : vector<8x32xf32>
    %29 = arith.mulf %24, %26 : vector<8x32xf32>
    %30 = arith.addf %28, %29 : vector<8x32xf32>
    %31 = math.tanh %30 : vector<8x32xf32>
    %32 = arith.mulf %27, %31 : vector<8x32xf32>
    %33 = arith.index_cast %c0_i32 : i32 to index
    %c0_18 = arith.constant 0 : index
    %c0_19 = arith.constant 0 : index
    %34 = vector.load %arg12[%33, %c0_18, %c0_19] : memref<30x8x32xf32, #tpu.memory_space<vmem>>, vector<1x8x32xf32>
    %35 = vector.shape_cast %34 : vector<1x8x32xf32> to vector<8x32xf32>
    %36 = vector.shape_cast %32 : vector<8x32xf32> to vector<1x8x32xf32>
    tpu.vector_store %arg12[%33, %c0_18, %c0_19], %36 {strides = array<i32>} : memref<30x8x32xf32, #tpu.memory_space<vmem>>, vector<1x8x32xf32>,
    %c1_i32 = arith.constant 1 : i32
    %37 = arith.index_cast %c1_i32 : i32 to index
    %c0_20 = arith.constant 0 : index
    %c0_21 = arith.constant 0 : index
    %38 = vector.load %arg10[%37, %c0_20, %c0_21] : memref<30x8x128xf32, #tpu.memory_space<vmem>>, vector<1x8x128xf32>
    %39 = vector.shape_cast %38 : vector<1x8x128xf32> to vector<8x128xf32>
    %cst_22 = arith.constant dense<0.000000e+00> : vector<8x128xf32>
    %40 = tpu.matmul %32, %10, %cst_22 {dimension_numbers = #tpu.dot_dimension_numbers<[1], [0], [0], [1], [0, 0, 1, 1], [], []>} : vector<8x32xf32>, vector<32x128xf32>, vector<8x128xf32> -> vector<8x128xf32>
    %41 = arith.addf %39, %40 : vector<8x128xf32>
    %42 = arith.negf %41 : vector<8x128xf32>
    %43 = math.exp %42 : vector<8x128xf32>
    %cst_23 = arith.constant 1.000000e+00 : f32
    %44 = vector.broadcast %cst_23 : f32 to vector<8x128xf32>
    %45 = arith.addf %44, %43 : vector<8x128xf32>
    %46 = arith.divf %44, %45 : vector<8x128xf32>
    %47 = math.tanh %41 : vector<8x128xf32>
    %48 = vector.extract_strided_slice %46 {offsets = [0, 0], sizes = [8, 32], strides = [1, 1]} : vector<8x128xf32> to vector<8x32xf32>
    %49 = vector.extract_strided_slice %46 {offsets = [0, 32], sizes = [8, 32], strides = [1, 1]} : vector<8x128xf32> to vector<8x32xf32>
    %50 = vector.extract_strided_slice %47 {offsets = [0, 64], sizes = [8, 32], strides = [1, 1]} : vector<8x128xf32> to vector<8x32xf32>
    %51 = vector.extract_strided_slice %46 {offsets = [0, 96], sizes = [8, 32], strides = [1, 1]} : vector<8x128xf32> to vector<8x32xf32>
    %52 = arith.mulf %49, %30 : vector<8x32xf32>
    %53 = arith.mulf %48, %50 : vector<8x32xf32>
    %54 = arith.addf %52, %53 : vector<8x32xf32>
    %55 = math.tanh %54 : vector<8x32xf32>
    %56 = arith.mulf %51, %55 : vector<8x32xf32>
    %57 = arith.index_cast %c1_i32 : i32 to index
    %c0_24 = arith.constant 0 : index
    %c0_25 = arith.constant 0 : index
    %58 = vector.load %arg12[%57, %c0_24, %c0_25] : memref<30x8x32xf32, #tpu.memory_space<vmem>>, vector<1x8x32xf32>
    %59 = vector.shape_cast %58 : vector<1x8x32xf32> to vector<8x32xf32>
    %60 = vector.shape_cast %56 : vector<8x32xf32> to vector<1x8x32xf32>
    tpu.vector_store %arg12[%57, %c0_24, %c0_25], %60 {strides = array<i32>} : memref<30x8x32xf32, #tpu.memory_space<vmem>>, vector<1x8x32xf32>,
    %c2_i32 = arith.constant 2 : i32
    %61 = arith.index_cast %c2_i32 : i32 to index
    %c0_26 = arith.constant 0 : index
    %c0_27 = arith.constant 0 : index
    %62 = vector.load %arg10[%61, %c0_26, %c0_27] : memref<30x8x128xf32, #tpu.memory_space<vmem>>, vector<1x8x128xf32>
    %63 = vector.shape_cast %62 : vector<1x8x128xf32> to vector<8x128xf32>
    %cst_28 = arith.constant dense<0.000000e+00> : vector<8x128xf32>
    %64 = tpu.matmul %56, %10, %cst_28 {dimension_numbers = #tpu.dot_dimension_numbers<[1], [0], [0], [1], [0, 0, 1, 1], [], []>} : vector<8x32xf32>, vector<32x128xf32>, vector<8x128xf32> -> vector<8x128xf32>
    %65 = arith.addf %63, %64 : vector<8x128xf32>
    %66 = arith.negf %65 : vector<8x128xf32>
    %67 = math.exp %66 : vector<8x128xf32>
    %cst_29 = arith.constant 1.000000e+00 : f32
    %68 = vector.broadcast %cst_29 : f32 to vector<8x128xf32>
    %69 = arith.addf %68, %67 : vector<8x128xf32>
    %70 = arith.divf %68, %69 : vector<8x128xf32>
    %71 = math.tanh %65 : vector<8x128xf32>
    %72 = vector.extract_strided_slice %70 {offsets = [0, 0], sizes = [8, 32], strides = [1, 1]} : vector<8x128xf32> to vector<8x32xf32>
    %73 = vector.extract_strided_slice %70 {offsets = [0, 32], sizes = [8, 32], strides = [1, 1]} : vector<8x128xf32> to vector<8x32xf32>
    %74 = vector.extract_strided_slice %71 {offsets = [0, 64], sizes = [8, 32], strides = [1, 1]} : vector<8x128xf32> to vector<8x32xf32>
    %75 = vector.extract_strided_slice %70 {offsets = [0, 96], sizes = [8, 32], strides = [1, 1]} : vector<8x128xf32> to vector<8x32xf32>
    %76 = arith.mulf %73, %54 : vector<8x32xf32>
    %77 = arith.mulf %72, %74 : vector<8x32xf32>
    %78 = arith.addf %76, %77 : vector<8x32xf32>
    %79 = math.tanh %78 : vector<8x32xf32>
    %80 = arith.mulf %75, %79 : vector<8x32xf32>
    %81 = arith.index_cast %c2_i32 : i32 to index
    %c0_30 = arith.constant 0 : index
    %c0_31 = arith.constant 0 : index
    %82 = vector.load %arg12[%81, %c0_30, %c0_31] : memref<30x8x32xf32, #tpu.memory_space<vmem>>, vector<1x8x32xf32>
    %83 = vector.shape_cast %82 : vector<1x8x32xf32> to vector<8x32xf32>
    %84 = vector.shape_cast %80 : vector<8x32xf32> to vector<1x8x32xf32>
    tpu.vector_store %arg12[%81, %c0_30, %c0_31], %84 {strides = array<i32>} : memref<30x8x32xf32, #tpu.memory_space<vmem>>, vector<1x8x32xf32>,
    %c3_i32 = arith.constant 3 : i32
    %85 = arith.index_cast %c3_i32 : i32 to index
    %c0_32 = arith.constant 0 : index
    %c0_33 = arith.constant 0 : index
    %86 = vector.load %arg10[%85, %c0_32, %c0_33] : memref<30x8x128xf32, #tpu.memory_space<vmem>>, vector<1x8x128xf32>
    %87 = vector.shape_cast %86 : vector<1x8x128xf32> to vector<8x128xf32>
    %cst_34 = arith.constant dense<0.000000e+00> : vector<8x128xf32>
    %88 = tpu.matmul %80, %10, %cst_34 {dimension_numbers = #tpu.dot_dimension_numbers<[1], [0], [0], [1], [0, 0, 1, 1], [], []>} : vector<8x32xf32>, vector<32x128xf32>, vector<8x128xf32> -> vector<8x128xf32>
    %89 = arith.addf %87, %88 : vector<8x128xf32>
    %90 = arith.negf %89 : vector<8x128xf32>
    %91 = math.exp %90 : vector<8x128xf32>
    %cst_35 = arith.constant 1.000000e+00 : f32
    %92 = vector.broadcast %cst_35 : f32 to vector<8x128xf32>
    %93 = arith.addf %92, %91 : vector<8x128xf32>
    %94 = arith.divf %92, %93 : vector<8x128xf32>
    %95 = math.tanh %89 : vector<8x128xf32>
    %96 = vector.extract_strided_slice %94 {offsets = [0, 0], sizes = [8, 32], strides = [1, 1]} : vector<8x128xf32> to vector<8x32xf32>
    %97 = vector.extract_strided_slice %94 {offsets = [0, 32], sizes = [8, 32], strides = [1, 1]} : vector<8x128xf32> to vector<8x32xf32>
    %98 = vector.extract_strided_slice %95 {offsets = [0, 64], sizes = [8, 32], strides = [1, 1]} : vector<8x128xf32> to vector<8x32xf32>
    %99 = vector.extract_strided_slice %94 {offsets = [0, 96], sizes = [8, 32], strides = [1, 1]} : vector<8x128xf32> to vector<8x32xf32>
    %100 = arith.mulf %97, %78 : vector<8x32xf32>
    %101 = arith.mulf %96, %98 : vector<8x32xf32>
    %102 = arith.addf %100, %101 : vector<8x32xf32>
    %103 = math.tanh %102 : vector<8x32xf32>
    %104 = arith.mulf %99, %103 : vector<8x32xf32>
    %105 = arith.index_cast %c3_i32 : i32 to index
    %c0_36 = arith.constant 0 : index
    %c0_37 = arith.constant 0 : index
    %106 = vector.load %arg12[%105, %c0_36, %c0_37] : memref<30x8x32xf32, #tpu.memory_space<vmem>>, vector<1x8x32xf32>
    %107 = vector.shape_cast %106 : vector<1x8x32xf32> to vector<8x32xf32>
    %108 = vector.shape_cast %104 : vector<8x32xf32> to vector<1x8x32xf32>
    tpu.vector_store %arg12[%105, %c0_36, %c0_37], %108 {strides = array<i32>} : memref<30x8x32xf32, #tpu.memory_space<vmem>>, vector<1x8x32xf32>,
    %c4_i32 = arith.constant 4 : i32
    %109 = arith.index_cast %c4_i32 : i32 to index
    %c0_38 = arith.constant 0 : index
    %c0_39 = arith.constant 0 : index
    %110 = vector.load %arg10[%109, %c0_38, %c0_39] : memref<30x8x128xf32, #tpu.memory_space<vmem>>, vector<1x8x128xf32>
    %111 = vector.shape_cast %110 : vector<1x8x128xf32> to vector<8x128xf32>
    %cst_40 = arith.constant dense<0.000000e+00> : vector<8x128xf32>
    %112 = tpu.matmul %104, %10, %cst_40 {dimension_numbers = #tpu.dot_dimension_numbers<[1], [0], [0], [1], [0, 0, 1, 1], [], []>} : vector<8x32xf32>, vector<32x128xf32>, vector<8x128xf32> -> vector<8x128xf32>
    %113 = arith.addf %111, %112 : vector<8x128xf32>
    %114 = arith.negf %113 : vector<8x128xf32>
    %115 = math.exp %114 : vector<8x128xf32>
    %cst_41 = arith.constant 1.000000e+00 : f32
    %116 = vector.broadcast %cst_41 : f32 to vector<8x128xf32>
    %117 = arith.addf %116, %115 : vector<8x128xf32>
    %118 = arith.divf %116, %117 : vector<8x128xf32>
    %119 = math.tanh %113 : vector<8x128xf32>
    %120 = vector.extract_strided_slice %118 {offsets = [0, 0], sizes = [8, 32], strides = [1, 1]} : vector<8x128xf32> to vector<8x32xf32>
    %121 = vector.extract_strided_slice %118 {offsets = [0, 32], sizes = [8, 32], strides = [1, 1]} : vector<8x128xf32> to vector<8x32xf32>
    %122 = vector.extract_strided_slice %119 {offsets = [0, 64], sizes = [8, 32], strides = [1, 1]} : vector<8x128xf32> to vector<8x32xf32>
    %123 = vector.extract_strided_slice %118 {offsets = [0, 96], sizes = [8, 32], strides = [1, 1]} : vector<8x128xf32> to vector<8x32xf32>
    %124 = arith.mulf %121, %102 : vector<8x32xf32>
    %125 = arith.mulf %120, %122 : vector<8x32xf32>
    %126 = arith.addf %124, %125 : vector<8x32xf32>
    %127 = math.tanh %126 : vector<8x32xf32>
    %128 = arith.mulf %123, %127 : vector<8x32xf32>
    %129 = arith.index_cast %c4_i32 : i32 to index
    %c0_42 = arith.constant 0 : index
    %c0_43 = arith.constant 0 : index
    %130 = vector.load %arg12[%129, %c0_42, %c0_43] : memref<30x8x32xf32, #tpu.memory_space<vmem>>, vector<1x8x32xf32>
    %131 = vector.shape_cast %130 : vector<1x8x32xf32> to vector<8x32xf32>
    %132 = vector.shape_cast %128 : vector<8x32xf32> to vector<1x8x32xf32>
    tpu.vector_store %arg12[%129, %c0_42, %c0_43], %132 {strides = array<i32>} : memref<30x8x32xf32, #tpu.memory_space<vmem>>, vector<1x8x32xf32>,
    %c5_i32 = arith.constant 5 : i32
    %133 = arith.index_cast %c5_i32 : i32 to index
    %c0_44 = arith.constant 0 : index
    %c0_45 = arith.constant 0 : index
    %134 = vector.load %arg10[%133, %c0_44, %c0_45] : memref<30x8x128xf32, #tpu.memory_space<vmem>>, vector<1x8x128xf32>
    %135 = vector.shape_cast %134 : vector<1x8x128xf32> to vector<8x128xf32>
    %cst_46 = arith.constant dense<0.000000e+00> : vector<8x128xf32>
    %136 = tpu.matmul %128, %10, %cst_46 {dimension_numbers = #tpu.dot_dimension_numbers<[1], [0], [0], [1], [0, 0, 1, 1], [], []>} : vector<8x32xf32>, vector<32x128xf32>, vector<8x128xf32> -> vector<8x128xf32>
    %137 = arith.addf %135, %136 : vector<8x128xf32>
    %138 = arith.negf %137 : vector<8x128xf32>
    %139 = math.exp %138 : vector<8x128xf32>
    %cst_47 = arith.constant 1.000000e+00 : f32
    %140 = vector.broadcast %cst_47 : f32 to vector<8x128xf32>
    %141 = arith.addf %140, %139 : vector<8x128xf32>
    %142 = arith.divf %140, %141 : vector<8x128xf32>
    %143 = math.tanh %137 : vector<8x128xf32>
    %144 = vector.extract_strided_slice %142 {offsets = [0, 0], sizes = [8, 32], strides = [1, 1]} : vector<8x128xf32> to vector<8x32xf32>
    %145 = vector.extract_strided_slice %142 {offsets = [0, 32], sizes = [8, 32], strides = [1, 1]} : vector<8x128xf32> to vector<8x32xf32>
    %146 = vector.extract_strided_slice %143 {offsets = [0, 64], sizes = [8, 32], strides = [1, 1]} : vector<8x128xf32> to vector<8x32xf32>
    %147 = vector.extract_strided_slice %142 {offsets = [0, 96], sizes = [8, 32], strides = [1, 1]} : vector<8x128xf32> to vector<8x32xf32>
    %148 = arith.mulf %145, %126 : vector<8x32xf32>
    %149 = arith.mulf %144, %146 : vector<8x32xf32>
    %150 = arith.addf %148, %149 : vector<8x32xf32>
    %151 = math.tanh %150 : vector<8x32xf32>
    %152 = arith.mulf %147, %151 : vector<8x32xf32>
    %153 = arith.index_cast %c5_i32 : i32 to index
    %c0_48 = arith.constant 0 : index
    %c0_49 = arith.constant 0 : index
    %154 = vector.load %arg12[%153, %c0_48, %c0_49] : memref<30x8x32xf32, #tpu.memory_space<vmem>>, vector<1x8x32xf32>
    %155 = vector.shape_cast %154 : vector<1x8x32xf32> to vector<8x32xf32>
    %156 = vector.shape_cast %152 : vector<8x32xf32> to vector<1x8x32xf32>
    tpu.vector_store %arg12[%153, %c0_48, %c0_49], %156 {strides = array<i32>} : memref<30x8x32xf32, #tpu.memory_space<vmem>>, vector<1x8x32xf32>,
    %c6_i32 = arith.constant 6 : i32
    %157 = arith.index_cast %c6_i32 : i32 to index
    %c0_50 = arith.constant 0 : index
    %c0_51 = arith.constant 0 : index
    %158 = vector.load %arg10[%157, %c0_50, %c0_51] : memref<30x8x128xf32, #tpu.memory_space<vmem>>, vector<1x8x128xf32>
    %159 = vector.shape_cast %158 : vector<1x8x128xf32> to vector<8x128xf32>
    %cst_52 = arith.constant dense<0.000000e+00> : vector<8x128xf32>
    %160 = tpu.matmul %152, %10, %cst_52 {dimension_numbers = #tpu.dot_dimension_numbers<[1], [0], [0], [1], [0, 0, 1, 1], [], []>} : vector<8x32xf32>, vector<32x128xf32>, vector<8x128xf32> -> vector<8x128xf32>
    %161 = arith.addf %159, %160 : vector<8x128xf32>
    %162 = arith.negf %161 : vector<8x128xf32>
    %163 = math.exp %162 : vector<8x128xf32>
    %cst_53 = arith.constant 1.000000e+00 : f32
    %164 = vector.broadcast %cst_53 : f32 to vector<8x128xf32>
    %165 = arith.addf %164, %163 : vector<8x128xf32>
    %166 = arith.divf %164, %165 : vector<8x128xf32>
    %167 = math.tanh %161 : vector<8x128xf32>
    %168 = vector.extract_strided_slice %166 {offsets = [0, 0], sizes = [8, 32], strides = [1, 1]} : vector<8x128xf32> to vector<8x32xf32>
    %169 = vector.extract_strided_slice %166 {offsets = [0, 32], sizes = [8, 32], strides = [1, 1]} : vector<8x128xf32> to vector<8x32xf32>
    %170 = vector.extract_strided_slice %167 {offsets = [0, 64], sizes = [8, 32], strides = [1, 1]} : vector<8x128xf32> to vector<8x32xf32>
    %171 = vector.extract_strided_slice %166 {offsets = [0, 96], sizes = [8, 32], strides = [1, 1]} : vector<8x128xf32> to vector<8x32xf32>
    %172 = arith.mulf %169, %150 : vector<8x32xf32>
    %173 = arith.mulf %168, %170 : vector<8x32xf32>
    %174 = arith.addf %172, %173 : vector<8x32xf32>
    %175 = math.tanh %174 : vector<8x32xf32>
    %176 = arith.mulf %171, %175 : vector<8x32xf32>
    %177 = arith.index_cast %c6_i32 : i32 to index
    %c0_54 = arith.constant 0 : index
    %c0_55 = arith.constant 0 : index
    %178 = vector.load %arg12[%177, %c0_54, %c0_55] : memref<30x8x32xf32, #tpu.memory_space<vmem>>, vector<1x8x32xf32>
    %179 = vector.shape_cast %178 : vector<1x8x32xf32> to vector<8x32xf32>
    %180 = vector.shape_cast %176 : vector<8x32xf32> to vector<1x8x32xf32>
    tpu.vector_store %arg12[%177, %c0_54, %c0_55], %180 {strides = array<i32>} : memref<30x8x32xf32, #tpu.memory_space<vmem>>, vector<1x8x32xf32>,
    %c7_i32 = arith.constant 7 : i32
    %181 = arith.index_cast %c7_i32 : i32 to index
    %c0_56 = arith.constant 0 : index
    %c0_57 = arith.constant 0 : index
    %182 = vector.load %arg10[%181, %c0_56, %c0_57] : memref<30x8x128xf32, #tpu.memory_space<vmem>>, vector<1x8x128xf32>
    %183 = vector.shape_cast %182 : vector<1x8x128xf32> to vector<8x128xf32>
    %cst_58 = arith.constant dense<0.000000e+00> : vector<8x128xf32>
    %184 = tpu.matmul %176, %10, %cst_58 {dimension_numbers = #tpu.dot_dimension_numbers<[1], [0], [0], [1], [0, 0, 1, 1], [], []>} : vector<8x32xf32>, vector<32x128xf32>, vector<8x128xf32> -> vector<8x128xf32>
    %185 = arith.addf %183, %184 : vector<8x128xf32>
    %186 = arith.negf %185 : vector<8x128xf32>
    %187 = math.exp %186 : vector<8x128xf32>
    %cst_59 = arith.constant 1.000000e+00 : f32
    %188 = vector.broadcast %cst_59 : f32 to vector<8x128xf32>
    %189 = arith.addf %188, %187 : vector<8x128xf32>
    %190 = arith.divf %188, %189 : vector<8x128xf32>
    %191 = math.tanh %185 : vector<8x128xf32>
    %192 = vector.extract_strided_slice %190 {offsets = [0, 0], sizes = [8, 32], strides = [1, 1]} : vector<8x128xf32> to vector<8x32xf32>
    %193 = vector.extract_strided_slice %190 {offsets = [0, 32], sizes = [8, 32], strides = [1, 1]} : vector<8x128xf32> to vector<8x32xf32>
    %194 = vector.extract_strided_slice %191 {offsets = [0, 64], sizes = [8, 32], strides = [1, 1]} : vector<8x128xf32> to vector<8x32xf32>
    %195 = vector.extract_strided_slice %190 {offsets = [0, 96], sizes = [8, 32], strides = [1, 1]} : vector<8x128xf32> to vector<8x32xf32>
    %196 = arith.mulf %193, %174 : vector<8x32xf32>
    %197 = arith.mulf %192, %194 : vector<8x32xf32>
    %198 = arith.addf %196, %197 : vector<8x32xf32>
    %199 = math.tanh %198 : vector<8x32xf32>
    %200 = arith.mulf %195, %199 : vector<8x32xf32>
    %201 = arith.index_cast %c7_i32 : i32 to index
    %c0_60 = arith.constant 0 : index
    %c0_61 = arith.constant 0 : index
    %202 = vector.load %arg12[%201, %c0_60, %c0_61] : memref<30x8x32xf32, #tpu.memory_space<vmem>>, vector<1x8x32xf32>
    %203 = vector.shape_cast %202 : vector<1x8x32xf32> to vector<8x32xf32>
    %204 = vector.shape_cast %200 : vector<8x32xf32> to vector<1x8x32xf32>
    tpu.vector_store %arg12[%201, %c0_60, %c0_61], %204 {strides = array<i32>} : memref<30x8x32xf32, #tpu.memory_space<vmem>>, vector<1x8x32xf32>,
    %c8_i32 = arith.constant 8 : i32
    %205 = arith.index_cast %c8_i32 : i32 to index
    %c0_62 = arith.constant 0 : index
    %c0_63 = arith.constant 0 : index
    %206 = vector.load %arg10[%205, %c0_62, %c0_63] : memref<30x8x128xf32, #tpu.memory_space<vmem>>, vector<1x8x128xf32>
    %207 = vector.shape_cast %206 : vector<1x8x128xf32> to vector<8x128xf32>
    %cst_64 = arith.constant dense<0.000000e+00> : vector<8x128xf32>
    %208 = tpu.matmul %200, %10, %cst_64 {dimension_numbers = #tpu.dot_dimension_numbers<[1], [0], [0], [1], [0, 0, 1, 1], [], []>} : vector<8x32xf32>, vector<32x128xf32>, vector<8x128xf32> -> vector<8x128xf32>
    %209 = arith.addf %207, %208 : vector<8x128xf32>
    %210 = arith.negf %209 : vector<8x128xf32>
    %211 = math.exp %210 : vector<8x128xf32>
    %cst_65 = arith.constant 1.000000e+00 : f32
    %212 = vector.broadcast %cst_65 : f32 to vector<8x128xf32>
    %213 = arith.addf %212, %211 : vector<8x128xf32>
    %214 = arith.divf %212, %213 : vector<8x128xf32>
    %215 = math.tanh %209 : vector<8x128xf32>
    %216 = vector.extract_strided_slice %214 {offsets = [0, 0], sizes = [8, 32], strides = [1, 1]} : vector<8x128xf32> to vector<8x32xf32>
    %217 = vector.extract_strided_slice %214 {offsets = [0, 32], sizes = [8, 32], strides = [1, 1]} : vector<8x128xf32> to vector<8x32xf32>
    %218 = vector.extract_strided_slice %215 {offsets = [0, 64], sizes = [8, 32], strides = [1, 1]} : vector<8x128xf32> to vector<8x32xf32>
    %219 = vector.extract_strided_slice %214 {offsets = [0, 96], sizes = [8, 32], strides = [1, 1]} : vector<8x128xf32> to vector<8x32xf32>
    %220 = arith.mulf %217, %198 : vector<8x32xf32>
    %221 = arith.mulf %216, %218 : vector<8x32xf32>
    %222 = arith.addf %220, %221 : vector<8x32xf32>
    %223 = math.tanh %222 : vector<8x32xf32>
    %224 = arith.mulf %219, %223 : vector<8x32xf32>
    %225 = arith.index_cast %c8_i32 : i32 to index
    %c0_66 = arith.constant 0 : index
    %c0_67 = arith.constant 0 : index
    %226 = vector.load %arg12[%225, %c0_66, %c0_67] : memref<30x8x32xf32, #tpu.memory_space<vmem>>, vector<1x8x32xf32>
    %227 = vector.shape_cast %226 : vector<1x8x32xf32> to vector<8x32xf32>
    %228 = vector.shape_cast %224 : vector<8x32xf32> to vector<1x8x32xf32>
    tpu.vector_store %arg12[%225, %c0_66, %c0_67], %228 {strides = array<i32>} : memref<30x8x32xf32, #tpu.memory_space<vmem>>, vector<1x8x32xf32>,
    %c9_i32 = arith.constant 9 : i32
    %229 = arith.index_cast %c9_i32 : i32 to index
    %c0_68 = arith.constant 0 : index
    %c0_69 = arith.constant 0 : index
    %230 = vector.load %arg10[%229, %c0_68, %c0_69] : memref<30x8x128xf32, #tpu.memory_space<vmem>>, vector<1x8x128xf32>
    %231 = vector.shape_cast %230 : vector<1x8x128xf32> to vector<8x128xf32>
    %cst_70 = arith.constant dense<0.000000e+00> : vector<8x128xf32>
    %232 = tpu.matmul %224, %10, %cst_70 {dimension_numbers = #tpu.dot_dimension_numbers<[1], [0], [0], [1], [0, 0, 1, 1], [], []>} : vector<8x32xf32>, vector<32x128xf32>, vector<8x128xf32> -> vector<8x128xf32>
    %233 = arith.addf %231, %232 : vector<8x128xf32>
    %234 = arith.negf %233 : vector<8x128xf32>
    %235 = math.exp %234 : vector<8x128xf32>
    %cst_71 = arith.constant 1.000000e+00 : f32
    %236 = vector.broadcast %cst_71 : f32 to vector<8x128xf32>
    %237 = arith.addf %236, %235 : vector<8x128xf32>
    %238 = arith.divf %236, %237 : vector<8x128xf32>
    %239 = math.tanh %233 : vector<8x128xf32>
    %240 = vector.extract_strided_slice %238 {offsets = [0, 0], sizes = [8, 32], strides = [1, 1]} : vector<8x128xf32> to vector<8x32xf32>
    %241 = vector.extract_strided_slice %238 {offsets = [0, 32], sizes = [8, 32], strides = [1, 1]} : vector<8x128xf32> to vector<8x32xf32>
    %242 = vector.extract_strided_slice %239 {offsets = [0, 64], sizes = [8, 32], strides = [1, 1]} : vector<8x128xf32> to vector<8x32xf32>
    %243 = vector.extract_strided_slice %238 {offsets = [0, 96], sizes = [8, 32], strides = [1, 1]} : vector<8x128xf32> to vector<8x32xf32>
    %244 = arith.mulf %241, %222 : vector<8x32xf32>
    %245 = arith.mulf %240, %242 : vector<8x32xf32>
    %246 = arith.addf %244, %245 : vector<8x32xf32>
    %247 = math.tanh %246 : vector<8x32xf32>
    %248 = arith.mulf %243, %247 : vector<8x32xf32>
    %249 = arith.index_cast %c9_i32 : i32 to index
    %c0_72 = arith.constant 0 : index
    %c0_73 = arith.constant 0 : index
    %250 = vector.load %arg12[%249, %c0_72, %c0_73] : memref<30x8x32xf32, #tpu.memory_space<vmem>>, vector<1x8x32xf32>
    %251 = vector.shape_cast %250 : vector<1x8x32xf32> to vector<8x32xf32>
    %252 = vector.shape_cast %248 : vector<8x32xf32> to vector<1x8x32xf32>
    tpu.vector_store %arg12[%249, %c0_72, %c0_73], %252 {strides = array<i32>} : memref<30x8x32xf32, #tpu.memory_space<vmem>>, vector<1x8x32xf32>,
    %c10_i32 = arith.constant 10 : i32
    %253 = arith.index_cast %c10_i32 : i32 to index
    %c0_74 = arith.constant 0 : index
    %c0_75 = arith.constant 0 : index
    %254 = vector.load %arg10[%253, %c0_74, %c0_75] : memref<30x8x128xf32, #tpu.memory_space<vmem>>, vector<1x8x128xf32>
    %255 = vector.shape_cast %254 : vector<1x8x128xf32> to vector<8x128xf32>
    %cst_76 = arith.constant dense<0.000000e+00> : vector<8x128xf32>
    %256 = tpu.matmul %248, %10, %cst_76 {dimension_numbers = #tpu.dot_dimension_numbers<[1], [0], [0], [1], [0, 0, 1, 1], [], []>} : vector<8x32xf32>, vector<32x128xf32>, vector<8x128xf32> -> vector<8x128xf32>
    %257 = arith.addf %255, %256 : vector<8x128xf32>
    %258 = arith.negf %257 : vector<8x128xf32>
    %259 = math.exp %258 : vector<8x128xf32>
    %cst_77 = arith.constant 1.000000e+00 : f32
    %260 = vector.broadcast %cst_77 : f32 to vector<8x128xf32>
    %261 = arith.addf %260, %259 : vector<8x128xf32>
    %262 = arith.divf %260, %261 : vector<8x128xf32>
    %263 = math.tanh %257 : vector<8x128xf32>
    %264 = vector.extract_strided_slice %262 {offsets = [0, 0], sizes = [8, 32], strides = [1, 1]} : vector<8x128xf32> to vector<8x32xf32>
    %265 = vector.extract_strided_slice %262 {offsets = [0, 32], sizes = [8, 32], strides = [1, 1]} : vector<8x128xf32> to vector<8x32xf32>
    %266 = vector.extract_strided_slice %263 {offsets = [0, 64], sizes = [8, 32], strides = [1, 1]} : vector<8x128xf32> to vector<8x32xf32>
    %267 = vector.extract_strided_slice %262 {offsets = [0, 96], sizes = [8, 32], strides = [1, 1]} : vector<8x128xf32> to vector<8x32xf32>
    %268 = arith.mulf %265, %246 : vector<8x32xf32>
    %269 = arith.mulf %264, %266 : vector<8x32xf32>
    %270 = arith.addf %268, %269 : vector<8x32xf32>
    %271 = math.tanh %270 : vector<8x32xf32>
    %272 = arith.mulf %267, %271 : vector<8x32xf32>
    %273 = arith.index_cast %c10_i32 : i32 to index
    %c0_78 = arith.constant 0 : index
    %c0_79 = arith.constant 0 : index
    %274 = vector.load %arg12[%273, %c0_78, %c0_79] : memref<30x8x32xf32, #tpu.memory_space<vmem>>, vector<1x8x32xf32>
    %275 = vector.shape_cast %274 : vector<1x8x32xf32> to vector<8x32xf32>
    %276 = vector.shape_cast %272 : vector<8x32xf32> to vector<1x8x32xf32>
    tpu.vector_store %arg12[%273, %c0_78, %c0_79], %276 {strides = array<i32>} : memref<30x8x32xf32, #tpu.memory_space<vmem>>, vector<1x8x32xf32>,
    %c11_i32 = arith.constant 11 : i32
    %277 = arith.index_cast %c11_i32 : i32 to index
    %c0_80 = arith.constant 0 : index
    %c0_81 = arith.constant 0 : index
    %278 = vector.load %arg10[%277, %c0_80, %c0_81] : memref<30x8x128xf32, #tpu.memory_space<vmem>>, vector<1x8x128xf32>
    %279 = vector.shape_cast %278 : vector<1x8x128xf32> to vector<8x128xf32>
    %cst_82 = arith.constant dense<0.000000e+00> : vector<8x128xf32>
    %280 = tpu.matmul %272, %10, %cst_82 {dimension_numbers = #tpu.dot_dimension_numbers<[1], [0], [0], [1], [0, 0, 1, 1], [], []>} : vector<8x32xf32>, vector<32x128xf32>, vector<8x128xf32> -> vector<8x128xf32>
    %281 = arith.addf %279, %280 : vector<8x128xf32>
    %282 = arith.negf %281 : vector<8x128xf32>
    %283 = math.exp %282 : vector<8x128xf32>
    %cst_83 = arith.constant 1.000000e+00 : f32
    %284 = vector.broadcast %cst_83 : f32 to vector<8x128xf32>
    %285 = arith.addf %284, %283 : vector<8x128xf32>
    %286 = arith.divf %284, %285 : vector<8x128xf32>
    %287 = math.tanh %281 : vector<8x128xf32>
    %288 = vector.extract_strided_slice %286 {offsets = [0, 0], sizes = [8, 32], strides = [1, 1]} : vector<8x128xf32> to vector<8x32xf32>
    %289 = vector.extract_strided_slice %286 {offsets = [0, 32], sizes = [8, 32], strides = [1, 1]} : vector<8x128xf32> to vector<8x32xf32>
    %290 = vector.extract_strided_slice %287 {offsets = [0, 64], sizes = [8, 32], strides = [1, 1]} : vector<8x128xf32> to vector<8x32xf32>
    %291 = vector.extract_strided_slice %286 {offsets = [0, 96], sizes = [8, 32], strides = [1, 1]} : vector<8x128xf32> to vector<8x32xf32>
    %292 = arith.mulf %289, %270 : vector<8x32xf32>
    %293 = arith.mulf %288, %290 : vector<8x32xf32>
    %294 = arith.addf %292, %293 : vector<8x32xf32>
    %295 = math.tanh %294 : vector<8x32xf32>
    %296 = arith.mulf %291, %295 : vector<8x32xf32>
    %297 = arith.index_cast %c11_i32 : i32 to index
    %c0_84 = arith.constant 0 : index
    %c0_85 = arith.constant 0 : index
    %298 = vector.load %arg12[%297, %c0_84, %c0_85] : memref<30x8x32xf32, #tpu.memory_space<vmem>>, vector<1x8x32xf32>
    %299 = vector.shape_cast %298 : vector<1x8x32xf32> to vector<8x32xf32>
    %300 = vector.shape_cast %296 : vector<8x32xf32> to vector<1x8x32xf32>
    tpu.vector_store %arg12[%297, %c0_84, %c0_85], %300 {strides = array<i32>} : memref<30x8x32xf32, #tpu.memory_space<vmem>>, vector<1x8x32xf32>,
    %c12_i32 = arith.constant 12 : i32
    %301 = arith.index_cast %c12_i32 : i32 to index
    %c0_86 = arith.constant 0 : index
    %c0_87 = arith.constant 0 : index
    %302 = vector.load %arg10[%301, %c0_86, %c0_87] : memref<30x8x128xf32, #tpu.memory_space<vmem>>, vector<1x8x128xf32>
    %303 = vector.shape_cast %302 : vector<1x8x128xf32> to vector<8x128xf32>
    %cst_88 = arith.constant dense<0.000000e+00> : vector<8x128xf32>
    %304 = tpu.matmul %296, %10, %cst_88 {dimension_numbers = #tpu.dot_dimension_numbers<[1], [0], [0], [1], [0, 0, 1, 1], [], []>} : vector<8x32xf32>, vector<32x128xf32>, vector<8x128xf32> -> vector<8x128xf32>
    %305 = arith.addf %303, %304 : vector<8x128xf32>
    %306 = arith.negf %305 : vector<8x128xf32>
    %307 = math.exp %306 : vector<8x128xf32>
    %cst_89 = arith.constant 1.000000e+00 : f32
    %308 = vector.broadcast %cst_89 : f32 to vector<8x128xf32>
    %309 = arith.addf %308, %307 : vector<8x128xf32>
    %310 = arith.divf %308, %309 : vector<8x128xf32>
    %311 = math.tanh %305 : vector<8x128xf32>
    %312 = vector.extract_strided_slice %310 {offsets = [0, 0], sizes = [8, 32], strides = [1, 1]} : vector<8x128xf32> to vector<8x32xf32>
    %313 = vector.extract_strided_slice %310 {offsets = [0, 32], sizes = [8, 32], strides = [1, 1]} : vector<8x128xf32> to vector<8x32xf32>
    %314 = vector.extract_strided_slice %311 {offsets = [0, 64], sizes = [8, 32], strides = [1, 1]} : vector<8x128xf32> to vector<8x32xf32>
    %315 = vector.extract_strided_slice %310 {offsets = [0, 96], sizes = [8, 32], strides = [1, 1]} : vector<8x128xf32> to vector<8x32xf32>
    %316 = arith.mulf %313, %294 : vector<8x32xf32>
    %317 = arith.mulf %312, %314 : vector<8x32xf32>
    %318 = arith.addf %316, %317 : vector<8x32xf32>
    %319 = math.tanh %318 : vector<8x32xf32>
    %320 = arith.mulf %315, %319 : vector<8x32xf32>
    %321 = arith.index_cast %c12_i32 : i32 to index
    %c0_90 = arith.constant 0 : index
    %c0_91 = arith.constant 0 : index
    %322 = vector.load %arg12[%321, %c0_90, %c0_91] : memref<30x8x32xf32, #tpu.memory_space<vmem>>, vector<1x8x32xf32>
    %323 = vector.shape_cast %322 : vector<1x8x32xf32> to vector<8x32xf32>
    %324 = vector.shape_cast %320 : vector<8x32xf32> to vector<1x8x32xf32>
    tpu.vector_store %arg12[%321, %c0_90, %c0_91], %324 {strides = array<i32>} : memref<30x8x32xf32, #tpu.memory_space<vmem>>, vector<1x8x32xf32>,
    %c13_i32 = arith.constant 13 : i32
    %325 = arith.index_cast %c13_i32 : i32 to index
    %c0_92 = arith.constant 0 : index
    %c0_93 = arith.constant 0 : index
    %326 = vector.load %arg10[%325, %c0_92, %c0_93] : memref<30x8x128xf32, #tpu.memory_space<vmem>>, vector<1x8x128xf32>
    %327 = vector.shape_cast %326 : vector<1x8x128xf32> to vector<8x128xf32>
    %cst_94 = arith.constant dense<0.000000e+00> : vector<8x128xf32>
    %328 = tpu.matmul %320, %10, %cst_94 {dimension_numbers = #tpu.dot_dimension_numbers<[1], [0], [0], [1], [0, 0, 1, 1], [], []>} : vector<8x32xf32>, vector<32x128xf32>, vector<8x128xf32> -> vector<8x128xf32>
    %329 = arith.addf %327, %328 : vector<8x128xf32>
    %330 = arith.negf %329 : vector<8x128xf32>
    %331 = math.exp %330 : vector<8x128xf32>
    %cst_95 = arith.constant 1.000000e+00 : f32
    %332 = vector.broadcast %cst_95 : f32 to vector<8x128xf32>
    %333 = arith.addf %332, %331 : vector<8x128xf32>
    %334 = arith.divf %332, %333 : vector<8x128xf32>
    %335 = math.tanh %329 : vector<8x128xf32>
    %336 = vector.extract_strided_slice %334 {offsets = [0, 0], sizes = [8, 32], strides = [1, 1]} : vector<8x128xf32> to vector<8x32xf32>
    %337 = vector.extract_strided_slice %334 {offsets = [0, 32], sizes = [8, 32], strides = [1, 1]} : vector<8x128xf32> to vector<8x32xf32>
    %338 = vector.extract_strided_slice %335 {offsets = [0, 64], sizes = [8, 32], strides = [1, 1]} : vector<8x128xf32> to vector<8x32xf32>
    %339 = vector.extract_strided_slice %334 {offsets = [0, 96], sizes = [8, 32], strides = [1, 1]} : vector<8x128xf32> to vector<8x32xf32>
    %340 = arith.mulf %337, %318 : vector<8x32xf32>
    %341 = arith.mulf %336, %338 : vector<8x32xf32>
    %342 = arith.addf %340, %341 : vector<8x32xf32>
    %343 = math.tanh %342 : vector<8x32xf32>
    %344 = arith.mulf %339, %343 : vector<8x32xf32>
    %345 = arith.index_cast %c13_i32 : i32 to index
    %c0_96 = arith.constant 0 : index
    %c0_97 = arith.constant 0 : index
    %346 = vector.load %arg12[%345, %c0_96, %c0_97] : memref<30x8x32xf32, #tpu.memory_space<vmem>>, vector<1x8x32xf32>
    %347 = vector.shape_cast %346 : vector<1x8x32xf32> to vector<8x32xf32>
    %348 = vector.shape_cast %344 : vector<8x32xf32> to vector<1x8x32xf32>
    tpu.vector_store %arg12[%345, %c0_96, %c0_97], %348 {strides = array<i32>} : memref<30x8x32xf32, #tpu.memory_space<vmem>>, vector<1x8x32xf32>,
    %c14_i32 = arith.constant 14 : i32
    %349 = arith.index_cast %c14_i32 : i32 to index
    %c0_98 = arith.constant 0 : index
    %c0_99 = arith.constant 0 : index
    %350 = vector.load %arg10[%349, %c0_98, %c0_99] : memref<30x8x128xf32, #tpu.memory_space<vmem>>, vector<1x8x128xf32>
    %351 = vector.shape_cast %350 : vector<1x8x128xf32> to vector<8x128xf32>
    %cst_100 = arith.constant dense<0.000000e+00> : vector<8x128xf32>
    %352 = tpu.matmul %344, %10, %cst_100 {dimension_numbers = #tpu.dot_dimension_numbers<[1], [0], [0], [1], [0, 0, 1, 1], [], []>} : vector<8x32xf32>, vector<32x128xf32>, vector<8x128xf32> -> vector<8x128xf32>
    %353 = arith.addf %351, %352 : vector<8x128xf32>
    %354 = arith.negf %353 : vector<8x128xf32>
    %355 = math.exp %354 : vector<8x128xf32>
    %cst_101 = arith.constant 1.000000e+00 : f32
    %356 = vector.broadcast %cst_101 : f32 to vector<8x128xf32>
    %357 = arith.addf %356, %355 : vector<8x128xf32>
    %358 = arith.divf %356, %357 : vector<8x128xf32>
    %359 = math.tanh %353 : vector<8x128xf32>
    %360 = vector.extract_strided_slice %358 {offsets = [0, 0], sizes = [8, 32], strides = [1, 1]} : vector<8x128xf32> to vector<8x32xf32>
    %361 = vector.extract_strided_slice %358 {offsets = [0, 32], sizes = [8, 32], strides = [1, 1]} : vector<8x128xf32> to vector<8x32xf32>
    %362 = vector.extract_strided_slice %359 {offsets = [0, 64], sizes = [8, 32], strides = [1, 1]} : vector<8x128xf32> to vector<8x32xf32>
    %363 = vector.extract_strided_slice %358 {offsets = [0, 96], sizes = [8, 32], strides = [1, 1]} : vector<8x128xf32> to vector<8x32xf32>
    %364 = arith.mulf %361, %342 : vector<8x32xf32>
    %365 = arith.mulf %360, %362 : vector<8x32xf32>
    %366 = arith.addf %364, %365 : vector<8x32xf32>
    %367 = math.tanh %366 : vector<8x32xf32>
    %368 = arith.mulf %363, %367 : vector<8x32xf32>
    %369 = arith.index_cast %c14_i32 : i32 to index
    %c0_102 = arith.constant 0 : index
    %c0_103 = arith.constant 0 : index
    %370 = vector.load %arg12[%369, %c0_102, %c0_103] : memref<30x8x32xf32, #tpu.memory_space<vmem>>, vector<1x8x32xf32>
    %371 = vector.shape_cast %370 : vector<1x8x32xf32> to vector<8x32xf32>
    %372 = vector.shape_cast %368 : vector<8x32xf32> to vector<1x8x32xf32>
    tpu.vector_store %arg12[%369, %c0_102, %c0_103], %372 {strides = array<i32>} : memref<30x8x32xf32, #tpu.memory_space<vmem>>, vector<1x8x32xf32>,
    %c15_i32 = arith.constant 15 : i32
    %373 = arith.index_cast %c15_i32 : i32 to index
    %c0_104 = arith.constant 0 : index
    %c0_105 = arith.constant 0 : index
    %374 = vector.load %arg10[%373, %c0_104, %c0_105] : memref<30x8x128xf32, #tpu.memory_space<vmem>>, vector<1x8x128xf32>
    %375 = vector.shape_cast %374 : vector<1x8x128xf32> to vector<8x128xf32>
    %cst_106 = arith.constant dense<0.000000e+00> : vector<8x128xf32>
    %376 = tpu.matmul %368, %10, %cst_106 {dimension_numbers = #tpu.dot_dimension_numbers<[1], [0], [0], [1], [0, 0, 1, 1], [], []>} : vector<8x32xf32>, vector<32x128xf32>, vector<8x128xf32> -> vector<8x128xf32>
    %377 = arith.addf %375, %376 : vector<8x128xf32>
    %378 = arith.negf %377 : vector<8x128xf32>
    %379 = math.exp %378 : vector<8x128xf32>
    %cst_107 = arith.constant 1.000000e+00 : f32
    %380 = vector.broadcast %cst_107 : f32 to vector<8x128xf32>
    %381 = arith.addf %380, %379 : vector<8x128xf32>
    %382 = arith.divf %380, %381 : vector<8x128xf32>
    %383 = math.tanh %377 : vector<8x128xf32>
    %384 = vector.extract_strided_slice %382 {offsets = [0, 0], sizes = [8, 32], strides = [1, 1]} : vector<8x128xf32> to vector<8x32xf32>
    %385 = vector.extract_strided_slice %382 {offsets = [0, 32], sizes = [8, 32], strides = [1, 1]} : vector<8x128xf32> to vector<8x32xf32>
    %386 = vector.extract_strided_slice %383 {offsets = [0, 64], sizes = [8, 32], strides = [1, 1]} : vector<8x128xf32> to vector<8x32xf32>
    %387 = vector.extract_strided_slice %382 {offsets = [0, 96], sizes = [8, 32], strides = [1, 1]} : vector<8x128xf32> to vector<8x32xf32>
    %388 = arith.mulf %385, %366 : vector<8x32xf32>
    %389 = arith.mulf %384, %386 : vector<8x32xf32>
    %390 = arith.addf %388, %389 : vector<8x32xf32>
    %391 = math.tanh %390 : vector<8x32xf32>
    %392 = arith.mulf %387, %391 : vector<8x32xf32>
    %393 = arith.index_cast %c15_i32 : i32 to index
    %c0_108 = arith.constant 0 : index
    %c0_109 = arith.constant 0 : index
    %394 = vector.load %arg12[%393, %c0_108, %c0_109] : memref<30x8x32xf32, #tpu.memory_space<vmem>>, vector<1x8x32xf32>
    %395 = vector.shape_cast %394 : vector<1x8x32xf32> to vector<8x32xf32>
    %396 = vector.shape_cast %392 : vector<8x32xf32> to vector<1x8x32xf32>
    tpu.vector_store %arg12[%393, %c0_108, %c0_109], %396 {strides = array<i32>} : memref<30x8x32xf32, #tpu.memory_space<vmem>>, vector<1x8x32xf32>,
    %c16_i32 = arith.constant 16 : i32
    %397 = arith.index_cast %c16_i32 : i32 to index
    %c0_110 = arith.constant 0 : index
    %c0_111 = arith.constant 0 : index
    %398 = vector.load %arg10[%397, %c0_110, %c0_111] : memref<30x8x128xf32, #tpu.memory_space<vmem>>, vector<1x8x128xf32>
    %399 = vector.shape_cast %398 : vector<1x8x128xf32> to vector<8x128xf32>
    %cst_112 = arith.constant dense<0.000000e+00> : vector<8x128xf32>
    %400 = tpu.matmul %392, %10, %cst_112 {dimension_numbers = #tpu.dot_dimension_numbers<[1], [0], [0], [1], [0, 0, 1, 1], [], []>} : vector<8x32xf32>, vector<32x128xf32>, vector<8x128xf32> -> vector<8x128xf32>
    %401 = arith.addf %399, %400 : vector<8x128xf32>
    %402 = arith.negf %401 : vector<8x128xf32>
    %403 = math.exp %402 : vector<8x128xf32>
    %cst_113 = arith.constant 1.000000e+00 : f32
    %404 = vector.broadcast %cst_113 : f32 to vector<8x128xf32>
    %405 = arith.addf %404, %403 : vector<8x128xf32>
    %406 = arith.divf %404, %405 : vector<8x128xf32>
    %407 = math.tanh %401 : vector<8x128xf32>
    %408 = vector.extract_strided_slice %406 {offsets = [0, 0], sizes = [8, 32], strides = [1, 1]} : vector<8x128xf32> to vector<8x32xf32>
    %409 = vector.extract_strided_slice %406 {offsets = [0, 32], sizes = [8, 32], strides = [1, 1]} : vector<8x128xf32> to vector<8x32xf32>
    %410 = vector.extract_strided_slice %407 {offsets = [0, 64], sizes = [8, 32], strides = [1, 1]} : vector<8x128xf32> to vector<8x32xf32>
    %411 = vector.extract_strided_slice %406 {offsets = [0, 96], sizes = [8, 32], strides = [1, 1]} : vector<8x128xf32> to vector<8x32xf32>
    %412 = arith.mulf %409, %390 : vector<8x32xf32>
    %413 = arith.mulf %408, %410 : vector<8x32xf32>
    %414 = arith.addf %412, %413 : vector<8x32xf32>
    %415 = math.tanh %414 : vector<8x32xf32>
    %416 = arith.mulf %411, %415 : vector<8x32xf32>
    %417 = arith.index_cast %c16_i32 : i32 to index
    %c0_114 = arith.constant 0 : index
    %c0_115 = arith.constant 0 : index
    %418 = vector.load %arg12[%417, %c0_114, %c0_115] : memref<30x8x32xf32, #tpu.memory_space<vmem>>, vector<1x8x32xf32>
    %419 = vector.shape_cast %418 : vector<1x8x32xf32> to vector<8x32xf32>
    %420 = vector.shape_cast %416 : vector<8x32xf32> to vector<1x8x32xf32>
    tpu.vector_store %arg12[%417, %c0_114, %c0_115], %420 {strides = array<i32>} : memref<30x8x32xf32, #tpu.memory_space<vmem>>, vector<1x8x32xf32>,
    %c17_i32 = arith.constant 17 : i32
    %421 = arith.index_cast %c17_i32 : i32 to index
    %c0_116 = arith.constant 0 : index
    %c0_117 = arith.constant 0 : index
    %422 = vector.load %arg10[%421, %c0_116, %c0_117] : memref<30x8x128xf32, #tpu.memory_space<vmem>>, vector<1x8x128xf32>
    %423 = vector.shape_cast %422 : vector<1x8x128xf32> to vector<8x128xf32>
    %cst_118 = arith.constant dense<0.000000e+00> : vector<8x128xf32>
    %424 = tpu.matmul %416, %10, %cst_118 {dimension_numbers = #tpu.dot_dimension_numbers<[1], [0], [0], [1], [0, 0, 1, 1], [], []>} : vector<8x32xf32>, vector<32x128xf32>, vector<8x128xf32> -> vector<8x128xf32>
    %425 = arith.addf %423, %424 : vector<8x128xf32>
    %426 = arith.negf %425 : vector<8x128xf32>
    %427 = math.exp %426 : vector<8x128xf32>
    %cst_119 = arith.constant 1.000000e+00 : f32
    %428 = vector.broadcast %cst_119 : f32 to vector<8x128xf32>
    %429 = arith.addf %428, %427 : vector<8x128xf32>
    %430 = arith.divf %428, %429 : vector<8x128xf32>
    %431 = math.tanh %425 : vector<8x128xf32>
    %432 = vector.extract_strided_slice %430 {offsets = [0, 0], sizes = [8, 32], strides = [1, 1]} : vector<8x128xf32> to vector<8x32xf32>
    %433 = vector.extract_strided_slice %430 {offsets = [0, 32], sizes = [8, 32], strides = [1, 1]} : vector<8x128xf32> to vector<8x32xf32>
    %434 = vector.extract_strided_slice %431 {offsets = [0, 64], sizes = [8, 32], strides = [1, 1]} : vector<8x128xf32> to vector<8x32xf32>
    %435 = vector.extract_strided_slice %430 {offsets = [0, 96], sizes = [8, 32], strides = [1, 1]} : vector<8x128xf32> to vector<8x32xf32>
    %436 = arith.mulf %433, %414 : vector<8x32xf32>
    %437 = arith.mulf %432, %434 : vector<8x32xf32>
    %438 = arith.addf %436, %437 : vector<8x32xf32>
    %439 = math.tanh %438 : vector<8x32xf32>
    %440 = arith.mulf %435, %439 : vector<8x32xf32>
    %441 = arith.index_cast %c17_i32 : i32 to index
    %c0_120 = arith.constant 0 : index
    %c0_121 = arith.constant 0 : index
    %442 = vector.load %arg12[%441, %c0_120, %c0_121] : memref<30x8x32xf32, #tpu.memory_space<vmem>>, vector<1x8x32xf32>
    %443 = vector.shape_cast %442 : vector<1x8x32xf32> to vector<8x32xf32>
    %444 = vector.shape_cast %440 : vector<8x32xf32> to vector<1x8x32xf32>
    tpu.vector_store %arg12[%441, %c0_120, %c0_121], %444 {strides = array<i32>} : memref<30x8x32xf32, #tpu.memory_space<vmem>>, vector<1x8x32xf32>,
    %c18_i32 = arith.constant 18 : i32
    %445 = arith.index_cast %c18_i32 : i32 to index
    %c0_122 = arith.constant 0 : index
    %c0_123 = arith.constant 0 : index
    %446 = vector.load %arg10[%445, %c0_122, %c0_123] : memref<30x8x128xf32, #tpu.memory_space<vmem>>, vector<1x8x128xf32>
    %447 = vector.shape_cast %446 : vector<1x8x128xf32> to vector<8x128xf32>
    %cst_124 = arith.constant dense<0.000000e+00> : vector<8x128xf32>
    %448 = tpu.matmul %440, %10, %cst_124 {dimension_numbers = #tpu.dot_dimension_numbers<[1], [0], [0], [1], [0, 0, 1, 1], [], []>} : vector<8x32xf32>, vector<32x128xf32>, vector<8x128xf32> -> vector<8x128xf32>
    %449 = arith.addf %447, %448 : vector<8x128xf32>
    %450 = arith.negf %449 : vector<8x128xf32>
    %451 = math.exp %450 : vector<8x128xf32>
    %cst_125 = arith.constant 1.000000e+00 : f32
    %452 = vector.broadcast %cst_125 : f32 to vector<8x128xf32>
    %453 = arith.addf %452, %451 : vector<8x128xf32>
    %454 = arith.divf %452, %453 : vector<8x128xf32>
    %455 = math.tanh %449 : vector<8x128xf32>
    %456 = vector.extract_strided_slice %454 {offsets = [0, 0], sizes = [8, 32], strides = [1, 1]} : vector<8x128xf32> to vector<8x32xf32>
    %457 = vector.extract_strided_slice %454 {offsets = [0, 32], sizes = [8, 32], strides = [1, 1]} : vector<8x128xf32> to vector<8x32xf32>
    %458 = vector.extract_strided_slice %455 {offsets = [0, 64], sizes = [8, 32], strides = [1, 1]} : vector<8x128xf32> to vector<8x32xf32>
    %459 = vector.extract_strided_slice %454 {offsets = [0, 96], sizes = [8, 32], strides = [1, 1]} : vector<8x128xf32> to vector<8x32xf32>
    %460 = arith.mulf %457, %438 : vector<8x32xf32>
    %461 = arith.mulf %456, %458 : vector<8x32xf32>
    %462 = arith.addf %460, %461 : vector<8x32xf32>
    %463 = math.tanh %462 : vector<8x32xf32>
    %464 = arith.mulf %459, %463 : vector<8x32xf32>
    %465 = arith.index_cast %c18_i32 : i32 to index
    %c0_126 = arith.constant 0 : index
    %c0_127 = arith.constant 0 : index
    %466 = vector.load %arg12[%465, %c0_126, %c0_127] : memref<30x8x32xf32, #tpu.memory_space<vmem>>, vector<1x8x32xf32>
    %467 = vector.shape_cast %466 : vector<1x8x32xf32> to vector<8x32xf32>
    %468 = vector.shape_cast %464 : vector<8x32xf32> to vector<1x8x32xf32>
    tpu.vector_store %arg12[%465, %c0_126, %c0_127], %468 {strides = array<i32>} : memref<30x8x32xf32, #tpu.memory_space<vmem>>, vector<1x8x32xf32>,
    %c19_i32 = arith.constant 19 : i32
    %469 = arith.index_cast %c19_i32 : i32 to index
    %c0_128 = arith.constant 0 : index
    %c0_129 = arith.constant 0 : index
    %470 = vector.load %arg10[%469, %c0_128, %c0_129] : memref<30x8x128xf32, #tpu.memory_space<vmem>>, vector<1x8x128xf32>
    %471 = vector.shape_cast %470 : vector<1x8x128xf32> to vector<8x128xf32>
    %cst_130 = arith.constant dense<0.000000e+00> : vector<8x128xf32>
    %472 = tpu.matmul %464, %10, %cst_130 {dimension_numbers = #tpu.dot_dimension_numbers<[1], [0], [0], [1], [0, 0, 1, 1], [], []>} : vector<8x32xf32>, vector<32x128xf32>, vector<8x128xf32> -> vector<8x128xf32>
    %473 = arith.addf %471, %472 : vector<8x128xf32>
    %474 = arith.negf %473 : vector<8x128xf32>
    %475 = math.exp %474 : vector<8x128xf32>
    %cst_131 = arith.constant 1.000000e+00 : f32
    %476 = vector.broadcast %cst_131 : f32 to vector<8x128xf32>
    %477 = arith.addf %476, %475 : vector<8x128xf32>
    %478 = arith.divf %476, %477 : vector<8x128xf32>
    %479 = math.tanh %473 : vector<8x128xf32>
    %480 = vector.extract_strided_slice %478 {offsets = [0, 0], sizes = [8, 32], strides = [1, 1]} : vector<8x128xf32> to vector<8x32xf32>
    %481 = vector.extract_strided_slice %478 {offsets = [0, 32], sizes = [8, 32], strides = [1, 1]} : vector<8x128xf32> to vector<8x32xf32>
    %482 = vector.extract_strided_slice %479 {offsets = [0, 64], sizes = [8, 32], strides = [1, 1]} : vector<8x128xf32> to vector<8x32xf32>
    %483 = vector.extract_strided_slice %478 {offsets = [0, 96], sizes = [8, 32], strides = [1, 1]} : vector<8x128xf32> to vector<8x32xf32>
    %484 = arith.mulf %481, %462 : vector<8x32xf32>
    %485 = arith.mulf %480, %482 : vector<8x32xf32>
    %486 = arith.addf %484, %485 : vector<8x32xf32>
    %487 = math.tanh %486 : vector<8x32xf32>
    %488 = arith.mulf %483, %487 : vector<8x32xf32>
    %489 = arith.index_cast %c19_i32 : i32 to index
    %c0_132 = arith.constant 0 : index
    %c0_133 = arith.constant 0 : index
    %490 = vector.load %arg12[%489, %c0_132, %c0_133] : memref<30x8x32xf32, #tpu.memory_space<vmem>>, vector<1x8x32xf32>
    %491 = vector.shape_cast %490 : vector<1x8x32xf32> to vector<8x32xf32>
    %492 = vector.shape_cast %488 : vector<8x32xf32> to vector<1x8x32xf32>
    tpu.vector_store %arg12[%489, %c0_132, %c0_133], %492 {strides = array<i32>} : memref<30x8x32xf32, #tpu.memory_space<vmem>>, vector<1x8x32xf32>,
    %c20_i32 = arith.constant 20 : i32
    %493 = arith.index_cast %c20_i32 : i32 to index
    %c0_134 = arith.constant 0 : index
    %c0_135 = arith.constant 0 : index
    %494 = vector.load %arg10[%493, %c0_134, %c0_135] : memref<30x8x128xf32, #tpu.memory_space<vmem>>, vector<1x8x128xf32>
    %495 = vector.shape_cast %494 : vector<1x8x128xf32> to vector<8x128xf32>
    %cst_136 = arith.constant dense<0.000000e+00> : vector<8x128xf32>
    %496 = tpu.matmul %488, %10, %cst_136 {dimension_numbers = #tpu.dot_dimension_numbers<[1], [0], [0], [1], [0, 0, 1, 1], [], []>} : vector<8x32xf32>, vector<32x128xf32>, vector<8x128xf32> -> vector<8x128xf32>
    %497 = arith.addf %495, %496 : vector<8x128xf32>
    %498 = arith.negf %497 : vector<8x128xf32>
    %499 = math.exp %498 : vector<8x128xf32>
    %cst_137 = arith.constant 1.000000e+00 : f32
    %500 = vector.broadcast %cst_137 : f32 to vector<8x128xf32>
    %501 = arith.addf %500, %499 : vector<8x128xf32>
    %502 = arith.divf %500, %501 : vector<8x128xf32>
    %503 = math.tanh %497 : vector<8x128xf32>
    %504 = vector.extract_strided_slice %502 {offsets = [0, 0], sizes = [8, 32], strides = [1, 1]} : vector<8x128xf32> to vector<8x32xf32>
    %505 = vector.extract_strided_slice %502 {offsets = [0, 32], sizes = [8, 32], strides = [1, 1]} : vector<8x128xf32> to vector<8x32xf32>
    %506 = vector.extract_strided_slice %503 {offsets = [0, 64], sizes = [8, 32], strides = [1, 1]} : vector<8x128xf32> to vector<8x32xf32>
    %507 = vector.extract_strided_slice %502 {offsets = [0, 96], sizes = [8, 32], strides = [1, 1]} : vector<8x128xf32> to vector<8x32xf32>
    %508 = arith.mulf %505, %486 : vector<8x32xf32>
    %509 = arith.mulf %504, %506 : vector<8x32xf32>
    %510 = arith.addf %508, %509 : vector<8x32xf32>
    %511 = math.tanh %510 : vector<8x32xf32>
    %512 = arith.mulf %507, %511 : vector<8x32xf32>
    %513 = arith.index_cast %c20_i32 : i32 to index
    %c0_138 = arith.constant 0 : index
    %c0_139 = arith.constant 0 : index
    %514 = vector.load %arg12[%513, %c0_138, %c0_139] : memref<30x8x32xf32, #tpu.memory_space<vmem>>, vector<1x8x32xf32>
    %515 = vector.shape_cast %514 : vector<1x8x32xf32> to vector<8x32xf32>
    %516 = vector.shape_cast %512 : vector<8x32xf32> to vector<1x8x32xf32>
    tpu.vector_store %arg12[%513, %c0_138, %c0_139], %516 {strides = array<i32>} : memref<30x8x32xf32, #tpu.memory_space<vmem>>, vector<1x8x32xf32>,
    %c21_i32 = arith.constant 21 : i32
    %517 = arith.index_cast %c21_i32 : i32 to index
    %c0_140 = arith.constant 0 : index
    %c0_141 = arith.constant 0 : index
    %518 = vector.load %arg10[%517, %c0_140, %c0_141] : memref<30x8x128xf32, #tpu.memory_space<vmem>>, vector<1x8x128xf32>
    %519 = vector.shape_cast %518 : vector<1x8x128xf32> to vector<8x128xf32>
    %cst_142 = arith.constant dense<0.000000e+00> : vector<8x128xf32>
    %520 = tpu.matmul %512, %10, %cst_142 {dimension_numbers = #tpu.dot_dimension_numbers<[1], [0], [0], [1], [0, 0, 1, 1], [], []>} : vector<8x32xf32>, vector<32x128xf32>, vector<8x128xf32> -> vector<8x128xf32>
    %521 = arith.addf %519, %520 : vector<8x128xf32>
    %522 = arith.negf %521 : vector<8x128xf32>
    %523 = math.exp %522 : vector<8x128xf32>
    %cst_143 = arith.constant 1.000000e+00 : f32
    %524 = vector.broadcast %cst_143 : f32 to vector<8x128xf32>
    %525 = arith.addf %524, %523 : vector<8x128xf32>
    %526 = arith.divf %524, %525 : vector<8x128xf32>
    %527 = math.tanh %521 : vector<8x128xf32>
    %528 = vector.extract_strided_slice %526 {offsets = [0, 0], sizes = [8, 32], strides = [1, 1]} : vector<8x128xf32> to vector<8x32xf32>
    %529 = vector.extract_strided_slice %526 {offsets = [0, 32], sizes = [8, 32], strides = [1, 1]} : vector<8x128xf32> to vector<8x32xf32>
    %530 = vector.extract_strided_slice %527 {offsets = [0, 64], sizes = [8, 32], strides = [1, 1]} : vector<8x128xf32> to vector<8x32xf32>
    %531 = vector.extract_strided_slice %526 {offsets = [0, 96], sizes = [8, 32], strides = [1, 1]} : vector<8x128xf32> to vector<8x32xf32>
    %532 = arith.mulf %529, %510 : vector<8x32xf32>
    %533 = arith.mulf %528, %530 : vector<8x32xf32>
    %534 = arith.addf %532, %533 : vector<8x32xf32>
    %535 = math.tanh %534 : vector<8x32xf32>
    %536 = arith.mulf %531, %535 : vector<8x32xf32>
    %537 = arith.index_cast %c21_i32 : i32 to index
    %c0_144 = arith.constant 0 : index
    %c0_145 = arith.constant 0 : index
    %538 = vector.load %arg12[%537, %c0_144, %c0_145] : memref<30x8x32xf32, #tpu.memory_space<vmem>>, vector<1x8x32xf32>
    %539 = vector.shape_cast %538 : vector<1x8x32xf32> to vector<8x32xf32>
    %540 = vector.shape_cast %536 : vector<8x32xf32> to vector<1x8x32xf32>
    tpu.vector_store %arg12[%537, %c0_144, %c0_145], %540 {strides = array<i32>} : memref<30x8x32xf32, #tpu.memory_space<vmem>>, vector<1x8x32xf32>,
    %c22_i32 = arith.constant 22 : i32
    %541 = arith.index_cast %c22_i32 : i32 to index
    %c0_146 = arith.constant 0 : index
    %c0_147 = arith.constant 0 : index
    %542 = vector.load %arg10[%541, %c0_146, %c0_147] : memref<30x8x128xf32, #tpu.memory_space<vmem>>, vector<1x8x128xf32>
    %543 = vector.shape_cast %542 : vector<1x8x128xf32> to vector<8x128xf32>
    %cst_148 = arith.constant dense<0.000000e+00> : vector<8x128xf32>
    %544 = tpu.matmul %536, %10, %cst_148 {dimension_numbers = #tpu.dot_dimension_numbers<[1], [0], [0], [1], [0, 0, 1, 1], [], []>} : vector<8x32xf32>, vector<32x128xf32>, vector<8x128xf32> -> vector<8x128xf32>
    %545 = arith.addf %543, %544 : vector<8x128xf32>
    %546 = arith.negf %545 : vector<8x128xf32>
    %547 = math.exp %546 : vector<8x128xf32>
    %cst_149 = arith.constant 1.000000e+00 : f32
    %548 = vector.broadcast %cst_149 : f32 to vector<8x128xf32>
    %549 = arith.addf %548, %547 : vector<8x128xf32>
    %550 = arith.divf %548, %549 : vector<8x128xf32>
    %551 = math.tanh %545 : vector<8x128xf32>
    %552 = vector.extract_strided_slice %550 {offsets = [0, 0], sizes = [8, 32], strides = [1, 1]} : vector<8x128xf32> to vector<8x32xf32>
    %553 = vector.extract_strided_slice %550 {offsets = [0, 32], sizes = [8, 32], strides = [1, 1]} : vector<8x128xf32> to vector<8x32xf32>
    %554 = vector.extract_strided_slice %551 {offsets = [0, 64], sizes = [8, 32], strides = [1, 1]} : vector<8x128xf32> to vector<8x32xf32>
    %555 = vector.extract_strided_slice %550 {offsets = [0, 96], sizes = [8, 32], strides = [1, 1]} : vector<8x128xf32> to vector<8x32xf32>
    %556 = arith.mulf %553, %534 : vector<8x32xf32>
    %557 = arith.mulf %552, %554 : vector<8x32xf32>
    %558 = arith.addf %556, %557 : vector<8x32xf32>
    %559 = math.tanh %558 : vector<8x32xf32>
    %560 = arith.mulf %555, %559 : vector<8x32xf32>
    %561 = arith.index_cast %c22_i32 : i32 to index
    %c0_150 = arith.constant 0 : index
    %c0_151 = arith.constant 0 : index
    %562 = vector.load %arg12[%561, %c0_150, %c0_151] : memref<30x8x32xf32, #tpu.memory_space<vmem>>, vector<1x8x32xf32>
    %563 = vector.shape_cast %562 : vector<1x8x32xf32> to vector<8x32xf32>
    %564 = vector.shape_cast %560 : vector<8x32xf32> to vector<1x8x32xf32>
    tpu.vector_store %arg12[%561, %c0_150, %c0_151], %564 {strides = array<i32>} : memref<30x8x32xf32, #tpu.memory_space<vmem>>, vector<1x8x32xf32>,
    %c23_i32 = arith.constant 23 : i32
    %565 = arith.index_cast %c23_i32 : i32 to index
    %c0_152 = arith.constant 0 : index
    %c0_153 = arith.constant 0 : index
    %566 = vector.load %arg10[%565, %c0_152, %c0_153] : memref<30x8x128xf32, #tpu.memory_space<vmem>>, vector<1x8x128xf32>
    %567 = vector.shape_cast %566 : vector<1x8x128xf32> to vector<8x128xf32>
    %cst_154 = arith.constant dense<0.000000e+00> : vector<8x128xf32>
    %568 = tpu.matmul %560, %10, %cst_154 {dimension_numbers = #tpu.dot_dimension_numbers<[1], [0], [0], [1], [0, 0, 1, 1], [], []>} : vector<8x32xf32>, vector<32x128xf32>, vector<8x128xf32> -> vector<8x128xf32>
    %569 = arith.addf %567, %568 : vector<8x128xf32>
    %570 = arith.negf %569 : vector<8x128xf32>
    %571 = math.exp %570 : vector<8x128xf32>
    %cst_155 = arith.constant 1.000000e+00 : f32
    %572 = vector.broadcast %cst_155 : f32 to vector<8x128xf32>
    %573 = arith.addf %572, %571 : vector<8x128xf32>
    %574 = arith.divf %572, %573 : vector<8x128xf32>
    %575 = math.tanh %569 : vector<8x128xf32>
    %576 = vector.extract_strided_slice %574 {offsets = [0, 0], sizes = [8, 32], strides = [1, 1]} : vector<8x128xf32> to vector<8x32xf32>
    %577 = vector.extract_strided_slice %574 {offsets = [0, 32], sizes = [8, 32], strides = [1, 1]} : vector<8x128xf32> to vector<8x32xf32>
    %578 = vector.extract_strided_slice %575 {offsets = [0, 64], sizes = [8, 32], strides = [1, 1]} : vector<8x128xf32> to vector<8x32xf32>
    %579 = vector.extract_strided_slice %574 {offsets = [0, 96], sizes = [8, 32], strides = [1, 1]} : vector<8x128xf32> to vector<8x32xf32>
    %580 = arith.mulf %577, %558 : vector<8x32xf32>
    %581 = arith.mulf %576, %578 : vector<8x32xf32>
    %582 = arith.addf %580, %581 : vector<8x32xf32>
    %583 = math.tanh %582 : vector<8x32xf32>
    %584 = arith.mulf %579, %583 : vector<8x32xf32>
    %585 = arith.index_cast %c23_i32 : i32 to index
    %c0_156 = arith.constant 0 : index
    %c0_157 = arith.constant 0 : index
    %586 = vector.load %arg12[%585, %c0_156, %c0_157] : memref<30x8x32xf32, #tpu.memory_space<vmem>>, vector<1x8x32xf32>
    %587 = vector.shape_cast %586 : vector<1x8x32xf32> to vector<8x32xf32>
    %588 = vector.shape_cast %584 : vector<8x32xf32> to vector<1x8x32xf32>
    tpu.vector_store %arg12[%585, %c0_156, %c0_157], %588 {strides = array<i32>} : memref<30x8x32xf32, #tpu.memory_space<vmem>>, vector<1x8x32xf32>,
    %c24_i32 = arith.constant 24 : i32
    %589 = arith.index_cast %c24_i32 : i32 to index
    %c0_158 = arith.constant 0 : index
    %c0_159 = arith.constant 0 : index
    %590 = vector.load %arg10[%589, %c0_158, %c0_159] : memref<30x8x128xf32, #tpu.memory_space<vmem>>, vector<1x8x128xf32>
    %591 = vector.shape_cast %590 : vector<1x8x128xf32> to vector<8x128xf32>
    %cst_160 = arith.constant dense<0.000000e+00> : vector<8x128xf32>
    %592 = tpu.matmul %584, %10, %cst_160 {dimension_numbers = #tpu.dot_dimension_numbers<[1], [0], [0], [1], [0, 0, 1, 1], [], []>} : vector<8x32xf32>, vector<32x128xf32>, vector<8x128xf32> -> vector<8x128xf32>
    %593 = arith.addf %591, %592 : vector<8x128xf32>
    %594 = arith.negf %593 : vector<8x128xf32>
    %595 = math.exp %594 : vector<8x128xf32>
    %cst_161 = arith.constant 1.000000e+00 : f32
    %596 = vector.broadcast %cst_161 : f32 to vector<8x128xf32>
    %597 = arith.addf %596, %595 : vector<8x128xf32>
    %598 = arith.divf %596, %597 : vector<8x128xf32>
    %599 = math.tanh %593 : vector<8x128xf32>
    %600 = vector.extract_strided_slice %598 {offsets = [0, 0], sizes = [8, 32], strides = [1, 1]} : vector<8x128xf32> to vector<8x32xf32>
    %601 = vector.extract_strided_slice %598 {offsets = [0, 32], sizes = [8, 32], strides = [1, 1]} : vector<8x128xf32> to vector<8x32xf32>
    %602 = vector.extract_strided_slice %599 {offsets = [0, 64], sizes = [8, 32], strides = [1, 1]} : vector<8x128xf32> to vector<8x32xf32>
    %603 = vector.extract_strided_slice %598 {offsets = [0, 96], sizes = [8, 32], strides = [1, 1]} : vector<8x128xf32> to vector<8x32xf32>
    %604 = arith.mulf %601, %582 : vector<8x32xf32>
    %605 = arith.mulf %600, %602 : vector<8x32xf32>
    %606 = arith.addf %604, %605 : vector<8x32xf32>
    %607 = math.tanh %606 : vector<8x32xf32>
    %608 = arith.mulf %603, %607 : vector<8x32xf32>
    %609 = arith.index_cast %c24_i32 : i32 to index
    %c0_162 = arith.constant 0 : index
    %c0_163 = arith.constant 0 : index
    %610 = vector.load %arg12[%609, %c0_162, %c0_163] : memref<30x8x32xf32, #tpu.memory_space<vmem>>, vector<1x8x32xf32>
    %611 = vector.shape_cast %610 : vector<1x8x32xf32> to vector<8x32xf32>
    %612 = vector.shape_cast %608 : vector<8x32xf32> to vector<1x8x32xf32>
    tpu.vector_store %arg12[%609, %c0_162, %c0_163], %612 {strides = array<i32>} : memref<30x8x32xf32, #tpu.memory_space<vmem>>, vector<1x8x32xf32>,
    %c25_i32 = arith.constant 25 : i32
    %613 = arith.index_cast %c25_i32 : i32 to index
    %c0_164 = arith.constant 0 : index
    %c0_165 = arith.constant 0 : index
    %614 = vector.load %arg10[%613, %c0_164, %c0_165] : memref<30x8x128xf32, #tpu.memory_space<vmem>>, vector<1x8x128xf32>
    %615 = vector.shape_cast %614 : vector<1x8x128xf32> to vector<8x128xf32>
    %cst_166 = arith.constant dense<0.000000e+00> : vector<8x128xf32>
    %616 = tpu.matmul %608, %10, %cst_166 {dimension_numbers = #tpu.dot_dimension_numbers<[1], [0], [0], [1], [0, 0, 1, 1], [], []>} : vector<8x32xf32>, vector<32x128xf32>, vector<8x128xf32> -> vector<8x128xf32>
    %617 = arith.addf %615, %616 : vector<8x128xf32>
    %618 = arith.negf %617 : vector<8x128xf32>
    %619 = math.exp %618 : vector<8x128xf32>
    %cst_167 = arith.constant 1.000000e+00 : f32
    %620 = vector.broadcast %cst_167 : f32 to vector<8x128xf32>
    %621 = arith.addf %620, %619 : vector<8x128xf32>
    %622 = arith.divf %620, %621 : vector<8x128xf32>
    %623 = math.tanh %617 : vector<8x128xf32>
    %624 = vector.extract_strided_slice %622 {offsets = [0, 0], sizes = [8, 32], strides = [1, 1]} : vector<8x128xf32> to vector<8x32xf32>
    %625 = vector.extract_strided_slice %622 {offsets = [0, 32], sizes = [8, 32], strides = [1, 1]} : vector<8x128xf32> to vector<8x32xf32>
    %626 = vector.extract_strided_slice %623 {offsets = [0, 64], sizes = [8, 32], strides = [1, 1]} : vector<8x128xf32> to vector<8x32xf32>
    %627 = vector.extract_strided_slice %622 {offsets = [0, 96], sizes = [8, 32], strides = [1, 1]} : vector<8x128xf32> to vector<8x32xf32>
    %628 = arith.mulf %625, %606 : vector<8x32xf32>
    %629 = arith.mulf %624, %626 : vector<8x32xf32>
    %630 = arith.addf %628, %629 : vector<8x32xf32>
    %631 = math.tanh %630 : vector<8x32xf32>
    %632 = arith.mulf %627, %631 : vector<8x32xf32>
    %633 = arith.index_cast %c25_i32 : i32 to index
    %c0_168 = arith.constant 0 : index
    %c0_169 = arith.constant 0 : index
    %634 = vector.load %arg12[%633, %c0_168, %c0_169] : memref<30x8x32xf32, #tpu.memory_space<vmem>>, vector<1x8x32xf32>
    %635 = vector.shape_cast %634 : vector<1x8x32xf32> to vector<8x32xf32>
    %636 = vector.shape_cast %632 : vector<8x32xf32> to vector<1x8x32xf32>
    tpu.vector_store %arg12[%633, %c0_168, %c0_169], %636 {strides = array<i32>} : memref<30x8x32xf32, #tpu.memory_space<vmem>>, vector<1x8x32xf32>,
    %c26_i32 = arith.constant 26 : i32
    %637 = arith.index_cast %c26_i32 : i32 to index
    %c0_170 = arith.constant 0 : index
    %c0_171 = arith.constant 0 : index
    %638 = vector.load %arg10[%637, %c0_170, %c0_171] : memref<30x8x128xf32, #tpu.memory_space<vmem>>, vector<1x8x128xf32>
    %639 = vector.shape_cast %638 : vector<1x8x128xf32> to vector<8x128xf32>
    %cst_172 = arith.constant dense<0.000000e+00> : vector<8x128xf32>
    %640 = tpu.matmul %632, %10, %cst_172 {dimension_numbers = #tpu.dot_dimension_numbers<[1], [0], [0], [1], [0, 0, 1, 1], [], []>} : vector<8x32xf32>, vector<32x128xf32>, vector<8x128xf32> -> vector<8x128xf32>
    %641 = arith.addf %639, %640 : vector<8x128xf32>
    %642 = arith.negf %641 : vector<8x128xf32>
    %643 = math.exp %642 : vector<8x128xf32>
    %cst_173 = arith.constant 1.000000e+00 : f32
    %644 = vector.broadcast %cst_173 : f32 to vector<8x128xf32>
    %645 = arith.addf %644, %643 : vector<8x128xf32>
    %646 = arith.divf %644, %645 : vector<8x128xf32>
    %647 = math.tanh %641 : vector<8x128xf32>
    %648 = vector.extract_strided_slice %646 {offsets = [0, 0], sizes = [8, 32], strides = [1, 1]} : vector<8x128xf32> to vector<8x32xf32>
    %649 = vector.extract_strided_slice %646 {offsets = [0, 32], sizes = [8, 32], strides = [1, 1]} : vector<8x128xf32> to vector<8x32xf32>
    %650 = vector.extract_strided_slice %647 {offsets = [0, 64], sizes = [8, 32], strides = [1, 1]} : vector<8x128xf32> to vector<8x32xf32>
    %651 = vector.extract_strided_slice %646 {offsets = [0, 96], sizes = [8, 32], strides = [1, 1]} : vector<8x128xf32> to vector<8x32xf32>
    %652 = arith.mulf %649, %630 : vector<8x32xf32>
    %653 = arith.mulf %648, %650 : vector<8x32xf32>
    %654 = arith.addf %652, %653 : vector<8x32xf32>
    %655 = math.tanh %654 : vector<8x32xf32>
    %656 = arith.mulf %651, %655 : vector<8x32xf32>
    %657 = arith.index_cast %c26_i32 : i32 to index
    %c0_174 = arith.constant 0 : index
    %c0_175 = arith.constant 0 : index
    %658 = vector.load %arg12[%657, %c0_174, %c0_175] : memref<30x8x32xf32, #tpu.memory_space<vmem>>, vector<1x8x32xf32>
    %659 = vector.shape_cast %658 : vector<1x8x32xf32> to vector<8x32xf32>
    %660 = vector.shape_cast %656 : vector<8x32xf32> to vector<1x8x32xf32>
    tpu.vector_store %arg12[%657, %c0_174, %c0_175], %660 {strides = array<i32>} : memref<30x8x32xf32, #tpu.memory_space<vmem>>, vector<1x8x32xf32>,
    %c27_i32 = arith.constant 27 : i32
    %661 = arith.index_cast %c27_i32 : i32 to index
    %c0_176 = arith.constant 0 : index
    %c0_177 = arith.constant 0 : index
    %662 = vector.load %arg10[%661, %c0_176, %c0_177] : memref<30x8x128xf32, #tpu.memory_space<vmem>>, vector<1x8x128xf32>
    %663 = vector.shape_cast %662 : vector<1x8x128xf32> to vector<8x128xf32>
    %cst_178 = arith.constant dense<0.000000e+00> : vector<8x128xf32>
    %664 = tpu.matmul %656, %10, %cst_178 {dimension_numbers = #tpu.dot_dimension_numbers<[1], [0], [0], [1], [0, 0, 1, 1], [], []>} : vector<8x32xf32>, vector<32x128xf32>, vector<8x128xf32> -> vector<8x128xf32>
    %665 = arith.addf %663, %664 : vector<8x128xf32>
    %666 = arith.negf %665 : vector<8x128xf32>
    %667 = math.exp %666 : vector<8x128xf32>
    %cst_179 = arith.constant 1.000000e+00 : f32
    %668 = vector.broadcast %cst_179 : f32 to vector<8x128xf32>
    %669 = arith.addf %668, %667 : vector<8x128xf32>
    %670 = arith.divf %668, %669 : vector<8x128xf32>
    %671 = math.tanh %665 : vector<8x128xf32>
    %672 = vector.extract_strided_slice %670 {offsets = [0, 0], sizes = [8, 32], strides = [1, 1]} : vector<8x128xf32> to vector<8x32xf32>
    %673 = vector.extract_strided_slice %670 {offsets = [0, 32], sizes = [8, 32], strides = [1, 1]} : vector<8x128xf32> to vector<8x32xf32>
    %674 = vector.extract_strided_slice %671 {offsets = [0, 64], sizes = [8, 32], strides = [1, 1]} : vector<8x128xf32> to vector<8x32xf32>
    %675 = vector.extract_strided_slice %670 {offsets = [0, 96], sizes = [8, 32], strides = [1, 1]} : vector<8x128xf32> to vector<8x32xf32>
    %676 = arith.mulf %673, %654 : vector<8x32xf32>
    %677 = arith.mulf %672, %674 : vector<8x32xf32>
    %678 = arith.addf %676, %677 : vector<8x32xf32>
    %679 = math.tanh %678 : vector<8x32xf32>
    %680 = arith.mulf %675, %679 : vector<8x32xf32>
    %681 = arith.index_cast %c27_i32 : i32 to index
    %c0_180 = arith.constant 0 : index
    %c0_181 = arith.constant 0 : index
    %682 = vector.load %arg12[%681, %c0_180, %c0_181] : memref<30x8x32xf32, #tpu.memory_space<vmem>>, vector<1x8x32xf32>
    %683 = vector.shape_cast %682 : vector<1x8x32xf32> to vector<8x32xf32>
    %684 = vector.shape_cast %680 : vector<8x32xf32> to vector<1x8x32xf32>
    tpu.vector_store %arg12[%681, %c0_180, %c0_181], %684 {strides = array<i32>} : memref<30x8x32xf32, #tpu.memory_space<vmem>>, vector<1x8x32xf32>,
    %c28_i32 = arith.constant 28 : i32
    %685 = arith.index_cast %c28_i32 : i32 to index
    %c0_182 = arith.constant 0 : index
    %c0_183 = arith.constant 0 : index
    %686 = vector.load %arg10[%685, %c0_182, %c0_183] : memref<30x8x128xf32, #tpu.memory_space<vmem>>, vector<1x8x128xf32>
    %687 = vector.shape_cast %686 : vector<1x8x128xf32> to vector<8x128xf32>
    %cst_184 = arith.constant dense<0.000000e+00> : vector<8x128xf32>
    %688 = tpu.matmul %680, %10, %cst_184 {dimension_numbers = #tpu.dot_dimension_numbers<[1], [0], [0], [1], [0, 0, 1, 1], [], []>} : vector<8x32xf32>, vector<32x128xf32>, vector<8x128xf32> -> vector<8x128xf32>
    %689 = arith.addf %687, %688 : vector<8x128xf32>
    %690 = arith.negf %689 : vector<8x128xf32>
    %691 = math.exp %690 : vector<8x128xf32>
    %cst_185 = arith.constant 1.000000e+00 : f32
    %692 = vector.broadcast %cst_185 : f32 to vector<8x128xf32>
    %693 = arith.addf %692, %691 : vector<8x128xf32>
    %694 = arith.divf %692, %693 : vector<8x128xf32>
    %695 = math.tanh %689 : vector<8x128xf32>
    %696 = vector.extract_strided_slice %694 {offsets = [0, 0], sizes = [8, 32], strides = [1, 1]} : vector<8x128xf32> to vector<8x32xf32>
    %697 = vector.extract_strided_slice %694 {offsets = [0, 32], sizes = [8, 32], strides = [1, 1]} : vector<8x128xf32> to vector<8x32xf32>
    %698 = vector.extract_strided_slice %695 {offsets = [0, 64], sizes = [8, 32], strides = [1, 1]} : vector<8x128xf32> to vector<8x32xf32>
    %699 = vector.extract_strided_slice %694 {offsets = [0, 96], sizes = [8, 32], strides = [1, 1]} : vector<8x128xf32> to vector<8x32xf32>
    %700 = arith.mulf %697, %678 : vector<8x32xf32>
    %701 = arith.mulf %696, %698 : vector<8x32xf32>
    %702 = arith.addf %700, %701 : vector<8x32xf32>
    %703 = math.tanh %702 : vector<8x32xf32>
    %704 = arith.mulf %699, %703 : vector<8x32xf32>
    %705 = arith.index_cast %c28_i32 : i32 to index
    %c0_186 = arith.constant 0 : index
    %c0_187 = arith.constant 0 : index
    %706 = vector.load %arg12[%705, %c0_186, %c0_187] : memref<30x8x32xf32, #tpu.memory_space<vmem>>, vector<1x8x32xf32>
    %707 = vector.shape_cast %706 : vector<1x8x32xf32> to vector<8x32xf32>
    %708 = vector.shape_cast %704 : vector<8x32xf32> to vector<1x8x32xf32>
    tpu.vector_store %arg12[%705, %c0_186, %c0_187], %708 {strides = array<i32>} : memref<30x8x32xf32, #tpu.memory_space<vmem>>, vector<1x8x32xf32>,
    %c29_i32 = arith.constant 29 : i32
    %709 = arith.index_cast %c29_i32 : i32 to index
    %c0_188 = arith.constant 0 : index
    %c0_189 = arith.constant 0 : index
    %710 = vector.load %arg10[%709, %c0_188, %c0_189] : memref<30x8x128xf32, #tpu.memory_space<vmem>>, vector<1x8x128xf32>
    %711 = vector.shape_cast %710 : vector<1x8x128xf32> to vector<8x128xf32>
    %cst_190 = arith.constant dense<0.000000e+00> : vector<8x128xf32>
    %712 = tpu.matmul %704, %10, %cst_190 {dimension_numbers = #tpu.dot_dimension_numbers<[1], [0], [0], [1], [0, 0, 1, 1], [], []>} : vector<8x32xf32>, vector<32x128xf32>, vector<8x128xf32> -> vector<8x128xf32>
    %713 = arith.addf %711, %712 : vector<8x128xf32>
    %714 = arith.negf %713 : vector<8x128xf32>
    %715 = math.exp %714 : vector<8x128xf32>
    %cst_191 = arith.constant 1.000000e+00 : f32
    %716 = vector.broadcast %cst_191 : f32 to vector<8x128xf32>
    %717 = arith.addf %716, %715 : vector<8x128xf32>
    %718 = arith.divf %716, %717 : vector<8x128xf32>
    %719 = math.tanh %713 : vector<8x128xf32>
    %720 = vector.extract_strided_slice %718 {offsets = [0, 0], sizes = [8, 32], strides = [1, 1]} : vector<8x128xf32> to vector<8x32xf32>
    %721 = vector.extract_strided_slice %718 {offsets = [0, 32], sizes = [8, 32], strides = [1, 1]} : vector<8x128xf32> to vector<8x32xf32>
    %722 = vector.extract_strided_slice %719 {offsets = [0, 64], sizes = [8, 32], strides = [1, 1]} : vector<8x128xf32> to vector<8x32xf32>
    %723 = vector.extract_strided_slice %718 {offsets = [0, 96], sizes = [8, 32], strides = [1, 1]} : vector<8x128xf32> to vector<8x32xf32>
    %724 = arith.mulf %721, %702 : vector<8x32xf32>
    %725 = arith.mulf %720, %722 : vector<8x32xf32>
    %726 = arith.addf %724, %725 : vector<8x32xf32>
    %727 = math.tanh %726 : vector<8x32xf32>
    %728 = arith.mulf %723, %727 : vector<8x32xf32>
    %729 = arith.index_cast %c29_i32 : i32 to index
    %c0_192 = arith.constant 0 : index
    %c0_193 = arith.constant 0 : index
    %730 = vector.load %arg12[%729, %c0_192, %c0_193] : memref<30x8x32xf32, #tpu.memory_space<vmem>>, vector<1x8x32xf32>
    %731 = vector.shape_cast %730 : vector<1x8x32xf32> to vector<8x32xf32>
    %732 = vector.shape_cast %728 : vector<8x32xf32> to vector<1x8x32xf32>
    tpu.vector_store %arg12[%729, %c0_192, %c0_193], %732 {strides = array<i32>} : memref<30x8x32xf32, #tpu.memory_space<vmem>>, vector<1x8x32xf32>,
    %c30_i32 = arith.constant 30 : i32
    %c0_194 = arith.constant 0 : index
    %c0_195 = arith.constant 0 : index
    %c0_196 = arith.constant 0 : index
    %733 = vector.load %arg12[%c0_194, %c0_195, %c0_196] : memref<30x8x32xf32, #tpu.memory_space<vmem>>, vector<30x8x32xf32>
    %734 = vector.shape_cast %733 : vector<30x8x32xf32> to vector<240x32xf32>
    %c0_197 = arith.constant 0 : index
    %c0_198 = arith.constant 0 : index
    %735 = vector.load %arg4[%c0_197, %c0_198] : memref<32x64xf32, #tpu.memory_space<vmem>>, vector<32x64xf32>
    %cst_199 = arith.constant dense<0.000000e+00> : vector<240x64xf32>
    %736 = tpu.matmul %734, %735, %cst_199 {dimension_numbers = #tpu.dot_dimension_numbers<[1], [0], [0], [1], [0, 0, 1, 1], [], []>} : vector<240x32xf32>, vector<32x64xf32>, vector<240x64xf32> -> vector<240x64xf32>
    %c0_200 = arith.constant 0 : index
    %c0_201 = arith.constant 0 : index
    %737 = vector.load %arg6[%c0_200, %c0_201] : memref<1x64xf32, #tpu.memory_space<vmem>>, vector<1x64xf32>
    %738 = vector.broadcast %737 : vector<1x64xf32> to vector<240x64xf32>
    %739 = arith.addf %736, %738 : vector<240x64xf32>
    %740 = vector.shape_cast %739 : vector<240x64xf32> to vector<30x8x64xf32>
    %c0_202 = arith.constant 0 : index
    %c0_203 = arith.constant 0 : index
    %c0_204 = arith.constant 0 : index
    %741 = vector.load %arg11[%c0_202, %c0_203, %c0_204] : memref<30x8x64xf32, #tpu.memory_space<vmem>>, vector<30x8x64xf32>
    tpu.vector_store %arg11[%c0_202, %c0_203, %c0_204], %740 {strides = array<i32>} : memref<30x8x64xf32, #tpu.memory_space<vmem>>, vector<30x8x64xf32>,
    %c0_205 = arith.constant 0 : index
    %c0_206 = arith.constant 0 : index
    %742 = vector.load %arg5[%c0_205, %c0_206] : memref<16x64xf32, #tpu.memory_space<vmem>>, vector<16x64xf32>
    %cst_207 = arith.constant 0.000000e+00 : f32
    %743 = vector.broadcast %cst_207 : f32 to vector<8x16xf32>
    %cst_208 = arith.constant 0.000000e+00 : f32
    %744 = vector.broadcast %cst_208 : f32 to vector<8x16xf32>
    %c0_i32_209 = arith.constant 0 : i32
    %745 = arith.index_cast %c0_i32_209 : i32 to index
    %c0_210 = arith.constant 0 : index
    %c0_211 = arith.constant 0 : index
    %746 = vector.load %arg11[%745, %c0_210, %c0_211] : memref<30x8x64xf32, #tpu.memory_space<vmem>>, vector<1x8x64xf32>
    %747 = vector.shape_cast %746 : vector<1x8x64xf32> to vector<8x64xf32>
    %cst_212 = arith.constant dense<0.000000e+00> : vector<8x64xf32>
    %748 = tpu.matmul %743, %742, %cst_212 {dimension_numbers = #tpu.dot_dimension_numbers<[1], [0], [0], [1], [0, 0, 1, 1], [], []>} : vector<8x16xf32>, vector<16x64xf32>, vector<8x64xf32> -> vector<8x64xf32>
    %749 = arith.addf %747, %748 : vector<8x64xf32>
    %750 = arith.negf %749 : vector<8x64xf32>
    %751 = math.exp %750 : vector<8x64xf32>
    %cst_213 = arith.constant 1.000000e+00 : f32
    %752 = vector.broadcast %cst_213 : f32 to vector<8x64xf32>
    %753 = arith.addf %752, %751 : vector<8x64xf32>
    %754 = arith.divf %752, %753 : vector<8x64xf32>
    %755 = math.tanh %749 : vector<8x64xf32>
    %756 = vector.extract_strided_slice %754 {offsets = [0, 0], sizes = [8, 16], strides = [1, 1]} : vector<8x64xf32> to vector<8x16xf32>
    %757 = vector.extract_strided_slice %754 {offsets = [0, 16], sizes = [8, 16], strides = [1, 1]} : vector<8x64xf32> to vector<8x16xf32>
    %758 = vector.extract_strided_slice %755 {offsets = [0, 32], sizes = [8, 16], strides = [1, 1]} : vector<8x64xf32> to vector<8x16xf32>
    %759 = vector.extract_strided_slice %754 {offsets = [0, 48], sizes = [8, 16], strides = [1, 1]} : vector<8x64xf32> to vector<8x16xf32>
    %760 = arith.mulf %757, %744 : vector<8x16xf32>
    %761 = arith.mulf %756, %758 : vector<8x16xf32>
    %762 = arith.addf %760, %761 : vector<8x16xf32>
    %763 = math.tanh %762 : vector<8x16xf32>
    %764 = arith.mulf %759, %763 : vector<8x16xf32>
    %765 = arith.index_cast %c0_i32_209 : i32 to index
    %c0_214 = arith.constant 0 : index
    %c0_215 = arith.constant 0 : index
    %766 = vector.load %arg7[%765, %c0_214, %c0_215] : memref<30x16x128xf32, #tpu.memory_space<vmem>>, vector<1x16x128xf32>
    %767 = vector.shape_cast %766 : vector<1x16x128xf32> to vector<16x128xf32>
    %cst_216 = arith.constant dense<0.000000e+00> : vector<8x128xf32>
    %768 = tpu.matmul %764, %767, %cst_216 {dimension_numbers = #tpu.dot_dimension_numbers<[1], [0], [0], [1], [0, 0, 1, 1], [], []>} : vector<8x16xf32>, vector<16x128xf32>, vector<8x128xf32> -> vector<8x128xf32>
    %769 = arith.addf %0, %768 : vector<8x128xf32>
    %c1_i32_217 = arith.constant 1 : i32
    %770 = arith.index_cast %c1_i32_217 : i32 to index
    %c0_218 = arith.constant 0 : index
    %c0_219 = arith.constant 0 : index
    %771 = vector.load %arg11[%770, %c0_218, %c0_219] : memref<30x8x64xf32, #tpu.memory_space<vmem>>, vector<1x8x64xf32>
    %772 = vector.shape_cast %771 : vector<1x8x64xf32> to vector<8x64xf32>
    %cst_220 = arith.constant dense<0.000000e+00> : vector<8x64xf32>
    %773 = tpu.matmul %764, %742, %cst_220 {dimension_numbers = #tpu.dot_dimension_numbers<[1], [0], [0], [1], [0, 0, 1, 1], [], []>} : vector<8x16xf32>, vector<16x64xf32>, vector<8x64xf32> -> vector<8x64xf32>
    %774 = arith.addf %772, %773 : vector<8x64xf32>
    %775 = arith.negf %774 : vector<8x64xf32>
    %776 = math.exp %775 : vector<8x64xf32>
    %cst_221 = arith.constant 1.000000e+00 : f32
    %777 = vector.broadcast %cst_221 : f32 to vector<8x64xf32>
    %778 = arith.addf %777, %776 : vector<8x64xf32>
    %779 = arith.divf %777, %778 : vector<8x64xf32>
    %780 = math.tanh %774 : vector<8x64xf32>
    %781 = vector.extract_strided_slice %779 {offsets = [0, 0], sizes = [8, 16], strides = [1, 1]} : vector<8x64xf32> to vector<8x16xf32>
    %782 = vector.extract_strided_slice %779 {offsets = [0, 16], sizes = [8, 16], strides = [1, 1]} : vector<8x64xf32> to vector<8x16xf32>
    %783 = vector.extract_strided_slice %780 {offsets = [0, 32], sizes = [8, 16], strides = [1, 1]} : vector<8x64xf32> to vector<8x16xf32>
    %784 = vector.extract_strided_slice %779 {offsets = [0, 48], sizes = [8, 16], strides = [1, 1]} : vector<8x64xf32> to vector<8x16xf32>
    %785 = arith.mulf %782, %762 : vector<8x16xf32>
    %786 = arith.mulf %781, %783 : vector<8x16xf32>
    %787 = arith.addf %785, %786 : vector<8x16xf32>
    %788 = math.tanh %787 : vector<8x16xf32>
    %789 = arith.mulf %784, %788 : vector<8x16xf32>
    %790 = arith.index_cast %c1_i32_217 : i32 to index
    %c0_222 = arith.constant 0 : index
    %c0_223 = arith.constant 0 : index
    %791 = vector.load %arg7[%790, %c0_222, %c0_223] : memref<30x16x128xf32, #tpu.memory_space<vmem>>, vector<1x16x128xf32>
    %792 = vector.shape_cast %791 : vector<1x16x128xf32> to vector<16x128xf32>
    %cst_224 = arith.constant dense<0.000000e+00> : vector<8x128xf32>
    %793 = tpu.matmul %789, %792, %cst_224 {dimension_numbers = #tpu.dot_dimension_numbers<[1], [0], [0], [1], [0, 0, 1, 1], [], []>} : vector<8x16xf32>, vector<16x128xf32>, vector<8x128xf32> -> vector<8x128xf32>
    %794 = arith.addf %769, %793 : vector<8x128xf32>
    %c2_i32_225 = arith.constant 2 : i32
    %795 = arith.index_cast %c2_i32_225 : i32 to index
    %c0_226 = arith.constant 0 : index
    %c0_227 = arith.constant 0 : index
    %796 = vector.load %arg11[%795, %c0_226, %c0_227] : memref<30x8x64xf32, #tpu.memory_space<vmem>>, vector<1x8x64xf32>
    %797 = vector.shape_cast %796 : vector<1x8x64xf32> to vector<8x64xf32>
    %cst_228 = arith.constant dense<0.000000e+00> : vector<8x64xf32>
    %798 = tpu.matmul %789, %742, %cst_228 {dimension_numbers = #tpu.dot_dimension_numbers<[1], [0], [0], [1], [0, 0, 1, 1], [], []>} : vector<8x16xf32>, vector<16x64xf32>, vector<8x64xf32> -> vector<8x64xf32>
    %799 = arith.addf %797, %798 : vector<8x64xf32>
    %800 = arith.negf %799 : vector<8x64xf32>
    %801 = math.exp %800 : vector<8x64xf32>
    %cst_229 = arith.constant 1.000000e+00 : f32
    %802 = vector.broadcast %cst_229 : f32 to vector<8x64xf32>
    %803 = arith.addf %802, %801 : vector<8x64xf32>
    %804 = arith.divf %802, %803 : vector<8x64xf32>
    %805 = math.tanh %799 : vector<8x64xf32>
    %806 = vector.extract_strided_slice %804 {offsets = [0, 0], sizes = [8, 16], strides = [1, 1]} : vector<8x64xf32> to vector<8x16xf32>
    %807 = vector.extract_strided_slice %804 {offsets = [0, 16], sizes = [8, 16], strides = [1, 1]} : vector<8x64xf32> to vector<8x16xf32>
    %808 = vector.extract_strided_slice %805 {offsets = [0, 32], sizes = [8, 16], strides = [1, 1]} : vector<8x64xf32> to vector<8x16xf32>
    %809 = vector.extract_strided_slice %804 {offsets = [0, 48], sizes = [8, 16], strides = [1, 1]} : vector<8x64xf32> to vector<8x16xf32>
    %810 = arith.mulf %807, %787 : vector<8x16xf32>
    %811 = arith.mulf %806, %808 : vector<8x16xf32>
    %812 = arith.addf %810, %811 : vector<8x16xf32>
    %813 = math.tanh %812 : vector<8x16xf32>
    %814 = arith.mulf %809, %813 : vector<8x16xf32>
    %815 = arith.index_cast %c2_i32_225 : i32 to index
    %c0_230 = arith.constant 0 : index
    %c0_231 = arith.constant 0 : index
    %816 = vector.load %arg7[%815, %c0_230, %c0_231] : memref<30x16x128xf32, #tpu.memory_space<vmem>>, vector<1x16x128xf32>
    %817 = vector.shape_cast %816 : vector<1x16x128xf32> to vector<16x128xf32>
    %cst_232 = arith.constant dense<0.000000e+00> : vector<8x128xf32>
    %818 = tpu.matmul %814, %817, %cst_232 {dimension_numbers = #tpu.dot_dimension_numbers<[1], [0], [0], [1], [0, 0, 1, 1], [], []>} : vector<8x16xf32>, vector<16x128xf32>, vector<8x128xf32> -> vector<8x128xf32>
    %819 = arith.addf %794, %818 : vector<8x128xf32>
    %c3_i32_233 = arith.constant 3 : i32
    %820 = arith.index_cast %c3_i32_233 : i32 to index
    %c0_234 = arith.constant 0 : index
    %c0_235 = arith.constant 0 : index
    %821 = vector.load %arg11[%820, %c0_234, %c0_235] : memref<30x8x64xf32, #tpu.memory_space<vmem>>, vector<1x8x64xf32>
    %822 = vector.shape_cast %821 : vector<1x8x64xf32> to vector<8x64xf32>
    %cst_236 = arith.constant dense<0.000000e+00> : vector<8x64xf32>
    %823 = tpu.matmul %814, %742, %cst_236 {dimension_numbers = #tpu.dot_dimension_numbers<[1], [0], [0], [1], [0, 0, 1, 1], [], []>} : vector<8x16xf32>, vector<16x64xf32>, vector<8x64xf32> -> vector<8x64xf32>
    %824 = arith.addf %822, %823 : vector<8x64xf32>
    %825 = arith.negf %824 : vector<8x64xf32>
    %826 = math.exp %825 : vector<8x64xf32>
    %cst_237 = arith.constant 1.000000e+00 : f32
    %827 = vector.broadcast %cst_237 : f32 to vector<8x64xf32>
    %828 = arith.addf %827, %826 : vector<8x64xf32>
    %829 = arith.divf %827, %828 : vector<8x64xf32>
    %830 = math.tanh %824 : vector<8x64xf32>
    %831 = vector.extract_strided_slice %829 {offsets = [0, 0], sizes = [8, 16], strides = [1, 1]} : vector<8x64xf32> to vector<8x16xf32>
    %832 = vector.extract_strided_slice %829 {offsets = [0, 16], sizes = [8, 16], strides = [1, 1]} : vector<8x64xf32> to vector<8x16xf32>
    %833 = vector.extract_strided_slice %830 {offsets = [0, 32], sizes = [8, 16], strides = [1, 1]} : vector<8x64xf32> to vector<8x16xf32>
    %834 = vector.extract_strided_slice %829 {offsets = [0, 48], sizes = [8, 16], strides = [1, 1]} : vector<8x64xf32> to vector<8x16xf32>
    %835 = arith.mulf %832, %812 : vector<8x16xf32>
    %836 = arith.mulf %831, %833 : vector<8x16xf32>
    %837 = arith.addf %835, %836 : vector<8x16xf32>
    %838 = math.tanh %837 : vector<8x16xf32>
    %839 = arith.mulf %834, %838 : vector<8x16xf32>
    %840 = arith.index_cast %c3_i32_233 : i32 to index
    %c0_238 = arith.constant 0 : index
    %c0_239 = arith.constant 0 : index
    %841 = vector.load %arg7[%840, %c0_238, %c0_239] : memref<30x16x128xf32, #tpu.memory_space<vmem>>, vector<1x16x128xf32>
    %842 = vector.shape_cast %841 : vector<1x16x128xf32> to vector<16x128xf32>
    %cst_240 = arith.constant dense<0.000000e+00> : vector<8x128xf32>
    %843 = tpu.matmul %839, %842, %cst_240 {dimension_numbers = #tpu.dot_dimension_numbers<[1], [0], [0], [1], [0, 0, 1, 1], [], []>} : vector<8x16xf32>, vector<16x128xf32>, vector<8x128xf32> -> vector<8x128xf32>
    %844 = arith.addf %819, %843 : vector<8x128xf32>
    %c4_i32_241 = arith.constant 4 : i32
    %845 = arith.index_cast %c4_i32_241 : i32 to index
    %c0_242 = arith.constant 0 : index
    %c0_243 = arith.constant 0 : index
    %846 = vector.load %arg11[%845, %c0_242, %c0_243] : memref<30x8x64xf32, #tpu.memory_space<vmem>>, vector<1x8x64xf32>
    %847 = vector.shape_cast %846 : vector<1x8x64xf32> to vector<8x64xf32>
    %cst_244 = arith.constant dense<0.000000e+00> : vector<8x64xf32>
    %848 = tpu.matmul %839, %742, %cst_244 {dimension_numbers = #tpu.dot_dimension_numbers<[1], [0], [0], [1], [0, 0, 1, 1], [], []>} : vector<8x16xf32>, vector<16x64xf32>, vector<8x64xf32> -> vector<8x64xf32>
    %849 = arith.addf %847, %848 : vector<8x64xf32>
    %850 = arith.negf %849 : vector<8x64xf32>
    %851 = math.exp %850 : vector<8x64xf32>
    %cst_245 = arith.constant 1.000000e+00 : f32
    %852 = vector.broadcast %cst_245 : f32 to vector<8x64xf32>
    %853 = arith.addf %852, %851 : vector<8x64xf32>
    %854 = arith.divf %852, %853 : vector<8x64xf32>
    %855 = math.tanh %849 : vector<8x64xf32>
    %856 = vector.extract_strided_slice %854 {offsets = [0, 0], sizes = [8, 16], strides = [1, 1]} : vector<8x64xf32> to vector<8x16xf32>
    %857 = vector.extract_strided_slice %854 {offsets = [0, 16], sizes = [8, 16], strides = [1, 1]} : vector<8x64xf32> to vector<8x16xf32>
    %858 = vector.extract_strided_slice %855 {offsets = [0, 32], sizes = [8, 16], strides = [1, 1]} : vector<8x64xf32> to vector<8x16xf32>
    %859 = vector.extract_strided_slice %854 {offsets = [0, 48], sizes = [8, 16], strides = [1, 1]} : vector<8x64xf32> to vector<8x16xf32>
    %860 = arith.mulf %857, %837 : vector<8x16xf32>
    %861 = arith.mulf %856, %858 : vector<8x16xf32>
    %862 = arith.addf %860, %861 : vector<8x16xf32>
    %863 = math.tanh %862 : vector<8x16xf32>
    %864 = arith.mulf %859, %863 : vector<8x16xf32>
    %865 = arith.index_cast %c4_i32_241 : i32 to index
    %c0_246 = arith.constant 0 : index
    %c0_247 = arith.constant 0 : index
    %866 = vector.load %arg7[%865, %c0_246, %c0_247] : memref<30x16x128xf32, #tpu.memory_space<vmem>>, vector<1x16x128xf32>
    %867 = vector.shape_cast %866 : vector<1x16x128xf32> to vector<16x128xf32>
    %cst_248 = arith.constant dense<0.000000e+00> : vector<8x128xf32>
    %868 = tpu.matmul %864, %867, %cst_248 {dimension_numbers = #tpu.dot_dimension_numbers<[1], [0], [0], [1], [0, 0, 1, 1], [], []>} : vector<8x16xf32>, vector<16x128xf32>, vector<8x128xf32> -> vector<8x128xf32>
    %869 = arith.addf %844, %868 : vector<8x128xf32>
    %c5_i32_249 = arith.constant 5 : i32
    %870 = arith.index_cast %c5_i32_249 : i32 to index
    %c0_250 = arith.constant 0 : index
    %c0_251 = arith.constant 0 : index
    %871 = vector.load %arg11[%870, %c0_250, %c0_251] : memref<30x8x64xf32, #tpu.memory_space<vmem>>, vector<1x8x64xf32>
    %872 = vector.shape_cast %871 : vector<1x8x64xf32> to vector<8x64xf32>
    %cst_252 = arith.constant dense<0.000000e+00> : vector<8x64xf32>
    %873 = tpu.matmul %864, %742, %cst_252 {dimension_numbers = #tpu.dot_dimension_numbers<[1], [0], [0], [1], [0, 0, 1, 1], [], []>} : vector<8x16xf32>, vector<16x64xf32>, vector<8x64xf32> -> vector<8x64xf32>
    %874 = arith.addf %872, %873 : vector<8x64xf32>
    %875 = arith.negf %874 : vector<8x64xf32>
    %876 = math.exp %875 : vector<8x64xf32>
    %cst_253 = arith.constant 1.000000e+00 : f32
    %877 = vector.broadcast %cst_253 : f32 to vector<8x64xf32>
    %878 = arith.addf %877, %876 : vector<8x64xf32>
    %879 = arith.divf %877, %878 : vector<8x64xf32>
    %880 = math.tanh %874 : vector<8x64xf32>
    %881 = vector.extract_strided_slice %879 {offsets = [0, 0], sizes = [8, 16], strides = [1, 1]} : vector<8x64xf32> to vector<8x16xf32>
    %882 = vector.extract_strided_slice %879 {offsets = [0, 16], sizes = [8, 16], strides = [1, 1]} : vector<8x64xf32> to vector<8x16xf32>
    %883 = vector.extract_strided_slice %880 {offsets = [0, 32], sizes = [8, 16], strides = [1, 1]} : vector<8x64xf32> to vector<8x16xf32>
    %884 = vector.extract_strided_slice %879 {offsets = [0, 48], sizes = [8, 16], strides = [1, 1]} : vector<8x64xf32> to vector<8x16xf32>
    %885 = arith.mulf %882, %862 : vector<8x16xf32>
    %886 = arith.mulf %881, %883 : vector<8x16xf32>
    %887 = arith.addf %885, %886 : vector<8x16xf32>
    %888 = math.tanh %887 : vector<8x16xf32>
    %889 = arith.mulf %884, %888 : vector<8x16xf32>
    %890 = arith.index_cast %c5_i32_249 : i32 to index
    %c0_254 = arith.constant 0 : index
    %c0_255 = arith.constant 0 : index
    %891 = vector.load %arg7[%890, %c0_254, %c0_255] : memref<30x16x128xf32, #tpu.memory_space<vmem>>, vector<1x16x128xf32>
    %892 = vector.shape_cast %891 : vector<1x16x128xf32> to vector<16x128xf32>
    %cst_256 = arith.constant dense<0.000000e+00> : vector<8x128xf32>
    %893 = tpu.matmul %889, %892, %cst_256 {dimension_numbers = #tpu.dot_dimension_numbers<[1], [0], [0], [1], [0, 0, 1, 1], [], []>} : vector<8x16xf32>, vector<16x128xf32>, vector<8x128xf32> -> vector<8x128xf32>
    %894 = arith.addf %869, %893 : vector<8x128xf32>
    %c6_i32_257 = arith.constant 6 : i32
    %895 = arith.index_cast %c6_i32_257 : i32 to index
    %c0_258 = arith.constant 0 : index
    %c0_259 = arith.constant 0 : index
    %896 = vector.load %arg11[%895, %c0_258, %c0_259] : memref<30x8x64xf32, #tpu.memory_space<vmem>>, vector<1x8x64xf32>
    %897 = vector.shape_cast %896 : vector<1x8x64xf32> to vector<8x64xf32>
    %cst_260 = arith.constant dense<0.000000e+00> : vector<8x64xf32>
    %898 = tpu.matmul %889, %742, %cst_260 {dimension_numbers = #tpu.dot_dimension_numbers<[1], [0], [0], [1], [0, 0, 1, 1], [], []>} : vector<8x16xf32>, vector<16x64xf32>, vector<8x64xf32> -> vector<8x64xf32>
    %899 = arith.addf %897, %898 : vector<8x64xf32>
    %900 = arith.negf %899 : vector<8x64xf32>
    %901 = math.exp %900 : vector<8x64xf32>
    %cst_261 = arith.constant 1.000000e+00 : f32
    %902 = vector.broadcast %cst_261 : f32 to vector<8x64xf32>
    %903 = arith.addf %902, %901 : vector<8x64xf32>
    %904 = arith.divf %902, %903 : vector<8x64xf32>
    %905 = math.tanh %899 : vector<8x64xf32>
    %906 = vector.extract_strided_slice %904 {offsets = [0, 0], sizes = [8, 16], strides = [1, 1]} : vector<8x64xf32> to vector<8x16xf32>
    %907 = vector.extract_strided_slice %904 {offsets = [0, 16], sizes = [8, 16], strides = [1, 1]} : vector<8x64xf32> to vector<8x16xf32>
    %908 = vector.extract_strided_slice %905 {offsets = [0, 32], sizes = [8, 16], strides = [1, 1]} : vector<8x64xf32> to vector<8x16xf32>
    %909 = vector.extract_strided_slice %904 {offsets = [0, 48], sizes = [8, 16], strides = [1, 1]} : vector<8x64xf32> to vector<8x16xf32>
    %910 = arith.mulf %907, %887 : vector<8x16xf32>
    %911 = arith.mulf %906, %908 : vector<8x16xf32>
    %912 = arith.addf %910, %911 : vector<8x16xf32>
    %913 = math.tanh %912 : vector<8x16xf32>
    %914 = arith.mulf %909, %913 : vector<8x16xf32>
    %915 = arith.index_cast %c6_i32_257 : i32 to index
    %c0_262 = arith.constant 0 : index
    %c0_263 = arith.constant 0 : index
    %916 = vector.load %arg7[%915, %c0_262, %c0_263] : memref<30x16x128xf32, #tpu.memory_space<vmem>>, vector<1x16x128xf32>
    %917 = vector.shape_cast %916 : vector<1x16x128xf32> to vector<16x128xf32>
    %cst_264 = arith.constant dense<0.000000e+00> : vector<8x128xf32>
    %918 = tpu.matmul %914, %917, %cst_264 {dimension_numbers = #tpu.dot_dimension_numbers<[1], [0], [0], [1], [0, 0, 1, 1], [], []>} : vector<8x16xf32>, vector<16x128xf32>, vector<8x128xf32> -> vector<8x128xf32>
    %919 = arith.addf %894, %918 : vector<8x128xf32>
    %c7_i32_265 = arith.constant 7 : i32
    %920 = arith.index_cast %c7_i32_265 : i32 to index
    %c0_266 = arith.constant 0 : index
    %c0_267 = arith.constant 0 : index
    %921 = vector.load %arg11[%920, %c0_266, %c0_267] : memref<30x8x64xf32, #tpu.memory_space<vmem>>, vector<1x8x64xf32>
    %922 = vector.shape_cast %921 : vector<1x8x64xf32> to vector<8x64xf32>
    %cst_268 = arith.constant dense<0.000000e+00> : vector<8x64xf32>
    %923 = tpu.matmul %914, %742, %cst_268 {dimension_numbers = #tpu.dot_dimension_numbers<[1], [0], [0], [1], [0, 0, 1, 1], [], []>} : vector<8x16xf32>, vector<16x64xf32>, vector<8x64xf32> -> vector<8x64xf32>
    %924 = arith.addf %922, %923 : vector<8x64xf32>
    %925 = arith.negf %924 : vector<8x64xf32>
    %926 = math.exp %925 : vector<8x64xf32>
    %cst_269 = arith.constant 1.000000e+00 : f32
    %927 = vector.broadcast %cst_269 : f32 to vector<8x64xf32>
    %928 = arith.addf %927, %926 : vector<8x64xf32>
    %929 = arith.divf %927, %928 : vector<8x64xf32>
    %930 = math.tanh %924 : vector<8x64xf32>
    %931 = vector.extract_strided_slice %929 {offsets = [0, 0], sizes = [8, 16], strides = [1, 1]} : vector<8x64xf32> to vector<8x16xf32>
    %932 = vector.extract_strided_slice %929 {offsets = [0, 16], sizes = [8, 16], strides = [1, 1]} : vector<8x64xf32> to vector<8x16xf32>
    %933 = vector.extract_strided_slice %930 {offsets = [0, 32], sizes = [8, 16], strides = [1, 1]} : vector<8x64xf32> to vector<8x16xf32>
    %934 = vector.extract_strided_slice %929 {offsets = [0, 48], sizes = [8, 16], strides = [1, 1]} : vector<8x64xf32> to vector<8x16xf32>
    %935 = arith.mulf %932, %912 : vector<8x16xf32>
    %936 = arith.mulf %931, %933 : vector<8x16xf32>
    %937 = arith.addf %935, %936 : vector<8x16xf32>
    %938 = math.tanh %937 : vector<8x16xf32>
    %939 = arith.mulf %934, %938 : vector<8x16xf32>
    %940 = arith.index_cast %c7_i32_265 : i32 to index
    %c0_270 = arith.constant 0 : index
    %c0_271 = arith.constant 0 : index
    %941 = vector.load %arg7[%940, %c0_270, %c0_271] : memref<30x16x128xf32, #tpu.memory_space<vmem>>, vector<1x16x128xf32>
    %942 = vector.shape_cast %941 : vector<1x16x128xf32> to vector<16x128xf32>
    %cst_272 = arith.constant dense<0.000000e+00> : vector<8x128xf32>
    %943 = tpu.matmul %939, %942, %cst_272 {dimension_numbers = #tpu.dot_dimension_numbers<[1], [0], [0], [1], [0, 0, 1, 1], [], []>} : vector<8x16xf32>, vector<16x128xf32>, vector<8x128xf32> -> vector<8x128xf32>
    %944 = arith.addf %919, %943 : vector<8x128xf32>
    %c8_i32_273 = arith.constant 8 : i32
    %945 = arith.index_cast %c8_i32_273 : i32 to index
    %c0_274 = arith.constant 0 : index
    %c0_275 = arith.constant 0 : index
    %946 = vector.load %arg11[%945, %c0_274, %c0_275] : memref<30x8x64xf32, #tpu.memory_space<vmem>>, vector<1x8x64xf32>
    %947 = vector.shape_cast %946 : vector<1x8x64xf32> to vector<8x64xf32>
    %cst_276 = arith.constant dense<0.000000e+00> : vector<8x64xf32>
    %948 = tpu.matmul %939, %742, %cst_276 {dimension_numbers = #tpu.dot_dimension_numbers<[1], [0], [0], [1], [0, 0, 1, 1], [], []>} : vector<8x16xf32>, vector<16x64xf32>, vector<8x64xf32> -> vector<8x64xf32>
    %949 = arith.addf %947, %948 : vector<8x64xf32>
    %950 = arith.negf %949 : vector<8x64xf32>
    %951 = math.exp %950 : vector<8x64xf32>
    %cst_277 = arith.constant 1.000000e+00 : f32
    %952 = vector.broadcast %cst_277 : f32 to vector<8x64xf32>
    %953 = arith.addf %952, %951 : vector<8x64xf32>
    %954 = arith.divf %952, %953 : vector<8x64xf32>
    %955 = math.tanh %949 : vector<8x64xf32>
    %956 = vector.extract_strided_slice %954 {offsets = [0, 0], sizes = [8, 16], strides = [1, 1]} : vector<8x64xf32> to vector<8x16xf32>
    %957 = vector.extract_strided_slice %954 {offsets = [0, 16], sizes = [8, 16], strides = [1, 1]} : vector<8x64xf32> to vector<8x16xf32>
    %958 = vector.extract_strided_slice %955 {offsets = [0, 32], sizes = [8, 16], strides = [1, 1]} : vector<8x64xf32> to vector<8x16xf32>
    %959 = vector.extract_strided_slice %954 {offsets = [0, 48], sizes = [8, 16], strides = [1, 1]} : vector<8x64xf32> to vector<8x16xf32>
    %960 = arith.mulf %957, %937 : vector<8x16xf32>
    %961 = arith.mulf %956, %958 : vector<8x16xf32>
    %962 = arith.addf %960, %961 : vector<8x16xf32>
    %963 = math.tanh %962 : vector<8x16xf32>
    %964 = arith.mulf %959, %963 : vector<8x16xf32>
    %965 = arith.index_cast %c8_i32_273 : i32 to index
    %c0_278 = arith.constant 0 : index
    %c0_279 = arith.constant 0 : index
    %966 = vector.load %arg7[%965, %c0_278, %c0_279] : memref<30x16x128xf32, #tpu.memory_space<vmem>>, vector<1x16x128xf32>
    %967 = vector.shape_cast %966 : vector<1x16x128xf32> to vector<16x128xf32>
    %cst_280 = arith.constant dense<0.000000e+00> : vector<8x128xf32>
    %968 = tpu.matmul %964, %967, %cst_280 {dimension_numbers = #tpu.dot_dimension_numbers<[1], [0], [0], [1], [0, 0, 1, 1], [], []>} : vector<8x16xf32>, vector<16x128xf32>, vector<8x128xf32> -> vector<8x128xf32>
    %969 = arith.addf %944, %968 : vector<8x128xf32>
    %c9_i32_281 = arith.constant 9 : i32
    %970 = arith.index_cast %c9_i32_281 : i32 to index
    %c0_282 = arith.constant 0 : index
    %c0_283 = arith.constant 0 : index
    %971 = vector.load %arg11[%970, %c0_282, %c0_283] : memref<30x8x64xf32, #tpu.memory_space<vmem>>, vector<1x8x64xf32>
    %972 = vector.shape_cast %971 : vector<1x8x64xf32> to vector<8x64xf32>
    %cst_284 = arith.constant dense<0.000000e+00> : vector<8x64xf32>
    %973 = tpu.matmul %964, %742, %cst_284 {dimension_numbers = #tpu.dot_dimension_numbers<[1], [0], [0], [1], [0, 0, 1, 1], [], []>} : vector<8x16xf32>, vector<16x64xf32>, vector<8x64xf32> -> vector<8x64xf32>
    %974 = arith.addf %972, %973 : vector<8x64xf32>
    %975 = arith.negf %974 : vector<8x64xf32>
    %976 = math.exp %975 : vector<8x64xf32>
    %cst_285 = arith.constant 1.000000e+00 : f32
    %977 = vector.broadcast %cst_285 : f32 to vector<8x64xf32>
    %978 = arith.addf %977, %976 : vector<8x64xf32>
    %979 = arith.divf %977, %978 : vector<8x64xf32>
    %980 = math.tanh %974 : vector<8x64xf32>
    %981 = vector.extract_strided_slice %979 {offsets = [0, 0], sizes = [8, 16], strides = [1, 1]} : vector<8x64xf32> to vector<8x16xf32>
    %982 = vector.extract_strided_slice %979 {offsets = [0, 16], sizes = [8, 16], strides = [1, 1]} : vector<8x64xf32> to vector<8x16xf32>
    %983 = vector.extract_strided_slice %980 {offsets = [0, 32], sizes = [8, 16], strides = [1, 1]} : vector<8x64xf32> to vector<8x16xf32>
    %984 = vector.extract_strided_slice %979 {offsets = [0, 48], sizes = [8, 16], strides = [1, 1]} : vector<8x64xf32> to vector<8x16xf32>
    %985 = arith.mulf %982, %962 : vector<8x16xf32>
    %986 = arith.mulf %981, %983 : vector<8x16xf32>
    %987 = arith.addf %985, %986 : vector<8x16xf32>
    %988 = math.tanh %987 : vector<8x16xf32>
    %989 = arith.mulf %984, %988 : vector<8x16xf32>
    %990 = arith.index_cast %c9_i32_281 : i32 to index
    %c0_286 = arith.constant 0 : index
    %c0_287 = arith.constant 0 : index
    %991 = vector.load %arg7[%990, %c0_286, %c0_287] : memref<30x16x128xf32, #tpu.memory_space<vmem>>, vector<1x16x128xf32>
    %992 = vector.shape_cast %991 : vector<1x16x128xf32> to vector<16x128xf32>
    %cst_288 = arith.constant dense<0.000000e+00> : vector<8x128xf32>
    %993 = tpu.matmul %989, %992, %cst_288 {dimension_numbers = #tpu.dot_dimension_numbers<[1], [0], [0], [1], [0, 0, 1, 1], [], []>} : vector<8x16xf32>, vector<16x128xf32>, vector<8x128xf32> -> vector<8x128xf32>
    %994 = arith.addf %969, %993 : vector<8x128xf32>
    %c10_i32_289 = arith.constant 10 : i32
    %995 = arith.index_cast %c10_i32_289 : i32 to index
    %c0_290 = arith.constant 0 : index
    %c0_291 = arith.constant 0 : index
    %996 = vector.load %arg11[%995, %c0_290, %c0_291] : memref<30x8x64xf32, #tpu.memory_space<vmem>>, vector<1x8x64xf32>
    %997 = vector.shape_cast %996 : vector<1x8x64xf32> to vector<8x64xf32>
    %cst_292 = arith.constant dense<0.000000e+00> : vector<8x64xf32>
    %998 = tpu.matmul %989, %742, %cst_292 {dimension_numbers = #tpu.dot_dimension_numbers<[1], [0], [0], [1], [0, 0, 1, 1], [], []>} : vector<8x16xf32>, vector<16x64xf32>, vector<8x64xf32> -> vector<8x64xf32>
    %999 = arith.addf %997, %998 : vector<8x64xf32>
    %1000 = arith.negf %999 : vector<8x64xf32>
    %1001 = math.exp %1000 : vector<8x64xf32>
    %cst_293 = arith.constant 1.000000e+00 : f32
    %1002 = vector.broadcast %cst_293 : f32 to vector<8x64xf32>
    %1003 = arith.addf %1002, %1001 : vector<8x64xf32>
    %1004 = arith.divf %1002, %1003 : vector<8x64xf32>
    %1005 = math.tanh %999 : vector<8x64xf32>
    %1006 = vector.extract_strided_slice %1004 {offsets = [0, 0], sizes = [8, 16], strides = [1, 1]} : vector<8x64xf32> to vector<8x16xf32>
    %1007 = vector.extract_strided_slice %1004 {offsets = [0, 16], sizes = [8, 16], strides = [1, 1]} : vector<8x64xf32> to vector<8x16xf32>
    %1008 = vector.extract_strided_slice %1005 {offsets = [0, 32], sizes = [8, 16], strides = [1, 1]} : vector<8x64xf32> to vector<8x16xf32>
    %1009 = vector.extract_strided_slice %1004 {offsets = [0, 48], sizes = [8, 16], strides = [1, 1]} : vector<8x64xf32> to vector<8x16xf32>
    %1010 = arith.mulf %1007, %987 : vector<8x16xf32>
    %1011 = arith.mulf %1006, %1008 : vector<8x16xf32>
    %1012 = arith.addf %1010, %1011 : vector<8x16xf32>
    %1013 = math.tanh %1012 : vector<8x16xf32>
    %1014 = arith.mulf %1009, %1013 : vector<8x16xf32>
    %1015 = arith.index_cast %c10_i32_289 : i32 to index
    %c0_294 = arith.constant 0 : index
    %c0_295 = arith.constant 0 : index
    %1016 = vector.load %arg7[%1015, %c0_294, %c0_295] : memref<30x16x128xf32, #tpu.memory_space<vmem>>, vector<1x16x128xf32>
    %1017 = vector.shape_cast %1016 : vector<1x16x128xf32> to vector<16x128xf32>
    %cst_296 = arith.constant dense<0.000000e+00> : vector<8x128xf32>
    %1018 = tpu.matmul %1014, %1017, %cst_296 {dimension_numbers = #tpu.dot_dimension_numbers<[1], [0], [0], [1], [0, 0, 1, 1], [], []>} : vector<8x16xf32>, vector<16x128xf32>, vector<8x128xf32> -> vector<8x128xf32>
    %1019 = arith.addf %994, %1018 : vector<8x128xf32>
    %c11_i32_297 = arith.constant 11 : i32
    %1020 = arith.index_cast %c11_i32_297 : i32 to index
    %c0_298 = arith.constant 0 : index
    %c0_299 = arith.constant 0 : index
    %1021 = vector.load %arg11[%1020, %c0_298, %c0_299] : memref<30x8x64xf32, #tpu.memory_space<vmem>>, vector<1x8x64xf32>
    %1022 = vector.shape_cast %1021 : vector<1x8x64xf32> to vector<8x64xf32>
    %cst_300 = arith.constant dense<0.000000e+00> : vector<8x64xf32>
    %1023 = tpu.matmul %1014, %742, %cst_300 {dimension_numbers = #tpu.dot_dimension_numbers<[1], [0], [0], [1], [0, 0, 1, 1], [], []>} : vector<8x16xf32>, vector<16x64xf32>, vector<8x64xf32> -> vector<8x64xf32>
    %1024 = arith.addf %1022, %1023 : vector<8x64xf32>
    %1025 = arith.negf %1024 : vector<8x64xf32>
    %1026 = math.exp %1025 : vector<8x64xf32>
    %cst_301 = arith.constant 1.000000e+00 : f32
    %1027 = vector.broadcast %cst_301 : f32 to vector<8x64xf32>
    %1028 = arith.addf %1027, %1026 : vector<8x64xf32>
    %1029 = arith.divf %1027, %1028 : vector<8x64xf32>
    %1030 = math.tanh %1024 : vector<8x64xf32>
    %1031 = vector.extract_strided_slice %1029 {offsets = [0, 0], sizes = [8, 16], strides = [1, 1]} : vector<8x64xf32> to vector<8x16xf32>
    %1032 = vector.extract_strided_slice %1029 {offsets = [0, 16], sizes = [8, 16], strides = [1, 1]} : vector<8x64xf32> to vector<8x16xf32>
    %1033 = vector.extract_strided_slice %1030 {offsets = [0, 32], sizes = [8, 16], strides = [1, 1]} : vector<8x64xf32> to vector<8x16xf32>
    %1034 = vector.extract_strided_slice %1029 {offsets = [0, 48], sizes = [8, 16], strides = [1, 1]} : vector<8x64xf32> to vector<8x16xf32>
    %1035 = arith.mulf %1032, %1012 : vector<8x16xf32>
    %1036 = arith.mulf %1031, %1033 : vector<8x16xf32>
    %1037 = arith.addf %1035, %1036 : vector<8x16xf32>
    %1038 = math.tanh %1037 : vector<8x16xf32>
    %1039 = arith.mulf %1034, %1038 : vector<8x16xf32>
    %1040 = arith.index_cast %c11_i32_297 : i32 to index
    %c0_302 = arith.constant 0 : index
    %c0_303 = arith.constant 0 : index
    %1041 = vector.load %arg7[%1040, %c0_302, %c0_303] : memref<30x16x128xf32, #tpu.memory_space<vmem>>, vector<1x16x128xf32>
    %1042 = vector.shape_cast %1041 : vector<1x16x128xf32> to vector<16x128xf32>
    %cst_304 = arith.constant dense<0.000000e+00> : vector<8x128xf32>
    %1043 = tpu.matmul %1039, %1042, %cst_304 {dimension_numbers = #tpu.dot_dimension_numbers<[1], [0], [0], [1], [0, 0, 1, 1], [], []>} : vector<8x16xf32>, vector<16x128xf32>, vector<8x128xf32> -> vector<8x128xf32>
    %1044 = arith.addf %1019, %1043 : vector<8x128xf32>
    %c12_i32_305 = arith.constant 12 : i32
    %1045 = arith.index_cast %c12_i32_305 : i32 to index
    %c0_306 = arith.constant 0 : index
    %c0_307 = arith.constant 0 : index
    %1046 = vector.load %arg11[%1045, %c0_306, %c0_307] : memref<30x8x64xf32, #tpu.memory_space<vmem>>, vector<1x8x64xf32>
    %1047 = vector.shape_cast %1046 : vector<1x8x64xf32> to vector<8x64xf32>
    %cst_308 = arith.constant dense<0.000000e+00> : vector<8x64xf32>
    %1048 = tpu.matmul %1039, %742, %cst_308 {dimension_numbers = #tpu.dot_dimension_numbers<[1], [0], [0], [1], [0, 0, 1, 1], [], []>} : vector<8x16xf32>, vector<16x64xf32>, vector<8x64xf32> -> vector<8x64xf32>
    %1049 = arith.addf %1047, %1048 : vector<8x64xf32>
    %1050 = arith.negf %1049 : vector<8x64xf32>
    %1051 = math.exp %1050 : vector<8x64xf32>
    %cst_309 = arith.constant 1.000000e+00 : f32
    %1052 = vector.broadcast %cst_309 : f32 to vector<8x64xf32>
    %1053 = arith.addf %1052, %1051 : vector<8x64xf32>
    %1054 = arith.divf %1052, %1053 : vector<8x64xf32>
    %1055 = math.tanh %1049 : vector<8x64xf32>
    %1056 = vector.extract_strided_slice %1054 {offsets = [0, 0], sizes = [8, 16], strides = [1, 1]} : vector<8x64xf32> to vector<8x16xf32>
    %1057 = vector.extract_strided_slice %1054 {offsets = [0, 16], sizes = [8, 16], strides = [1, 1]} : vector<8x64xf32> to vector<8x16xf32>
    %1058 = vector.extract_strided_slice %1055 {offsets = [0, 32], sizes = [8, 16], strides = [1, 1]} : vector<8x64xf32> to vector<8x16xf32>
    %1059 = vector.extract_strided_slice %1054 {offsets = [0, 48], sizes = [8, 16], strides = [1, 1]} : vector<8x64xf32> to vector<8x16xf32>
    %1060 = arith.mulf %1057, %1037 : vector<8x16xf32>
    %1061 = arith.mulf %1056, %1058 : vector<8x16xf32>
    %1062 = arith.addf %1060, %1061 : vector<8x16xf32>
    %1063 = math.tanh %1062 : vector<8x16xf32>
    %1064 = arith.mulf %1059, %1063 : vector<8x16xf32>
    %1065 = arith.index_cast %c12_i32_305 : i32 to index
    %c0_310 = arith.constant 0 : index
    %c0_311 = arith.constant 0 : index
    %1066 = vector.load %arg7[%1065, %c0_310, %c0_311] : memref<30x16x128xf32, #tpu.memory_space<vmem>>, vector<1x16x128xf32>
    %1067 = vector.shape_cast %1066 : vector<1x16x128xf32> to vector<16x128xf32>
    %cst_312 = arith.constant dense<0.000000e+00> : vector<8x128xf32>
    %1068 = tpu.matmul %1064, %1067, %cst_312 {dimension_numbers = #tpu.dot_dimension_numbers<[1], [0], [0], [1], [0, 0, 1, 1], [], []>} : vector<8x16xf32>, vector<16x128xf32>, vector<8x128xf32> -> vector<8x128xf32>
    %1069 = arith.addf %1044, %1068 : vector<8x128xf32>
    %c13_i32_313 = arith.constant 13 : i32
    %1070 = arith.index_cast %c13_i32_313 : i32 to index
    %c0_314 = arith.constant 0 : index
    %c0_315 = arith.constant 0 : index
    %1071 = vector.load %arg11[%1070, %c0_314, %c0_315] : memref<30x8x64xf32, #tpu.memory_space<vmem>>, vector<1x8x64xf32>
    %1072 = vector.shape_cast %1071 : vector<1x8x64xf32> to vector<8x64xf32>
    %cst_316 = arith.constant dense<0.000000e+00> : vector<8x64xf32>
    %1073 = tpu.matmul %1064, %742, %cst_316 {dimension_numbers = #tpu.dot_dimension_numbers<[1], [0], [0], [1], [0, 0, 1, 1], [], []>} : vector<8x16xf32>, vector<16x64xf32>, vector<8x64xf32> -> vector<8x64xf32>
    %1074 = arith.addf %1072, %1073 : vector<8x64xf32>
    %1075 = arith.negf %1074 : vector<8x64xf32>
    %1076 = math.exp %1075 : vector<8x64xf32>
    %cst_317 = arith.constant 1.000000e+00 : f32
    %1077 = vector.broadcast %cst_317 : f32 to vector<8x64xf32>
    %1078 = arith.addf %1077, %1076 : vector<8x64xf32>
    %1079 = arith.divf %1077, %1078 : vector<8x64xf32>
    %1080 = math.tanh %1074 : vector<8x64xf32>
    %1081 = vector.extract_strided_slice %1079 {offsets = [0, 0], sizes = [8, 16], strides = [1, 1]} : vector<8x64xf32> to vector<8x16xf32>
    %1082 = vector.extract_strided_slice %1079 {offsets = [0, 16], sizes = [8, 16], strides = [1, 1]} : vector<8x64xf32> to vector<8x16xf32>
    %1083 = vector.extract_strided_slice %1080 {offsets = [0, 32], sizes = [8, 16], strides = [1, 1]} : vector<8x64xf32> to vector<8x16xf32>
    %1084 = vector.extract_strided_slice %1079 {offsets = [0, 48], sizes = [8, 16], strides = [1, 1]} : vector<8x64xf32> to vector<8x16xf32>
    %1085 = arith.mulf %1082, %1062 : vector<8x16xf32>
    %1086 = arith.mulf %1081, %1083 : vector<8x16xf32>
    %1087 = arith.addf %1085, %1086 : vector<8x16xf32>
    %1088 = math.tanh %1087 : vector<8x16xf32>
    %1089 = arith.mulf %1084, %1088 : vector<8x16xf32>
    %1090 = arith.index_cast %c13_i32_313 : i32 to index
    %c0_318 = arith.constant 0 : index
    %c0_319 = arith.constant 0 : index
    %1091 = vector.load %arg7[%1090, %c0_318, %c0_319] : memref<30x16x128xf32, #tpu.memory_space<vmem>>, vector<1x16x128xf32>
    %1092 = vector.shape_cast %1091 : vector<1x16x128xf32> to vector<16x128xf32>
    %cst_320 = arith.constant dense<0.000000e+00> : vector<8x128xf32>
    %1093 = tpu.matmul %1089, %1092, %cst_320 {dimension_numbers = #tpu.dot_dimension_numbers<[1], [0], [0], [1], [0, 0, 1, 1], [], []>} : vector<8x16xf32>, vector<16x128xf32>, vector<8x128xf32> -> vector<8x128xf32>
    %1094 = arith.addf %1069, %1093 : vector<8x128xf32>
    %c14_i32_321 = arith.constant 14 : i32
    %1095 = arith.index_cast %c14_i32_321 : i32 to index
    %c0_322 = arith.constant 0 : index
    %c0_323 = arith.constant 0 : index
    %1096 = vector.load %arg11[%1095, %c0_322, %c0_323] : memref<30x8x64xf32, #tpu.memory_space<vmem>>, vector<1x8x64xf32>
    %1097 = vector.shape_cast %1096 : vector<1x8x64xf32> to vector<8x64xf32>
    %cst_324 = arith.constant dense<0.000000e+00> : vector<8x64xf32>
    %1098 = tpu.matmul %1089, %742, %cst_324 {dimension_numbers = #tpu.dot_dimension_numbers<[1], [0], [0], [1], [0, 0, 1, 1], [], []>} : vector<8x16xf32>, vector<16x64xf32>, vector<8x64xf32> -> vector<8x64xf32>
    %1099 = arith.addf %1097, %1098 : vector<8x64xf32>
    %1100 = arith.negf %1099 : vector<8x64xf32>
    %1101 = math.exp %1100 : vector<8x64xf32>
    %cst_325 = arith.constant 1.000000e+00 : f32
    %1102 = vector.broadcast %cst_325 : f32 to vector<8x64xf32>
    %1103 = arith.addf %1102, %1101 : vector<8x64xf32>
    %1104 = arith.divf %1102, %1103 : vector<8x64xf32>
    %1105 = math.tanh %1099 : vector<8x64xf32>
    %1106 = vector.extract_strided_slice %1104 {offsets = [0, 0], sizes = [8, 16], strides = [1, 1]} : vector<8x64xf32> to vector<8x16xf32>
    %1107 = vector.extract_strided_slice %1104 {offsets = [0, 16], sizes = [8, 16], strides = [1, 1]} : vector<8x64xf32> to vector<8x16xf32>
    %1108 = vector.extract_strided_slice %1105 {offsets = [0, 32], sizes = [8, 16], strides = [1, 1]} : vector<8x64xf32> to vector<8x16xf32>
    %1109 = vector.extract_strided_slice %1104 {offsets = [0, 48], sizes = [8, 16], strides = [1, 1]} : vector<8x64xf32> to vector<8x16xf32>
    %1110 = arith.mulf %1107, %1087 : vector<8x16xf32>
    %1111 = arith.mulf %1106, %1108 : vector<8x16xf32>
    %1112 = arith.addf %1110, %1111 : vector<8x16xf32>
    %1113 = math.tanh %1112 : vector<8x16xf32>
    %1114 = arith.mulf %1109, %1113 : vector<8x16xf32>
    %1115 = arith.index_cast %c14_i32_321 : i32 to index
    %c0_326 = arith.constant 0 : index
    %c0_327 = arith.constant 0 : index
    %1116 = vector.load %arg7[%1115, %c0_326, %c0_327] : memref<30x16x128xf32, #tpu.memory_space<vmem>>, vector<1x16x128xf32>
    %1117 = vector.shape_cast %1116 : vector<1x16x128xf32> to vector<16x128xf32>
    %cst_328 = arith.constant dense<0.000000e+00> : vector<8x128xf32>
    %1118 = tpu.matmul %1114, %1117, %cst_328 {dimension_numbers = #tpu.dot_dimension_numbers<[1], [0], [0], [1], [0, 0, 1, 1], [], []>} : vector<8x16xf32>, vector<16x128xf32>, vector<8x128xf32> -> vector<8x128xf32>
    %1119 = arith.addf %1094, %1118 : vector<8x128xf32>
    %c15_i32_329 = arith.constant 15 : i32
    %1120 = arith.index_cast %c15_i32_329 : i32 to index
    %c0_330 = arith.constant 0 : index
    %c0_331 = arith.constant 0 : index
    %1121 = vector.load %arg11[%1120, %c0_330, %c0_331] : memref<30x8x64xf32, #tpu.memory_space<vmem>>, vector<1x8x64xf32>
    %1122 = vector.shape_cast %1121 : vector<1x8x64xf32> to vector<8x64xf32>
    %cst_332 = arith.constant dense<0.000000e+00> : vector<8x64xf32>
    %1123 = tpu.matmul %1114, %742, %cst_332 {dimension_numbers = #tpu.dot_dimension_numbers<[1], [0], [0], [1], [0, 0, 1, 1], [], []>} : vector<8x16xf32>, vector<16x64xf32>, vector<8x64xf32> -> vector<8x64xf32>
    %1124 = arith.addf %1122, %1123 : vector<8x64xf32>
    %1125 = arith.negf %1124 : vector<8x64xf32>
    %1126 = math.exp %1125 : vector<8x64xf32>
    %cst_333 = arith.constant 1.000000e+00 : f32
    %1127 = vector.broadcast %cst_333 : f32 to vector<8x64xf32>
    %1128 = arith.addf %1127, %1126 : vector<8x64xf32>
    %1129 = arith.divf %1127, %1128 : vector<8x64xf32>
    %1130 = math.tanh %1124 : vector<8x64xf32>
    %1131 = vector.extract_strided_slice %1129 {offsets = [0, 0], sizes = [8, 16], strides = [1, 1]} : vector<8x64xf32> to vector<8x16xf32>
    %1132 = vector.extract_strided_slice %1129 {offsets = [0, 16], sizes = [8, 16], strides = [1, 1]} : vector<8x64xf32> to vector<8x16xf32>
    %1133 = vector.extract_strided_slice %1130 {offsets = [0, 32], sizes = [8, 16], strides = [1, 1]} : vector<8x64xf32> to vector<8x16xf32>
    %1134 = vector.extract_strided_slice %1129 {offsets = [0, 48], sizes = [8, 16], strides = [1, 1]} : vector<8x64xf32> to vector<8x16xf32>
    %1135 = arith.mulf %1132, %1112 : vector<8x16xf32>
    %1136 = arith.mulf %1131, %1133 : vector<8x16xf32>
    %1137 = arith.addf %1135, %1136 : vector<8x16xf32>
    %1138 = math.tanh %1137 : vector<8x16xf32>
    %1139 = arith.mulf %1134, %1138 : vector<8x16xf32>
    %1140 = arith.index_cast %c15_i32_329 : i32 to index
    %c0_334 = arith.constant 0 : index
    %c0_335 = arith.constant 0 : index
    %1141 = vector.load %arg7[%1140, %c0_334, %c0_335] : memref<30x16x128xf32, #tpu.memory_space<vmem>>, vector<1x16x128xf32>
    %1142 = vector.shape_cast %1141 : vector<1x16x128xf32> to vector<16x128xf32>
    %cst_336 = arith.constant dense<0.000000e+00> : vector<8x128xf32>
    %1143 = tpu.matmul %1139, %1142, %cst_336 {dimension_numbers = #tpu.dot_dimension_numbers<[1], [0], [0], [1], [0, 0, 1, 1], [], []>} : vector<8x16xf32>, vector<16x128xf32>, vector<8x128xf32> -> vector<8x128xf32>
    %1144 = arith.addf %1119, %1143 : vector<8x128xf32>
    %c16_i32_337 = arith.constant 16 : i32
    %1145 = arith.index_cast %c16_i32_337 : i32 to index
    %c0_338 = arith.constant 0 : index
    %c0_339 = arith.constant 0 : index
    %1146 = vector.load %arg11[%1145, %c0_338, %c0_339] : memref<30x8x64xf32, #tpu.memory_space<vmem>>, vector<1x8x64xf32>
    %1147 = vector.shape_cast %1146 : vector<1x8x64xf32> to vector<8x64xf32>
    %cst_340 = arith.constant dense<0.000000e+00> : vector<8x64xf32>
    %1148 = tpu.matmul %1139, %742, %cst_340 {dimension_numbers = #tpu.dot_dimension_numbers<[1], [0], [0], [1], [0, 0, 1, 1], [], []>} : vector<8x16xf32>, vector<16x64xf32>, vector<8x64xf32> -> vector<8x64xf32>
    %1149 = arith.addf %1147, %1148 : vector<8x64xf32>
    %1150 = arith.negf %1149 : vector<8x64xf32>
    %1151 = math.exp %1150 : vector<8x64xf32>
    %cst_341 = arith.constant 1.000000e+00 : f32
    %1152 = vector.broadcast %cst_341 : f32 to vector<8x64xf32>
    %1153 = arith.addf %1152, %1151 : vector<8x64xf32>
    %1154 = arith.divf %1152, %1153 : vector<8x64xf32>
    %1155 = math.tanh %1149 : vector<8x64xf32>
    %1156 = vector.extract_strided_slice %1154 {offsets = [0, 0], sizes = [8, 16], strides = [1, 1]} : vector<8x64xf32> to vector<8x16xf32>
    %1157 = vector.extract_strided_slice %1154 {offsets = [0, 16], sizes = [8, 16], strides = [1, 1]} : vector<8x64xf32> to vector<8x16xf32>
    %1158 = vector.extract_strided_slice %1155 {offsets = [0, 32], sizes = [8, 16], strides = [1, 1]} : vector<8x64xf32> to vector<8x16xf32>
    %1159 = vector.extract_strided_slice %1154 {offsets = [0, 48], sizes = [8, 16], strides = [1, 1]} : vector<8x64xf32> to vector<8x16xf32>
    %1160 = arith.mulf %1157, %1137 : vector<8x16xf32>
    %1161 = arith.mulf %1156, %1158 : vector<8x16xf32>
    %1162 = arith.addf %1160, %1161 : vector<8x16xf32>
    %1163 = math.tanh %1162 : vector<8x16xf32>
    %1164 = arith.mulf %1159, %1163 : vector<8x16xf32>
    %1165 = arith.index_cast %c16_i32_337 : i32 to index
    %c0_342 = arith.constant 0 : index
    %c0_343 = arith.constant 0 : index
    %1166 = vector.load %arg7[%1165, %c0_342, %c0_343] : memref<30x16x128xf32, #tpu.memory_space<vmem>>, vector<1x16x128xf32>
    %1167 = vector.shape_cast %1166 : vector<1x16x128xf32> to vector<16x128xf32>
    %cst_344 = arith.constant dense<0.000000e+00> : vector<8x128xf32>
    %1168 = tpu.matmul %1164, %1167, %cst_344 {dimension_numbers = #tpu.dot_dimension_numbers<[1], [0], [0], [1], [0, 0, 1, 1], [], []>} : vector<8x16xf32>, vector<16x128xf32>, vector<8x128xf32> -> vector<8x128xf32>
    %1169 = arith.addf %1144, %1168 : vector<8x128xf32>
    %c17_i32_345 = arith.constant 17 : i32
    %1170 = arith.index_cast %c17_i32_345 : i32 to index
    %c0_346 = arith.constant 0 : index
    %c0_347 = arith.constant 0 : index
    %1171 = vector.load %arg11[%1170, %c0_346, %c0_347] : memref<30x8x64xf32, #tpu.memory_space<vmem>>, vector<1x8x64xf32>
    %1172 = vector.shape_cast %1171 : vector<1x8x64xf32> to vector<8x64xf32>
    %cst_348 = arith.constant dense<0.000000e+00> : vector<8x64xf32>
    %1173 = tpu.matmul %1164, %742, %cst_348 {dimension_numbers = #tpu.dot_dimension_numbers<[1], [0], [0], [1], [0, 0, 1, 1], [], []>} : vector<8x16xf32>, vector<16x64xf32>, vector<8x64xf32> -> vector<8x64xf32>
    %1174 = arith.addf %1172, %1173 : vector<8x64xf32>
    %1175 = arith.negf %1174 : vector<8x64xf32>
    %1176 = math.exp %1175 : vector<8x64xf32>
    %cst_349 = arith.constant 1.000000e+00 : f32
    %1177 = vector.broadcast %cst_349 : f32 to vector<8x64xf32>
    %1178 = arith.addf %1177, %1176 : vector<8x64xf32>
    %1179 = arith.divf %1177, %1178 : vector<8x64xf32>
    %1180 = math.tanh %1174 : vector<8x64xf32>
    %1181 = vector.extract_strided_slice %1179 {offsets = [0, 0], sizes = [8, 16], strides = [1, 1]} : vector<8x64xf32> to vector<8x16xf32>
    %1182 = vector.extract_strided_slice %1179 {offsets = [0, 16], sizes = [8, 16], strides = [1, 1]} : vector<8x64xf32> to vector<8x16xf32>
    %1183 = vector.extract_strided_slice %1180 {offsets = [0, 32], sizes = [8, 16], strides = [1, 1]} : vector<8x64xf32> to vector<8x16xf32>
    %1184 = vector.extract_strided_slice %1179 {offsets = [0, 48], sizes = [8, 16], strides = [1, 1]} : vector<8x64xf32> to vector<8x16xf32>
    %1185 = arith.mulf %1182, %1162 : vector<8x16xf32>
    %1186 = arith.mulf %1181, %1183 : vector<8x16xf32>
    %1187 = arith.addf %1185, %1186 : vector<8x16xf32>
    %1188 = math.tanh %1187 : vector<8x16xf32>
    %1189 = arith.mulf %1184, %1188 : vector<8x16xf32>
    %1190 = arith.index_cast %c17_i32_345 : i32 to index
    %c0_350 = arith.constant 0 : index
    %c0_351 = arith.constant 0 : index
    %1191 = vector.load %arg7[%1190, %c0_350, %c0_351] : memref<30x16x128xf32, #tpu.memory_space<vmem>>, vector<1x16x128xf32>
    %1192 = vector.shape_cast %1191 : vector<1x16x128xf32> to vector<16x128xf32>
    %cst_352 = arith.constant dense<0.000000e+00> : vector<8x128xf32>
    %1193 = tpu.matmul %1189, %1192, %cst_352 {dimension_numbers = #tpu.dot_dimension_numbers<[1], [0], [0], [1], [0, 0, 1, 1], [], []>} : vector<8x16xf32>, vector<16x128xf32>, vector<8x128xf32> -> vector<8x128xf32>
    %1194 = arith.addf %1169, %1193 : vector<8x128xf32>
    %c18_i32_353 = arith.constant 18 : i32
    %1195 = arith.index_cast %c18_i32_353 : i32 to index
    %c0_354 = arith.constant 0 : index
    %c0_355 = arith.constant 0 : index
    %1196 = vector.load %arg11[%1195, %c0_354, %c0_355] : memref<30x8x64xf32, #tpu.memory_space<vmem>>, vector<1x8x64xf32>
    %1197 = vector.shape_cast %1196 : vector<1x8x64xf32> to vector<8x64xf32>
    %cst_356 = arith.constant dense<0.000000e+00> : vector<8x64xf32>
    %1198 = tpu.matmul %1189, %742, %cst_356 {dimension_numbers = #tpu.dot_dimension_numbers<[1], [0], [0], [1], [0, 0, 1, 1], [], []>} : vector<8x16xf32>, vector<16x64xf32>, vector<8x64xf32> -> vector<8x64xf32>
    %1199 = arith.addf %1197, %1198 : vector<8x64xf32>
    %1200 = arith.negf %1199 : vector<8x64xf32>
    %1201 = math.exp %1200 : vector<8x64xf32>
    %cst_357 = arith.constant 1.000000e+00 : f32
    %1202 = vector.broadcast %cst_357 : f32 to vector<8x64xf32>
    %1203 = arith.addf %1202, %1201 : vector<8x64xf32>
    %1204 = arith.divf %1202, %1203 : vector<8x64xf32>
    %1205 = math.tanh %1199 : vector<8x64xf32>
    %1206 = vector.extract_strided_slice %1204 {offsets = [0, 0], sizes = [8, 16], strides = [1, 1]} : vector<8x64xf32> to vector<8x16xf32>
    %1207 = vector.extract_strided_slice %1204 {offsets = [0, 16], sizes = [8, 16], strides = [1, 1]} : vector<8x64xf32> to vector<8x16xf32>
    %1208 = vector.extract_strided_slice %1205 {offsets = [0, 32], sizes = [8, 16], strides = [1, 1]} : vector<8x64xf32> to vector<8x16xf32>
    %1209 = vector.extract_strided_slice %1204 {offsets = [0, 48], sizes = [8, 16], strides = [1, 1]} : vector<8x64xf32> to vector<8x16xf32>
    %1210 = arith.mulf %1207, %1187 : vector<8x16xf32>
    %1211 = arith.mulf %1206, %1208 : vector<8x16xf32>
    %1212 = arith.addf %1210, %1211 : vector<8x16xf32>
    %1213 = math.tanh %1212 : vector<8x16xf32>
    %1214 = arith.mulf %1209, %1213 : vector<8x16xf32>
    %1215 = arith.index_cast %c18_i32_353 : i32 to index
    %c0_358 = arith.constant 0 : index
    %c0_359 = arith.constant 0 : index
    %1216 = vector.load %arg7[%1215, %c0_358, %c0_359] : memref<30x16x128xf32, #tpu.memory_space<vmem>>, vector<1x16x128xf32>
    %1217 = vector.shape_cast %1216 : vector<1x16x128xf32> to vector<16x128xf32>
    %cst_360 = arith.constant dense<0.000000e+00> : vector<8x128xf32>
    %1218 = tpu.matmul %1214, %1217, %cst_360 {dimension_numbers = #tpu.dot_dimension_numbers<[1], [0], [0], [1], [0, 0, 1, 1], [], []>} : vector<8x16xf32>, vector<16x128xf32>, vector<8x128xf32> -> vector<8x128xf32>
    %1219 = arith.addf %1194, %1218 : vector<8x128xf32>
    %c19_i32_361 = arith.constant 19 : i32
    %1220 = arith.index_cast %c19_i32_361 : i32 to index
    %c0_362 = arith.constant 0 : index
    %c0_363 = arith.constant 0 : index
    %1221 = vector.load %arg11[%1220, %c0_362, %c0_363] : memref<30x8x64xf32, #tpu.memory_space<vmem>>, vector<1x8x64xf32>
    %1222 = vector.shape_cast %1221 : vector<1x8x64xf32> to vector<8x64xf32>
    %cst_364 = arith.constant dense<0.000000e+00> : vector<8x64xf32>
    %1223 = tpu.matmul %1214, %742, %cst_364 {dimension_numbers = #tpu.dot_dimension_numbers<[1], [0], [0], [1], [0, 0, 1, 1], [], []>} : vector<8x16xf32>, vector<16x64xf32>, vector<8x64xf32> -> vector<8x64xf32>
    %1224 = arith.addf %1222, %1223 : vector<8x64xf32>
    %1225 = arith.negf %1224 : vector<8x64xf32>
    %1226 = math.exp %1225 : vector<8x64xf32>
    %cst_365 = arith.constant 1.000000e+00 : f32
    %1227 = vector.broadcast %cst_365 : f32 to vector<8x64xf32>
    %1228 = arith.addf %1227, %1226 : vector<8x64xf32>
    %1229 = arith.divf %1227, %1228 : vector<8x64xf32>
    %1230 = math.tanh %1224 : vector<8x64xf32>
    %1231 = vector.extract_strided_slice %1229 {offsets = [0, 0], sizes = [8, 16], strides = [1, 1]} : vector<8x64xf32> to vector<8x16xf32>
    %1232 = vector.extract_strided_slice %1229 {offsets = [0, 16], sizes = [8, 16], strides = [1, 1]} : vector<8x64xf32> to vector<8x16xf32>
    %1233 = vector.extract_strided_slice %1230 {offsets = [0, 32], sizes = [8, 16], strides = [1, 1]} : vector<8x64xf32> to vector<8x16xf32>
    %1234 = vector.extract_strided_slice %1229 {offsets = [0, 48], sizes = [8, 16], strides = [1, 1]} : vector<8x64xf32> to vector<8x16xf32>
    %1235 = arith.mulf %1232, %1212 : vector<8x16xf32>
    %1236 = arith.mulf %1231, %1233 : vector<8x16xf32>
    %1237 = arith.addf %1235, %1236 : vector<8x16xf32>
    %1238 = math.tanh %1237 : vector<8x16xf32>
    %1239 = arith.mulf %1234, %1238 : vector<8x16xf32>
    %1240 = arith.index_cast %c19_i32_361 : i32 to index
    %c0_366 = arith.constant 0 : index
    %c0_367 = arith.constant 0 : index
    %1241 = vector.load %arg7[%1240, %c0_366, %c0_367] : memref<30x16x128xf32, #tpu.memory_space<vmem>>, vector<1x16x128xf32>
    %1242 = vector.shape_cast %1241 : vector<1x16x128xf32> to vector<16x128xf32>
    %cst_368 = arith.constant dense<0.000000e+00> : vector<8x128xf32>
    %1243 = tpu.matmul %1239, %1242, %cst_368 {dimension_numbers = #tpu.dot_dimension_numbers<[1], [0], [0], [1], [0, 0, 1, 1], [], []>} : vector<8x16xf32>, vector<16x128xf32>, vector<8x128xf32> -> vector<8x128xf32>
    %1244 = arith.addf %1219, %1243 : vector<8x128xf32>
    %c20_i32_369 = arith.constant 20 : i32
    %1245 = arith.index_cast %c20_i32_369 : i32 to index
    %c0_370 = arith.constant 0 : index
    %c0_371 = arith.constant 0 : index
    %1246 = vector.load %arg11[%1245, %c0_370, %c0_371] : memref<30x8x64xf32, #tpu.memory_space<vmem>>, vector<1x8x64xf32>
    %1247 = vector.shape_cast %1246 : vector<1x8x64xf32> to vector<8x64xf32>
    %cst_372 = arith.constant dense<0.000000e+00> : vector<8x64xf32>
    %1248 = tpu.matmul %1239, %742, %cst_372 {dimension_numbers = #tpu.dot_dimension_numbers<[1], [0], [0], [1], [0, 0, 1, 1], [], []>} : vector<8x16xf32>, vector<16x64xf32>, vector<8x64xf32> -> vector<8x64xf32>
    %1249 = arith.addf %1247, %1248 : vector<8x64xf32>
    %1250 = arith.negf %1249 : vector<8x64xf32>
    %1251 = math.exp %1250 : vector<8x64xf32>
    %cst_373 = arith.constant 1.000000e+00 : f32
    %1252 = vector.broadcast %cst_373 : f32 to vector<8x64xf32>
    %1253 = arith.addf %1252, %1251 : vector<8x64xf32>
    %1254 = arith.divf %1252, %1253 : vector<8x64xf32>
    %1255 = math.tanh %1249 : vector<8x64xf32>
    %1256 = vector.extract_strided_slice %1254 {offsets = [0, 0], sizes = [8, 16], strides = [1, 1]} : vector<8x64xf32> to vector<8x16xf32>
    %1257 = vector.extract_strided_slice %1254 {offsets = [0, 16], sizes = [8, 16], strides = [1, 1]} : vector<8x64xf32> to vector<8x16xf32>
    %1258 = vector.extract_strided_slice %1255 {offsets = [0, 32], sizes = [8, 16], strides = [1, 1]} : vector<8x64xf32> to vector<8x16xf32>
    %1259 = vector.extract_strided_slice %1254 {offsets = [0, 48], sizes = [8, 16], strides = [1, 1]} : vector<8x64xf32> to vector<8x16xf32>
    %1260 = arith.mulf %1257, %1237 : vector<8x16xf32>
    %1261 = arith.mulf %1256, %1258 : vector<8x16xf32>
    %1262 = arith.addf %1260, %1261 : vector<8x16xf32>
    %1263 = math.tanh %1262 : vector<8x16xf32>
    %1264 = arith.mulf %1259, %1263 : vector<8x16xf32>
    %1265 = arith.index_cast %c20_i32_369 : i32 to index
    %c0_374 = arith.constant 0 : index
    %c0_375 = arith.constant 0 : index
    %1266 = vector.load %arg7[%1265, %c0_374, %c0_375] : memref<30x16x128xf32, #tpu.memory_space<vmem>>, vector<1x16x128xf32>
    %1267 = vector.shape_cast %1266 : vector<1x16x128xf32> to vector<16x128xf32>
    %cst_376 = arith.constant dense<0.000000e+00> : vector<8x128xf32>
    %1268 = tpu.matmul %1264, %1267, %cst_376 {dimension_numbers = #tpu.dot_dimension_numbers<[1], [0], [0], [1], [0, 0, 1, 1], [], []>} : vector<8x16xf32>, vector<16x128xf32>, vector<8x128xf32> -> vector<8x128xf32>
    %1269 = arith.addf %1244, %1268 : vector<8x128xf32>
    %c21_i32_377 = arith.constant 21 : i32
    %1270 = arith.index_cast %c21_i32_377 : i32 to index
    %c0_378 = arith.constant 0 : index
    %c0_379 = arith.constant 0 : index
    %1271 = vector.load %arg11[%1270, %c0_378, %c0_379] : memref<30x8x64xf32, #tpu.memory_space<vmem>>, vector<1x8x64xf32>
    %1272 = vector.shape_cast %1271 : vector<1x8x64xf32> to vector<8x64xf32>
    %cst_380 = arith.constant dense<0.000000e+00> : vector<8x64xf32>
    %1273 = tpu.matmul %1264, %742, %cst_380 {dimension_numbers = #tpu.dot_dimension_numbers<[1], [0], [0], [1], [0, 0, 1, 1], [], []>} : vector<8x16xf32>, vector<16x64xf32>, vector<8x64xf32> -> vector<8x64xf32>
    %1274 = arith.addf %1272, %1273 : vector<8x64xf32>
    %1275 = arith.negf %1274 : vector<8x64xf32>
    %1276 = math.exp %1275 : vector<8x64xf32>
    %cst_381 = arith.constant 1.000000e+00 : f32
    %1277 = vector.broadcast %cst_381 : f32 to vector<8x64xf32>
    %1278 = arith.addf %1277, %1276 : vector<8x64xf32>
    %1279 = arith.divf %1277, %1278 : vector<8x64xf32>
    %1280 = math.tanh %1274 : vector<8x64xf32>
    %1281 = vector.extract_strided_slice %1279 {offsets = [0, 0], sizes = [8, 16], strides = [1, 1]} : vector<8x64xf32> to vector<8x16xf32>
    %1282 = vector.extract_strided_slice %1279 {offsets = [0, 16], sizes = [8, 16], strides = [1, 1]} : vector<8x64xf32> to vector<8x16xf32>
    %1283 = vector.extract_strided_slice %1280 {offsets = [0, 32], sizes = [8, 16], strides = [1, 1]} : vector<8x64xf32> to vector<8x16xf32>
    %1284 = vector.extract_strided_slice %1279 {offsets = [0, 48], sizes = [8, 16], strides = [1, 1]} : vector<8x64xf32> to vector<8x16xf32>
    %1285 = arith.mulf %1282, %1262 : vector<8x16xf32>
    %1286 = arith.mulf %1281, %1283 : vector<8x16xf32>
    %1287 = arith.addf %1285, %1286 : vector<8x16xf32>
    %1288 = math.tanh %1287 : vector<8x16xf32>
    %1289 = arith.mulf %1284, %1288 : vector<8x16xf32>
    %1290 = arith.index_cast %c21_i32_377 : i32 to index
    %c0_382 = arith.constant 0 : index
    %c0_383 = arith.constant 0 : index
    %1291 = vector.load %arg7[%1290, %c0_382, %c0_383] : memref<30x16x128xf32, #tpu.memory_space<vmem>>, vector<1x16x128xf32>
    %1292 = vector.shape_cast %1291 : vector<1x16x128xf32> to vector<16x128xf32>
    %cst_384 = arith.constant dense<0.000000e+00> : vector<8x128xf32>
    %1293 = tpu.matmul %1289, %1292, %cst_384 {dimension_numbers = #tpu.dot_dimension_numbers<[1], [0], [0], [1], [0, 0, 1, 1], [], []>} : vector<8x16xf32>, vector<16x128xf32>, vector<8x128xf32> -> vector<8x128xf32>
    %1294 = arith.addf %1269, %1293 : vector<8x128xf32>
    %c22_i32_385 = arith.constant 22 : i32
    %1295 = arith.index_cast %c22_i32_385 : i32 to index
    %c0_386 = arith.constant 0 : index
    %c0_387 = arith.constant 0 : index
    %1296 = vector.load %arg11[%1295, %c0_386, %c0_387] : memref<30x8x64xf32, #tpu.memory_space<vmem>>, vector<1x8x64xf32>
    %1297 = vector.shape_cast %1296 : vector<1x8x64xf32> to vector<8x64xf32>
    %cst_388 = arith.constant dense<0.000000e+00> : vector<8x64xf32>
    %1298 = tpu.matmul %1289, %742, %cst_388 {dimension_numbers = #tpu.dot_dimension_numbers<[1], [0], [0], [1], [0, 0, 1, 1], [], []>} : vector<8x16xf32>, vector<16x64xf32>, vector<8x64xf32> -> vector<8x64xf32>
    %1299 = arith.addf %1297, %1298 : vector<8x64xf32>
    %1300 = arith.negf %1299 : vector<8x64xf32>
    %1301 = math.exp %1300 : vector<8x64xf32>
    %cst_389 = arith.constant 1.000000e+00 : f32
    %1302 = vector.broadcast %cst_389 : f32 to vector<8x64xf32>
    %1303 = arith.addf %1302, %1301 : vector<8x64xf32>
    %1304 = arith.divf %1302, %1303 : vector<8x64xf32>
    %1305 = math.tanh %1299 : vector<8x64xf32>
    %1306 = vector.extract_strided_slice %1304 {offsets = [0, 0], sizes = [8, 16], strides = [1, 1]} : vector<8x64xf32> to vector<8x16xf32>
    %1307 = vector.extract_strided_slice %1304 {offsets = [0, 16], sizes = [8, 16], strides = [1, 1]} : vector<8x64xf32> to vector<8x16xf32>
    %1308 = vector.extract_strided_slice %1305 {offsets = [0, 32], sizes = [8, 16], strides = [1, 1]} : vector<8x64xf32> to vector<8x16xf32>
    %1309 = vector.extract_strided_slice %1304 {offsets = [0, 48], sizes = [8, 16], strides = [1, 1]} : vector<8x64xf32> to vector<8x16xf32>
    %1310 = arith.mulf %1307, %1287 : vector<8x16xf32>
    %1311 = arith.mulf %1306, %1308 : vector<8x16xf32>
    %1312 = arith.addf %1310, %1311 : vector<8x16xf32>
    %1313 = math.tanh %1312 : vector<8x16xf32>
    %1314 = arith.mulf %1309, %1313 : vector<8x16xf32>
    %1315 = arith.index_cast %c22_i32_385 : i32 to index
    %c0_390 = arith.constant 0 : index
    %c0_391 = arith.constant 0 : index
    %1316 = vector.load %arg7[%1315, %c0_390, %c0_391] : memref<30x16x128xf32, #tpu.memory_space<vmem>>, vector<1x16x128xf32>
    %1317 = vector.shape_cast %1316 : vector<1x16x128xf32> to vector<16x128xf32>
    %cst_392 = arith.constant dense<0.000000e+00> : vector<8x128xf32>
    %1318 = tpu.matmul %1314, %1317, %cst_392 {dimension_numbers = #tpu.dot_dimension_numbers<[1], [0], [0], [1], [0, 0, 1, 1], [], []>} : vector<8x16xf32>, vector<16x128xf32>, vector<8x128xf32> -> vector<8x128xf32>
    %1319 = arith.addf %1294, %1318 : vector<8x128xf32>
    %c23_i32_393 = arith.constant 23 : i32
    %1320 = arith.index_cast %c23_i32_393 : i32 to index
    %c0_394 = arith.constant 0 : index
    %c0_395 = arith.constant 0 : index
    %1321 = vector.load %arg11[%1320, %c0_394, %c0_395] : memref<30x8x64xf32, #tpu.memory_space<vmem>>, vector<1x8x64xf32>
    %1322 = vector.shape_cast %1321 : vector<1x8x64xf32> to vector<8x64xf32>
    %cst_396 = arith.constant dense<0.000000e+00> : vector<8x64xf32>
    %1323 = tpu.matmul %1314, %742, %cst_396 {dimension_numbers = #tpu.dot_dimension_numbers<[1], [0], [0], [1], [0, 0, 1, 1], [], []>} : vector<8x16xf32>, vector<16x64xf32>, vector<8x64xf32> -> vector<8x64xf32>
    %1324 = arith.addf %1322, %1323 : vector<8x64xf32>
    %1325 = arith.negf %1324 : vector<8x64xf32>
    %1326 = math.exp %1325 : vector<8x64xf32>
    %cst_397 = arith.constant 1.000000e+00 : f32
    %1327 = vector.broadcast %cst_397 : f32 to vector<8x64xf32>
    %1328 = arith.addf %1327, %1326 : vector<8x64xf32>
    %1329 = arith.divf %1327, %1328 : vector<8x64xf32>
    %1330 = math.tanh %1324 : vector<8x64xf32>
    %1331 = vector.extract_strided_slice %1329 {offsets = [0, 0], sizes = [8, 16], strides = [1, 1]} : vector<8x64xf32> to vector<8x16xf32>
    %1332 = vector.extract_strided_slice %1329 {offsets = [0, 16], sizes = [8, 16], strides = [1, 1]} : vector<8x64xf32> to vector<8x16xf32>
    %1333 = vector.extract_strided_slice %1330 {offsets = [0, 32], sizes = [8, 16], strides = [1, 1]} : vector<8x64xf32> to vector<8x16xf32>
    %1334 = vector.extract_strided_slice %1329 {offsets = [0, 48], sizes = [8, 16], strides = [1, 1]} : vector<8x64xf32> to vector<8x16xf32>
    %1335 = arith.mulf %1332, %1312 : vector<8x16xf32>
    %1336 = arith.mulf %1331, %1333 : vector<8x16xf32>
    %1337 = arith.addf %1335, %1336 : vector<8x16xf32>
    %1338 = math.tanh %1337 : vector<8x16xf32>
    %1339 = arith.mulf %1334, %1338 : vector<8x16xf32>
    %1340 = arith.index_cast %c23_i32_393 : i32 to index
    %c0_398 = arith.constant 0 : index
    %c0_399 = arith.constant 0 : index
    %1341 = vector.load %arg7[%1340, %c0_398, %c0_399] : memref<30x16x128xf32, #tpu.memory_space<vmem>>, vector<1x16x128xf32>
    %1342 = vector.shape_cast %1341 : vector<1x16x128xf32> to vector<16x128xf32>
    %cst_400 = arith.constant dense<0.000000e+00> : vector<8x128xf32>
    %1343 = tpu.matmul %1339, %1342, %cst_400 {dimension_numbers = #tpu.dot_dimension_numbers<[1], [0], [0], [1], [0, 0, 1, 1], [], []>} : vector<8x16xf32>, vector<16x128xf32>, vector<8x128xf32> -> vector<8x128xf32>
    %1344 = arith.addf %1319, %1343 : vector<8x128xf32>
    %c24_i32_401 = arith.constant 24 : i32
    %1345 = arith.index_cast %c24_i32_401 : i32 to index
    %c0_402 = arith.constant 0 : index
    %c0_403 = arith.constant 0 : index
    %1346 = vector.load %arg11[%1345, %c0_402, %c0_403] : memref<30x8x64xf32, #tpu.memory_space<vmem>>, vector<1x8x64xf32>
    %1347 = vector.shape_cast %1346 : vector<1x8x64xf32> to vector<8x64xf32>
    %cst_404 = arith.constant dense<0.000000e+00> : vector<8x64xf32>
    %1348 = tpu.matmul %1339, %742, %cst_404 {dimension_numbers = #tpu.dot_dimension_numbers<[1], [0], [0], [1], [0, 0, 1, 1], [], []>} : vector<8x16xf32>, vector<16x64xf32>, vector<8x64xf32> -> vector<8x64xf32>
    %1349 = arith.addf %1347, %1348 : vector<8x64xf32>
    %1350 = arith.negf %1349 : vector<8x64xf32>
    %1351 = math.exp %1350 : vector<8x64xf32>
    %cst_405 = arith.constant 1.000000e+00 : f32
    %1352 = vector.broadcast %cst_405 : f32 to vector<8x64xf32>
    %1353 = arith.addf %1352, %1351 : vector<8x64xf32>
    %1354 = arith.divf %1352, %1353 : vector<8x64xf32>
    %1355 = math.tanh %1349 : vector<8x64xf32>
    %1356 = vector.extract_strided_slice %1354 {offsets = [0, 0], sizes = [8, 16], strides = [1, 1]} : vector<8x64xf32> to vector<8x16xf32>
    %1357 = vector.extract_strided_slice %1354 {offsets = [0, 16], sizes = [8, 16], strides = [1, 1]} : vector<8x64xf32> to vector<8x16xf32>
    %1358 = vector.extract_strided_slice %1355 {offsets = [0, 32], sizes = [8, 16], strides = [1, 1]} : vector<8x64xf32> to vector<8x16xf32>
    %1359 = vector.extract_strided_slice %1354 {offsets = [0, 48], sizes = [8, 16], strides = [1, 1]} : vector<8x64xf32> to vector<8x16xf32>
    %1360 = arith.mulf %1357, %1337 : vector<8x16xf32>
    %1361 = arith.mulf %1356, %1358 : vector<8x16xf32>
    %1362 = arith.addf %1360, %1361 : vector<8x16xf32>
    %1363 = math.tanh %1362 : vector<8x16xf32>
    %1364 = arith.mulf %1359, %1363 : vector<8x16xf32>
    %1365 = arith.index_cast %c24_i32_401 : i32 to index
    %c0_406 = arith.constant 0 : index
    %c0_407 = arith.constant 0 : index
    %1366 = vector.load %arg7[%1365, %c0_406, %c0_407] : memref<30x16x128xf32, #tpu.memory_space<vmem>>, vector<1x16x128xf32>
    %1367 = vector.shape_cast %1366 : vector<1x16x128xf32> to vector<16x128xf32>
    %cst_408 = arith.constant dense<0.000000e+00> : vector<8x128xf32>
    %1368 = tpu.matmul %1364, %1367, %cst_408 {dimension_numbers = #tpu.dot_dimension_numbers<[1], [0], [0], [1], [0, 0, 1, 1], [], []>} : vector<8x16xf32>, vector<16x128xf32>, vector<8x128xf32> -> vector<8x128xf32>
    %1369 = arith.addf %1344, %1368 : vector<8x128xf32>
    %c25_i32_409 = arith.constant 25 : i32
    %1370 = arith.index_cast %c25_i32_409 : i32 to index
    %c0_410 = arith.constant 0 : index
    %c0_411 = arith.constant 0 : index
    %1371 = vector.load %arg11[%1370, %c0_410, %c0_411] : memref<30x8x64xf32, #tpu.memory_space<vmem>>, vector<1x8x64xf32>
    %1372 = vector.shape_cast %1371 : vector<1x8x64xf32> to vector<8x64xf32>
    %cst_412 = arith.constant dense<0.000000e+00> : vector<8x64xf32>
    %1373 = tpu.matmul %1364, %742, %cst_412 {dimension_numbers = #tpu.dot_dimension_numbers<[1], [0], [0], [1], [0, 0, 1, 1], [], []>} : vector<8x16xf32>, vector<16x64xf32>, vector<8x64xf32> -> vector<8x64xf32>
    %1374 = arith.addf %1372, %1373 : vector<8x64xf32>
    %1375 = arith.negf %1374 : vector<8x64xf32>
    %1376 = math.exp %1375 : vector<8x64xf32>
    %cst_413 = arith.constant 1.000000e+00 : f32
    %1377 = vector.broadcast %cst_413 : f32 to vector<8x64xf32>
    %1378 = arith.addf %1377, %1376 : vector<8x64xf32>
    %1379 = arith.divf %1377, %1378 : vector<8x64xf32>
    %1380 = math.tanh %1374 : vector<8x64xf32>
    %1381 = vector.extract_strided_slice %1379 {offsets = [0, 0], sizes = [8, 16], strides = [1, 1]} : vector<8x64xf32> to vector<8x16xf32>
    %1382 = vector.extract_strided_slice %1379 {offsets = [0, 16], sizes = [8, 16], strides = [1, 1]} : vector<8x64xf32> to vector<8x16xf32>
    %1383 = vector.extract_strided_slice %1380 {offsets = [0, 32], sizes = [8, 16], strides = [1, 1]} : vector<8x64xf32> to vector<8x16xf32>
    %1384 = vector.extract_strided_slice %1379 {offsets = [0, 48], sizes = [8, 16], strides = [1, 1]} : vector<8x64xf32> to vector<8x16xf32>
    %1385 = arith.mulf %1382, %1362 : vector<8x16xf32>
    %1386 = arith.mulf %1381, %1383 : vector<8x16xf32>
    %1387 = arith.addf %1385, %1386 : vector<8x16xf32>
    %1388 = math.tanh %1387 : vector<8x16xf32>
    %1389 = arith.mulf %1384, %1388 : vector<8x16xf32>
    %1390 = arith.index_cast %c25_i32_409 : i32 to index
    %c0_414 = arith.constant 0 : index
    %c0_415 = arith.constant 0 : index
    %1391 = vector.load %arg7[%1390, %c0_414, %c0_415] : memref<30x16x128xf32, #tpu.memory_space<vmem>>, vector<1x16x128xf32>
    %1392 = vector.shape_cast %1391 : vector<1x16x128xf32> to vector<16x128xf32>
    %cst_416 = arith.constant dense<0.000000e+00> : vector<8x128xf32>
    %1393 = tpu.matmul %1389, %1392, %cst_416 {dimension_numbers = #tpu.dot_dimension_numbers<[1], [0], [0], [1], [0, 0, 1, 1], [], []>} : vector<8x16xf32>, vector<16x128xf32>, vector<8x128xf32> -> vector<8x128xf32>
    %1394 = arith.addf %1369, %1393 : vector<8x128xf32>
    %c26_i32_417 = arith.constant 26 : i32
    %1395 = arith.index_cast %c26_i32_417 : i32 to index
    %c0_418 = arith.constant 0 : index
    %c0_419 = arith.constant 0 : index
    %1396 = vector.load %arg11[%1395, %c0_418, %c0_419] : memref<30x8x64xf32, #tpu.memory_space<vmem>>, vector<1x8x64xf32>
    %1397 = vector.shape_cast %1396 : vector<1x8x64xf32> to vector<8x64xf32>
    %cst_420 = arith.constant dense<0.000000e+00> : vector<8x64xf32>
    %1398 = tpu.matmul %1389, %742, %cst_420 {dimension_numbers = #tpu.dot_dimension_numbers<[1], [0], [0], [1], [0, 0, 1, 1], [], []>} : vector<8x16xf32>, vector<16x64xf32>, vector<8x64xf32> -> vector<8x64xf32>
    %1399 = arith.addf %1397, %1398 : vector<8x64xf32>
    %1400 = arith.negf %1399 : vector<8x64xf32>
    %1401 = math.exp %1400 : vector<8x64xf32>
    %cst_421 = arith.constant 1.000000e+00 : f32
    %1402 = vector.broadcast %cst_421 : f32 to vector<8x64xf32>
    %1403 = arith.addf %1402, %1401 : vector<8x64xf32>
    %1404 = arith.divf %1402, %1403 : vector<8x64xf32>
    %1405 = math.tanh %1399 : vector<8x64xf32>
    %1406 = vector.extract_strided_slice %1404 {offsets = [0, 0], sizes = [8, 16], strides = [1, 1]} : vector<8x64xf32> to vector<8x16xf32>
    %1407 = vector.extract_strided_slice %1404 {offsets = [0, 16], sizes = [8, 16], strides = [1, 1]} : vector<8x64xf32> to vector<8x16xf32>
    %1408 = vector.extract_strided_slice %1405 {offsets = [0, 32], sizes = [8, 16], strides = [1, 1]} : vector<8x64xf32> to vector<8x16xf32>
    %1409 = vector.extract_strided_slice %1404 {offsets = [0, 48], sizes = [8, 16], strides = [1, 1]} : vector<8x64xf32> to vector<8x16xf32>
    %1410 = arith.mulf %1407, %1387 : vector<8x16xf32>
    %1411 = arith.mulf %1406, %1408 : vector<8x16xf32>
    %1412 = arith.addf %1410, %1411 : vector<8x16xf32>
    %1413 = math.tanh %1412 : vector<8x16xf32>
    %1414 = arith.mulf %1409, %1413 : vector<8x16xf32>
    %1415 = arith.index_cast %c26_i32_417 : i32 to index
    %c0_422 = arith.constant 0 : index
    %c0_423 = arith.constant 0 : index
    %1416 = vector.load %arg7[%1415, %c0_422, %c0_423] : memref<30x16x128xf32, #tpu.memory_space<vmem>>, vector<1x16x128xf32>
    %1417 = vector.shape_cast %1416 : vector<1x16x128xf32> to vector<16x128xf32>
    %cst_424 = arith.constant dense<0.000000e+00> : vector<8x128xf32>
    %1418 = tpu.matmul %1414, %1417, %cst_424 {dimension_numbers = #tpu.dot_dimension_numbers<[1], [0], [0], [1], [0, 0, 1, 1], [], []>} : vector<8x16xf32>, vector<16x128xf32>, vector<8x128xf32> -> vector<8x128xf32>
    %1419 = arith.addf %1394, %1418 : vector<8x128xf32>
    %c27_i32_425 = arith.constant 27 : i32
    %1420 = arith.index_cast %c27_i32_425 : i32 to index
    %c0_426 = arith.constant 0 : index
    %c0_427 = arith.constant 0 : index
    %1421 = vector.load %arg11[%1420, %c0_426, %c0_427] : memref<30x8x64xf32, #tpu.memory_space<vmem>>, vector<1x8x64xf32>
    %1422 = vector.shape_cast %1421 : vector<1x8x64xf32> to vector<8x64xf32>
    %cst_428 = arith.constant dense<0.000000e+00> : vector<8x64xf32>
    %1423 = tpu.matmul %1414, %742, %cst_428 {dimension_numbers = #tpu.dot_dimension_numbers<[1], [0], [0], [1], [0, 0, 1, 1], [], []>} : vector<8x16xf32>, vector<16x64xf32>, vector<8x64xf32> -> vector<8x64xf32>
    %1424 = arith.addf %1422, %1423 : vector<8x64xf32>
    %1425 = arith.negf %1424 : vector<8x64xf32>
    %1426 = math.exp %1425 : vector<8x64xf32>
    %cst_429 = arith.constant 1.000000e+00 : f32
    %1427 = vector.broadcast %cst_429 : f32 to vector<8x64xf32>
    %1428 = arith.addf %1427, %1426 : vector<8x64xf32>
    %1429 = arith.divf %1427, %1428 : vector<8x64xf32>
    %1430 = math.tanh %1424 : vector<8x64xf32>
    %1431 = vector.extract_strided_slice %1429 {offsets = [0, 0], sizes = [8, 16], strides = [1, 1]} : vector<8x64xf32> to vector<8x16xf32>
    %1432 = vector.extract_strided_slice %1429 {offsets = [0, 16], sizes = [8, 16], strides = [1, 1]} : vector<8x64xf32> to vector<8x16xf32>
    %1433 = vector.extract_strided_slice %1430 {offsets = [0, 32], sizes = [8, 16], strides = [1, 1]} : vector<8x64xf32> to vector<8x16xf32>
    %1434 = vector.extract_strided_slice %1429 {offsets = [0, 48], sizes = [8, 16], strides = [1, 1]} : vector<8x64xf32> to vector<8x16xf32>
    %1435 = arith.mulf %1432, %1412 : vector<8x16xf32>
    %1436 = arith.mulf %1431, %1433 : vector<8x16xf32>
    %1437 = arith.addf %1435, %1436 : vector<8x16xf32>
    %1438 = math.tanh %1437 : vector<8x16xf32>
    %1439 = arith.mulf %1434, %1438 : vector<8x16xf32>
    %1440 = arith.index_cast %c27_i32_425 : i32 to index
    %c0_430 = arith.constant 0 : index
    %c0_431 = arith.constant 0 : index
    %1441 = vector.load %arg7[%1440, %c0_430, %c0_431] : memref<30x16x128xf32, #tpu.memory_space<vmem>>, vector<1x16x128xf32>
    %1442 = vector.shape_cast %1441 : vector<1x16x128xf32> to vector<16x128xf32>
    %cst_432 = arith.constant dense<0.000000e+00> : vector<8x128xf32>
    %1443 = tpu.matmul %1439, %1442, %cst_432 {dimension_numbers = #tpu.dot_dimension_numbers<[1], [0], [0], [1], [0, 0, 1, 1], [], []>} : vector<8x16xf32>, vector<16x128xf32>, vector<8x128xf32> -> vector<8x128xf32>
    %1444 = arith.addf %1419, %1443 : vector<8x128xf32>
    %c28_i32_433 = arith.constant 28 : i32
    %1445 = arith.index_cast %c28_i32_433 : i32 to index
    %c0_434 = arith.constant 0 : index
    %c0_435 = arith.constant 0 : index
    %1446 = vector.load %arg11[%1445, %c0_434, %c0_435] : memref<30x8x64xf32, #tpu.memory_space<vmem>>, vector<1x8x64xf32>
    %1447 = vector.shape_cast %1446 : vector<1x8x64xf32> to vector<8x64xf32>
    %cst_436 = arith.constant dense<0.000000e+00> : vector<8x64xf32>
    %1448 = tpu.matmul %1439, %742, %cst_436 {dimension_numbers = #tpu.dot_dimension_numbers<[1], [0], [0], [1], [0, 0, 1, 1], [], []>} : vector<8x16xf32>, vector<16x64xf32>, vector<8x64xf32> -> vector<8x64xf32>
    %1449 = arith.addf %1447, %1448 : vector<8x64xf32>
    %1450 = arith.negf %1449 : vector<8x64xf32>
    %1451 = math.exp %1450 : vector<8x64xf32>
    %cst_437 = arith.constant 1.000000e+00 : f32
    %1452 = vector.broadcast %cst_437 : f32 to vector<8x64xf32>
    %1453 = arith.addf %1452, %1451 : vector<8x64xf32>
    %1454 = arith.divf %1452, %1453 : vector<8x64xf32>
    %1455 = math.tanh %1449 : vector<8x64xf32>
    %1456 = vector.extract_strided_slice %1454 {offsets = [0, 0], sizes = [8, 16], strides = [1, 1]} : vector<8x64xf32> to vector<8x16xf32>
    %1457 = vector.extract_strided_slice %1454 {offsets = [0, 16], sizes = [8, 16], strides = [1, 1]} : vector<8x64xf32> to vector<8x16xf32>
    %1458 = vector.extract_strided_slice %1455 {offsets = [0, 32], sizes = [8, 16], strides = [1, 1]} : vector<8x64xf32> to vector<8x16xf32>
    %1459 = vector.extract_strided_slice %1454 {offsets = [0, 48], sizes = [8, 16], strides = [1, 1]} : vector<8x64xf32> to vector<8x16xf32>
    %1460 = arith.mulf %1457, %1437 : vector<8x16xf32>
    %1461 = arith.mulf %1456, %1458 : vector<8x16xf32>
    %1462 = arith.addf %1460, %1461 : vector<8x16xf32>
    %1463 = math.tanh %1462 : vector<8x16xf32>
    %1464 = arith.mulf %1459, %1463 : vector<8x16xf32>
    %1465 = arith.index_cast %c28_i32_433 : i32 to index
    %c0_438 = arith.constant 0 : index
    %c0_439 = arith.constant 0 : index
    %1466 = vector.load %arg7[%1465, %c0_438, %c0_439] : memref<30x16x128xf32, #tpu.memory_space<vmem>>, vector<1x16x128xf32>
    %1467 = vector.shape_cast %1466 : vector<1x16x128xf32> to vector<16x128xf32>
    %cst_440 = arith.constant dense<0.000000e+00> : vector<8x128xf32>
    %1468 = tpu.matmul %1464, %1467, %cst_440 {dimension_numbers = #tpu.dot_dimension_numbers<[1], [0], [0], [1], [0, 0, 1, 1], [], []>} : vector<8x16xf32>, vector<16x128xf32>, vector<8x128xf32> -> vector<8x128xf32>
    %1469 = arith.addf %1444, %1468 : vector<8x128xf32>
    %c29_i32_441 = arith.constant 29 : i32
    %1470 = arith.index_cast %c29_i32_441 : i32 to index
    %c0_442 = arith.constant 0 : index
    %c0_443 = arith.constant 0 : index
    %1471 = vector.load %arg11[%1470, %c0_442, %c0_443] : memref<30x8x64xf32, #tpu.memory_space<vmem>>, vector<1x8x64xf32>
    %1472 = vector.shape_cast %1471 : vector<1x8x64xf32> to vector<8x64xf32>
    %cst_444 = arith.constant dense<0.000000e+00> : vector<8x64xf32>
    %1473 = tpu.matmul %1464, %742, %cst_444 {dimension_numbers = #tpu.dot_dimension_numbers<[1], [0], [0], [1], [0, 0, 1, 1], [], []>} : vector<8x16xf32>, vector<16x64xf32>, vector<8x64xf32> -> vector<8x64xf32>
    %1474 = arith.addf %1472, %1473 : vector<8x64xf32>
    %1475 = arith.negf %1474 : vector<8x64xf32>
    %1476 = math.exp %1475 : vector<8x64xf32>
    %cst_445 = arith.constant 1.000000e+00 : f32
    %1477 = vector.broadcast %cst_445 : f32 to vector<8x64xf32>
    %1478 = arith.addf %1477, %1476 : vector<8x64xf32>
    %1479 = arith.divf %1477, %1478 : vector<8x64xf32>
    %1480 = math.tanh %1474 : vector<8x64xf32>
    %1481 = vector.extract_strided_slice %1479 {offsets = [0, 0], sizes = [8, 16], strides = [1, 1]} : vector<8x64xf32> to vector<8x16xf32>
    %1482 = vector.extract_strided_slice %1479 {offsets = [0, 16], sizes = [8, 16], strides = [1, 1]} : vector<8x64xf32> to vector<8x16xf32>
    %1483 = vector.extract_strided_slice %1480 {offsets = [0, 32], sizes = [8, 16], strides = [1, 1]} : vector<8x64xf32> to vector<8x16xf32>
    %1484 = vector.extract_strided_slice %1479 {offsets = [0, 48], sizes = [8, 16], strides = [1, 1]} : vector<8x64xf32> to vector<8x16xf32>
    %1485 = arith.mulf %1482, %1462 : vector<8x16xf32>
    %1486 = arith.mulf %1481, %1483 : vector<8x16xf32>
    %1487 = arith.addf %1485, %1486 : vector<8x16xf32>
    %1488 = math.tanh %1487 : vector<8x16xf32>
    %1489 = arith.mulf %1484, %1488 : vector<8x16xf32>
    %1490 = arith.index_cast %c29_i32_441 : i32 to index
    %c0_446 = arith.constant 0 : index
    %c0_447 = arith.constant 0 : index
    %1491 = vector.load %arg7[%1490, %c0_446, %c0_447] : memref<30x16x128xf32, #tpu.memory_space<vmem>>, vector<1x16x128xf32>
    %1492 = vector.shape_cast %1491 : vector<1x16x128xf32> to vector<16x128xf32>
    %cst_448 = arith.constant dense<0.000000e+00> : vector<8x128xf32>
    %1493 = tpu.matmul %1489, %1492, %cst_448 {dimension_numbers = #tpu.dot_dimension_numbers<[1], [0], [0], [1], [0, 0, 1, 1], [], []>} : vector<8x16xf32>, vector<16x128xf32>, vector<8x128xf32> -> vector<8x128xf32>
    %1494 = arith.addf %1469, %1493 : vector<8x128xf32>
    %c30_i32_449 = arith.constant 30 : i32
    %c0_450 = arith.constant 0 : index
    %c0_451 = arith.constant 0 : index
    %1495 = vector.load %arg8[%c0_450, %c0_451] : memref<1x128xf32, #tpu.memory_space<vmem>>, vector<1x128xf32>
    %1496 = vector.broadcast %1495 : vector<1x128xf32> to vector<8x128xf32>
    %1497 = arith.addf %1494, %1496 : vector<8x128xf32>
    %1498 = tpu.iota {dimensions = array<i32: 1>} : vector<8x128xi32>
    %c50_i32 = arith.constant 50 : i32
    %1499 = vector.broadcast %c50_i32 : i32 to vector<8x128xi32>
    %1500 = arith.cmpi slt, %1498, %1499 : vector<8x128xi32>
    %cst_452 = arith.constant -1.000000e+30 : f32
    %1501 = vector.broadcast %cst_452 : f32 to vector<8x128xf32>
    %1502 = arith.select %1500, %1497, %1501 : vector<8x128xi1>, vector<8x128xf32>
    %cst_453 = arith.constant dense<0xFF800000> : vector<8xf32>
    %1503 = vector.multi_reduction <maximumf>, %1502, %cst_453 [1] : vector<8x128xf32> to vector<8xf32>
    %1504 = vector.shape_cast %1503 : vector<8xf32> to vector<8x1xf32>
    %1505 = vector.broadcast %1504 : vector<8x1xf32> to vector<8x128xf32>
    %1506 = arith.subf %1502, %1505 : vector<8x128xf32>
    %1507 = math.exp %1506 : vector<8x128xf32>
    %cst_454 = arith.constant dense<0.000000e+00> : vector<8xf32>
    %1508 = vector.multi_reduction <add>, %1507, %cst_454 [1] : vector<8x128xf32> to vector<8xf32>
    %1509 = vector.shape_cast %1508 : vector<8xf32> to vector<8x1xf32>
    %1510 = math.log %1509 : vector<8x1xf32>
    %1511 = vector.broadcast %1510 : vector<8x1xf32> to vector<8x128xf32>
    %1512 = arith.subf %1506, %1511 : vector<8x128xf32>
    %c0_455 = arith.constant 0 : index
    %c0_456 = arith.constant 0 : index
    %1513 = vector.load %arg9[%c0_455, %c0_456] : memref<8x128xf32, #tpu.memory_space<vmem>>, vector<8x128xf32>
    tpu.vector_store %arg9[%c0_455, %c0_456], %1512 {strides = array<i32>} : memref<8x128xf32, #tpu.memory_space<vmem>>, vector<8x128xf32>,
    return
  }
}

</mosaic_0001>

<bundles_post_ra>
// kernel: lstm_model_forward.1
= control target key start
LH: loop header
LB: loop body
LE: loop exit
PB: predicated region body
PF: predicated region fallthrough
CT: control target
= control target key end

     0   :  { %v11268_v0 = vmov 0.0   ;;  %vm11269_vm0 = vmmov 0   ;;  %vm71_vm1 = vcmask 130048   ;;  %s11270_s26 = smov 64   ;;  %s11271_s27 = smov 32   ;;  %vm412_vm2 = vcmask 261120   ;;  %s13016_s1 = inlined_call_operand.vmem [shape: f32[16,128], index: 1, kind: input, shape index: {}]   ;;  %s13017_s2 = inlined_call_operand.vmem [shape: f32[32,128], index: 2, kind: input, shape index: {}]   ;;  %s13018_s0 = inlined_call_operand.vmem [shape: f32[30,8,16], index: 0, kind: input, shape index: {}]   ;;  %s13019_s3 = inlined_call_operand.vmem [shape: f32[1,128], index: 3, kind: input, shape index: {}]   ;;  %s13020_s4 = inlined_call_operand.vmem [shape: f32[32,64], index: 4, kind: input, shape index: {}]   ;;  %s13021_s6 = inlined_call_operand.vmem [shape: f32[1,64], index: 6, kind: input, shape index: {}]   ;;  %s13022_s5 = inlined_call_operand.vmem [shape: f32[16,64], index: 5, kind: input, shape index: {}]   ;;  %s13023_s7 = inlined_call_operand.vmem [shape: f32[30,16,128], index: 7, kind: input, shape index: {}]   ;;  %s13024_s8 = inlined_call_operand.vmem [shape: f32[1,128], index: 8, kind: input, shape index: {}]   ;;  %s13025_s9 = inlined_call_operand.vmem [shape: f32[8,128], index: 9, kind: output, shape index: {}]  }
   0x1   :  { %9959 = vmatprep.subr.mxu1 %v11268_v0  ;;  %v63_v1 = vld [vmem:[%s13016_s1 + $0x8] sm:$0xff]  ;;  %v11332_v2 = vld [vmem:[%s13017_s2 + $0x18] sm:$0xff]  ;;  %v62_v3 = vld [vmem:[%s13016_s1] sm:$0xff]  ;;  %9967 = vmatprep.mubr.msk.f32.mxu1 %vm11269_vm0, %v11268_v0  ;;  %vm3907_vm3 = vcmask 523264   ;;  %s11272_s12 = smov 96   ;;  %s11273_s13 = smov 16  }
   0x2   :  { %9910 = vmatprep.subr.mxu0 %v63_v1  ;;  %9960 = vmatpush3.msra.mxu1 %v11332_v2  ;;  %v11343_v4 = vld [vmem:[%s13017_s2 + $0x10] sm:$0xff]  ;;  %v32_v5 = vld [vmem:[%s13018_s0] sm:$0xff]  ;;  %v33_v6 = vld [vmem:[%s13018_s0 + $0x8] sm:$0xff]  ;;  %s11274_s14 = smov 80  }
   0x3   :  { %9911 = vmatpush3.msra.mxu0 %v63_v1  ;;  %9961 = vmatprep.subr.mxu1 %v11268_v0  ;;  %v11356_v7 = vld [vmem:[%s13017_s2 + $0x8] sm:$0xff]  ;;  %v11364_v8 = vld [vmem:[%s13017_s2] sm:$0xff]  ;;  %v34_v44 = vld [vmem:[%s13018_s0 + $0x10] sm:$0xff] }
   0x4   :  { %9912 = vmatprep.subr.mxu0 %v62_v3  ;;  %9962 = vmatpush3.msra.mxu1 %v11343_v4  ;;  %v11393_v10 = vld [vmem:[%s13019_s3] ss:$0 sm:$0xff]  ;;  %v35_v45 = vld [vmem:[%s13018_s0 + $0x18] sm:$0xff] }
   0x5   :  { %9913 = vmatpush3.msra.mxu0 %v62_v3  ;;  %9914 = vmatprep.mubr.msk.f32.mxu0 %vm71_vm1, %v32_v5 }
   0x6   :  { %9963 = vmatprep.subr.mxu1 %v11268_v0  ;;  %9915 = vmatmul.mubr.msk.f32.vlgmr.msra.gmra.mxu0 %vm71_vm1, %v33_v6 }
   0x7   :  { %9964 = vmatpush3.msra.mxu1 %v11356_v7  ;;  %10036 = vmatprep.subr.mxu0 %v11268_v0 }
   0x8   :  { %9965 = vmatprep.subr.mxu1 %v11268_v0  ;;  %10037 = vmatpush3.msra.mxu0 %v11332_v2 }
   0x9   :  { %9966 = vmatpush3.msra.mxu1 %v11364_v8  ;;  %10038 = vmatprep.subr.mxu0 %v11268_v0 }
   0xa   :  { %9968 = vmatmul.mubr.f32.vlgmr.msra.gmra.mxu1 %v11268_v0  ;;  %9970 = vmatprep.subr.mxu1 %v11268_v0 }
   0xb   :  { %9971 = vmatpush3.msra.mxu1 %v11332_v2  ;;  %9978 = vmatprep.mubr.msk.f32.mxu1 %vm11269_vm0, %v11268_v0 }
   0xc   :  { %9972 = vmatprep.subr.mxu1 %v11268_v0  ;;  %10039 = vmatpush3.msra.mxu0 %v11343_v4 }
   0xd   :  { %9973 = vmatpush3.msra.mxu1 %v11343_v4  ;;  %10040 = vmatprep.subr.mxu0 %v11268_v0 }
   0xe   :  { %9974 = vmatprep.subr.mxu1 %v11268_v0  ;;  %10041 = vmatpush3.msra.mxu0 %v11356_v7 }
   0xf   :  { %9975 = vmatpush3.msra.mxu1 %v11356_v7  ;;  %10042 = vmatprep.subr.mxu0 %v11268_v0 }
  0x10   :  { %9976 = vmatprep.subr.mxu1 %v11268_v0  ;;  %10043 = vmatpush3.msra.mxu0 %v11364_v8 }
  0x11   :  { %9977 = vmatpush3.msra.mxu1 %v11364_v8  ;;  %10058 = vmatprep.subr.mxu0 %v11268_v0 }
  0x12   :  { %9981 = vmatprep.subr.mxu1 %v11268_v0  ;;  %9917 = vmatprep.mubr.msk.f32.mxu0 %vm71_vm1, %v34_v44 }
  0x13   :  { %9918 = vmatmul.mubr.msk.f32.gmra.mxu0 %vm71_vm1, %v35_v45 }
  0xc6   :  { %v9916_v9 = vpop.f32.mrf.mxu0 }
  0xc7   :  { %v234_v30 = vadd.f32 %v9916_v9, %v11393_v10 }
  0xc8   :  { %v228_v11 = vpop.f32.mrf.mxu0 }
  0xc9   :  { %v229_v12 = vadd.f32 %v11393_v10, %v228_v11 }
  0xca   :  { %v482_v13 = vpop.f32.mrf.mxu1 }
  0xcb   :  { %v486_v14 = vadd.f32 %v482_v13, %v229_v12 }
  0xcc   :  { %v9969_v15 = vpop.f32.mrf.mxu1 }
  0xcd   :  { %10769 = vtanh.f32 %v486_v14  ;;  %v9276_v17 = vmul.f32 -1.442695, %v486_v14 }
  0xcf   :  { %10771 = vpow2.f32 %v9276_v17 }
  0xd3   :  { %v9919_v50 = vpop.f32.mrf.mxu0 }
  0xd4   :  { %v244_v12 = vadd.f32 %v9919_v50, %v11393_v10 }
  0xd5   :  { %v238_v51 = vpop.f32.mrf.mxu0 }
  0xd6   :  { %v239_v52 = vadd.f32 %v11393_v10, %v238_v51 }
  0xda   :  { %v10770_v16 = vpop.eup %10769 }
  0xdb   :  { %496 = vrot.lane.b32.xlu0 %v10770_v16, %s11270_s26 }
  0xdc   :  { %v10772_v18 = vpop.eup %10771 }
  0xdd   :  { %v490_v19 = vadd.f32 1.0, %v10772_v18 }
  0xdf   :  { %10773 = vrcp.f32 %v490_v19 }
  0xec   :  { %v10774_v20 = vpop.eup %10773 }
  0xed   :  { %v494_v23 = vmul.f32 0.0, %v10774_v20 }
 0x14d   :  { %v497_v21 = vpop.permute.xlu0 %496 }
 0x14e   :  { %v499_v22 = vmul.f32 %v10774_v20, %v497_v21 }
 0x150   :  { %501 = vrot.lane.b32.xlu0 %v499_v22, %s11271_s27 }
 0x1c2   :  { %v502_v24 = vpop.permute.xlu0 %501 }
 0x1c3   :  { %v504_v25 = vadd.f32 %v502_v24, %v494_v23 }
 0x1c5   :  { %10775 = vtanh.f32 %v504_v25 }
 0x1d2   :  { %v10776_v26 = vpop.eup %10775 }
 0x1d3   :  { %507 = vrot.lane.b32.xlu1 %v10776_v26, %s11270_s26  ;;  %v36_v26 = vld [vmem:[%s13018_s0 + $0x20] sm:$0xff] }
 0x1d4   :  { %9920 = vmatprep.mubr.msk.f32.mxu0 %vm71_vm1, %v36_v26 }
 0x245   :  { %v508_v27 = vpop.permute.xlu1 %507 }
 0x246   :  { %v510_v28 = vmul.f32 %v10774_v20, %v508_v27  ;;  %v37_v27 = vld [vmem:[%s13018_s0 + $0x28] sm:$0xff] }
 0x247   :  { %9921 = vmatmul.mubr.msk.f32.gmra.mxu0 %vm71_vm1, %v37_v27 }
 0x248   :  { %512 = vrot.lane.b32.xlu1 %v510_v28, %s11271_s27 }
 0x2ba   :  { %v513_v29 = vpop.permute.xlu1 %512 }
 0x2bb   :  { %515 = vst.msk [vmem:[#allocation4] sm:$0xff] %vm412_vm2, %v513_v29  ;;  %9979 = vmatmul.mubr.msk.f32.vlgmr.msra.gmra.mxu1 %vm412_vm2, %v513_v29 }
 0x2bc   :  { %9982 = vmatpush3.msra.mxu1 %v11332_v2  ;;  %9989 = vmatprep.mubr.msk.f32.mxu1 %vm11269_vm0, %v11268_v0 }
 0x2bd   :  { %9983 = vmatprep.subr.mxu1 %v11268_v0 }
 0x2be   :  { %9984 = vmatpush3.msra.mxu1 %v11343_v4 }
 0x2bf   :  { %9985 = vmatprep.subr.mxu1 %v11268_v0 }
 0x2c0   :  { %9986 = vmatpush3.msra.mxu1 %v11356_v7 }
 0x2c1   :  { %9987 = vmatprep.subr.mxu1 %v11268_v0 }
 0x2c2   :  { %9988 = vmatpush3.msra.mxu1 %v11364_v8 }
 0x2c3   :  { %9992 = vmatprep.subr.mxu1 %v11268_v0 }
 0x37b   :  { %v586_v31 = vpop.f32.mrf.mxu1 }
 0x37c   :  { %v590_v32 = vadd.f32 %v586_v31, %v234_v30 }
 0x37d   :  { %v9980_v33 = vpop.f32.mrf.mxu1 }
 0x37e   :  { %10777 = vtanh.f32 %v590_v32  ;;  %v9278_v35 = vmul.f32 -1.442695, %v590_v32  ;;  %v9922_v32 = vpop.f32.mrf.mxu0 }
 0x380   :  { %10779 = vpow2.f32 %v9278_v35  ;;  %v248_v33 = vpop.f32.mrf.mxu0 }
 0x38b   :  { %v10778_v34 = vpop.eup %10777 }
 0x38c   :  { %600 = vrot.lane.b32.xlu0 %v10778_v34, %s11270_s26  ;;  %v249_v34 = vadd.f32 %v11393_v10, %v248_v33  ;;  %v43_v33 = vld [vmem:[%s13018_s0 + $0x58] sm:$0xff] }
 0x38d   :  { %v10780_v36 = vpop.eup %10779 }
 0x38e   :  { %v594_v37 = vadd.f32 1.0, %v10780_v36 }
 0x390   :  { %10781 = vrcp.f32 %v594_v37 }
 0x39d   :  { %v10782_v38 = vpop.eup %10781 }
 0x39e   :  { %v598_v41 = vmul.f32 %v10782_v38, %v504_v25 }
 0x3fe   :  { %v601_v39 = vpop.permute.xlu0 %600 }
 0x3ff   :  { %v603_v40 = vmul.f32 %v10782_v38, %v601_v39 }
 0x401   :  { %605 = vrot.lane.b32.xlu1 %v603_v40, %s11271_s27 }
 0x473   :  { %v606_v42 = vpop.permute.xlu1 %605 }
 0x474   :  { %v608_v43 = vadd.f32 %v606_v42, %v598_v41 }
 0x476   :  { %10783 = vtanh.f32 %v608_v43 }
 0x483   :  { %v10784_v46 = vpop.eup %10783 }
 0x484   :  { %611 = vrot.lane.b32.xlu0 %v10784_v46, %s11270_s26 }
 0x4f6   :  { %v612_v47 = vpop.permute.xlu0 %611 }
 0x4f7   :  { %v614_v48 = vmul.f32 %v10782_v38, %v612_v47 }
 0x4f9   :  { %616 = vrot.lane.b32.xlu1 %v614_v48, %s11271_s27 }
 0x56b   :  { %v617_v49 = vpop.permute.xlu1 %616 }
 0x56c   :  { %620 = vst.msk [vmem:[#allocation4 + $0x8] sm:$0xff] %vm412_vm2, %v617_v49  ;;  %9990 = vmatmul.mubr.msk.f32.vlgmr.msra.gmra.mxu1 %vm412_vm2, %v617_v49 }
 0x56d   :  { %9993 = vmatpush3.msra.mxu1 %v11332_v2  ;;  %10000 = vmatprep.mubr.msk.f32.mxu1 %vm11269_vm0, %v11268_v0 }
 0x56e   :  { %9994 = vmatprep.subr.mxu1 %v11268_v0 }
 0x56f   :  { %9995 = vmatpush3.msra.mxu1 %v11343_v4 }
 0x570   :  { %9996 = vmatprep.subr.mxu1 %v11268_v0 }
 0x571   :  { %9997 = vmatpush3.msra.mxu1 %v11356_v7 }
 0x572   :  { %9998 = vmatprep.subr.mxu1 %v11268_v0 }
 0x573   :  { %9999 = vmatpush3.msra.mxu1 %v11364_v8 }
 0x574   :  { %10003 = vmatprep.subr.mxu1 %v11268_v0 }
 0x62c   :  { %v691_v53 = vpop.f32.mrf.mxu1 }
 0x62d   :  { %v695_v54 = vadd.f32 %v691_v53, %v239_v52  ;;  %v254_v52 = vadd.f32 %v9922_v32, %v11393_v10  ;;  %v42_v32 = vld [vmem:[%s13018_s0 + $0x50] sm:$0xff] }
 0x62e   :  { %v9991_v55 = vpop.f32.mrf.mxu1 }
 0x62f   :  { %10785 = vtanh.f32 %v695_v54  ;;  %v9280_v57 = vmul.f32 -1.442695, %v695_v54 }
 0x631   :  { %10787 = vpow2.f32 %v9280_v57 }
 0x63c   :  { %v10786_v56 = vpop.eup %10785 }
 0x63d   :  { %705 = vrot.lane.b32.xlu0 %v10786_v56, %s11270_s26 }
 0x63e   :  { %v10788_v58 = vpop.eup %10787 }
 0x63f   :  { %v699_v59 = vadd.f32 1.0, %v10788_v58 }
 0x641   :  { %10789 = vrcp.f32 %v699_v59 }
 0x64e   :  { %v10790_v60 = vpop.eup %10789 }
 0x64f   :  { %v703_v63 = vmul.f32 %v10790_v60, %v608_v43 }
 0x6af   :  { %v706_v61 = vpop.permute.xlu0 %705 }
 0x6b0   :  { %v708_v62 = vmul.f32 %v10790_v60, %v706_v61 }
 0x6b2   :  { %710 = vrot.lane.b32.xlu1 %v708_v62, %s11271_s27 }
 0x724   :  { %v711_v1 = vpop.permute.xlu1 %710 }
 0x725   :  { %v713_v3 = vadd.f32 %v711_v1, %v703_v63 }
 0x727   :  { %10791 = vtanh.f32 %v713_v3 }
 0x734   :  { %v10792_v5 = vpop.eup %10791 }
 0x735   :  { %716 = vrot.lane.b32.xlu0 %v10792_v5, %s11270_s26  ;;  %v38_v5 = vld [vmem:[%s13018_s0 + $0x30] sm:$0xff] }
 0x736   :  { %9923 = vmatprep.mubr.msk.f32.mxu0 %vm71_vm1, %v38_v5 }
 0x7a7   :  { %v717_v6 = vpop.permute.xlu0 %716 }
 0x7a8   :  { %v719_v9 = vmul.f32 %v10790_v60, %v717_v6  ;;  %v39_v6 = vld [vmem:[%s13018_s0 + $0x38] sm:$0xff] }
 0x7a9   :  { %9924 = vmatmul.mubr.msk.f32.gmra.mxu0 %vm71_vm1, %v39_v6 }
 0x7aa   :  { %721 = vrot.lane.b32.xlu1 %v719_v9, %s11271_s27 }
 0x81c   :  { %v722_v11 = vpop.permute.xlu1 %721 }
 0x81d   :  { %725 = vst.msk [vmem:[#allocation4 + $0x10] sm:$0xff] %vm412_vm2, %v722_v11  ;;  %10001 = vmatmul.mubr.msk.f32.vlgmr.msra.gmra.mxu1 %vm412_vm2, %v722_v11 }
 0x81e   :  { %10004 = vmatpush3.msra.mxu1 %v11332_v2  ;;  %10011 = vmatprep.mubr.msk.f32.mxu1 %vm11269_vm0, %v11268_v0 }
 0x81f   :  { %10005 = vmatprep.subr.mxu1 %v11268_v0 }
 0x820   :  { %10006 = vmatpush3.msra.mxu1 %v11343_v4 }
 0x821   :  { %10007 = vmatprep.subr.mxu1 %v11268_v0 }
 0x822   :  { %10008 = vmatpush3.msra.mxu1 %v11356_v7 }
 0x823   :  { %10009 = vmatprep.subr.mxu1 %v11268_v0 }
 0x824   :  { %10010 = vmatpush3.msra.mxu1 %v11364_v8 }
 0x825   :  { %10014 = vmatprep.subr.mxu1 %v11268_v0 }
 0x8dd   :  { %v796_v13 = vpop.f32.mrf.mxu1 }
 0x8de   :  { %v800_v14 = vadd.f32 %v796_v13, %v244_v12 }
 0x8df   :  { %v10002_v15 = vpop.f32.mrf.mxu1 }
 0x8e0   :  { %10793 = vtanh.f32 %v800_v14  ;;  %v9282_v17 = vmul.f32 -1.442695, %v800_v14  ;;  %v11521_v14 = vpop.f32.mrf.mxu0 }
 0x8e2   :  { %10795 = vpow2.f32 %v9282_v17  ;;  %v258_v15 = vpop.f32.mrf.mxu0 }
 0x8ed   :  { %v10794_v16 = vpop.eup %10793 }
 0x8ee   :  { %810 = vrot.lane.b32.xlu0 %v10794_v16, %s11270_s26  ;;  %v259_v16 = vadd.f32 %v11393_v10, %v258_v15 }
 0x8ef   :  { %v10796_v18 = vpop.eup %10795 }
 0x8f0   :  { %v804_v19 = vadd.f32 1.0, %v10796_v18 }
 0x8f2   :  { %10797 = vrcp.f32 %v804_v19 }
 0x8ff   :  { %v10798_v20 = vpop.eup %10797 }
 0x900   :  { %v808_v23 = vmul.f32 %v10798_v20, %v713_v3 }
 0x960   :  { %v811_v21 = vpop.permute.xlu0 %810 }
 0x961   :  { %v813_v22 = vmul.f32 %v10798_v20, %v811_v21 }
 0x963   :  { %815 = vrot.lane.b32.xlu1 %v813_v22, %s11271_s27 }
 0x9d5   :  { %v816_v24 = vpop.permute.xlu1 %815 }
 0x9d6   :  { %v818_v25 = vadd.f32 %v816_v24, %v808_v23 }
 0x9d8   :  { %10799 = vtanh.f32 %v818_v25 }
 0x9e5   :  { %v10800_v28 = vpop.eup %10799 }
 0x9e6   :  { %821 = vrot.lane.b32.xlu0 %v10800_v28, %s11270_s26 }
 0xa58   :  { %v822_v29 = vpop.permute.xlu0 %821 }
 0xa59   :  { %v824_v30 = vmul.f32 %v10798_v20, %v822_v29 }
 0xa5b   :  { %826 = vrot.lane.b32.xlu1 %v824_v30, %s11271_s27  ;;  %v40_v30 = vld [vmem:[%s13018_s0 + $0x40] sm:$0xff] }
 0xa5c   :  { %9926 = vmatprep.mubr.msk.f32.mxu0 %vm71_vm1, %v40_v30 }
 0xacd   :  { %v827_v31 = vpop.permute.xlu1 %826 }
 0xace   :  { %830 = vst.msk [vmem:[#allocation4 + $0x18] sm:$0xff] %vm412_vm2, %v827_v31  ;;  %10012 = vmatmul.mubr.msk.f32.vlgmr.msra.gmra.mxu1 %vm412_vm2, %v827_v31  ;;  %v41_v31 = vld [vmem:[%s13018_s0 + $0x48] sm:$0xff] }
 0xacf   :  { %10015 = vmatpush3.msra.mxu1 %v11332_v2  ;;  %10022 = vmatprep.mubr.msk.f32.mxu1 %vm11269_vm0, %v11268_v0 }
 0xad0   :  { %10016 = vmatprep.subr.mxu1 %v11268_v0  ;;  %9927 = vmatmul.mubr.msk.f32.gmra.mxu0 %vm71_vm1, %v41_v31 }
 0xad1   :  { %10017 = vmatpush3.msra.mxu1 %v11343_v4  ;;  %9929 = vmatprep.mubr.msk.f32.mxu0 %vm71_vm1, %v42_v32 }
 0xad2   :  { %10018 = vmatprep.subr.mxu1 %v11268_v0 }
 0xad3   :  { %10019 = vmatpush3.msra.mxu1 %v11356_v7 }
 0xad4   :  { %10020 = vmatprep.subr.mxu1 %v11268_v0  ;;  %9930 = vmatmul.mubr.msk.f32.gmra.mxu0 %vm71_vm1, %v43_v33 }
 0xad5   :  { %10021 = vmatpush3.msra.mxu1 %v11364_v8 }
 0xad6   :  { %10025 = vmatprep.subr.mxu1 %v11268_v0 }
 0xb8e   :  { %v901_v35 = vpop.f32.mrf.mxu1 }
 0xb8f   :  { %v905_v36 = vadd.f32 %v901_v35, %v249_v34  ;;  %v44_v34 = vld [vmem:[%s13018_s0 + $0x60] sm:$0xff]  ;;  %v45_v35 = vld [vmem:[%s13018_s0 + $0x68] sm:$0xff] }
 0xb90   :  { %v10013_v37 = vpop.f32.mrf.mxu1  ;;  %9932 = vmatprep.mubr.msk.f32.mxu0 %vm71_vm1, %v44_v34 }
 0xb91   :  { %10801 = vtanh.f32 %v905_v36  ;;  %v9284_v39 = vmul.f32 -1.442695, %v905_v36  ;;  %v46_v36 = vld [vmem:[%s13018_s0 + $0x70] sm:$0xff]  ;;  %9933 = vmatmul.mubr.msk.f32.gmra.mxu0 %vm71_vm1, %v45_v35 }
 0xb92   :  { %9935 = vmatprep.mubr.msk.f32.mxu0 %vm71_vm1, %v46_v36 }
 0xb93   :  { %10803 = vpow2.f32 %v9284_v39  ;;  %v48_v39 = vld [vmem:[%s13018_s0 + $0x80] sm:$0xff] }
 0xb9e   :  { %v10802_v38 = vpop.eup %10801 }
 0xb9f   :  { %915 = vrot.lane.b32.xlu0 %v10802_v38, %s11270_s26  ;;  %v47_v38 = vld [vmem:[%s13018_s0 + $0x78] sm:$0xff] }
 0xba0   :  { %v10804_v40 = vpop.eup %10803  ;;  %9936 = vmatmul.mubr.msk.f32.gmra.mxu0 %vm71_vm1, %v47_v38 }
 0xba1   :  { %v909_v41 = vadd.f32 1.0, %v10804_v40  ;;  %9938 = vmatprep.mubr.msk.f32.mxu0 %vm71_vm1, %v48_v39  ;;  %v49_v40 = vld [vmem:[%s13018_s0 + $0x88] sm:$0xff] }
 0xba3   :  { %10805 = vrcp.f32 %v909_v41  ;;  %v50_v41 = vld [vmem:[%s13018_s0 + $0x90] sm:$0xff] }
 0xba4   :  { %9939 = vmatmul.mubr.msk.f32.gmra.mxu0 %vm71_vm1, %v49_v40 }
 0xba5   :  { %9941 = vmatprep.mubr.msk.f32.mxu0 %vm71_vm1, %v50_v41 }
 0xbb0   :  { %v10806_v42 = vpop.eup %10805 }
 0xbb1   :  { %v913_v45 = vmul.f32 %v10806_v42, %v818_v25 }
 0xc11   :  { %v916_v43 = vpop.permute.xlu0 %915 }
 0xc12   :  { %v918_v44 = vmul.f32 %v10806_v42, %v916_v43  ;;  %v52_v43 = vld [vmem:[%s13018_s0 + $0xa0] sm:$0xff] }
 0xc14   :  { %920 = vrot.lane.b32.xlu1 %v918_v44, %s11271_s27  ;;  %v53_v44 = vld [vmem:[%s13018_s0 + $0xa8] sm:$0xff] }
 0xc86   :  { %v921_v46 = vpop.permute.xlu1 %920 }
 0xc87   :  { %v923_v47 = vadd.f32 %v921_v46, %v913_v45  ;;  %v54_v45 = vld [vmem:[%s13018_s0 + $0xb0] sm:$0xff]  ;;  %v55_v46 = vld [vmem:[%s13018_s0 + $0xb8] sm:$0xff] }
 0xc89   :  { %10807 = vtanh.f32 %v923_v47 }
 0xc96   :  { %v10808_v48 = vpop.eup %10807 }
 0xc97   :  { %926 = vrot.lane.b32.xlu0 %v10808_v48, %s11270_s26  ;;  %v57_v48 = vld [vmem:[%s13018_s0 + $0xc8] sm:$0xff] }
 0xd09   :  { %v927_v49 = vpop.permute.xlu0 %926 }
 0xd0a   :  { %v929_v50 = vmul.f32 %v10806_v42, %v927_v49  ;;  %v51_v42 = vld [vmem:[%s13018_s0 + $0x98] sm:$0xff]  ;;  %v58_v49 = vld [vmem:[%s13018_s0 + $0xd0] sm:$0xff] }
 0xd0b   :  { %9942 = vmatmul.mubr.msk.f32.gmra.mxu0 %vm71_vm1, %v51_v42 }
 0xd0c   :  { %931 = vrot.lane.b32.xlu1 %v929_v50, %s11271_s27  ;;  %9944 = vmatprep.mubr.msk.f32.mxu0 %vm71_vm1, %v52_v43  ;;  %v59_v50 = vld [vmem:[%s13018_s0 + $0xd8] sm:$0xff] }
 0xd0f   :  { %9945 = vmatmul.mubr.msk.f32.gmra.mxu0 %vm71_vm1, %v53_v44 }
 0xd10   :  { %9947 = vmatprep.mubr.msk.f32.mxu0 %vm71_vm1, %v54_v45 }
 0xd13   :  { %9948 = vmatmul.mubr.msk.f32.gmra.mxu0 %vm71_vm1, %v55_v46 }
 0xd7e   :  { %v932_v51 = vpop.permute.xlu1 %931 }
 0xd7f   :  { %935 = vst.msk [vmem:[#allocation4 + $0x20] sm:$0xff] %vm412_vm2, %v932_v51  ;;  %10023 = vmatmul.mubr.msk.f32.vlgmr.msra.gmra.mxu1 %vm412_vm2, %v932_v51  ;;  %v60_v51 = vld [vmem:[%s13018_s0 + $0xe0] sm:$0xff] }
 0xd80   :  { %10026 = vmatpush3.msra.mxu1 %v11332_v2  ;;  %10033 = vmatprep.mubr.msk.f32.mxu1 %vm11269_vm0, %v11268_v0 }
 0xd81   :  { %10027 = vmatprep.subr.mxu1 %v11268_v0 }
 0xd82   :  { %10028 = vmatpush3.msra.mxu1 %v11343_v4 }
 0xd83   :  { %10029 = vmatprep.subr.mxu1 %v11268_v0 }
 0xd84   :  { %10030 = vmatpush3.msra.mxu1 %v11356_v7 }
 0xd85   :  { %10031 = vmatprep.subr.mxu1 %v11268_v0 }
 0xd86   :  { %10032 = vmatpush3.msra.mxu1 %v11364_v8 }
 0xd87   :  { %10047 = vmatprep.subr.mxu1 %v11268_v0 }
 0xe3f   :  { %v1006_v53 = vpop.f32.mrf.mxu1 }
 0xe40   :  { %v1010_v54 = vadd.f32 %v1006_v53, %v254_v52  ;;  %v61_v52 = vld [vmem:[%s13018_s0 + $0xe8] sm:$0xff] }
 0xe41   :  { %v10024_v55 = vpop.f32.mrf.mxu1 }
 0xe42   :  { %10809 = vtanh.f32 %v1010_v54  ;;  %v9286_v57 = vmul.f32 -1.442695, %v1010_v54 }
 0xe44   :  { %10811 = vpow2.f32 %v9286_v57 }
 0xe4f   :  { %v10810_v56 = vpop.eup %10809 }
 0xe50   :  { %1020 = vrot.lane.b32.xlu0 %v10810_v56, %s11270_s26  ;;  %v11633_v56 = vpop.f32.mrf.mxu0 }
 0xe51   :  { %v10812_v58 = vpop.eup %10811 }
 0xe52   :  { %v1014_v59 = vadd.f32 1.0, %v10812_v58  ;;  %v268_v57 = vpop.f32.mrf.mxu0 }
 0xe54   :  { %10813 = vrcp.f32 %v1014_v59  ;;  %v11635_v58 = vpop.f32.mrf.mxu0 }
 0xe56   :  { %v11637_v59 = vpop.f32.mrf.mxu0 }
 0xe61   :  { %v10814_v60 = vpop.eup %10813 }
 0xe62   :  { %v1018_v63 = vmul.f32 %v10814_v60, %v923_v47  ;;  %v56_v47 = vld [vmem:[%s13018_s0 + $0xc0] sm:$0xff] }
 0xe63   :  { %9950 = vmatprep.mubr.msk.f32.mxu0 %vm71_vm1, %v56_v47 }
 0xe64   :  { %9951 = vmatmul.mubr.msk.f32.gmra.mxu0 %vm71_vm1, %v57_v48 }
 0xe65   :  { %9953 = vmatprep.mubr.msk.f32.mxu0 %vm71_vm1, %v58_v49 }
 0xe68   :  { %9954 = vmatmul.mubr.msk.f32.gmra.mxu0 %vm71_vm1, %v59_v50 }
 0xe69   :  { %9956 = vmatprep.mubr.msk.f32.mxu0 %vm71_vm1, %v60_v51 }
 0xe6c   :  { %9957 = vmatmul.mubr.msk.f32.gmra.mxu0 %vm71_vm1, %v61_v52 }
 0xe6d   :  { %10044 = vmatprep.mubr.msk.f32.mxu0 %vm11269_vm0, %v11268_v0 }
 0xec2   :  { %v1021_v61 = vpop.permute.xlu0 %1020 }
 0xec3   :  { %v1023_v62 = vmul.f32 %v10814_v60, %v1021_v61 }
 0xec5   :  { %1025 = vrot.lane.b32.xlu1 %v1023_v62, %s11271_s27 }
 0xf37   :  { %v1026_v1 = vpop.permute.xlu1 %1025 }
 0xf38   :  { %v1028_v3 = vadd.f32 %v1026_v1, %v1018_v63 }
 0xf3a   :  { %10815 = vtanh.f32 %v1028_v3 }
 0xf47   :  { %v10816_v9 = vpop.eup %10815 }
 0xf48   :  { %1031 = vrot.lane.b32.xlu0 %v10816_v9, %s11270_s26 }
 0xfba   :  { %v1032_v11 = vpop.permute.xlu0 %1031 }
 0xfbb   :  { %v1034_v12 = vmul.f32 %v10814_v60, %v1032_v11  ;;  %v11639_v60 = vpop.f32.mrf.mxu0 }
 0xfbd   :  { %1036 = vrot.lane.b32.xlu1 %v1034_v12, %s11271_s27  ;;  %v11641_v61 = vpop.f32.mrf.mxu0 }
 0xfbf   :  { %v11643_v62 = vpop.f32.mrf.mxu0 }
 0xfc1   :  { %v11645_v63 = vpop.f32.mrf.mxu0 }
 0xfc3   :  { %v11647_v1 = vpop.f32.mrf.mxu0 }
0x102f   :  { %v1037_v13 = vpop.permute.xlu1 %1036 }
0x1030   :  { %1040 = vst.msk [vmem:[#allocation4 + $0x28] sm:$0xff] %vm412_vm2, %v1037_v13  ;;  %10034 = vmatmul.mubr.msk.f32.vlgmr.msra.gmra.mxu1 %vm412_vm2, %v1037_v13 }
0x1031   :  { %10048 = vmatpush3.msra.mxu1 %v11332_v2  ;;  %10055 = vmatprep.mubr.msk.f32.mxu1 %vm11269_vm0, %v11268_v0 }
0x1032   :  { %10049 = vmatprep.subr.mxu1 %v11268_v0 }
0x1033   :  { %10050 = vmatpush3.msra.mxu1 %v11343_v4 }
0x1034   :  { %10051 = vmatprep.subr.mxu1 %v11268_v0 }
0x1035   :  { %10052 = vmatpush3.msra.mxu1 %v11356_v7 }
0x1036   :  { %10053 = vmatprep.subr.mxu1 %v11268_v0 }
0x1037   :  { %10054 = vmatpush3.msra.mxu1 %v11364_v8 }
0x1038   :  { %10069 = vmatprep.subr.mxu1 %v11268_v0 }
0x10f0   :  { %v1111_v17 = vpop.f32.mrf.mxu1 }
0x10f1   :  { %v1115_v18 = vadd.f32 %v1111_v17, %v259_v16 }
0x10f2   :  { %v10035_v19 = vpop.f32.mrf.mxu1 }
0x10f3   :  { %10817 = vtanh.f32 %v1115_v18  ;;  %v9288_v21 = vmul.f32 -1.442695, %v1115_v18 }
0x10f5   :  { %10819 = vpow2.f32 %v9288_v21  ;;  %v264_v21 = vadd.f32 %v11521_v14, %v11393_v10 }
0x1100   :  { %v10818_v20 = vpop.eup %10817 }
0x1101   :  { %1125 = vrot.lane.b32.xlu0 %v10818_v20, %s11270_s26 }
0x1102   :  { %v10820_v22 = vpop.eup %10819 }
0x1103   :  { %v1119_v23 = vadd.f32 1.0, %v10820_v22 }
0x1105   :  { %10821 = vrcp.f32 %v1119_v23 }
0x1112   :  { %v10822_v24 = vpop.eup %10821 }
0x1113   :  { %v1123_v27 = vmul.f32 %v10822_v24, %v1028_v3  ;;  %v11649_v3 = vpop.f32.mrf.mxu0 }
0x1115   :  { %v11651_v5 = vpop.f32.mrf.mxu0 }
0x1117   :  { %v11653_v6 = vpop.f32.mrf.mxu0 }
0x1119   :  { %v11655_v9 = vpop.f32.mrf.mxu0 }
0x111b   :  { %v11657_v11 = vpop.f32.mrf.mxu0 }
0x111d   :  { %v11659_v12 = vpop.f32.mrf.mxu0 }
0x111f   :  { %v11661_v13 = vpop.f32.mrf.mxu0 }
0x1121   :  { %v11663_v15 = vpop.f32.mrf.mxu0 }
0x1123   :  { %v11665_v16 = vpop.f32.mrf.mxu0 }
0x1125   :  { %v11667_v17 = vpop.f32.mrf.mxu0 }
0x1127   :  { %v11669_v18 = vpop.f32.mrf.mxu0 }
0x1129   :  { %v11671_v19 = vpop.f32.mrf.mxu0 }
0x112b   :  { %v11673_v20 = vpop.f32.mrf.mxu0 }
0x1173   :  { %v1126_v25 = vpop.permute.xlu0 %1125 }
0x1174   :  { %v1128_v26 = vmul.f32 %v10822_v24, %v1126_v25 }
0x1176   :  { %1130 = vrot.lane.b32.xlu1 %v1128_v26, %s11271_s27 }
0x11e8   :  { %v1131_v28 = vpop.permute.xlu1 %1130 }
0x11e9   :  { %v11526_v29 = vadd.f32 %v1131_v28, %v1123_v27 }
0x11eb   :  { %10823 = vtanh.f32 %v11526_v29 }
0x11f8   :  { %v10824_v37 = vpop.eup %10823 }
0x11f9   :  { %1136 = vrot.lane.b32.xlu0 %v10824_v37, %s11270_s26 }
0x126b   :  { %v1137_v53 = vpop.permute.xlu0 %1136 }
0x126c   :  { %v1139_v54 = vmul.f32 %v10822_v24, %v1137_v53 }
0x126e   :  { %1141 = vrot.lane.b32.xlu1 %v1139_v54, %s11271_s27 }
0x12e0   :  { %v1142_v55 = vpop.permute.xlu1 %1141 }
0x12e1   :  { %1145 = vst.msk [vmem:[#allocation4 + $0x30] sm:$0xff] %vm412_vm2, %v1142_v55  ;;  %10045 = vmatmul.mubr.msk.f32.vlgmr.msra.gmra.mxu0 %vm412_vm2, %v1142_v55 }
0x12e2   :  { %10059 = vmatpush3.msra.mxu0 %v11332_v2  ;;  %10066 = vmatprep.mubr.msk.f32.mxu0 %vm11269_vm0, %v11268_v0 }
0x12e3   :  { %10060 = vmatprep.subr.mxu0 %v11268_v0 }
0x12e4   :  { %10061 = vmatpush3.msra.mxu0 %v11343_v4 }
0x12e5   :  { %10062 = vmatprep.subr.mxu0 %v11268_v0 }
0x12e6   :  { %10063 = vmatpush3.msra.mxu0 %v11356_v7 }
0x12e7   :  { %10064 = vmatprep.subr.mxu0 %v11268_v0 }
0x12e8   :  { %10065 = vmatpush3.msra.mxu0 %v11364_v8 }
0x12e9   :  { %10080 = vmatprep.subr.mxu0 %v11268_v0 }
0x13a1   :  { %v1216_v22 = vpop.f32.mrf.mxu0 }
0x13a2   :  { %v1220_v23 = vadd.f32 %v1216_v22, %v264_v21 }
0x13a3   :  { %v10046_v24 = vpop.f32.mrf.mxu0 }
0x13a4   :  { %10825 = vtanh.f32 %v1220_v23  ;;  %v9290_v26 = vmul.f32 -1.442695, %v1220_v23 }
0x13a6   :  { %10827 = vpow2.f32 %v9290_v26 }
0x13b1   :  { %v10826_v25 = vpop.eup %10825 }
0x13b2   :  { %1230 = vrot.lane.b32.xlu0 %v10826_v25, %s11270_s26 }
0x13b3   :  { %v10828_v27 = vpop.eup %10827 }
0x13b4   :  { %v1224_v28 = vadd.f32 1.0, %v10828_v27 }
0x13b6   :  { %10829 = vrcp.f32 %v1224_v28 }
0x13c3   :  { %v10830_v30 = vpop.eup %10829 }
0x13c4   :  { %v1228_v33 = vmul.f32 %v10830_v30, %v11526_v29  ;;  %v269_v29 = vadd.f32 %v11393_v10, %v268_v57  ;;  %v274_v57 = vadd.f32 %v11633_v56, %v11393_v10 }
0x1424   :  { %v1231_v31 = vpop.permute.xlu0 %1230 }
0x1425   :  { %v1233_v32 = vmul.f32 %v10830_v30, %v1231_v31 }
0x1427   :  { %1235 = vrot.lane.b32.xlu1 %v1233_v32, %s11271_s27 }
0x1499   :  { %v1236_v14 = vpop.permute.xlu1 %1235 }
0x149a   :  { %v1238_v34 = vadd.f32 %v1236_v14, %v1228_v33 }
0x149c   :  { %10831 = vtanh.f32 %v1238_v34 }
0x14a9   :  { %v10832_v35 = vpop.eup %10831 }
0x14aa   :  { %1241 = vrot.lane.b32.xlu0 %v10832_v35, %s11270_s26 }
0x151c   :  { %v1242_v36 = vpop.permute.xlu0 %1241 }
0x151d   :  { %v1244_v37 = vmul.f32 %v10830_v30, %v1242_v36 }
0x151f   :  { %1246 = vrot.lane.b32.xlu1 %v1244_v37, %s11271_s27 }
0x1591   :  { %v1247_v38 = vpop.permute.xlu1 %1246 }
0x1592   :  { %1250 = vst.msk [vmem:[#allocation4 + $0x38] sm:$0xff] %vm412_vm2, %v1247_v38  ;;  %10056 = vmatmul.mubr.msk.f32.vlgmr.msra.gmra.mxu1 %vm412_vm2, %v1247_v38 }
0x1593   :  { %10070 = vmatpush3.msra.mxu1 %v11332_v2  ;;  %10077 = vmatprep.mubr.msk.f32.mxu1 %vm11269_vm0, %v11268_v0 }
0x1594   :  { %10071 = vmatprep.subr.mxu1 %v11268_v0 }
0x1595   :  { %10072 = vmatpush3.msra.mxu1 %v11343_v4 }
0x1596   :  { %10073 = vmatprep.subr.mxu1 %v11268_v0 }
0x1597   :  { %10074 = vmatpush3.msra.mxu1 %v11356_v7 }
0x1598   :  { %10075 = vmatprep.subr.mxu1 %v11268_v0 }
0x1599   :  { %10076 = vmatpush3.msra.mxu1 %v11364_v8 }
0x159a   :  { %10091 = vmatprep.subr.mxu1 %v11268_v0 }
0x1652   :  { %v1321_v39 = vpop.f32.mrf.mxu1 }
0x1653   :  { %v1325_v40 = vadd.f32 %v1321_v39, %v269_v29 }
0x1654   :  { %v10057_v41 = vpop.f32.mrf.mxu1 }
0x1655   :  { %10833 = vtanh.f32 %v1325_v40  ;;  %v9292_v43 = vmul.f32 -1.442695, %v1325_v40 }
0x1657   :  { %10835 = vpow2.f32 %v9292_v43 }
0x1662   :  { %v10834_v42 = vpop.eup %10833 }
0x1663   :  { %1335 = vrot.lane.b32.xlu0 %v10834_v42, %s11270_s26 }
0x1664   :  { %v10836_v44 = vpop.eup %10835 }
0x1665   :  { %v1329_v45 = vadd.f32 1.0, %v10836_v44 }
0x1667   :  { %10837 = vrcp.f32 %v1329_v45 }
0x1674   :  { %v10838_v46 = vpop.eup %10837 }
0x1675   :  { %v1333_v49 = vmul.f32 %v10838_v46, %v1238_v34 }
0x16d5   :  { %v1336_v47 = vpop.permute.xlu0 %1335 }
0x16d6   :  { %v1338_v48 = vmul.f32 %v10838_v46, %v1336_v47 }
0x16d8   :  { %1340 = vrot.lane.b32.xlu1 %v1338_v48, %s11271_s27 }
0x174a   :  { %v1341_v50 = vpop.permute.xlu1 %1340 }
0x174b   :  { %v1343_v51 = vadd.f32 %v1341_v50, %v1333_v49  ;;  %v11740_v49 = vld [vmem:[%s13017_s2 + $0x18] sm:$0xff]  ;;  %v11749_v50 = vld [vmem:[%s13017_s2 + $0x10] sm:$0xff] }
0x174d   :  { %10839 = vtanh.f32 %v1343_v51 }
0x175a   :  { %v10840_v52 = vpop.eup %10839 }
0x175b   :  { %1346 = vrot.lane.b32.xlu0 %v10840_v52, %s11270_s26  ;;  %v11763_v52 = vld [vmem:[%s13017_s2] sm:$0xff] }
0x17cd   :  { %v1347_v53 = vpop.permute.xlu0 %1346 }
0x17ce   :  { %v1349_v54 = vmul.f32 %v10838_v46, %v1347_v53  ;;  %v284_v53 = vadd.f32 %v11635_v58, %v11393_v10 }
0x17d0   :  { %1351 = vrot.lane.b32.xlu1 %v1349_v54, %s11271_s27 }
0x1842   :  { %v1352_v55 = vpop.permute.xlu1 %1351 }
0x1843   :  { %1355 = vst.msk [vmem:[#allocation4 + $0x40] sm:$0xff] %vm412_vm2, %v1352_v55  ;;  %10067 = vmatmul.mubr.msk.f32.vlgmr.msra.gmra.mxu0 %vm412_vm2, %v1352_v55 }
0x1844   :  { %10081 = vmatpush3.msra.mxu0 %v11332_v2  ;;  %10088 = vmatprep.mubr.msk.f32.mxu0 %vm11269_vm0, %v11268_v0 }
0x1845   :  { %10082 = vmatprep.subr.mxu0 %v11268_v0 }
0x1846   :  { %10083 = vmatpush3.msra.mxu0 %v11343_v4 }
0x1847   :  { %10084 = vmatprep.subr.mxu0 %v11268_v0 }
0x1848   :  { %10085 = vmatpush3.msra.mxu0 %v11356_v7 }
0x1849   :  { %10086 = vmatprep.subr.mxu0 %v11268_v0 }
0x184a   :  { %10087 = vmatpush3.msra.mxu0 %v11364_v8 }
0x184b   :  { %10102 = vmatprep.subr.mxu0 %v11268_v0 }
0x1903   :  { %v1426_v21 = vpop.f32.mrf.mxu0 }
0x1904   :  { %v1430_v22 = vadd.f32 %v1426_v21, %v274_v57 }
0x1905   :  { %v10068_v23 = vpop.f32.mrf.mxu0 }
0x1906   :  { %10841 = vtanh.f32 %v1430_v22  ;;  %v9294_v25 = vmul.f32 -1.442695, %v1430_v22 }
0x1908   :  { %10843 = vpow2.f32 %v9294_v25 }
0x1913   :  { %v10842_v24 = vpop.eup %10841 }
0x1914   :  { %1440 = vrot.lane.b32.xlu0 %v10842_v24, %s11270_s26 }
0x1915   :  { %v10844_v26 = vpop.eup %10843 }
0x1916   :  { %v1434_v27 = vadd.f32 1.0, %v10844_v26 }
0x1918   :  { %10845 = vrcp.f32 %v1434_v27 }
0x1925   :  { %v10846_v28 = vpop.eup %10845 }
0x1926   :  { %v1438_v32 = vmul.f32 %v10846_v28, %v1343_v51  ;;  %v11756_v51 = vld [vmem:[%s13017_s2 + $0x8] sm:$0xff] }
0x1986   :  { %v1441_v30 = vpop.permute.xlu0 %1440 }
0x1987   :  { %v1443_v31 = vmul.f32 %v10846_v28, %v1441_v30 }
0x1989   :  { %1445 = vrot.lane.b32.xlu1 %v1443_v31, %s11271_s27 }
0x19fb   :  { %v1446_v33 = vpop.permute.xlu1 %1445 }
0x19fc   :  { %v1448_v56 = vadd.f32 %v1446_v33, %v1438_v32 }
0x19fe   :  { %10847 = vtanh.f32 %v1448_v56 }
0x1a0b   :  { %v10848_v14 = vpop.eup %10847 }
0x1a0c   :  { %1451 = vrot.lane.b32.xlu0 %v10848_v14, %s11270_s26 }
0x1a7e   :  { %v1452_v34 = vpop.permute.xlu0 %1451 }
0x1a7f   :  { %v1454_v35 = vmul.f32 %v10846_v28, %v1452_v34 }
0x1a81   :  { %1456 = vrot.lane.b32.xlu1 %v1454_v35, %s11271_s27 }
0x1af3   :  { %v1457_v36 = vpop.permute.xlu1 %1456 }
0x1af4   :  { %1460 = vst.msk [vmem:[#allocation4 + $0x48] sm:$0xff] %vm412_vm2, %v1457_v36  ;;  %10078 = vmatmul.mubr.msk.f32.vlgmr.msra.gmra.mxu1 %vm412_vm2, %v1457_v36 }
0x1af5   :  { %10092 = vmatpush3.msra.mxu1 %v11332_v2  ;;  %10099 = vmatprep.mubr.msk.f32.mxu1 %vm11269_vm0, %v11268_v0  ;;  %v279_v2 = vadd.f32 %v11393_v10, %v11637_v59 }
0x1af6   :  { %10093 = vmatprep.subr.mxu1 %v11268_v0 }
0x1af7   :  { %10094 = vmatpush3.msra.mxu1 %v11343_v4 }
0x1af8   :  { %10095 = vmatprep.subr.mxu1 %v11268_v0 }
0x1af9   :  { %10096 = vmatpush3.msra.mxu1 %v11356_v7 }
0x1afa   :  { %10097 = vmatprep.subr.mxu1 %v11268_v0 }
0x1afb   :  { %10098 = vmatpush3.msra.mxu1 %v11364_v8 }
0x1afc   :  { %10113 = vmatprep.subr.mxu1 %v11268_v0 }
0x1bb4   :  { %v1531_v37 = vpop.f32.mrf.mxu1 }
0x1bb5   :  { %v1535_v38 = vadd.f32 %v1531_v37, %v279_v2 }
0x1bb6   :  { %v10079_v29 = vpop.f32.mrf.mxu1 }
0x1bb7   :  { %10849 = vtanh.f32 %v1535_v38  ;;  %v9296_v4 = vmul.f32 -1.442695, %v1535_v38 }
0x1bb9   :  { %10851 = vpow2.f32 %v9296_v4 }
0x1bc4   :  { %v10850_v39 = vpop.eup %10849 }
0x1bc5   :  { %1545 = vrot.lane.b32.xlu0 %v10850_v39, %s11270_s26 }
0x1bc6   :  { %v10852_v40 = vpop.eup %10851 }
0x1bc7   :  { %v1539_v7 = vadd.f32 1.0, %v10852_v40 }
0x1bc9   :  { %10853 = vrcp.f32 %v1539_v7 }
0x1bd6   :  { %v10854_v41 = vpop.eup %10853 }
0x1bd7   :  { %v1543_v43 = vmul.f32 %v10854_v41, %v1448_v56  ;;  %v11788_v56 = vld [vmem:[%s13019_s3] ss:$0 sm:$0xff] }
0x1bd8   :  { %v289_v14 = vadd.f32 %v11788_v56, %v11641_v61 }
0x1c37   :  { %v1546_v42 = vpop.permute.xlu0 %1545 }
0x1c38   :  { %v1548_v8 = vmul.f32 %v10854_v41, %v1546_v42 }
0x1c3a   :  { %1550 = vrot.lane.b32.xlu1 %v1548_v8, %s11271_s27 }
0x1cac   :  { %v1551_v44 = vpop.permute.xlu1 %1550 }
0x1cad   :  { %v1553_v59 = vadd.f32 %v1551_v44, %v1543_v43 }
0x1caf   :  { %10855 = vtanh.f32 %v1553_v59 }
0x1cbc   :  { %v10856_v45 = vpop.eup %10855 }
0x1cbd   :  { %1556 = vrot.lane.b32.xlu0 %v10856_v45, %s11270_s26 }
0x1d2f   :  { %v1557_v46 = vpop.permute.xlu0 %1556 }
0x1d30   :  { %v1559_v47 = vmul.f32 %v10854_v41, %v1557_v46 }
0x1d32   :  { %1561 = vrot.lane.b32.xlu1 %v1559_v47, %s11271_s27 }
0x1da4   :  { %v1562_v48 = vpop.permute.xlu1 %1561 }
0x1da5   :  { %1565 = vst.msk [vmem:[#allocation4 + $0x50] sm:$0xff] %vm412_vm2, %v1562_v48  ;;  %10089 = vmatmul.mubr.msk.f32.vlgmr.msra.gmra.mxu0 %vm412_vm2, %v1562_v48 }
0x1da6   :  { %10103 = vmatpush3.msra.mxu0 %v11740_v49  ;;  %10110 = vmatprep.mubr.msk.f32.mxu0 %vm11269_vm0, %v11268_v0 }
0x1da7   :  { %10104 = vmatprep.subr.mxu0 %v11268_v0 }
0x1da8   :  { %10105 = vmatpush3.msra.mxu0 %v11749_v50 }
0x1da9   :  { %10106 = vmatprep.subr.mxu0 %v11268_v0 }
0x1daa   :  { %10107 = vmatpush3.msra.mxu0 %v11756_v51 }
0x1dab   :  { %10108 = vmatprep.subr.mxu0 %v11268_v0 }
0x1dac   :  { %10109 = vmatpush3.msra.mxu0 %v11763_v52 }
0x1dad   :  { %10124 = vmatprep.subr.mxu0 %v11268_v0 }
0x1e65   :  { %v1636_v54 = vpop.f32.mrf.mxu0 }
0x1e66   :  { %v1640_v55 = vadd.f32 %v1636_v54, %v284_v53 }
0x1e67   :  { %v10090_v57 = vpop.f32.mrf.mxu0 }
0x1e68   :  { %10857 = vtanh.f32 %v1640_v55  ;;  %v9298_v22 = vmul.f32 -1.442695, %v1640_v55 }
0x1e6a   :  { %10859 = vpow2.f32 %v9298_v22 }
0x1e75   :  { %v10858_v21 = vpop.eup %10857 }
0x1e76   :  { %1650 = vrot.lane.b32.xlu0 %v10858_v21, %s11270_s26 }
0x1e77   :  { %v10860_v23 = vpop.eup %10859 }
0x1e78   :  { %v1644_v24 = vadd.f32 1.0, %v10860_v23 }
0x1e7a   :  { %10861 = vrcp.f32 %v1644_v24 }
0x1e87   :  { %v10862_v25 = vpop.eup %10861 }
0x1e88   :  { %v1648_v28 = vmul.f32 %v10862_v25, %v1553_v59  ;;  %v294_v59 = vadd.f32 %v11788_v56, %v11639_v60 }
0x1ee8   :  { %v1651_v26 = vpop.permute.xlu0 %1650 }
0x1ee9   :  { %v1653_v27 = vmul.f32 %v10862_v25, %v1651_v26 }
0x1eeb   :  { %1655 = vrot.lane.b32.xlu1 %v1653_v27, %s11271_s27 }
0x1f5d   :  { %v1656_v30 = vpop.permute.xlu1 %1655 }
0x1f5e   :  { %v1658_v10 = vadd.f32 %v1656_v30, %v1648_v28  ;;  %v299_v30 = vadd.f32 %v11788_v56, %v11645_v63 }
0x1f60   :  { %10863 = vtanh.f32 %v1658_v10 }
0x1f6d   :  { %v10864_v58 = vpop.eup %10863 }
0x1f6e   :  { %1661 = vrot.lane.b32.xlu0 %v10864_v58, %s11270_s26 }
0x1fe0   :  { %v1662_v31 = vpop.permute.xlu0 %1661 }
0x1fe1   :  { %v1664_v32 = vmul.f32 %v10862_v25, %v1662_v31 }
0x1fe3   :  { %1666 = vrot.lane.b32.xlu1 %v1664_v32, %s11271_s27 }
0x2055   :  { %v1667_v33 = vpop.permute.xlu1 %1666 }
0x2056   :  { %1670 = vst.msk [vmem:[#allocation4 + $0x58] sm:$0xff] %vm412_vm2, %v1667_v33  ;;  %10100 = vmatmul.mubr.msk.f32.vlgmr.msra.gmra.mxu1 %vm412_vm2, %v1667_v33 }
0x2057   :  { %10114 = vmatpush3.msra.mxu1 %v11740_v49  ;;  %10121 = vmatprep.mubr.msk.f32.mxu1 %vm11269_vm0, %v11268_v0 }
0x2058   :  { %10115 = vmatprep.subr.mxu1 %v11268_v0 }
0x2059   :  { %10116 = vmatpush3.msra.mxu1 %v11749_v50 }
0x205a   :  { %10117 = vmatprep.subr.mxu1 %v11268_v0 }
0x205b   :  { %10118 = vmatpush3.msra.mxu1 %v11756_v51 }
0x205c   :  { %10119 = vmatprep.subr.mxu1 %v11268_v0 }
0x205d   :  { %10120 = vmatpush3.msra.mxu1 %v11763_v52 }
0x205e   :  { %10135 = vmatprep.subr.mxu1 %v11268_v0 }
0x2116   :  { %v1741_v34 = vpop.f32.mrf.mxu1 }
0x2117   :  { %v1745_v35 = vadd.f32 %v1741_v34, %v289_v14 }
0x2118   :  { %v10101_v36 = vpop.f32.mrf.mxu1 }
0x2119   :  { %10865 = vtanh.f32 %v1745_v35  ;;  %v9300_v37 = vmul.f32 -1.442695, %v1745_v35 }
0x211b   :  { %10867 = vpow2.f32 %v9300_v37 }
0x2126   :  { %v10866_v2 = vpop.eup %10865 }
0x2127   :  { %1755 = vrot.lane.b32.xlu0 %v10866_v2, %s11270_s26 }
0x2128   :  { %v10868_v38 = vpop.eup %10867 }
0x2129   :  { %v1749_v29 = vadd.f32 1.0, %v10868_v38 }
0x212b   :  { %10869 = vrcp.f32 %v1749_v29 }
0x2138   :  { %v10870_v39 = vpop.eup %10869 }
0x2139   :  { %v1753_v7 = vmul.f32 %v10870_v39, %v1658_v10 }
0x2199   :  { %v1756_v4 = vpop.permute.xlu0 %1755 }
0x219a   :  { %v1758_v40 = vmul.f32 %v10870_v39, %v1756_v4 }
0x219c   :  { %1760 = vrot.lane.b32.xlu1 %v1758_v40, %s11271_s27 }
0x220e   :  { %v1761_v41 = vpop.permute.xlu1 %1760 }
0x220f   :  { %v1763_v61 = vadd.f32 %v1761_v41, %v1753_v7  ;;  %v304_v7 = vadd.f32 %v11788_v56, %v11643_v62 }
0x2211   :  { %10871 = vtanh.f32 %v1763_v61 }
0x221e   :  { %v10872_v42 = vpop.eup %10871 }
0x221f   :  { %1766 = vrot.lane.b32.xlu0 %v10872_v42, %s11270_s26 }
0x2291   :  { %v1767_v8 = vpop.permute.xlu0 %1766 }
0x2292   :  { %v1769_v43 = vmul.f32 %v10870_v39, %v1767_v8 }
0x2294   :  { %1771 = vrot.lane.b32.xlu1 %v1769_v43, %s11271_s27 }
0x2306   :  { %v1772_v44 = vpop.permute.xlu1 %1771 }
0x2307   :  { %1775 = vst.msk [vmem:[#allocation4 + $0x60] sm:$0xff] %vm412_vm2, %v1772_v44  ;;  %10111 = vmatmul.mubr.msk.f32.vlgmr.msra.gmra.mxu0 %vm412_vm2, %v1772_v44 }
0x2308   :  { %10125 = vmatpush3.msra.mxu0 %v11740_v49  ;;  %10132 = vmatprep.mubr.msk.f32.mxu0 %vm11269_vm0, %v11268_v0 }
0x2309   :  { %10126 = vmatprep.subr.mxu0 %v11268_v0 }
0x230a   :  { %10127 = vmatpush3.msra.mxu0 %v11749_v50 }
0x230b   :  { %10128 = vmatprep.subr.mxu0 %v11268_v0 }
0x230c   :  { %10129 = vmatpush3.msra.mxu0 %v11756_v51 }
0x230d   :  { %10130 = vmatprep.subr.mxu0 %v11268_v0 }
0x230e   :  { %10131 = vmatpush3.msra.mxu0 %v11763_v52 }
0x230f   :  { %10146 = vmatprep.subr.mxu0 %v11268_v0 }
0x23c7   :  { %v1846_v45 = vpop.f32.mrf.mxu0 }
0x23c8   :  { %v1850_v46 = vadd.f32 %v1846_v45, %v294_v59 }
0x23c9   :  { %v10112_v47 = vpop.f32.mrf.mxu0 }
0x23ca   :  { %10873 = vtanh.f32 %v1850_v46  ;;  %v9302_v53 = vmul.f32 -1.442695, %v1850_v46 }
0x23cc   :  { %10875 = vpow2.f32 %v9302_v53 }
0x23d7   :  { %v10874_v48 = vpop.eup %10873 }
0x23d8   :  { %1860 = vrot.lane.b32.xlu0 %v10874_v48, %s11270_s26 }
0x23d9   :  { %v10876_v54 = vpop.eup %10875 }
0x23da   :  { %v1854_v55 = vadd.f32 1.0, %v10876_v54 }
0x23dc   :  { %10877 = vrcp.f32 %v1854_v55 }
0x23e9   :  { %v10878_v57 = vpop.eup %10877 }
0x23ea   :  { %v1858_v23 = vmul.f32 %v10878_v57, %v1763_v61 }
0x244a   :  { %v1861_v21 = vpop.permute.xlu0 %1860 }
0x244b   :  { %v1863_v22 = vmul.f32 %v10878_v57, %v1861_v21 }
0x244d   :  { %1865 = vrot.lane.b32.xlu1 %v1863_v22, %s11271_s27  ;;  %v309_v22 = vadd.f32 %v11788_v56, %v11649_v3 }
0x24bf   :  { %v1866_v24 = vpop.permute.xlu1 %1865 }
0x24c0   :  { %v1868_v60 = vadd.f32 %v1866_v24, %v1858_v23 }
0x24c2   :  { %10879 = vtanh.f32 %v1868_v60 }
0x24cf   :  { %v10880_v25 = vpop.eup %10879 }
0x24d0   :  { %1871 = vrot.lane.b32.xlu0 %v10880_v25, %s11270_s26 }
0x2542   :  { %v1872_v26 = vpop.permute.xlu0 %1871 }
0x2543   :  { %v1874_v27 = vmul.f32 %v10878_v57, %v1872_v26 }
0x2545   :  { %1876 = vrot.lane.b32.xlu1 %v1874_v27, %s11271_s27 }
0x25b7   :  { %v1877_v28 = vpop.permute.xlu1 %1876 }
0x25b8   :  { %1880 = vst.msk [vmem:[#allocation4 + $0x68] sm:$0xff] %vm412_vm2, %v1877_v28  ;;  %10122 = vmatmul.mubr.msk.f32.vlgmr.msra.gmra.mxu1 %vm412_vm2, %v1877_v28 }
0x25b9   :  { %10136 = vmatpush3.msra.mxu1 %v11740_v49  ;;  %10143 = vmatprep.mubr.msk.f32.mxu1 %vm11269_vm0, %v11268_v0 }
0x25ba   :  { %10137 = vmatprep.subr.mxu1 %v11268_v0 }
0x25bb   :  { %10138 = vmatpush3.msra.mxu1 %v11749_v50 }
0x25bc   :  { %10139 = vmatprep.subr.mxu1 %v11268_v0 }
0x25bd   :  { %10140 = vmatpush3.msra.mxu1 %v11756_v51 }
0x25be   :  { %10141 = vmatprep.subr.mxu1 %v11268_v0 }
0x25bf   :  { %10142 = vmatpush3.msra.mxu1 %v11763_v52 }
0x25c0   :  { %10157 = vmatprep.subr.mxu1 %v11268_v0 }
0x2678   :  { %v1951_v10 = vpop.f32.mrf.mxu1 }
0x2679   :  { %v1955_v58 = vadd.f32 %v1951_v10, %v299_v30 }
0x267a   :  { %v10123_v31 = vpop.f32.mrf.mxu1 }
0x267b   :  { %10881 = vtanh.f32 %v1955_v58  ;;  %v9304_v33 = vmul.f32 -1.442695, %v1955_v58 }
0x267d   :  { %10883 = vpow2.f32 %v9304_v33 }
0x2688   :  { %v10882_v32 = vpop.eup %10881 }
0x2689   :  { %1965 = vrot.lane.b32.xlu0 %v10882_v32, %s11270_s26 }
0x268a   :  { %v10884_v14 = vpop.eup %10883 }
0x268b   :  { %v1959_v34 = vadd.f32 1.0, %v10884_v14 }
0x268d   :  { %10885 = vrcp.f32 %v1959_v34 }
0x269a   :  { %v10886_v35 = vpop.eup %10885 }
0x269b   :  { %v1963_v37 = vmul.f32 %v10886_v35, %v1868_v60 }
0x26fb   :  { %v1966_v36 = vpop.permute.xlu0 %1965 }
0x26fc   :  { %v1968_v2 = vmul.f32 %v10886_v35, %v1966_v36  ;;  %v314_v36 = vadd.f32 %v11788_v56, %v11647_v1 }
0x26fe   :  { %1970 = vrot.lane.b32.xlu1 %v1968_v2, %s11271_s27 }
0x2770   :  { %v1971_v38 = vpop.permute.xlu1 %1970 }
0x2771   :  { %v1973_v63 = vadd.f32 %v1971_v38, %v1963_v37 }
0x2773   :  { %10887 = vtanh.f32 %v1973_v63 }
0x2780   :  { %v10888_v29 = vpop.eup %10887 }
0x2781   :  { %1976 = vrot.lane.b32.xlu0 %v10888_v29, %s11270_s26 }
0x27f3   :  { %v1977_v39 = vpop.permute.xlu0 %1976 }
0x27f4   :  { %v1979_v4 = vmul.f32 %v10886_v35, %v1977_v39 }
0x27f6   :  { %1981 = vrot.lane.b32.xlu1 %v1979_v4, %s11271_s27 }
0x2868   :  { %v1982_v40 = vpop.permute.xlu1 %1981 }
0x2869   :  { %1985 = vst.msk [vmem:[#allocation4 + $0x70] sm:$0xff] %vm412_vm2, %v1982_v40  ;;  %10133 = vmatmul.mubr.msk.f32.vlgmr.msra.gmra.mxu0 %vm412_vm2, %v1982_v40 }
0x286a   :  { %10147 = vmatpush3.msra.mxu0 %v11740_v49  ;;  %10154 = vmatprep.mubr.msk.f32.mxu0 %vm11269_vm0, %v11268_v0 }
0x286b   :  { %10148 = vmatprep.subr.mxu0 %v11268_v0 }
0x286c   :  { %10149 = vmatpush3.msra.mxu0 %v11749_v50 }
0x286d   :  { %10150 = vmatprep.subr.mxu0 %v11268_v0 }
0x286e   :  { %10151 = vmatpush3.msra.mxu0 %v11756_v51 }
0x286f   :  { %10152 = vmatprep.subr.mxu0 %v11268_v0 }
0x2870   :  { %10153 = vmatpush3.msra.mxu0 %v11763_v52 }
0x2871   :  { %10168 = vmatprep.subr.mxu0 %v11268_v0 }
0x2929   :  { %v2056_v41 = vpop.f32.mrf.mxu0 }
0x292a   :  { %v2060_v61 = vadd.f32 %v2056_v41, %v304_v7 }
0x292b   :  { %v10134_v42 = vpop.f32.mrf.mxu0 }
0x292c   :  { %10889 = vtanh.f32 %v2060_v61  ;;  %v9306_v43 = vmul.f32 -1.442695, %v2060_v61 }
0x292e   :  { %10891 = vpow2.f32 %v9306_v43 }
0x2939   :  { %v10890_v8 = vpop.eup %10889 }
0x293a   :  { %2070 = vrot.lane.b32.xlu0 %v10890_v8, %s11270_s26 }
0x293b   :  { %v10892_v44 = vpop.eup %10891 }
0x293c   :  { %v2064_v59 = vadd.f32 1.0, %v10892_v44 }
0x293e   :  { %10893 = vrcp.f32 %v2064_v59 }
0x294b   :  { %v10894_v45 = vpop.eup %10893 }
0x294c   :  { %v2068_v48 = vmul.f32 %v10894_v45, %v1973_v63 }
0x29ac   :  { %v2071_v46 = vpop.permute.xlu0 %2070 }
0x29ad   :  { %v2073_v47 = vmul.f32 %v10894_v45, %v2071_v46 }
0x29af   :  { %2075 = vrot.lane.b32.xlu1 %v2073_v47, %s11271_s27 }
0x2a21   :  { %v2076_v53 = vpop.permute.xlu1 %2075 }
0x2a22   :  { %v2078_v62 = vadd.f32 %v2076_v53, %v2068_v48 }
0x2a24   :  { %10895 = vtanh.f32 %v2078_v62 }
0x2a31   :  { %v10896_v54 = vpop.eup %10895 }
0x2a32   :  { %2081 = vrot.lane.b32.xlu0 %v10896_v54, %s11270_s26 }
0x2aa4   :  { %v2082_v55 = vpop.permute.xlu0 %2081 }
0x2aa5   :  { %v2084_v57 = vmul.f32 %v10894_v45, %v2082_v55  ;;  %v319_v45 = vadd.f32 %v11788_v56, %v11653_v6 }
0x2aa7   :  { %2086 = vrot.lane.b32.xlu1 %v2084_v57, %s11271_s27 }
0x2b19   :  { %v2087_v21 = vpop.permute.xlu1 %2086 }
0x2b1a   :  { %2090 = vst.msk [vmem:[#allocation4 + $0x78] sm:$0xff] %vm412_vm2, %v2087_v21  ;;  %10144 = vmatmul.mubr.msk.f32.vlgmr.msra.gmra.mxu1 %vm412_vm2, %v2087_v21 }
0x2b1b   :  { %10158 = vmatpush3.msra.mxu1 %v11740_v49  ;;  %10165 = vmatprep.mubr.msk.f32.mxu1 %vm11269_vm0, %v11268_v0 }
0x2b1c   :  { %10159 = vmatprep.subr.mxu1 %v11268_v0 }
0x2b1d   :  { %10160 = vmatpush3.msra.mxu1 %v11749_v50 }
0x2b1e   :  { %10161 = vmatprep.subr.mxu1 %v11268_v0 }
0x2b1f   :  { %10162 = vmatpush3.msra.mxu1 %v11756_v51 }
0x2b20   :  { %10163 = vmatprep.subr.mxu1 %v11268_v0 }
0x2b21   :  { %10164 = vmatpush3.msra.mxu1 %v11763_v52 }
0x2b22   :  { %10179 = vmatprep.subr.mxu1 %v11268_v0 }
0x2bda   :  { %v2161_v23 = vpop.f32.mrf.mxu1 }
0x2bdb   :  { %v2165_v24 = vadd.f32 %v2161_v23, %v309_v22 }
0x2bdc   :  { %v10145_v60 = vpop.f32.mrf.mxu1 }
0x2bdd   :  { %10897 = vtanh.f32 %v2165_v24  ;;  %v9308_v26 = vmul.f32 -1.442695, %v2165_v24 }
0x2bdf   :  { %10899 = vpow2.f32 %v9308_v26 }
0x2bea   :  { %v10898_v25 = vpop.eup %10897 }
0x2beb   :  { %2175 = vrot.lane.b32.xlu0 %v10898_v25, %s11270_s26 }
0x2bec   :  { %v10900_v27 = vpop.eup %10899 }
0x2bed   :  { %v2169_v28 = vadd.f32 1.0, %v10900_v27 }
0x2bef   :  { %10901 = vrcp.f32 %v2169_v28  ;;  %v324_v28 = vadd.f32 %v11788_v56, %v11651_v5 }
0x2bfc   :  { %v10902_v30 = vpop.eup %10901 }
0x2bfd   :  { %v2173_v31 = vmul.f32 %v10902_v30, %v2078_v62 }
0x2c5d   :  { %v2176_v10 = vpop.permute.xlu0 %2175 }
0x2c5e   :  { %v2178_v58 = vmul.f32 %v10902_v30, %v2176_v10 }
0x2c60   :  { %2180 = vrot.lane.b32.xlu1 %v2178_v58, %s11271_s27 }
0x2cd2   :  { %v2181_v32 = vpop.permute.xlu1 %2180 }
0x2cd3   :  { %v2183_v3 = vadd.f32 %v2181_v32, %v2173_v31 }
0x2cd5   :  { %10903 = vtanh.f32 %v2183_v3 }
0x2ce2   :  { %v10904_v33 = vpop.eup %10903 }
0x2ce3   :  { %2186 = vrot.lane.b32.xlu0 %v10904_v33, %s11270_s26 }
0x2d55   :  { %v2187_v14 = vpop.permute.xlu0 %2186 }
0x2d56   :  { %v2189_v34 = vmul.f32 %v10902_v30, %v2187_v14 }
0x2d58   :  { %2191 = vrot.lane.b32.xlu1 %v2189_v34, %s11271_s27 }
0x2dca   :  { %v2192_v35 = vpop.permute.xlu1 %2191 }
0x2dcb   :  { %2195 = vst.msk [vmem:[#allocation4 + $0x80] sm:$0xff] %vm412_vm2, %v2192_v35  ;;  %10155 = vmatmul.mubr.msk.f32.vlgmr.msra.gmra.mxu0 %vm412_vm2, %v2192_v35 }
0x2dcc   :  { %10169 = vmatpush3.msra.mxu0 %v11740_v49  ;;  %10176 = vmatprep.mubr.msk.f32.mxu0 %vm11269_vm0, %v11268_v0 }
0x2dcd   :  { %10170 = vmatprep.subr.mxu0 %v11268_v0 }
0x2dce   :  { %10171 = vmatpush3.msra.mxu0 %v11749_v50 }
0x2dcf   :  { %10172 = vmatprep.subr.mxu0 %v11268_v0 }
0x2dd0   :  { %10173 = vmatpush3.msra.mxu0 %v11756_v51 }
0x2dd1   :  { %10174 = vmatprep.subr.mxu0 %v11268_v0 }
0x2dd2   :  { %10175 = vmatpush3.msra.mxu0 %v11763_v52 }
0x2dd3   :  { %10190 = vmatprep.subr.mxu0 %v11268_v0 }
0x2e8b   :  { %v2266_v2 = vpop.f32.mrf.mxu0 }
0x2e8c   :  { %v2270_v37 = vadd.f32 %v2266_v2, %v314_v36 }
0x2e8d   :  { %v10156_v38 = vpop.f32.mrf.mxu0 }
0x2e8e   :  { %10905 = vtanh.f32 %v2270_v37  ;;  %v9310_v29 = vmul.f32 -1.442695, %v2270_v37 }
0x2e90   :  { %10907 = vpow2.f32 %v9310_v29 }
0x2e9b   :  { %v10906_v63 = vpop.eup %10905 }
0x2e9c   :  { %2280 = vrot.lane.b32.xlu0 %v10906_v63, %s11270_s26 }
0x2e9d   :  { %v10908_v39 = vpop.eup %10907 }
0x2e9e   :  { %v2274_v4 = vadd.f32 1.0, %v10908_v39  ;;  %v329_v39 = vadd.f32 %v11788_v56, %v11657_v11 }
0x2ea0   :  { %10909 = vrcp.f32 %v2274_v4 }
0x2ead   :  { %v10910_v40 = vpop.eup %10909 }
0x2eae   :  { %v2278_v61 = vmul.f32 %v10910_v40, %v2183_v3 }
0x2f0e   :  { %v2281_v7 = vpop.permute.xlu0 %2280 }
0x2f0f   :  { %v2283_v41 = vmul.f32 %v10910_v40, %v2281_v7 }
0x2f11   :  { %2285 = vrot.lane.b32.xlu1 %v2283_v41, %s11271_s27 }
0x2f83   :  { %v2286_v42 = vpop.permute.xlu1 %2285 }
0x2f84   :  { %v2288_v1 = vadd.f32 %v2286_v42, %v2278_v61 }
0x2f86   :  { %10911 = vtanh.f32 %v2288_v1 }
0x2f93   :  { %v10912_v8 = vpop.eup %10911 }
0x2f94   :  { %2291 = vrot.lane.b32.xlu0 %v10912_v8, %s11270_s26 }
0x3006   :  { %v2292_v43 = vpop.permute.xlu0 %2291 }
0x3007   :  { %v2294_v44 = vmul.f32 %v10910_v40, %v2292_v43 }
0x3009   :  { %2296 = vrot.lane.b32.xlu1 %v2294_v44, %s11271_s27 }
0x307b   :  { %v2297_v59 = vpop.permute.xlu1 %2296 }
0x307c   :  { %2300 = vst.msk [vmem:[#allocation4 + $0x88] sm:$0xff] %vm412_vm2, %v2297_v59  ;;  %10166 = vmatmul.mubr.msk.f32.vlgmr.msra.gmra.mxu1 %vm412_vm2, %v2297_v59 }
0x307d   :  { %10180 = vmatpush3.msra.mxu1 %v11740_v49  ;;  %10187 = vmatprep.mubr.msk.f32.mxu1 %vm11269_vm0, %v11268_v0 }
0x307e   :  { %10181 = vmatprep.subr.mxu1 %v11268_v0 }
0x307f   :  { %10182 = vmatpush3.msra.mxu1 %v11749_v50 }
0x3080   :  { %10183 = vmatprep.subr.mxu1 %v11268_v0 }
0x3081   :  { %10184 = vmatpush3.msra.mxu1 %v11756_v51 }
0x3082   :  { %10185 = vmatprep.subr.mxu1 %v11268_v0 }
0x3083   :  { %10186 = vmatpush3.msra.mxu1 %v11763_v52 }
0x3084   :  { %10201 = vmatprep.subr.mxu1 %v11268_v0 }
0x313c   :  { %v2371_v46 = vpop.f32.mrf.mxu1 }
0x313d   :  { %v2375_v47 = vadd.f32 %v2371_v46, %v319_v45 }
0x313e   :  { %v10167_v48 = vpop.f32.mrf.mxu1 }
0x313f   :  { %10913 = vtanh.f32 %v2375_v47  ;;  %v9312_v62 = vmul.f32 -1.442695, %v2375_v47 }
0x3141   :  { %10915 = vpow2.f32 %v9312_v62  ;;  %v334_v62 = vadd.f32 %v11788_v56, %v11655_v9 }
0x314c   :  { %v10914_v53 = vpop.eup %10913 }
0x314d   :  { %2385 = vrot.lane.b32.xlu0 %v10914_v53, %s11270_s26 }
0x314e   :  { %v10916_v54 = vpop.eup %10915 }
0x314f   :  { %v2379_v55 = vadd.f32 1.0, %v10916_v54 }
0x3151   :  { %10917 = vrcp.f32 %v2379_v55 }
0x315e   :  { %v10918_v57 = vpop.eup %10917 }
0x315f   :  { %v2383_v23 = vmul.f32 %v10918_v57, %v2288_v1 }
0x31bf   :  { %v2386_v21 = vpop.permute.xlu0 %2385 }
0x31c0   :  { %v2388_v22 = vmul.f32 %v10918_v57, %v2386_v21 }
0x31c2   :  { %2390 = vrot.lane.b32.xlu1 %v2388_v22, %s11271_s27 }
0x3234   :  { %v2391_v24 = vpop.permute.xlu1 %2390 }
0x3235   :  { %v2393_v6 = vadd.f32 %v2391_v24, %v2383_v23 }
0x3237   :  { %10919 = vtanh.f32 %v2393_v6 }
0x3244   :  { %v10920_v60 = vpop.eup %10919 }
0x3245   :  { %2396 = vrot.lane.b32.xlu0 %v10920_v60, %s11270_s26 }
0x32b7   :  { %v2397_v25 = vpop.permute.xlu0 %2396 }
0x32b8   :  { %v2399_v26 = vmul.f32 %v10918_v57, %v2397_v25 }
0x32ba   :  { %2401 = vrot.lane.b32.xlu1 %v2399_v26, %s11271_s27 }
0x332c   :  { %v2402_v27 = vpop.permute.xlu1 %2401 }
0x332d   :  { %2405 = vst.msk [vmem:[#allocation4 + $0x90] sm:$0xff] %vm412_vm2, %v2402_v27  ;;  %10177 = vmatmul.mubr.msk.f32.vlgmr.msra.gmra.mxu0 %vm412_vm2, %v2402_v27 }
0x332e   :  { %10191 = vmatpush3.msra.mxu0 %v11740_v49  ;;  %10198 = vmatprep.mubr.msk.f32.mxu0 %vm11269_vm0, %v11268_v0 }
0x332f   :  { %10192 = vmatprep.subr.mxu0 %v11268_v0 }
0x3330   :  { %10193 = vmatpush3.msra.mxu0 %v11749_v50 }
0x3331   :  { %10194 = vmatprep.subr.mxu0 %v11268_v0 }
0x3332   :  { %10195 = vmatpush3.msra.mxu0 %v11756_v51 }
0x3333   :  { %10196 = vmatprep.subr.mxu0 %v11268_v0 }
0x3334   :  { %10197 = vmatpush3.msra.mxu0 %v11763_v52 }
0x3335   :  { %10212 = vmatprep.subr.mxu0 %v11268_v0 }
0x33ed   :  { %v2476_v30 = vpop.f32.mrf.mxu0 }
0x33ee   :  { %v2480_v10 = vadd.f32 %v2476_v30, %v324_v28 }
0x33ef   :  { %v10178_v58 = vpop.f32.mrf.mxu0 }
0x33f0   :  { %10921 = vtanh.f32 %v2480_v10  ;;  %v9314_v32 = vmul.f32 -1.442695, %v2480_v10 }
0x33f2   :  { %10923 = vpow2.f32 %v9314_v32 }
0x33fd   :  { %v10922_v31 = vpop.eup %10921 }
0x33fe   :  { %2490 = vrot.lane.b32.xlu0 %v10922_v31, %s11270_s26  ;;  %v339_v31 = vadd.f32 %v11788_v56, %v11661_v13 }
0x33ff   :  { %v10924_v3 = vpop.eup %10923 }
0x3400   :  { %v2484_v33 = vadd.f32 1.0, %v10924_v3 }
0x3402   :  { %10925 = vrcp.f32 %v2484_v33 }
0x340f   :  { %v10926_v14 = vpop.eup %10925 }
0x3410   :  { %v2488_v36 = vmul.f32 %v10926_v14, %v2393_v6 }
0x3470   :  { %v2491_v34 = vpop.permute.xlu0 %2490 }
0x3471   :  { %v2493_v35 = vmul.f32 %v10926_v14, %v2491_v34 }
0x3473   :  { %2495 = vrot.lane.b32.xlu1 %v2493_v35, %s11271_s27 }
0x34e5   :  { %v2496_v2 = vpop.permute.xlu1 %2495 }
0x34e6   :  { %v2498_v5 = vadd.f32 %v2496_v2, %v2488_v36 }
0x34e8   :  { %10927 = vtanh.f32 %v2498_v5 }
0x34f5   :  { %v10928_v37 = vpop.eup %10927 }
0x34f6   :  { %2501 = vrot.lane.b32.xlu0 %v10928_v37, %s11270_s26 }
0x3568   :  { %v2502_v38 = vpop.permute.xlu0 %2501 }
0x3569   :  { %v2504_v63 = vmul.f32 %v10926_v14, %v2502_v38 }
0x356b   :  { %2506 = vrot.lane.b32.xlu1 %v2504_v63, %s11271_s27 }
0x35dd   :  { %v2507_v29 = vpop.permute.xlu1 %2506 }
0x35de   :  { %2510 = vst.msk [vmem:[#allocation4 + $0x98] sm:$0xff] %vm412_vm2, %v2507_v29  ;;  %10188 = vmatmul.mubr.msk.f32.vlgmr.msra.gmra.mxu1 %vm412_vm2, %v2507_v29 }
0x35df   :  { %10202 = vmatpush3.msra.mxu1 %v11740_v49  ;;  %10209 = vmatprep.mubr.msk.f32.mxu1 %vm11269_vm0, %v11268_v0 }
0x35e0   :  { %10203 = vmatprep.subr.mxu1 %v11268_v0 }
0x35e1   :  { %10204 = vmatpush3.msra.mxu1 %v11749_v50 }
0x35e2   :  { %10205 = vmatprep.subr.mxu1 %v11268_v0 }
0x35e3   :  { %10206 = vmatpush3.msra.mxu1 %v11756_v51 }
0x35e4   :  { %10207 = vmatprep.subr.mxu1 %v11268_v0 }
0x35e5   :  { %10208 = vmatpush3.msra.mxu1 %v11763_v52 }
0x35e6   :  { %10223 = vmatprep.subr.mxu1 %v11268_v0 }
0x369e   :  { %v2581_v4 = vpop.f32.mrf.mxu1 }
0x369f   :  { %v2585_v40 = vadd.f32 %v2581_v4, %v329_v39 }
0x36a0   :  { %v10189_v7 = vpop.f32.mrf.mxu1 }
0x36a1   :  { %10929 = vtanh.f32 %v2585_v40  ;;  %v9316_v61 = vmul.f32 -1.442695, %v2585_v40  ;;  %v344_v7 = vadd.f32 %v11788_v56, %v11659_v12 }
0x36a3   :  { %10931 = vpow2.f32 %v9316_v61 }
0x36ae   :  { %v10930_v41 = vpop.eup %10929 }
0x36af   :  { %2595 = vrot.lane.b32.xlu0 %v10930_v41, %s11270_s26 }
0x36b0   :  { %v10932_v42 = vpop.eup %10931 }
0x36b1   :  { %v2589_v1 = vadd.f32 1.0, %v10932_v42 }
0x36b3   :  { %10933 = vrcp.f32 %v2589_v1 }
0x36c0   :  { %v10934_v8 = vpop.eup %10933 }
0x36c1   :  { %v2593_v59 = vmul.f32 %v10934_v8, %v2498_v5 }
0x3721   :  { %v2596_v43 = vpop.permute.xlu0 %2595 }
0x3722   :  { %v2598_v44 = vmul.f32 %v10934_v8, %v2596_v43 }
0x3724   :  { %2600 = vrot.lane.b32.xlu1 %v2598_v44, %s11271_s27 }
0x3796   :  { %v2601_v45 = vpop.permute.xlu1 %2600 }
0x3797   :  { %v2603_v11 = vadd.f32 %v2601_v45, %v2593_v59 }
0x3799   :  { %10935 = vtanh.f32 %v2603_v11 }
0x37a6   :  { %v10936_v46 = vpop.eup %10935 }
0x37a7   :  { %2606 = vrot.lane.b32.xlu0 %v10936_v46, %s11270_s26 }
0x3819   :  { %v2607_v47 = vpop.permute.xlu0 %2606 }
0x381a   :  { %v2609_v48 = vmul.f32 %v10934_v8, %v2607_v47 }
0x381c   :  { %2611 = vrot.lane.b32.xlu1 %v2609_v48, %s11271_s27 }
0x388e   :  { %v2612_v53 = vpop.permute.xlu1 %2611 }
0x388f   :  { %2615 = vst.msk [vmem:[#allocation4 + $0xa0] sm:$0xff] %vm412_vm2, %v2612_v53  ;;  %10199 = vmatmul.mubr.msk.f32.vlgmr.msra.gmra.mxu0 %vm412_vm2, %v2612_v53 }
0x3890   :  { %10213 = vmatpush3.msra.mxu0 %v11740_v49  ;;  %10220 = vmatprep.mubr.msk.f32.mxu0 %vm11269_vm0, %v11268_v0 }
0x3891   :  { %10214 = vmatprep.subr.mxu0 %v11268_v0 }
0x3892   :  { %10215 = vmatpush3.msra.mxu0 %v11749_v50 }
0x3893   :  { %10216 = vmatprep.subr.mxu0 %v11268_v0 }
0x3894   :  { %10217 = vmatpush3.msra.mxu0 %v11756_v51 }
0x3895   :  { %10218 = vmatprep.subr.mxu0 %v11268_v0 }
0x3896   :  { %10219 = vmatpush3.msra.mxu0 %v11763_v52 }
0x3897   :  { %10234 = vmatprep.subr.mxu0 %v11268_v0 }
0x394f   :  { %v2686_v54 = vpop.f32.mrf.mxu0 }
0x3950   :  { %v2690_v55 = vadd.f32 %v2686_v54, %v334_v62 }
0x3951   :  { %v10200_v57 = vpop.f32.mrf.mxu0 }
0x3952   :  { %10937 = vtanh.f32 %v2690_v55  ;;  %v9318_v22 = vmul.f32 -1.442695, %v2690_v55 }
0x3954   :  { %10939 = vpow2.f32 %v9318_v22 }
0x395f   :  { %v10938_v21 = vpop.eup %10937 }
0x3960   :  { %2700 = vrot.lane.b32.xlu0 %v10938_v21, %s11270_s26 }
0x3961   :  { %v10940_v23 = vpop.eup %10939 }
0x3962   :  { %v2694_v24 = vadd.f32 1.0, %v10940_v23 }
0x3964   :  { %10941 = vrcp.f32 %v2694_v24 }
0x3971   :  { %v10942_v6 = vpop.eup %10941 }
0x3972   :  { %v2698_v26 = vmul.f32 %v10942_v6, %v2603_v11 }
0x39d2   :  { %v2701_v60 = vpop.permute.xlu0 %2700 }
0x39d3   :  { %v2703_v25 = vmul.f32 %v10942_v6, %v2701_v60 }
0x39d5   :  { %2705 = vrot.lane.b32.xlu1 %v2703_v25, %s11271_s27 }
0x3a47   :  { %v2706_v27 = vpop.permute.xlu1 %2705 }
0x3a48   :  { %v2708_v9 = vadd.f32 %v2706_v27, %v2698_v26 }
0x3a4a   :  { %10943 = vtanh.f32 %v2708_v9 }
0x3a57   :  { %v10944_v28 = vpop.eup %10943 }
0x3a58   :  { %2711 = vrot.lane.b32.xlu0 %v10944_v28, %s11270_s26 }
0x3aca   :  { %v2712_v30 = vpop.permute.xlu0 %2711 }
0x3acb   :  { %v2714_v10 = vmul.f32 %v10942_v6, %v2712_v30  ;;  %v12017_v30 = vld [vmem:[%s13017_s2 + $0x18] sm:$0xff] }
0x3acd   :  { %2716 = vrot.lane.b32.xlu1 %v2714_v10, %s11271_s27  ;;  %v12026_v10 = vld [vmem:[%s13017_s2 + $0x10] sm:$0xff] }
0x3b3f   :  { %v2717_v58 = vpop.permute.xlu1 %2716 }
0x3b40   :  { %2720 = vst.msk [vmem:[#allocation4 + $0xa8] sm:$0xff] %vm412_vm2, %v2717_v58  ;;  %10210 = vmatmul.mubr.msk.f32.vlgmr.msra.gmra.mxu1 %vm412_vm2, %v2717_v58  ;;  %v12033_v58 = vld [vmem:[%s13017_s2 + $0x8] sm:$0xff] }
0x3b41   :  { %10224 = vmatpush3.msra.mxu1 %v11740_v49  ;;  %10231 = vmatprep.mubr.msk.f32.mxu1 %vm11269_vm0, %v11268_v0 }
0x3b42   :  { %10225 = vmatprep.subr.mxu1 %v11268_v0 }
0x3b43   :  { %10226 = vmatpush3.msra.mxu1 %v11749_v50 }
0x3b44   :  { %10227 = vmatprep.subr.mxu1 %v11268_v0 }
0x3b45   :  { %10228 = vmatpush3.msra.mxu1 %v11756_v51 }
0x3b46   :  { %10229 = vmatprep.subr.mxu1 %v11268_v0 }
0x3b47   :  { %10230 = vmatpush3.msra.mxu1 %v11763_v52 }
0x3b48   :  { %10245 = vmatprep.subr.mxu1 %v11268_v0 }
0x3c00   :  { %v2791_v32 = vpop.f32.mrf.mxu1 }
0x3c01   :  { %v2795_v3 = vadd.f32 %v2791_v32, %v339_v31  ;;  %v12040_v31 = vld [vmem:[%s13017_s2] sm:$0xff]  ;;  %v354_v32 = vadd.f32 %v11788_v56, %v11663_v15 }
0x3c02   :  { %v10211_v33 = vpop.f32.mrf.mxu1 }
0x3c03   :  { %10945 = vtanh.f32 %v2795_v3  ;;  %v9320_v34 = vmul.f32 -1.442695, %v2795_v3 }
0x3c05   :  { %10947 = vpow2.f32 %v9320_v34 }
0x3c10   :  { %v10946_v14 = vpop.eup %10945 }
0x3c11   :  { %2805 = vrot.lane.b32.xlu0 %v10946_v14, %s11270_s26 }
0x3c12   :  { %v10948_v35 = vpop.eup %10947 }
0x3c13   :  { %v2799_v36 = vadd.f32 1.0, %v10948_v35 }
0x3c15   :  { %10949 = vrcp.f32 %v2799_v36 }
0x3c22   :  { %v10950_v2 = vpop.eup %10949 }
0x3c23   :  { %v2803_v38 = vmul.f32 %v10950_v2, %v2708_v9 }
0x3c83   :  { %v2806_v5 = vpop.permute.xlu0 %2805 }
0x3c84   :  { %v2808_v37 = vmul.f32 %v10950_v2, %v2806_v5 }
0x3c86   :  { %2810 = vrot.lane.b32.xlu1 %v2808_v37, %s11271_s27 }
0x3cf8   :  { %v2811_v63 = vpop.permute.xlu1 %2810 }
0x3cf9   :  { %v2813_v13 = vadd.f32 %v2811_v63, %v2803_v38 }
0x3cfb   :  { %10951 = vtanh.f32 %v2813_v13 }
0x3d08   :  { %v10952_v29 = vpop.eup %10951 }
0x3d09   :  { %2816 = vrot.lane.b32.xlu0 %v10952_v29, %s11270_s26 }
0x3d7b   :  { %v2817_v39 = vpop.permute.xlu0 %2816 }
0x3d7c   :  { %v2819_v4 = vmul.f32 %v10950_v2, %v2817_v39 }
0x3d7e   :  { %2821 = vrot.lane.b32.xlu1 %v2819_v4, %s11271_s27 }
0x3df0   :  { %v2822_v40 = vpop.permute.xlu1 %2821 }
0x3df1   :  { %2825 = vst.msk [vmem:[#allocation4 + $0xb0] sm:$0xff] %vm412_vm2, %v2822_v40  ;;  %10221 = vmatmul.mubr.msk.f32.vlgmr.msra.gmra.mxu0 %vm412_vm2, %v2822_v40  ;;  %v12064_v40 = vld [vmem:[%s13019_s3] ss:$0 sm:$0xff] }
0x3df2   :  { %10235 = vmatpush3.msra.mxu0 %v11740_v49  ;;  %10242 = vmatprep.mubr.msk.f32.mxu0 %vm11269_vm0, %v11268_v0 }
0x3df3   :  { %10236 = vmatprep.subr.mxu0 %v11268_v0 }
0x3df4   :  { %10237 = vmatpush3.msra.mxu0 %v11749_v50 }
0x3df5   :  { %10238 = vmatprep.subr.mxu0 %v11268_v0 }
0x3df6   :  { %10239 = vmatpush3.msra.mxu0 %v11756_v51 }
0x3df7   :  { %10240 = vmatprep.subr.mxu0 %v11268_v0 }
0x3df8   :  { %10241 = vmatpush3.msra.mxu0 %v11763_v52 }
0x3df9   :  { %10256 = vmatprep.subr.mxu0 %v11268_v0 }
0x3eb1   :  { %v2896_v41 = vpop.f32.mrf.mxu0 }
0x3eb2   :  { %v2900_v61 = vadd.f32 %v2896_v41, %v344_v7  ;;  %v359_v7 = vadd.f32 %v12064_v40, %v11669_v18 }
0x3eb3   :  { %v10222_v42 = vpop.f32.mrf.mxu0 }
0x3eb4   :  { %10953 = vtanh.f32 %v2900_v61  ;;  %v9322_v8 = vmul.f32 -1.442695, %v2900_v61 }
0x3eb6   :  { %10955 = vpow2.f32 %v9322_v8 }
0x3ec1   :  { %v10954_v1 = vpop.eup %10953 }
0x3ec2   :  { %2910 = vrot.lane.b32.xlu0 %v10954_v1, %s11270_s26 }
0x3ec3   :  { %v10956_v43 = vpop.eup %10955 }
0x3ec4   :  { %v2904_v44 = vadd.f32 1.0, %v10956_v43 }
0x3ec6   :  { %10957 = vrcp.f32 %v2904_v44 }
0x3ed3   :  { %v10958_v59 = vpop.eup %10957 }
0x3ed4   :  { %v2908_v46 = vmul.f32 %v10958_v59, %v2813_v13 }
0x3f34   :  { %v2911_v45 = vpop.permute.xlu0 %2910 }
0x3f35   :  { %v2913_v11 = vmul.f32 %v10958_v59, %v2911_v45 }
0x3f37   :  { %2915 = vrot.lane.b32.xlu1 %v2913_v11, %s11271_s27 }
0x3fa9   :  { %v2916_v47 = vpop.permute.xlu1 %2915 }
0x3faa   :  { %v2918_v12 = vadd.f32 %v2916_v47, %v2908_v46 }
0x3fac   :  { %10959 = vtanh.f32 %v2918_v12 }
0x3fb9   :  { %v10960_v48 = vpop.eup %10959 }
0x3fba   :  { %2921 = vrot.lane.b32.xlu0 %v10960_v48, %s11270_s26 }
0x402c   :  { %v2922_v53 = vpop.permute.xlu0 %2921 }
0x402d   :  { %v2924_v62 = vmul.f32 %v10958_v59, %v2922_v53 }
0x402f   :  { %2926 = vrot.lane.b32.xlu1 %v2924_v62, %s11271_s27 }
0x40a1   :  { %v2927_v54 = vpop.permute.xlu1 %2926 }
0x40a2   :  { %2930 = vst.msk [vmem:[#allocation4 + $0xb8] sm:$0xff] %vm412_vm2, %v2927_v54  ;;  %10232 = vmatmul.mubr.msk.f32.vlgmr.msra.gmra.mxu1 %vm412_vm2, %v2927_v54  ;;  %v364_v54 = vadd.f32 %v12064_v40, %v11667_v17 }
0x40a3   :  { %10246 = vmatpush3.msra.mxu1 %v11740_v49  ;;  %10253 = vmatprep.mubr.msk.f32.mxu1 %vm11269_vm0, %v11268_v0  ;;  %v349_v49 = vadd.f32 %v11788_v56, %v11665_v16 }
0x40a4   :  { %10247 = vmatprep.subr.mxu1 %v11268_v0 }
0x40a5   :  { %10248 = vmatpush3.msra.mxu1 %v11749_v50 }
0x40a6   :  { %10249 = vmatprep.subr.mxu1 %v11268_v0 }
0x40a7   :  { %10250 = vmatpush3.msra.mxu1 %v11756_v51 }
0x40a8   :  { %10251 = vmatprep.subr.mxu1 %v11268_v0 }
0x40a9   :  { %10252 = vmatpush3.msra.mxu1 %v11763_v52 }
0x40aa   :  { %10267 = vmatprep.subr.mxu1 %v11268_v0 }
0x4162   :  { %v3001_v55 = vpop.f32.mrf.mxu1 }
0x4163   :  { %v3005_v57 = vadd.f32 %v3001_v55, %v349_v49 }
0x4164   :  { %v10233_v21 = vpop.f32.mrf.mxu1 }
0x4165   :  { %10961 = vtanh.f32 %v3005_v57  ;;  %v9324_v50 = vmul.f32 -1.442695, %v3005_v57 }
0x4167   :  { %10963 = vpow2.f32 %v9324_v50 }
0x4172   :  { %v10962_v22 = vpop.eup %10961 }
0x4173   :  { %3015 = vrot.lane.b32.xlu0 %v10962_v22, %s11270_s26 }
0x4174   :  { %v10964_v23 = vpop.eup %10963 }
0x4175   :  { %v3009_v51 = vadd.f32 1.0, %v10964_v23 }
0x4177   :  { %10965 = vrcp.f32 %v3009_v51 }
0x4184   :  { %v10966_v24 = vpop.eup %10965 }
0x4185   :  { %v3013_v60 = vmul.f32 %v10966_v24, %v2918_v12 }
0x41e5   :  { %v3016_v6 = vpop.permute.xlu0 %3015 }
0x41e6   :  { %v3018_v52 = vmul.f32 %v10966_v24, %v3016_v6 }
0x41e8   :  { %3020 = vrot.lane.b32.xlu1 %v3018_v52, %s11271_s27 }
0x425a   :  { %v3021_v25 = vpop.permute.xlu1 %3020 }
0x425b   :  { %v3023_v16 = vadd.f32 %v3021_v25, %v3013_v60  ;;  %v3594_v25 = vld [vmem:[%s13020_s4 + $0x18] sm:$0xff] }
0x425d   :  { %10967 = vtanh.f32 %v3023_v16 }
0x426a   :  { %v10968_v26 = vpop.eup %10967 }
0x426b   :  { %3026 = vrot.lane.b32.xlu0 %v10968_v26, %s11270_s26 }
0x42dd   :  { %v3027_v27 = vpop.permute.xlu0 %3026 }
0x42de   :  { %v3029_v9 = vmul.f32 %v10966_v24, %v3027_v27 }
0x42e0   :  { %3031 = vrot.lane.b32.xlu1 %v3029_v9, %s11271_s27 }
0x4352   :  { %v3032_v28 = vpop.permute.xlu1 %3031 }
0x4353   :  { %3035 = vst.msk [vmem:[#allocation4 + $0xc0] sm:$0xff] %vm412_vm2, %v3032_v28  ;;  %10243 = vmatmul.mubr.msk.f32.vlgmr.msra.gmra.mxu0 %vm412_vm2, %v3032_v28  ;;  %v3593_v28 = vld [vmem:[%s13020_s4 + $0x10] sm:$0xff] }
0x4354   :  { %10257 = vmatpush3.msra.mxu0 %v12017_v30  ;;  %10264 = vmatprep.mubr.msk.f32.mxu0 %vm11269_vm0, %v11268_v0 }
0x4355   :  { %10258 = vmatprep.subr.mxu0 %v11268_v0 }
0x4356   :  { %10259 = vmatpush3.msra.mxu0 %v12026_v10 }
0x4357   :  { %10260 = vmatprep.subr.mxu0 %v11268_v0 }
0x4358   :  { %10261 = vmatpush3.msra.mxu0 %v12033_v58 }
0x4359   :  { %10262 = vmatprep.subr.mxu0 %v11268_v0 }
0x435a   :  { %10263 = vmatpush3.msra.mxu0 %v12040_v31 }
0x435b   :  { %10278 = vmatprep.subr.mxu0 %v11268_v0 }
0x4413   :  { %v3106_v3 = vpop.f32.mrf.mxu0 }
0x4414   :  { %v3110_v33 = vadd.f32 %v3106_v3, %v354_v32  ;;  %v3563_v32 = vld [vmem:[#allocation4 + $0x10] sm:$0xff]  ;;  %v3564_v3 = vld [vmem:[#allocation4 + $0x18] sm:$0xff] }
0x4415   :  { %v10244_v14 = vpop.f32.mrf.mxu0 }
0x4416   :  { %10969 = vtanh.f32 %v3110_v33  ;;  %v9326_v35 = vmul.f32 -1.442695, %v3110_v33  ;;  %v3565_v33 = vld [vmem:[#allocation4 + $0x20] sm:$0xff]  ;;  %v3566_v14 = vld [vmem:[#allocation4 + $0x28] sm:$0xff] }
0x4418   :  { %10971 = vpow2.f32 %v9326_v35  ;;  %v3568_v35 = vld [vmem:[#allocation4 + $0x38] sm:$0xff] }
0x4423   :  { %v10970_v34 = vpop.eup %10969 }
0x4424   :  { %3120 = vrot.lane.b32.xlu0 %v10970_v34, %s11270_s26  ;;  %v3567_v34 = vld [vmem:[#allocation4 + $0x30] sm:$0xff] }
0x4425   :  { %v10972_v36 = vpop.eup %10971 }
0x4426   :  { %v3114_v2 = vadd.f32 1.0, %v10972_v36  ;;  %v3569_v36 = vld [vmem:[#allocation4 + $0x40] sm:$0xff] }
0x4428   :  { %10973 = vrcp.f32 %v3114_v2  ;;  %v3570_v2 = vld [vmem:[#allocation4 + $0x48] sm:$0xff] }
0x4435   :  { %v10974_v5 = vpop.eup %10973 }
0x4436   :  { %v3118_v63 = vmul.f32 %v10974_v5, %v3023_v16 }
0x4496   :  { %v3121_v37 = vpop.permute.xlu0 %3120 }
0x4497   :  { %v3123_v38 = vmul.f32 %v10974_v5, %v3121_v37  ;;  %v3572_v37 = vld [vmem:[#allocation4 + $0x58] sm:$0xff] }
0x4499   :  { %3125 = vrot.lane.b32.xlu1 %v3123_v38, %s11271_s27  ;;  %v3573_v38 = vld [vmem:[#allocation4 + $0x60] sm:$0xff] }
0x450b   :  { %v3126_v13 = vpop.permute.xlu1 %3125 }
0x450c   :  { %v3128_v15 = vadd.f32 %v3126_v13, %v3118_v63  ;;  %v3574_v63 = vld [vmem:[#allocation4 + $0x68] sm:$0xff]  ;;  %v3575_v13 = vld [vmem:[#allocation4 + $0x70] sm:$0xff] }
0x450e   :  { %10975 = vtanh.f32 %v3128_v15 }
0x451b   :  { %v10976_v56 = vpop.eup %10975 }
0x451c   :  { %3131 = vrot.lane.b32.xlu0 %v10976_v56, %s11270_s26  ;;  %v3577_v56 = vld [vmem:[#allocation4 + $0x80] sm:$0xff] }
0x458e   :  { %v3132_v29 = vpop.permute.xlu0 %3131 }
0x458f   :  { %v3134_v39 = vmul.f32 %v10974_v5, %v3132_v29  ;;  %v3571_v5 = vld [vmem:[#allocation4 + $0x50] sm:$0xff]  ;;  %v3578_v29 = vld [vmem:[#allocation4 + $0x88] sm:$0xff] }
0x4591   :  { %3136 = vrot.lane.b32.xlu1 %v3134_v39, %s11271_s27  ;;  %v3579_v39 = vld [vmem:[#allocation4 + $0x90] sm:$0xff] }
0x4603   :  { %v3137_v4 = vpop.permute.xlu1 %3136 }
0x4604   :  { %3140 = vst.msk [vmem:[#allocation4 + $0xc8] sm:$0xff] %vm412_vm2, %v3137_v4  ;;  %10254 = vmatmul.mubr.msk.f32.vlgmr.msra.gmra.mxu1 %vm412_vm2, %v3137_v4  ;;  %v3580_v4 = vld [vmem:[#allocation4 + $0x98] sm:$0xff] }
0x4605   :  { %10268 = vmatpush3.msra.mxu1 %v12017_v30  ;;  %10275 = vmatprep.mubr.msk.f32.mxu1 %vm11269_vm0, %v11268_v0 }
0x4606   :  { %10269 = vmatprep.subr.mxu1 %v11268_v0 }
0x4607   :  { %10270 = vmatpush3.msra.mxu1 %v12026_v10 }
0x4608   :  { %10271 = vmatprep.subr.mxu1 %v11268_v0 }
0x4609   :  { %10272 = vmatpush3.msra.mxu1 %v12033_v58 }
0x460a   :  { %10273 = vmatprep.subr.mxu1 %v11268_v0 }
0x460b   :  { %10274 = vmatpush3.msra.mxu1 %v12040_v31 }
0x460c   :  { %10289 = vmatprep.subr.mxu1 %v3594_v25 }
0x46c4   :  { %v3211_v41 = vpop.f32.mrf.mxu1 }
0x46c5   :  { %v3215_v61 = vadd.f32 %v3211_v41, %v359_v7  ;;  %v3581_v7 = vld [vmem:[#allocation4 + $0xa0] sm:$0xff]  ;;  %v3582_v41 = vld [vmem:[#allocation4 + $0xa8] sm:$0xff] }
0x46c6   :  { %v10255_v42 = vpop.f32.mrf.mxu1 }
0x46c7   :  { %10977 = vtanh.f32 %v3215_v61  ;;  %v9328_v8 = vmul.f32 -1.442695, %v3215_v61  ;;  %v3583_v61 = vld [vmem:[#allocation4 + $0xb0] sm:$0xff]  ;;  %v3584_v42 = vld [vmem:[#allocation4 + $0xb8] sm:$0xff] }
0x46c9   :  { %10979 = vpow2.f32 %v9328_v8  ;;  %v3586_v8 = vld [vmem:[#allocation4 + $0xc8] sm:$0xff] }
0x46d4   :  { %v10978_v1 = vpop.eup %10977 }
0x46d5   :  { %3225 = vrot.lane.b32.xlu0 %v10978_v1, %s11270_s26  ;;  %v3585_v1 = vld [vmem:[#allocation4 + $0xc0] sm:$0xff] }
0x46d6   :  { %v10980_v43 = vpop.eup %10979 }
0x46d7   :  { %v3219_v44 = vadd.f32 1.0, %v10980_v43 }
0x46d9   :  { %10981 = vrcp.f32 %v3219_v44 }
0x46e6   :  { %v10982_v59 = vpop.eup %10981 }
0x46e7   :  { %v3223_v46 = vmul.f32 %v10982_v59, %v3128_v15  ;;  %v3576_v15 = vld [vmem:[#allocation4 + $0x78] sm:$0xff] }
0x4747   :  { %v3226_v45 = vpop.permute.xlu0 %3225 }
0x4748   :  { %v3228_v11 = vmul.f32 %v10982_v59, %v3226_v45 }
0x474a   :  { %3230 = vrot.lane.b32.xlu1 %v3228_v11, %s11271_s27 }
0x47bc   :  { %v3231_v47 = vpop.permute.xlu1 %3230 }
0x47bd   :  { %v3233_v18 = vadd.f32 %v3231_v47, %v3223_v46  ;;  %v12144_v47 = vld [vmem:[%s13021_s6] ss:$0 sm:$0xff] }
0x47bf   :  { %10983 = vtanh.f32 %v3233_v18 }
0x47cc   :  { %v10984_v12 = vpop.eup %10983 }
0x47cd   :  { %3236 = vrot.lane.b32.xlu0 %v10984_v12, %s11270_s26 }
0x483f   :  { %v3237_v48 = vpop.permute.xlu0 %3236 }
0x4840   :  { %v3239_v53 = vmul.f32 %v10982_v59, %v3237_v48  ;;  %v369_v59 = vadd.f32 %v12064_v40, %v11673_v20 }
0x4842   :  { %3241 = vrot.lane.b32.xlu1 %v3239_v53, %s11271_s27 }
0x48b4   :  { %v3242_v62 = vpop.permute.xlu1 %3241 }
0x48b5   :  { %3245 = vst.msk [vmem:[#allocation4 + $0xd0] sm:$0xff] %vm412_vm2, %v3242_v62  ;;  %10265 = vmatmul.mubr.msk.f32.vlgmr.msra.gmra.mxu0 %vm412_vm2, %v3242_v62 }
0x48b6   :  { %10279 = vmatpush3.msra.mxu0 %v12017_v30  ;;  %10286 = vmatprep.mubr.msk.f32.mxu0 %vm11269_vm0, %v11268_v0  ;;  %v3561_v30 = vld [vmem:[#allocation4] sm:$0xff] }
0x48b7   :  { %10280 = vmatprep.subr.mxu0 %v11268_v0 }
0x48b8   :  { %10281 = vmatpush3.msra.mxu0 %v12026_v10  ;;  %v3592_v10 = vld [vmem:[%s13020_s4 + $0x8] sm:$0xff] }
0x48b9   :  { %10282 = vmatprep.subr.mxu0 %v11268_v0 }
0x48ba   :  { %10283 = vmatpush3.msra.mxu0 %v12033_v58  ;;  %v3591_v58 = vld [vmem:[%s13020_s4] sm:$0xff] }
0x48bb   :  { %10284 = vmatprep.subr.mxu0 %v11268_v0 }
0x48bc   :  { %10285 = vmatpush3.msra.mxu0 %v12040_v31  ;;  %v3562_v31 = vld [vmem:[#allocation4 + $0x8] sm:$0xff]  ;;  %v3587_v43 = vld [vmem:[#allocation4 + $0xd0] sm:$0xff] }
0x48bd   :  { %10342 = vmatprep.subr.mxu0 %v11268_v0 }
0x4975   :  { %v3316_v49 = vpop.f32.mrf.mxu0 }
0x4976   :  { %v3320_v55 = vadd.f32 %v3316_v49, %v364_v54 }
0x4977   :  { %v10266_v57 = vpop.f32.mrf.mxu0 }
0x4978   :  { %10985 = vtanh.f32 %v3320_v55  ;;  %v9330_v22 = vmul.f32 -1.442695, %v3320_v55 }
0x497a   :  { %10987 = vpow2.f32 %v9330_v22 }
0x4985   :  { %v10986_v21 = vpop.eup %10985 }
0x4986   :  { %3330 = vrot.lane.b32.xlu0 %v10986_v21, %s11270_s26 }
0x4987   :  { %v10988_v50 = vpop.eup %10987 }
0x4988   :  { %v3324_v23 = vadd.f32 1.0, %v10988_v50 }
0x498a   :  { %10989 = vrcp.f32 %v3324_v23 }
0x4997   :  { %v10990_v51 = vpop.eup %10989 }
0x4998   :  { %v3328_v52 = vmul.f32 %v10990_v51, %v3233_v18 }
0x49f8   :  { %v3331_v24 = vpop.permute.xlu0 %3330 }
0x49f9   :  { %v3333_v6 = vmul.f32 %v10990_v51, %v3331_v24 }
0x49fb   :  { %3335 = vrot.lane.b32.xlu1 %v3333_v6, %s11271_s27 }
0x4a6d   :  { %v3336_v60 = vpop.permute.xlu1 %3335 }
0x4a6e   :  { %v12088_v17 = vadd.f32 %v3336_v60, %v3328_v52 }
0x4a70   :  { %10991 = vtanh.f32 %v12088_v17 }
0x4a7d   :  { %v10992_v16 = vpop.eup %10991 }
0x4a7e   :  { %3341 = vrot.lane.b32.xlu0 %v10992_v16, %s11270_s26 }
0x4af0   :  { %v3342_v26 = vpop.permute.xlu0 %3341 }
0x4af1   :  { %v3344_v27 = vmul.f32 %v10990_v51, %v3342_v26 }
0x4af3   :  { %3346 = vrot.lane.b32.xlu1 %v3344_v27, %s11271_s27 }
0x4b65   :  { %v3347_v9 = vpop.permute.xlu1 %3346 }
0x4b66   :  { %3350 = vst.msk [vmem:[#allocation4 + $0xd8] sm:$0xff] %vm412_vm2, %v3347_v9  ;;  %10276 = vmatmul.mubr.msk.f32.vlgmr.msra.gmra.mxu1 %vm412_vm2, %v3347_v9 }
0x4b67   :  { %10290 = vmatpush3.msra.mxu1 %v3594_v25  ;;  %10297 = vmatprep.mubr.msk.f32.mxu1 %vm412_vm2, %v3561_v30 }
0x4b68   :  { %10291 = vmatprep.subr.mxu1 %v3593_v28 }
0x4b69   :  { %10292 = vmatpush3.msra.mxu1 %v3593_v28 }
0x4b6a   :  { %10293 = vmatprep.subr.mxu1 %v3592_v10 }
0x4b6b   :  { %10294 = vmatpush3.msra.mxu1 %v3592_v10 }
0x4b6c   :  { %10295 = vmatprep.subr.mxu1 %v3591_v58 }
0x4b6d   :  { %10296 = vmatpush3.msra.mxu1 %v3591_v58  ;;  %v3588_v44 = vld [vmem:[#allocation4 + $0xd8] sm:$0xff] }
0x4b6e   :  { %10298 = vmatmul.mubr.msk.f32.vlgmr.msra.gmra.mxu1 %vm412_vm2, %v3562_v31  ;;  %10447 = vmatprep.subr.mxu1 %v11268_v0 }
0x4b6f   :  { %10300 = vmatprep.mubr.msk.f32.mxu1 %vm412_vm2, %v3563_v32 }
0x4b72   :  { %10301 = vmatmul.mubr.msk.f32.gmra.mxu1 %vm412_vm2, %v3564_v3 }
0x4b73   :  { %10303 = vmatprep.mubr.msk.f32.mxu1 %vm412_vm2, %v3565_v33 }
0x4b76   :  { %10304 = vmatmul.mubr.msk.f32.gmra.mxu1 %vm412_vm2, %v3566_v14 }
0x4b77   :  { %10306 = vmatprep.mubr.msk.f32.mxu1 %vm412_vm2, %v3567_v34 }
0x4b7a   :  { %10307 = vmatmul.mubr.msk.f32.gmra.mxu1 %vm412_vm2, %v3568_v35 }
0x4b7b   :  { %10309 = vmatprep.mubr.msk.f32.mxu1 %vm412_vm2, %v3569_v36 }
0x4b7e   :  { %10310 = vmatmul.mubr.msk.f32.gmra.mxu1 %vm412_vm2, %v3570_v2 }
0x4b7f   :  { %10312 = vmatprep.mubr.msk.f32.mxu1 %vm412_vm2, %v3571_v5 }
0x4b82   :  { %10313 = vmatmul.mubr.msk.f32.gmra.mxu1 %vm412_vm2, %v3572_v37 }
0x4b83   :  { %10315 = vmatprep.mubr.msk.f32.mxu1 %vm412_vm2, %v3573_v38 }
0x4b86   :  { %10316 = vmatmul.mubr.msk.f32.gmra.mxu1 %vm412_vm2, %v3574_v63 }
0x4b87   :  { %10318 = vmatprep.mubr.msk.f32.mxu1 %vm412_vm2, %v3575_v13 }
0x4b8a   :  { %10319 = vmatmul.mubr.msk.f32.gmra.mxu1 %vm412_vm2, %v3576_v15 }
0x4b8b   :  { %10321 = vmatprep.mubr.msk.f32.mxu1 %vm412_vm2, %v3577_v56 }
0x4b8e   :  { %10322 = vmatmul.mubr.msk.f32.gmra.mxu1 %vm412_vm2, %v3578_v29 }
0x4b8f   :  { %10324 = vmatprep.mubr.msk.f32.mxu1 %vm412_vm2, %v3579_v39 }
0x4b92   :  { %10325 = vmatmul.mubr.msk.f32.gmra.mxu1 %vm412_vm2, %v3580_v4 }
0x4b93   :  { %10327 = vmatprep.mubr.msk.f32.mxu1 %vm412_vm2, %v3581_v7 }
0x4b96   :  { %10328 = vmatmul.mubr.msk.f32.gmra.mxu1 %vm412_vm2, %v3582_v41 }
0x4b97   :  { %10330 = vmatprep.mubr.msk.f32.mxu1 %vm412_vm2, %v3583_v61 }
0x4b9a   :  { %10331 = vmatmul.mubr.msk.f32.gmra.mxu1 %vm412_vm2, %v3584_v42 }
0x4b9b   :  { %10333 = vmatprep.mubr.msk.f32.mxu1 %vm412_vm2, %v3585_v1 }
0x4b9e   :  { %10334 = vmatmul.mubr.msk.f32.gmra.mxu1 %vm412_vm2, %v3586_v8 }
0x4b9f   :  { %10336 = vmatprep.mubr.msk.f32.mxu1 %vm412_vm2, %v3587_v43 }
0x4ba2   :  { %10337 = vmatmul.mubr.msk.f32.gmra.mxu1 %vm412_vm2, %v3588_v44 }
0x4c26   :  { %v3421_v45 = vpop.f32.mrf.mxu1 }
0x4c27   :  { %v12138_v11 = vadd.f32 %v3421_v45, %v369_v59 }
0x4c28   :  { %v10277_v46 = vpop.f32.mrf.mxu1 }
0x4c29   :  { %10993 = vtanh.f32 %v12138_v11  ;;  %v9332_v46 = vmul.f32 -1.442695, %v12138_v11 }
0x4c2b   :  { %10995 = vpow2.f32 %v9332_v46 }
0x4c2e   :  { %v10299_v18 = vpop.f32.mrf.mxu1 }
0x4c2f   :  { %v3764_v12 = vadd.f32 %v10299_v18, %v12144_v47 }
0x4c30   :  { %v3758_v48 = vpop.f32.mrf.mxu1 }
0x4c31   :  { %3909 = vst.msk [vmem:[#allocation3 + $0x8] sm:$0xff] %vm3907_vm3, %v3764_v12  ;;  %v3759_v20 = vadd.f32 %v12144_v47, %v3758_v48 }
0x4c32   :  { %v10302_v53 = vpop.f32.mrf.mxu1 }
0x4c33   :  { %3908 = vst.msk [vmem:[#allocation3] sm:$0xff] %vm3907_vm3, %v3759_v20  ;;  %v3774_v62 = vadd.f32 %v10302_v53, %v12144_v47 }
0x4c34   :  { %v3768_v54 = vpop.f32.mrf.mxu1 }
0x4c35   :  { %3911 = vst.msk [vmem:[#allocation3 + $0x18] sm:$0xff] %vm3907_vm3, %v3774_v62  ;;  %v3769_v49 = vadd.f32 %v12144_v47, %v3768_v54 }
0x4c36   :  { %v10994_v55 = vpop.eup %10993  ;;  %v10305_v57 = vpop.f32.mrf.mxu1 }
0x4c37   :  { %3910 = vst.msk [vmem:[#allocation3 + $0x10] sm:$0xff] %vm3907_vm3, %v3769_v49  ;;  %v3784_v21 = vadd.f32 %v10305_v57, %v12144_v47  ;;  %3435 = vrot.lane.b32.xlu0 %v10994_v55, %s11270_s26  ;;  %v12214_v57 = vld [vmem:[%s13022_s5 + $0x8] sm:$0xff] }
0x4c38   :  { %v3778_v22 = vpop.f32.mrf.mxu1  ;;  %v10996_v18 = vpop.eup %10995 }
0x4c39   :  { %3913 = vst.msk [vmem:[#allocation3 + $0x28] sm:$0xff] %vm3907_vm3, %v3784_v21  ;;  %v3779_v50 = vadd.f32 %v12144_v47, %v3778_v22  ;;  %v3429_v12 = vadd.f32 1.0, %v10996_v18 }
0x4c3a   :  { %v10308_v23 = vpop.f32.mrf.mxu1 }
0x4c3b   :  { %3912 = vst.msk [vmem:[#allocation3 + $0x20] sm:$0xff] %vm3907_vm3, %v3779_v50  ;;  %v3794_v51 = vadd.f32 %v10308_v23, %v12144_v47  ;;  %10997 = vrcp.f32 %v3429_v12  ;;  %v374_v50 = vadd.f32 %v12064_v40, %v11671_v19 }
0x4c3c   :  { %v3788_v24 = vpop.f32.mrf.mxu1 }
0x4c3d   :  { %3915 = vst.msk [vmem:[#allocation3 + $0x38] sm:$0xff] %vm3907_vm3, %v3794_v51  ;;  %v3789_v6 = vadd.f32 %v12144_v47, %v3788_v24 }
0x4c3e   :  { %v10311_v52 = vpop.f32.mrf.mxu1  ;;  %v4291_v12 = vld [vmem:[#allocation3 + $0x10] sm:$0xff] }
0x4c3f   :  { %3914 = vst.msk [vmem:[#allocation3 + $0x30] sm:$0xff] %vm3907_vm3, %v3789_v6  ;;  %v3804_v60 = vadd.f32 %v10311_v52, %v12144_v47  ;;  %v3940_v6 = vld [vmem:[#allocation3] sm:$0xff] }
0x4c40   :  { %v3798_v25 = vpop.f32.mrf.mxu1 }
0x4c41   :  { %3917 = vst.msk [vmem:[#allocation3 + $0x48] sm:$0xff] %vm3907_vm3, %v3804_v60  ;;  %v3799_v16 = vadd.f32 %v12144_v47, %v3798_v25 }
0x4c42   :  { %v10314_v26 = vpop.f32.mrf.mxu1 }
0x4c43   :  { %3916 = vst.msk [vmem:[#allocation3 + $0x40] sm:$0xff] %vm3907_vm3, %v3799_v16  ;;  %v3814_v27 = vadd.f32 %v10314_v26, %v12144_v47 }
0x4c44   :  { %v3808_v9 = vpop.f32.mrf.mxu1 }
0x4c45   :  { %3919 = vst.msk [vmem:[#allocation3 + $0x58] sm:$0xff] %vm3907_vm3, %v3814_v27  ;;  %v3809_v28 = vadd.f32 %v12144_v47, %v3808_v9 }
0x4c46   :  { %v10317_v30 = vpop.f32.mrf.mxu1 }
0x4c47   :  { %3918 = vst.msk [vmem:[#allocation3 + $0x50] sm:$0xff] %vm3907_vm3, %v3809_v28  ;;  %v3824_v10 = vadd.f32 %v10317_v30, %v12144_v47 }
0x4c48   :  { %v3818_v58 = vpop.f32.mrf.mxu1  ;;  %v10998_v48 = vpop.eup %10997 }
0x4c49   :  { %3921 = vst.msk [vmem:[#allocation3 + $0x68] sm:$0xff] %vm3907_vm3, %v3824_v10  ;;  %v3819_v31 = vadd.f32 %v12144_v47, %v3818_v58  ;;  %v3433_v62 = vmul.f32 %v10998_v48, %v12088_v17  ;;  %v12221_v17 = vld [vmem:[%s13022_s5] sm:$0xff] }
0x4c4a   :  { %v10320_v32 = vpop.f32.mrf.mxu1 }
0x4c4b   :  { %3920 = vst.msk [vmem:[#allocation3 + $0x60] sm:$0xff] %vm3907_vm3, %v3819_v31  ;;  %v3834_v3 = vadd.f32 %v10320_v32, %v12144_v47 }
0x4c4c   :  { %v3828_v33 = vpop.f32.mrf.mxu1 }
0x4c4d   :  { %3923 = vst.msk [vmem:[#allocation3 + $0x78] sm:$0xff] %vm3907_vm3, %v3834_v3  ;;  %v3829_v14 = vadd.f32 %v12144_v47, %v3828_v33 }
0x4c4e   :  { %v10323_v34 = vpop.f32.mrf.mxu1 }
0x4c4f   :  { %3922 = vst.msk [vmem:[#allocation3 + $0x70] sm:$0xff] %vm3907_vm3, %v3829_v14  ;;  %v3844_v35 = vadd.f32 %v10323_v34, %v12144_v47  ;;  %v4041_v14 = vld [vmem:[#allocation3 + $0x8] sm:$0xff] }
0x4c50   :  { %v3838_v36 = vpop.f32.mrf.mxu1 }
0x4c51   :  { %3925 = vst.msk [vmem:[#allocation3 + $0x88] sm:$0xff] %vm3907_vm3, %v3844_v35  ;;  %v3839_v2 = vadd.f32 %v12144_v47, %v3838_v36 }
0x4c52   :  { %v10326_v5 = vpop.f32.mrf.mxu1 }
0x4c53   :  { %3924 = vst.msk [vmem:[#allocation3 + $0x80] sm:$0xff] %vm3907_vm3, %v3839_v2  ;;  %v3854_v37 = vadd.f32 %v10326_v5, %v12144_v47 }
0x4c54   :  { %v3848_v38 = vpop.f32.mrf.mxu1 }
0x4c55   :  { %3927 = vst.msk [vmem:[#allocation3 + $0x98] sm:$0xff] %vm3907_vm3, %v3854_v37  ;;  %v3849_v63 = vadd.f32 %v12144_v47, %v3848_v38 }
0x4c56   :  { %v10329_v13 = vpop.f32.mrf.mxu1 }
0x4c57   :  { %3926 = vst.msk [vmem:[#allocation3 + $0x90] sm:$0xff] %vm3907_vm3, %v3849_v63  ;;  %v3864_v15 = vadd.f32 %v10329_v13, %v12144_v47 }
0x4c58   :  { %v3858_v56 = vpop.f32.mrf.mxu1 }
0x4c59   :  { %3929 = vst.msk [vmem:[#allocation3 + $0xa8] sm:$0xff] %vm3907_vm3, %v3864_v15  ;;  %v3859_v29 = vadd.f32 %v12144_v47, %v3858_v56 }
0x4c5a   :  { %v10332_v39 = vpop.f32.mrf.mxu1 }
0x4c5b   :  { %3928 = vst.msk [vmem:[#allocation3 + $0xa0] sm:$0xff] %vm3907_vm3, %v3859_v29  ;;  %v3874_v4 = vadd.f32 %v10332_v39, %v12144_v47 }
0x4c5c   :  { %v3868_v7 = vpop.f32.mrf.mxu1 }
0x4c5d   :  { %3931 = vst.msk [vmem:[#allocation3 + $0xb8] sm:$0xff] %vm3907_vm3, %v3874_v4  ;;  %v3869_v41 = vadd.f32 %v12144_v47, %v3868_v7  ;;  %v9370_v4 = vld [vmem:[%s13023_s7 + $0x18] sm:$0xff]  ;;  %v9369_v7 = vld [vmem:[%s13023_s7 + $0x10] sm:$0xff] }
0x4c5e   :  { %v10335_v61 = vpop.f32.mrf.mxu1 }
0x4c5f   :  { %3930 = vst.msk [vmem:[#allocation3 + $0xb0] sm:$0xff] %vm3907_vm3, %v3869_v41  ;;  %v3884_v42 = vadd.f32 %v10335_v61, %v12144_v47 }
0x4c60   :  { %v3878_v1 = vpop.f32.mrf.mxu1 }
0x4c61   :  { %3933 = vst.msk [vmem:[#allocation3 + $0xc8] sm:$0xff] %vm3907_vm3, %v3884_v42  ;;  %v3879_v8 = vadd.f32 %v12144_v47, %v3878_v1  ;;  %v4039_v1 = vld [vmem:[%s13023_s7 + $0x8] sm:$0xff] }
0x4c62   :  { %v10338_v43 = vpop.f32.mrf.mxu1 }
0x4c63   :  { %3932 = vst.msk [vmem:[#allocation3 + $0xc0] sm:$0xff] %vm3907_vm3, %v3879_v8  ;;  %v3894_v44 = vadd.f32 %v10338_v43, %v12144_v47  ;;  %v4038_v43 = vld [vmem:[%s13023_s7] sm:$0xff] }
0x4c64   :  { %v3888_v59 = vpop.f32.mrf.mxu1 }
0x4c65   :  { %3935 = vst.msk [vmem:[#allocation3 + $0xd8] sm:$0xff] %vm3907_vm3, %v3894_v44  ;;  %v3889_v45 = vadd.f32 %v12144_v47, %v3888_v59 }
0x4c67   :  { %3934 = vst.msk [vmem:[#allocation3 + $0xd0] sm:$0xff] %vm3907_vm3, %v3889_v45 }
0x4ca9   :  { %v3436_v20 = vpop.permute.xlu0 %3435 }
0x4caa   :  { %v3438_v53 = vmul.f32 %v10998_v48, %v3436_v20 }
0x4cac   :  { %3440 = vrot.lane.b32.xlu1 %v3438_v53, %s11271_s27 }
0x4d1e   :  { %v3441_v54 = vpop.permute.xlu1 %3440 }
0x4d1f   :  { %v12206_v49 = vadd.f32 %v3441_v54, %v3433_v62 }
0x4d21   :  { %10999 = vtanh.f32 %v12206_v49 }
0x4d2e   :  { %v11000_v47 = vpop.eup %10999 }
0x4d2f   :  { %3446 = vrot.lane.b32.xlu0 %v11000_v47, %s11270_s26 }
0x4da1   :  { %v3447_v11 = vpop.permute.xlu0 %3446 }
0x4da2   :  { %v3449_v55 = vmul.f32 %v10998_v48, %v3447_v11 }
0x4da4   :  { %3451 = vrot.lane.b32.xlu1 %v3449_v55, %s11271_s27 }
0x4e16   :  { %v3452_v21 = vpop.permute.xlu1 %3451 }
0x4e17   :  { %3455 = vst.msk [vmem:[#allocation4 + $0xe0] sm:$0xff] %vm412_vm2, %v3452_v21  ;;  %10287 = vmatmul.mubr.msk.f32.vlgmr.msra.gmra.mxu0 %vm412_vm2, %v3452_v21 }
0x4e18   :  { %10343 = vmatpush3.msra.mxu0 %v12214_v57  ;;  %10346 = vmatprep.mubr.msk.f32.mxu0 %vm11269_vm0, %v11268_v0 }
0x4e19   :  { %10344 = vmatprep.subr.mxu0 %v11268_v0 }
0x4e1a   :  { %10345 = vmatpush3.msra.mxu0 %v12221_v17 }
0x4e1b   :  { %10347 = vmatmul.mubr.f32.vlgmr.msra.gmra.mxu0 %v11268_v0  ;;  %10349 = vmatprep.subr.mxu0 %v11268_v0 }
0x4e1c   :  { %10350 = vmatpush3.msra.mxu0 %v12214_v57  ;;  %10353 = vmatprep.mubr.msk.f32.mxu0 %vm11269_vm0, %v11268_v0 }
0x4e1d   :  { %10351 = vmatprep.subr.mxu0 %v11268_v0 }
0x4e1e   :  { %v3589_v22 = vld [vmem:[#allocation4 + $0xe0] sm:$0xff]  ;;  %10352 = vmatpush3.msra.mxu0 %v12221_v17 }
0x4e1f   :  { %10339 = vmatprep.mubr.msk.f32.mxu1 %vm412_vm2, %v3589_v22  ;;  %10356 = vmatprep.subr.mxu0 %v11268_v0 }
0x4ed7   :  { %v3526_v23 = vpop.f32.mrf.mxu0 }
0x4ed8   :  { %v12239_v51 = vadd.f32 %v3526_v23, %v374_v50 }
0x4ed9   :  { %v10288_v24 = vpop.f32.mrf.mxu0 }
0x4edb   :  { %v4009_v52 = vpop.f32.mrf.mxu0 }
0x4edc   :  { %v4013_v60 = vadd.f32 %v4009_v52, %v3940_v6  ;;  %v9376_v6 = vld [vmem:[%s13023_s7 + $0x28] sm:$0xff]  ;;  %v9375_v52 = vld [vmem:[%s13023_s7 + $0x20] sm:$0xff] }
0x4edd   :  { %v10348_v25 = vpop.f32.mrf.mxu0 }
0x4ede   :  { %11001 = vtanh.f32 %v4013_v60  ;;  %v9366_v26 = vmul.f32 -1.442695, %v4013_v60 }
0x4ee0   :  { %11003 = vpow2.f32 %v9366_v26 }
0x4eeb   :  { %v11002_v16 = vpop.eup %11001 }
0x4eec   :  { %4023 = vrot.lane.b32.xlu0 %v11002_v16, %s11272_s12 }
0x4eed   :  { %v11004_v27 = vpop.eup %11003 }
0x4eee   :  { %v4017_v9 = vadd.f32 1.0, %v11004_v27 }
0x4ef0   :  { %11005 = vrcp.f32 %v4017_v9 }
0x4efd   :  { %v11006_v28 = vpop.eup %11005 }
0x4efe   :  { %v4021_v30 = vmul.f32 0.0, %v11006_v28 }
0x4f5e   :  { %v4024_v19 = vpop.permute.xlu0 %4023 }
0x4f5f   :  { %v4026_v40 = vmul.f32 %v11006_v28, %v4024_v19  ;;  %v4467_v19 = vld [vmem:[#allocation3 + $0x18] sm:$0xff] }
0x4f61   :  { %4028 = vrot.lane.b32.xlu1 %v4026_v40, %s11273_s13 }
0x4fd3   :  { %v4029_v10 = vpop.permute.xlu1 %4028 }
0x4fd4   :  { %v4031_v58 = vadd.f32 %v4029_v10, %v4021_v30 }
0x4fd6   :  { %11007 = vtanh.f32 %v4031_v58 }
0x4fe3   :  { %v11008_v31 = vpop.eup %11007 }
0x4fe4   :  { %4034 = vrot.lane.b32.xlu0 %v11008_v31, %s11271_s27 }
0x5056   :  { %v4035_v32 = vpop.permute.xlu0 %4034 }
0x5057   :  { %v4037_v3 = vmul.f32 %v11006_v28, %v4035_v32 }
0x5059   :  { %4043 = vrot.lane.b32.xlu1 %v4037_v3, %s11274_s14 }
0x50cb   :  { %v4044_v33 = vpop.permute.xlu1 %4043 }
0x50cc   :  { %10354 = vmatmul.mubr.msk.f32.vlgmr.msra.gmra.mxu0 %vm71_vm1, %v4044_v33 }
0x50cd   :  { %10360 = vmatprep.mubr.msk.f32.mxu0 %vm11269_vm0, %v11268_v0  ;;  %10357 = vmatpush3.msra.mxu0 %v9370_v4  ;;  %v4643_v4 = vld [vmem:[#allocation3 + $0x20] sm:$0xff] }
0x50ce   :  { %10358 = vmatprep.subr.mxu0 %v11268_v0 }
0x50cf   :  { %10359 = vmatpush3.msra.mxu0 %v9369_v7 }
0x50d0   :  { %10363 = vmatprep.subr.mxu0 %v11268_v0 }
0x518c   :  { %v4113_v34 = vpop.f32.mrf.mxu0 }
0x518d   :  { %v4117_v35 = vadd.f32 %v4113_v34, %v4041_v14 }
0x518e   :  { %v10355_v36 = vpop.f32.mrf.mxu0 }
0x518f   :  { %11009 = vtanh.f32 %v4117_v35  ;;  %v9368_v5 = vmul.f32 -1.442695, %v4117_v35 }
0x5191   :  { %11011 = vpow2.f32 %v9368_v5  ;;  %v9381_v5 = vld [vmem:[%s13023_s7 + $0x38] sm:$0xff] }
0x519c   :  { %v11010_v2 = vpop.eup %11009 }
0x519d   :  { %4127 = vrot.lane.b32.xlu0 %v11010_v2, %s11272_s12 }
0x519e   :  { %v11012_v37 = vpop.eup %11011 }
0x519f   :  { %v4121_v38 = vadd.f32 1.0, %v11012_v37  ;;  %v9380_v37 = vld [vmem:[%s13023_s7 + $0x30] sm:$0xff] }
0x51a1   :  { %11013 = vrcp.f32 %v4121_v38 }
0x51ae   :  { %v11014_v63 = vpop.eup %11013 }
0x51af   :  { %v4125_v56 = vmul.f32 %v11014_v63, %v4031_v58 }
0x520f   :  { %v4128_v13 = vpop.permute.xlu0 %4127 }
0x5210   :  { %v4130_v15 = vmul.f32 %v11014_v63, %v4128_v13 }
0x5212   :  { %4132 = vrot.lane.b32.xlu1 %v4130_v15, %s11273_s13 }
0x5284   :  { %v4133_v29 = vpop.permute.xlu1 %4132 }
0x5285   :  { %v4135_v39 = vadd.f32 %v4133_v29, %v4125_v56 }
0x5287   :  { %11015 = vtanh.f32 %v4135_v39 }
0x5294   :  { %v11016_v41 = vpop.eup %11015 }
0x5295   :  { %4138 = vrot.lane.b32.xlu0 %v11016_v41, %s11271_s27 }
0x5307   :  { %v4139_v61 = vpop.permute.xlu0 %4138 }
0x5308   :  { %v4141_v42 = vmul.f32 %v11014_v63, %v4139_v61 }
0x530a   :  { %4146 = vrot.lane.b32.xlu1 %v4141_v42, %s11274_s14 }
0x537c   :  { %v4147_v8 = vpop.permute.xlu1 %4146 }
0x537d   :  { %10361 = vmatmul.mubr.msk.f32.vlgmr.msra.gmra.mxu0 %vm71_vm1, %v4147_v8 }
0x537e   :  { %10364 = vmatpush3.msra.mxu0 %v4039_v1  ;;  %10367 = vmatprep.mubr.msk.f32.mxu0 %vm11269_vm0, %v11268_v0 }
0x537f   :  { %10365 = vmatprep.subr.mxu0 %v11268_v0 }
0x5380   :  { %10366 = vmatpush3.msra.mxu0 %v4038_v43 }
0x5381   :  { %10370 = vmatprep.subr.mxu0 %v11268_v0  ;;  %10368 = vmatmul.mubr.msk.f32.vlgmr.msra.gmra.mxu0 %vm71_vm1, %v4044_v33 }
0x5382   :  { %10371 = vmatpush3.msra.mxu0 %v12214_v57  ;;  %10374 = vmatprep.mubr.msk.f32.mxu0 %vm11269_vm0, %v11268_v0 }
0x5383   :  { %10372 = vmatprep.subr.mxu0 %v11268_v0 }
0x5384   :  { %10373 = vmatpush3.msra.mxu0 %v12221_v17 }
0x5385   :  { %10375 = vmatmul.mubr.msk.f32.vlgmr.msra.gmra.mxu0 %vm71_vm1, %v4147_v8  ;;  %10377 = vmatprep.subr.mxu0 %v11268_v0 }
0x5386   :  { %10381 = vmatprep.mubr.msk.f32.mxu0 %vm11269_vm0, %v11268_v0  ;;  %10378 = vmatpush3.msra.mxu0 %v9376_v6 }
0x5387   :  { %10379 = vmatprep.subr.mxu0 %v11268_v0 }
0x5388   :  { %10380 = vmatpush3.msra.mxu0 %v9375_v52 }
0x5389   :  { %10384 = vmatprep.subr.mxu0 %v11268_v0 }
0x543d   :  { %v4216_v44 = vpop.f32.mrf.mxu0 }
0x543f   :  { %v10362_v59 = vpop.f32.mrf.mxu0 }
0x5441   :  { %v4286_v45 = vpop.f32.mrf.mxu0 }
0x5442   :  { %v4287_v46 = vadd.f32 %v4286_v45, %v4216_v44 }
0x5443   :  { %v10369_v18 = vpop.f32.mrf.mxu0 }
0x5445   :  { %v4358_v48 = vpop.f32.mrf.mxu0 }
0x5446   :  { %v4362_v20 = vadd.f32 %v4358_v48, %v4291_v12  ;;  %v9386_v48 = vld [vmem:[%s13023_s7 + $0x48] sm:$0xff] }
0x5447   :  { %v10376_v53 = vpop.f32.mrf.mxu0 }
0x5448   :  { %11017 = vtanh.f32 %v4362_v20  ;;  %v9374_v54 = vmul.f32 -1.442695, %v4362_v20  ;;  %v9385_v20 = vld [vmem:[%s13023_s7 + $0x40] sm:$0xff] }
0x544a   :  { %11019 = vpow2.f32 %v9374_v54 }
0x5455   :  { %v11018_v62 = vpop.eup %11017 }
0x5456   :  { %4372 = vrot.lane.b32.xlu0 %v11018_v62, %s11272_s12 }
0x5457   :  { %v11020_v47 = vpop.eup %11019 }
0x5458   :  { %v4366_v11 = vadd.f32 1.0, %v11020_v47 }
0x545a   :  { %11021 = vrcp.f32 %v4366_v11 }
0x5467   :  { %v11022_v55 = vpop.eup %11021 }
0x5468   :  { %v4370_v50 = vmul.f32 %v11022_v55, %v4135_v39 }
0x54c8   :  { %v4373_v21 = vpop.permute.xlu0 %4372 }
0x54c9   :  { %v4375_v22 = vmul.f32 %v11022_v55, %v4373_v21 }
0x54cb   :  { %4377 = vrot.lane.b32.xlu1 %v4375_v22, %s11273_s13  ;;  %v4819_v22 = vld [vmem:[#allocation3 + $0x28] sm:$0xff] }
0x553d   :  { %v4378_v23 = vpop.permute.xlu1 %4377 }
0x553e   :  { %v4380_v24 = vadd.f32 %v4378_v23, %v4370_v50 }
0x5540   :  { %11023 = vtanh.f32 %v4380_v24 }
0x554d   :  { %v11024_v60 = vpop.eup %11023 }
0x554e   :  { %4383 = vrot.lane.b32.xlu0 %v11024_v60, %s11271_s27 }
0x55c0   :  { %v4384_v25 = vpop.permute.xlu0 %4383 }
0x55c1   :  { %v4386_v16 = vmul.f32 %v11022_v55, %v4384_v25 }
0x55c3   :  { %4391 = vrot.lane.b32.xlu1 %v4386_v16, %s11274_s14 }
0x5635   :  { %v4392_v26 = vpop.permute.xlu1 %4391 }
0x5636   :  { %10382 = vmatmul.mubr.msk.f32.vlgmr.msra.gmra.mxu0 %vm71_vm1, %v4392_v26 }
0x5637   :  { %10385 = vmatpush3.msra.mxu0 %v12214_v57  ;;  %10388 = vmatprep.mubr.msk.f32.mxu0 %vm11269_vm0, %v11268_v0 }
0x5638   :  { %10386 = vmatprep.subr.mxu0 %v11268_v0 }
0x5639   :  { %10387 = vmatpush3.msra.mxu0 %v12221_v17 }
0x563a   :  { %10389 = vmatmul.mubr.msk.f32.vlgmr.msra.gmra.mxu0 %vm71_vm1, %v4392_v26  ;;  %10391 = vmatprep.subr.mxu0 %v11268_v0 }
0x563b   :  { %10395 = vmatprep.mubr.msk.f32.mxu0 %vm11269_vm0, %v11268_v0  ;;  %10392 = vmatpush3.msra.mxu0 %v9381_v5 }
0x563c   :  { %10393 = vmatprep.subr.mxu0 %v11268_v0 }
0x563d   :  { %10394 = vmatpush3.msra.mxu0 %v9380_v37 }
0x563e   :  { %10398 = vmatprep.subr.mxu0 %v11268_v0 }
0x56f6   :  { %v4461_v27 = vpop.f32.mrf.mxu0 }
0x56f7   :  { %v4465_v9 = vadd.f32 %v4461_v27, %v4287_v46 }
0x56f8   :  { %v10383_v28 = vpop.f32.mrf.mxu0 }
0x56fa   :  { %v4534_v40 = vpop.f32.mrf.mxu0 }
0x56fb   :  { %v4538_v30 = vadd.f32 %v4534_v40, %v4467_v19  ;;  %v9391_v40 = vld [vmem:[%s13023_s7 + $0x58] sm:$0xff] }
0x56fc   :  { %v10390_v10 = vpop.f32.mrf.mxu0 }
0x56fd   :  { %11025 = vtanh.f32 %v4538_v30  ;;  %v9379_v31 = vmul.f32 -1.442695, %v4538_v30  ;;  %v9390_v30 = vld [vmem:[%s13023_s7 + $0x50] sm:$0xff] }
0x56ff   :  { %11027 = vpow2.f32 %v9379_v31 }
0x570a   :  { %v11026_v58 = vpop.eup %11025 }
0x570b   :  { %4548 = vrot.lane.b32.xlu0 %v11026_v58, %s11272_s12 }
0x570c   :  { %v11028_v32 = vpop.eup %11027 }
0x570d   :  { %v4542_v3 = vadd.f32 1.0, %v11028_v32 }
0x570f   :  { %11029 = vrcp.f32 %v4542_v3 }
0x571c   :  { %v11030_v33 = vpop.eup %11029 }
0x571d   :  { %v4546_v35 = vmul.f32 %v11030_v33, %v4380_v24 }
0x577d   :  { %v4549_v14 = vpop.permute.xlu0 %4548 }
0x577e   :  { %v4551_v34 = vmul.f32 %v11030_v33, %v4549_v14 }
0x5780   :  { %4553 = vrot.lane.b32.xlu1 %v4551_v34, %s11273_s13  ;;  %v4995_v34 = vld [vmem:[#allocation3 + $0x30] sm:$0xff] }
0x57f2   :  { %v4554_v36 = vpop.permute.xlu1 %4553 }
0x57f3   :  { %v4556_v2 = vadd.f32 %v4554_v36, %v4546_v35 }
0x57f5   :  { %11031 = vtanh.f32 %v4556_v2 }
0x5802   :  { %v11032_v38 = vpop.eup %11031 }
0x5803   :  { %4559 = vrot.lane.b32.xlu0 %v11032_v38, %s11271_s27 }
0x5875   :  { %v4560_v63 = vpop.permute.xlu0 %4559 }
0x5876   :  { %v4562_v13 = vmul.f32 %v11030_v33, %v4560_v63 }
0x5878   :  { %4567 = vrot.lane.b32.xlu1 %v4562_v13, %s11274_s14 }
0x58ea   :  { %v4568_v15 = vpop.permute.xlu1 %4567 }
0x58eb   :  { %10396 = vmatmul.mubr.msk.f32.vlgmr.msra.gmra.mxu0 %vm71_vm1, %v4568_v15 }
0x58ec   :  { %10399 = vmatpush3.msra.mxu0 %v12214_v57  ;;  %10402 = vmatprep.mubr.msk.f32.mxu0 %vm11269_vm0, %v11268_v0 }
0x58ed   :  { %10400 = vmatprep.subr.mxu0 %v11268_v0 }
0x58ee   :  { %10401 = vmatpush3.msra.mxu0 %v12221_v17 }
0x58ef   :  { %10403 = vmatmul.mubr.msk.f32.vlgmr.msra.gmra.mxu0 %vm71_vm1, %v4568_v15  ;;  %10405 = vmatprep.subr.mxu0 %v11268_v0 }
0x58f0   :  { %10409 = vmatprep.mubr.msk.f32.mxu0 %vm11269_vm0, %v11268_v0  ;;  %10406 = vmatpush3.msra.mxu0 %v9386_v48 }
0x58f1   :  { %10407 = vmatprep.subr.mxu0 %v11268_v0 }
0x58f2   :  { %10408 = vmatpush3.msra.mxu0 %v9385_v20 }
0x58f3   :  { %10412 = vmatprep.subr.mxu0 %v11268_v0 }
0x59ab   :  { %v4637_v56 = vpop.f32.mrf.mxu0 }
0x59ac   :  { %v4641_v29 = vadd.f32 %v4637_v56, %v4465_v9 }
0x59ad   :  { %v10397_v39 = vpop.f32.mrf.mxu0 }
0x59af   :  { %v4710_v7 = vpop.f32.mrf.mxu0 }
0x59b0   :  { %v4714_v41 = vadd.f32 %v4710_v7, %v4643_v4  ;;  %v9396_v7 = vld [vmem:[%s13023_s7 + $0x68] sm:$0xff] }
0x59b1   :  { %v10404_v61 = vpop.f32.mrf.mxu0 }
0x59b2   :  { %11033 = vtanh.f32 %v4714_v41  ;;  %v9384_v1 = vmul.f32 -1.442695, %v4714_v41  ;;  %v9395_v41 = vld [vmem:[%s13023_s7 + $0x60] sm:$0xff] }
0x59b4   :  { %11035 = vpow2.f32 %v9384_v1 }
0x59bf   :  { %v11034_v42 = vpop.eup %11033 }
0x59c0   :  { %4724 = vrot.lane.b32.xlu0 %v11034_v42, %s11272_s12 }
0x59c1   :  { %v11036_v8 = vpop.eup %11035 }
0x59c2   :  { %v4718_v43 = vadd.f32 1.0, %v11036_v8 }
0x59c4   :  { %11037 = vrcp.f32 %v4718_v43 }
0x59d1   :  { %v11038_v44 = vpop.eup %11037 }
0x59d2   :  { %v4722_v46 = vmul.f32 %v11038_v44, %v4556_v2 }
0x5a32   :  { %v4725_v59 = vpop.permute.xlu0 %4724 }
0x5a33   :  { %v4727_v45 = vmul.f32 %v11038_v44, %v4725_v59 }
0x5a35   :  { %4729 = vrot.lane.b32.xlu1 %v4727_v45, %s11273_s13  ;;  %v5171_v45 = vld [vmem:[#allocation3 + $0x38] sm:$0xff] }
0x5aa7   :  { %v4730_v18 = vpop.permute.xlu1 %4729 }
0x5aa8   :  { %v4732_v12 = vadd.f32 %v4730_v18, %v4722_v46 }
0x5aaa   :  { %11039 = vtanh.f32 %v4732_v12 }
0x5ab7   :  { %v11040_v53 = vpop.eup %11039 }
0x5ab8   :  { %4735 = vrot.lane.b32.xlu0 %v11040_v53, %s11271_s27 }
0x5b2a   :  { %v4736_v62 = vpop.permute.xlu0 %4735 }
0x5b2b   :  { %v4738_v54 = vmul.f32 %v11038_v44, %v4736_v62 }
0x5b2d   :  { %4743 = vrot.lane.b32.xlu1 %v4738_v54, %s11274_s14 }
0x5b9f   :  { %v4744_v47 = vpop.permute.xlu1 %4743 }
0x5ba0   :  { %10410 = vmatmul.mubr.msk.f32.vlgmr.msra.gmra.mxu0 %vm71_vm1, %v4744_v47 }
0x5ba1   :  { %10413 = vmatpush3.msra.mxu0 %v12214_v57  ;;  %10416 = vmatprep.mubr.msk.f32.mxu0 %vm11269_vm0, %v11268_v0 }
0x5ba2   :  { %10414 = vmatprep.subr.mxu0 %v11268_v0 }
0x5ba3   :  { %10415 = vmatpush3.msra.mxu0 %v12221_v17 }
0x5ba4   :  { %10417 = vmatmul.mubr.msk.f32.vlgmr.msra.gmra.mxu0 %vm71_vm1, %v4744_v47  ;;  %10419 = vmatprep.subr.mxu0 %v11268_v0 }
0x5ba5   :  { %10423 = vmatprep.mubr.msk.f32.mxu0 %vm11269_vm0, %v11268_v0  ;;  %10420 = vmatpush3.msra.mxu0 %v9391_v40 }
0x5ba6   :  { %10421 = vmatprep.subr.mxu0 %v11268_v0 }
0x5ba7   :  { %10422 = vmatpush3.msra.mxu0 %v9390_v30 }
0x5ba8   :  { %10426 = vmatprep.subr.mxu0 %v11268_v0 }
0x5c60   :  { %v4813_v11 = vpop.f32.mrf.mxu0 }
0x5c61   :  { %v4817_v55 = vadd.f32 %v4813_v11, %v4641_v29 }
0x5c62   :  { %v10411_v21 = vpop.f32.mrf.mxu0 }
0x5c64   :  { %v4886_v50 = vpop.f32.mrf.mxu0 }
0x5c65   :  { %v4890_v23 = vadd.f32 %v4886_v50, %v4819_v22 }
0x5c66   :  { %v10418_v24 = vpop.f32.mrf.mxu0 }
0x5c67   :  { %11041 = vtanh.f32 %v4890_v23  ;;  %v9389_v52 = vmul.f32 -1.442695, %v4890_v23 }
0x5c69   :  { %11043 = vpow2.f32 %v9389_v52  ;;  %v5347_v52 = vld [vmem:[#allocation3 + $0x40] sm:$0xff] }
0x5c74   :  { %v11042_v6 = vpop.eup %11041 }
0x5c75   :  { %4900 = vrot.lane.b32.xlu0 %v11042_v6, %s11272_s12 }
0x5c76   :  { %v11044_v60 = vpop.eup %11043 }
0x5c77   :  { %v4894_v25 = vadd.f32 1.0, %v11044_v60 }
0x5c79   :  { %11045 = vrcp.f32 %v4894_v25 }
0x5c86   :  { %v11046_v16 = vpop.eup %11045 }
0x5c87   :  { %v4898_v9 = vmul.f32 %v11046_v16, %v4732_v12 }
0x5ce7   :  { %v4901_v26 = vpop.permute.xlu0 %4900 }
0x5ce8   :  { %v4903_v27 = vmul.f32 %v11046_v16, %v4901_v26 }
0x5cea   :  { %4905 = vrot.lane.b32.xlu1 %v4903_v27, %s11273_s13 }
0x5d5c   :  { %v4906_v28 = vpop.permute.xlu1 %4905 }
0x5d5d   :  { %v4908_v19 = vadd.f32 %v4906_v28, %v4898_v9 }
0x5d5f   :  { %11047 = vtanh.f32 %v4908_v19 }
0x5d6c   :  { %v11048_v10 = vpop.eup %11047 }
0x5d6d   :  { %4911 = vrot.lane.b32.xlu0 %v11048_v10, %s11271_s27 }
0x5ddf   :  { %v4912_v58 = vpop.permute.xlu0 %4911 }
0x5de0   :  { %v4914_v31 = vmul.f32 %v11046_v16, %v4912_v58 }
0x5de2   :  { %4919 = vrot.lane.b32.xlu1 %v4914_v31, %s11274_s14 }
0x5e54   :  { %v4920_v32 = vpop.permute.xlu1 %4919 }
0x5e55   :  { %10424 = vmatmul.mubr.msk.f32.vlgmr.msra.gmra.mxu0 %vm71_vm1, %v4920_v32 }
0x5e56   :  { %10427 = vmatpush3.msra.mxu0 %v12214_v57  ;;  %10430 = vmatprep.mubr.msk.f32.mxu0 %vm11269_vm0, %v11268_v0 }
0x5e57   :  { %10428 = vmatprep.subr.mxu0 %v11268_v0 }
0x5e58   :  { %10429 = vmatpush3.msra.mxu0 %v12221_v17 }
0x5e59   :  { %10431 = vmatmul.mubr.msk.f32.vlgmr.msra.gmra.mxu0 %vm71_vm1, %v4920_v32  ;;  %10433 = vmatprep.subr.mxu0 %v11268_v0 }
0x5e5a   :  { %10437 = vmatprep.mubr.msk.f32.mxu0 %vm11269_vm0, %v11268_v0  ;;  %10434 = vmatpush3.msra.mxu0 %v9396_v7 }
0x5e5b   :  { %10435 = vmatprep.subr.mxu0 %v11268_v0 }
0x5e5c   :  { %10436 = vmatpush3.msra.mxu0 %v9395_v41 }
0x5e5d   :  { %10440 = vmatprep.subr.mxu0 %v11268_v0 }
0x5f15   :  { %v4989_v3 = vpop.f32.mrf.mxu0 }
0x5f16   :  { %v4993_v33 = vadd.f32 %v4989_v3, %v4817_v55 }
0x5f17   :  { %v10425_v14 = vpop.f32.mrf.mxu0 }
0x5f19   :  { %v5062_v35 = vpop.f32.mrf.mxu0 }
0x5f1a   :  { %v5066_v36 = vadd.f32 %v5062_v35, %v4995_v34  ;;  %v5523_v34 = vld [vmem:[#allocation3 + $0x48] sm:$0xff] }
0x5f1b   :  { %v10432_v2 = vpop.f32.mrf.mxu0 }
0x5f1c   :  { %11049 = vtanh.f32 %v5066_v36  ;;  %v9394_v37 = vmul.f32 -1.442695, %v5066_v36 }
0x5f1e   :  { %11051 = vpow2.f32 %v9394_v37 }
0x5f29   :  { %v11050_v5 = vpop.eup %11049 }
0x5f2a   :  { %5076 = vrot.lane.b32.xlu0 %v11050_v5, %s11272_s12 }
0x5f2b   :  { %v11052_v38 = vpop.eup %11051 }
0x5f2c   :  { %v5070_v63 = vadd.f32 1.0, %v11052_v38 }
0x5f2e   :  { %11053 = vrcp.f32 %v5070_v63 }
0x5f3b   :  { %v11054_v13 = vpop.eup %11053 }
0x5f3c   :  { %v5074_v29 = vmul.f32 %v11054_v13, %v4908_v19 }
0x5f9c   :  { %v5077_v15 = vpop.permute.xlu0 %5076 }
0x5f9d   :  { %v5079_v56 = vmul.f32 %v11054_v13, %v5077_v15 }
0x5f9f   :  { %5081 = vrot.lane.b32.xlu1 %v5079_v56, %s11273_s13 }
0x6011   :  { %v5082_v39 = vpop.permute.xlu1 %5081 }
0x6012   :  { %v5084_v4 = vadd.f32 %v5082_v39, %v5074_v29 }
0x6014   :  { %11055 = vtanh.f32 %v5084_v4 }
0x6021   :  { %v11056_v61 = vpop.eup %11055 }
0x6022   :  { %5087 = vrot.lane.b32.xlu0 %v11056_v61, %s11271_s27 }
0x6094   :  { %v5088_v42 = vpop.permute.xlu0 %5087 }
0x6095   :  { %v5090_v1 = vmul.f32 %v11054_v13, %v5088_v42 }
0x6097   :  { %5095 = vrot.lane.b32.xlu1 %v5090_v1, %s11274_s14  ;;  %v5699_v1 = vld [vmem:[#allocation3 + $0x50] sm:$0xff] }
0x6109   :  { %v5096_v8 = vpop.permute.xlu1 %5095 }
0x610a   :  { %10438 = vmatmul.mubr.msk.f32.vlgmr.msra.gmra.mxu0 %vm71_vm1, %v5096_v8 }
0x610b   :  { %10441 = vmatpush3.msra.mxu0 %v12214_v57  ;;  %10444 = vmatprep.mubr.msk.f32.mxu0 %vm11269_vm0, %v11268_v0 }
0x610c   :  { %10442 = vmatprep.subr.mxu0 %v11268_v0 }
0x610d   :  { %10443 = vmatpush3.msra.mxu0 %v12221_v17 }
0x610e   :  { %10445 = vmatmul.mubr.msk.f32.vlgmr.msra.gmra.mxu0 %vm71_vm1, %v5096_v8  ;;  %10454 = vmatprep.subr.mxu0 %v11268_v0 }
0x610f   :  { %10455 = vmatpush3.msra.mxu0 %v12214_v57  ;;  %10458 = vmatprep.mubr.msk.f32.mxu0 %vm11269_vm0, %v11268_v0 }
0x6110   :  { %10456 = vmatprep.subr.mxu0 %v11268_v0 }
0x6111   :  { %10457 = vmatpush3.msra.mxu0 %v12221_v17 }
0x6112   :  { %10468 = vmatprep.subr.mxu0 %v11268_v0 }
0x61ca   :  { %v5165_v43 = vpop.f32.mrf.mxu0 }
0x61cb   :  { %v12395_v44 = vadd.f32 %v5165_v43, %v4993_v33 }
0x61cc   :  { %v10439_v59 = vpop.f32.mrf.mxu0 }
0x61ce   :  { %v5238_v46 = vpop.f32.mrf.mxu0 }
0x61cf   :  { %v5242_v18 = vadd.f32 %v5238_v46, %v5171_v45 }
0x61d0   :  { %v10446_v12 = vpop.f32.mrf.mxu0 }
0x61d1   :  { %11057 = vtanh.f32 %v5242_v18  ;;  %v9399_v20 = vmul.f32 -1.442695, %v5242_v18 }
0x61d3   :  { %11059 = vpow2.f32 %v9399_v20 }
0x61de   :  { %v11058_v48 = vpop.eup %11057 }
0x61df   :  { %5252 = vrot.lane.b32.xlu0 %v11058_v48, %s11272_s12 }
0x61e0   :  { %v11060_v53 = vpop.eup %11059 }
0x61e1   :  { %v5246_v62 = vadd.f32 1.0, %v11060_v53 }
0x61e3   :  { %11061 = vrcp.f32 %v5246_v62 }
0x61f0   :  { %v11062_v54 = vpop.eup %11061 }
0x61f1   :  { %v5250_v55 = vmul.f32 %v11062_v54, %v5084_v4 }
0x6251   :  { %v5253_v47 = vpop.permute.xlu0 %5252 }
0x6252   :  { %v5255_v11 = vmul.f32 %v11062_v54, %v5253_v47 }
0x6254   :  { %5257 = vrot.lane.b32.xlu1 %v5255_v11, %s11273_s13 }
0x62c6   :  { %v5258_v21 = vpop.permute.xlu1 %5257 }
0x62c7   :  { %v5260_v22 = vadd.f32 %v5258_v21, %v5250_v55 }
0x62c9   :  { %11063 = vtanh.f32 %v5260_v22 }
0x62d6   :  { %v11064_v50 = vpop.eup %11063 }
0x62d7   :  { %5263 = vrot.lane.b32.xlu0 %v11064_v50, %s11271_s27  ;;  %v5875_v50 = vld [vmem:[#allocation3 + $0x58] sm:$0xff] }
0x6349   :  { %v5264_v23 = vpop.permute.xlu0 %5263 }
0x634a   :  { %v5266_v24 = vmul.f32 %v11062_v54, %v5264_v23 }
0x634c   :  { %5271 = vrot.lane.b32.xlu1 %v5266_v24, %s11274_s14 }
0x63be   :  { %v12401_v6 = vpop.permute.xlu1 %5271 }
0x63bf   :  { %10459 = vmatmul.mubr.msk.f32.vlgmr.msra.gmra.mxu0 %vm71_vm1, %v12401_v6 }
0x63c0   :  { %10469 = vmatpush3.msra.mxu0 %v12214_v57  ;;  %10472 = vmatprep.mubr.msk.f32.mxu0 %vm11269_vm0, %v11268_v0 }
0x63c1   :  { %10470 = vmatprep.subr.mxu0 %v11268_v0 }
0x63c2   :  { %10471 = vmatpush3.msra.mxu0 %v12221_v17 }
0x63c3   :  { %10482 = vmatprep.subr.mxu0 %v11268_v0 }
0x647f   :  { %v5414_v60 = vpop.f32.mrf.mxu0 }
0x6480   :  { %v5418_v25 = vadd.f32 %v5414_v60, %v5347_v52 }
0x6481   :  { %v10460_v16 = vpop.f32.mrf.mxu0 }
0x6482   :  { %11065 = vtanh.f32 %v5418_v25  ;;  %v9404_v27 = vmul.f32 -1.442695, %v5418_v25 }
0x6484   :  { %11067 = vpow2.f32 %v9404_v27 }
0x648f   :  { %v11066_v26 = vpop.eup %11065 }
0x6490   :  { %5428 = vrot.lane.b32.xlu0 %v11066_v26, %s11272_s12 }
0x6491   :  { %v11068_v9 = vpop.eup %11067 }
0x6492   :  { %v5422_v28 = vadd.f32 1.0, %v11068_v9 }
0x6494   :  { %11069 = vrcp.f32 %v5422_v28 }
0x64a1   :  { %v11070_v19 = vpop.eup %11069 }
0x64a2   :  { %v5426_v10 = vmul.f32 %v11070_v19, %v5260_v22 }
0x6502   :  { %v5429_v40 = vpop.permute.xlu0 %5428 }
0x6503   :  { %v5431_v30 = vmul.f32 %v11070_v19, %v5429_v40 }
0x6505   :  { %5433 = vrot.lane.b32.xlu1 %v5431_v30, %s11273_s13 }
0x6577   :  { %v5434_v58 = vpop.permute.xlu1 %5433 }
0x6578   :  { %v5436_v31 = vadd.f32 %v5434_v58, %v5426_v10 }
0x657a   :  { %11071 = vtanh.f32 %v5436_v31 }
0x6587   :  { %v11072_v32 = vpop.eup %11071 }
0x6588   :  { %5439 = vrot.lane.b32.xlu0 %v11072_v32, %s11271_s27 }
0x65fa   :  { %v5440_v3 = vpop.permute.xlu0 %5439 }
0x65fb   :  { %v5442_v33 = vmul.f32 %v11070_v19, %v5440_v3  ;;  %v6051_v3 = vld [vmem:[#allocation3 + $0x60] sm:$0xff] }
0x65fd   :  { %5447 = vrot.lane.b32.xlu1 %v5442_v33, %s11274_s14 }
0x666f   :  { %v12415_v14 = vpop.permute.xlu1 %5447 }
0x6670   :  { %10473 = vmatmul.mubr.msk.f32.vlgmr.msra.gmra.mxu0 %vm71_vm1, %v12415_v14 }
0x6671   :  { %10483 = vmatpush3.msra.mxu0 %v12214_v57  ;;  %10486 = vmatprep.mubr.msk.f32.mxu0 %vm11269_vm0, %v11268_v0 }
0x6672   :  { %10484 = vmatprep.subr.mxu0 %v11268_v0 }
0x6673   :  { %10485 = vmatpush3.msra.mxu0 %v12221_v17 }
0x6674   :  { %10496 = vmatprep.subr.mxu0 %v11268_v0 }
0x6730   :  { %v5590_v35 = vpop.f32.mrf.mxu0 }
0x6731   :  { %v5594_v36 = vadd.f32 %v5590_v35, %v5523_v34 }
0x6732   :  { %v10474_v2 = vpop.f32.mrf.mxu0 }
0x6733   :  { %11073 = vtanh.f32 %v5594_v36  ;;  %v9409_v37 = vmul.f32 -1.442695, %v5594_v36 }
0x6735   :  { %11075 = vpow2.f32 %v9409_v37 }
0x6740   :  { %v11074_v5 = vpop.eup %11073 }
0x6741   :  { %5604 = vrot.lane.b32.xlu0 %v11074_v5, %s11272_s12 }
0x6742   :  { %v11076_v38 = vpop.eup %11075 }
0x6743   :  { %v5598_v63 = vadd.f32 1.0, %v11076_v38 }
0x6745   :  { %11077 = vrcp.f32 %v5598_v63 }
0x6752   :  { %v11078_v13 = vpop.eup %11077 }
0x6753   :  { %v5602_v29 = vmul.f32 %v11078_v13, %v5436_v31 }
0x67b3   :  { %v5605_v15 = vpop.permute.xlu0 %5604 }
0x67b4   :  { %v5607_v56 = vmul.f32 %v11078_v13, %v5605_v15 }
0x67b6   :  { %5609 = vrot.lane.b32.xlu1 %v5607_v56, %s11273_s13 }
0x6828   :  { %v5610_v39 = vpop.permute.xlu1 %5609 }
0x6829   :  { %v5612_v4 = vadd.f32 %v5610_v39, %v5602_v29 }
0x682b   :  { %11079 = vtanh.f32 %v5612_v4 }
0x6838   :  { %v11080_v7 = vpop.eup %11079 }
0x6839   :  { %5615 = vrot.lane.b32.xlu0 %v11080_v7, %s11271_s27  ;;  %v12478_v7 = vld [vmem:[%s13022_s5 + $0x8] sm:$0xff] }
0x68ab   :  { %v5616_v41 = vpop.permute.xlu0 %5615 }
0x68ac   :  { %v5618_v61 = vmul.f32 %v11078_v13, %v5616_v41  ;;  %v12487_v41 = vld [vmem:[%s13022_s5] sm:$0xff] }
0x68ae   :  { %5623 = vrot.lane.b32.xlu1 %v5618_v61, %s11274_s14  ;;  %v6227_v61 = vld [vmem:[#allocation3 + $0x68] sm:$0xff] }
0x6920   :  { %v12429_v42 = vpop.permute.xlu1 %5623 }
0x6921   :  { %10487 = vmatmul.mubr.msk.f32.vlgmr.msra.gmra.mxu0 %vm71_vm1, %v12429_v42 }
0x6922   :  { %10497 = vmatpush3.msra.mxu0 %v12214_v57  ;;  %10500 = vmatprep.mubr.msk.f32.mxu0 %vm11269_vm0, %v11268_v0 }
0x6923   :  { %10498 = vmatprep.subr.mxu0 %v11268_v0 }
0x6924   :  { %10499 = vmatpush3.msra.mxu0 %v12221_v17 }
0x6925   :  { %10510 = vmatprep.subr.mxu0 %v11268_v0 }
0x69e1   :  { %v5766_v8 = vpop.f32.mrf.mxu0 }
0x69e2   :  { %v5770_v43 = vadd.f32 %v5766_v8, %v5699_v1 }
0x69e3   :  { %v10488_v59 = vpop.f32.mrf.mxu0 }
0x69e4   :  { %11081 = vtanh.f32 %v5770_v43  ;;  %v9414_v46 = vmul.f32 -1.442695, %v5770_v43 }
0x69e6   :  { %11083 = vpow2.f32 %v9414_v46 }
0x69f1   :  { %v11082_v45 = vpop.eup %11081 }
0x69f2   :  { %5780 = vrot.lane.b32.xlu0 %v11082_v45, %s11272_s12 }
0x69f3   :  { %v11084_v18 = vpop.eup %11083 }
0x69f4   :  { %v5774_v12 = vadd.f32 1.0, %v11084_v18 }
0x69f6   :  { %11085 = vrcp.f32 %v5774_v12 }
0x6a03   :  { %v11086_v48 = vpop.eup %11085 }
0x6a04   :  { %v5778_v62 = vmul.f32 %v11086_v48, %v5612_v4 }
0x6a64   :  { %v5781_v20 = vpop.permute.xlu0 %5780 }
0x6a65   :  { %v5783_v53 = vmul.f32 %v11086_v48, %v5781_v20 }
0x6a67   :  { %5785 = vrot.lane.b32.xlu1 %v5783_v53, %s11273_s13 }
0x6ad9   :  { %v5786_v54 = vpop.permute.xlu1 %5785 }
0x6ada   :  { %v5788_v47 = vadd.f32 %v5786_v54, %v5778_v62 }
0x6adc   :  { %11087 = vtanh.f32 %v5788_v47 }
0x6ae9   :  { %v11088_v11 = vpop.eup %11087 }
0x6aea   :  { %5791 = vrot.lane.b32.xlu0 %v11088_v11, %s11271_s27 }
0x6b5c   :  { %v5792_v55 = vpop.permute.xlu0 %5791 }
0x6b5d   :  { %v5794_v21 = vmul.f32 %v11086_v48, %v5792_v55 }
0x6b5f   :  { %5799 = vrot.lane.b32.xlu1 %v5794_v21, %s11274_s14 }
0x6bd1   :  { %v12443_v22 = vpop.permute.xlu1 %5799 }
0x6bd2   :  { %10501 = vmatmul.mubr.msk.f32.vlgmr.msra.gmra.mxu0 %vm71_vm1, %v12443_v22 }
0x6bd3   :  { %10511 = vmatpush3.msra.mxu0 %v12214_v57  ;;  %10514 = vmatprep.mubr.msk.f32.mxu0 %vm11269_vm0, %v11268_v0 }
0x6bd4   :  { %10512 = vmatprep.subr.mxu0 %v11268_v0 }
0x6bd5   :  { %10513 = vmatpush3.msra.mxu0 %v12221_v17 }
0x6bd6   :  { %10524 = vmatprep.subr.mxu0 %v11268_v0 }
0x6c92   :  { %v5942_v23 = vpop.f32.mrf.mxu0 }
0x6c93   :  { %v5946_v24 = vadd.f32 %v5942_v23, %v5875_v50  ;;  %v6403_v50 = vld [vmem:[#allocation3 + $0x70] sm:$0xff] }
0x6c94   :  { %v10502_v52 = vpop.f32.mrf.mxu0 }
0x6c95   :  { %11089 = vtanh.f32 %v5946_v24  ;;  %v9419_v25 = vmul.f32 -1.442695, %v5946_v24 }
0x6c97   :  { %11091 = vpow2.f32 %v9419_v25 }
0x6ca2   :  { %v11090_v60 = vpop.eup %11089 }
0x6ca3   :  { %5956 = vrot.lane.b32.xlu0 %v11090_v60, %s11272_s12 }
0x6ca4   :  { %v11092_v16 = vpop.eup %11091 }
0x6ca5   :  { %v5950_v26 = vadd.f32 1.0, %v11092_v16 }
0x6ca7   :  { %11093 = vrcp.f32 %v5950_v26 }
0x6cb4   :  { %v11094_v27 = vpop.eup %11093 }
0x6cb5   :  { %v5954_v19 = vmul.f32 %v11094_v27, %v5788_v47 }
0x6d15   :  { %v5957_v9 = vpop.permute.xlu0 %5956 }
0x6d16   :  { %v5959_v28 = vmul.f32 %v11094_v27, %v5957_v9 }
0x6d18   :  { %5961 = vrot.lane.b32.xlu1 %v5959_v28, %s11273_s13 }
0x6d8a   :  { %v5962_v40 = vpop.permute.xlu1 %5961 }
0x6d8b   :  { %v5964_v30 = vadd.f32 %v5962_v40, %v5954_v19 }
0x6d8d   :  { %11095 = vtanh.f32 %v5964_v30 }
0x6d9a   :  { %v11096_v10 = vpop.eup %11095 }
0x6d9b   :  { %5967 = vrot.lane.b32.xlu0 %v11096_v10, %s11271_s27 }
0x6e0d   :  { %v5968_v58 = vpop.permute.xlu0 %5967 }
0x6e0e   :  { %v5970_v31 = vmul.f32 %v11094_v27, %v5968_v58 }
0x6e10   :  { %5975 = vrot.lane.b32.xlu1 %v5970_v31, %s11274_s14 }
0x6e82   :  { %v12457_v32 = vpop.permute.xlu1 %5975 }
0x6e83   :  { %10515 = vmatmul.mubr.msk.f32.vlgmr.msra.gmra.mxu0 %vm71_vm1, %v12457_v32 }
0x6e84   :  { %10525 = vmatpush3.msra.mxu0 %v12214_v57  ;;  %10528 = vmatprep.mubr.msk.f32.mxu0 %vm11269_vm0, %v11268_v0 }
0x6e85   :  { %10526 = vmatprep.subr.mxu0 %v11268_v0 }
0x6e86   :  { %10527 = vmatpush3.msra.mxu0 %v12221_v17 }
0x6e87   :  { %10538 = vmatprep.subr.mxu0 %v11268_v0 }
0x6f43   :  { %v6118_v33 = vpop.f32.mrf.mxu0 }
0x6f44   :  { %v6122_v34 = vadd.f32 %v6118_v33, %v6051_v3  ;;  %v6579_v33 = vld [vmem:[#allocation3 + $0x78] sm:$0xff] }
0x6f45   :  { %v10516_v35 = vpop.f32.mrf.mxu0 }
0x6f46   :  { %11097 = vtanh.f32 %v6122_v34  ;;  %v9424_v2 = vmul.f32 -1.442695, %v6122_v34 }
0x6f48   :  { %11099 = vpow2.f32 %v9424_v2 }
0x6f53   :  { %v11098_v36 = vpop.eup %11097 }
0x6f54   :  { %6132 = vrot.lane.b32.xlu0 %v11098_v36, %s11272_s12 }
0x6f55   :  { %v11100_v57 = vpop.eup %11099 }
0x6f56   :  { %v6126_v5 = vadd.f32 1.0, %v11100_v57 }
0x6f58   :  { %11101 = vrcp.f32 %v6126_v5 }
0x6f65   :  { %v11102_v37 = vpop.eup %11101 }
0x6f66   :  { %v6130_v17 = vmul.f32 %v11102_v37, %v5964_v30 }
0x6fc6   :  { %v6133_v38 = vpop.permute.xlu0 %6132 }
0x6fc7   :  { %v6135_v63 = vmul.f32 %v11102_v37, %v6133_v38 }
0x6fc9   :  { %6137 = vrot.lane.b32.xlu1 %v6135_v63, %s11273_s13 }
0x703b   :  { %v6138_v13 = vpop.permute.xlu1 %6137 }
0x703c   :  { %v6140_v15 = vadd.f32 %v6138_v13, %v6130_v17 }
0x703e   :  { %11103 = vtanh.f32 %v6140_v15 }
0x704b   :  { %v11104_v56 = vpop.eup %11103 }
0x704c   :  { %6143 = vrot.lane.b32.xlu0 %v11104_v56, %s11271_s27 }
0x70be   :  { %v6144_v29 = vpop.permute.xlu0 %6143 }
0x70bf   :  { %v6146_v39 = vmul.f32 %v11102_v37, %v6144_v29 }
0x70c1   :  { %6151 = vrot.lane.b32.xlu1 %v6146_v39, %s11274_s14 }
0x7133   :  { %v12471_v4 = vpop.permute.xlu1 %6151 }
0x7134   :  { %10529 = vmatmul.mubr.msk.f32.vlgmr.msra.gmra.mxu0 %vm71_vm1, %v12471_v4 }
0x7135   :  { %10539 = vmatpush3.msra.mxu0 %v12478_v7  ;;  %10542 = vmatprep.mubr.msk.f32.mxu0 %vm11269_vm0, %v11268_v0 }
0x7136   :  { %10540 = vmatprep.subr.mxu0 %v11268_v0 }
0x7137   :  { %10541 = vmatpush3.msra.mxu0 %v12487_v41 }
0x7138   :  { %10552 = vmatprep.subr.mxu0 %v11268_v0 }
0x71f4   :  { %v6294_v1 = vpop.f32.mrf.mxu0 }
0x71f5   :  { %v6298_v8 = vadd.f32 %v6294_v1, %v6227_v61 }
0x71f6   :  { %v10530_v43 = vpop.f32.mrf.mxu0 }
0x71f7   :  { %11105 = vtanh.f32 %v6298_v8  ;;  %v9429_v45 = vmul.f32 -1.442695, %v6298_v8  ;;  %v6755_v8 = vld [vmem:[#allocation3 + $0x80] sm:$0xff] }
0x71f9   :  { %11107 = vpow2.f32 %v9429_v45 }
0x7204   :  { %v11106_v59 = vpop.eup %11105 }
0x7205   :  { %6308 = vrot.lane.b32.xlu0 %v11106_v59, %s11272_s12 }
0x7206   :  { %v11108_v46 = vpop.eup %11107 }
0x7207   :  { %v6302_v18 = vadd.f32 1.0, %v11108_v46 }
0x7209   :  { %11109 = vrcp.f32 %v6302_v18 }
0x7216   :  { %v11110_v12 = vpop.eup %11109 }
0x7217   :  { %v6306_v53 = vmul.f32 %v11110_v12, %v6140_v15 }
0x7277   :  { %v6309_v48 = vpop.permute.xlu0 %6308 }
0x7278   :  { %v6311_v20 = vmul.f32 %v11110_v12, %v6309_v48 }
0x727a   :  { %6313 = vrot.lane.b32.xlu1 %v6311_v20, %s11273_s13 }
0x72ec   :  { %v6314_v62 = vpop.permute.xlu1 %6313 }
0x72ed   :  { %v6316_v54 = vadd.f32 %v6314_v62, %v6306_v53 }
0x72ef   :  { %11111 = vtanh.f32 %v6316_v54 }
0x72fc   :  { %v11112_v47 = vpop.eup %11111 }
0x72fd   :  { %6319 = vrot.lane.b32.xlu0 %v11112_v47, %s11271_s27 }
0x736f   :  { %v6320_v11 = vpop.permute.xlu0 %6319 }
0x7370   :  { %v6322_v55 = vmul.f32 %v11110_v12, %v6320_v11 }
0x7372   :  { %6327 = vrot.lane.b32.xlu1 %v6322_v55, %s11274_s14 }
0x73e4   :  { %v12495_v21 = vpop.permute.xlu1 %6327 }
0x73e5   :  { %10543 = vmatmul.mubr.msk.f32.vlgmr.msra.gmra.mxu0 %vm71_vm1, %v12495_v21 }
0x73e6   :  { %10553 = vmatpush3.msra.mxu0 %v12478_v7  ;;  %10556 = vmatprep.mubr.msk.f32.mxu0 %vm11269_vm0, %v11268_v0 }
0x73e7   :  { %10554 = vmatprep.subr.mxu0 %v11268_v0 }
0x73e8   :  { %10555 = vmatpush3.msra.mxu0 %v12487_v41 }
0x73e9   :  { %10566 = vmatprep.subr.mxu0 %v11268_v0 }
0x74a5   :  { %v6470_v23 = vpop.f32.mrf.mxu0 }
0x74a6   :  { %v6474_v24 = vadd.f32 %v6470_v23, %v6403_v50 }
0x74a7   :  { %v10544_v52 = vpop.f32.mrf.mxu0 }
0x74a8   :  { %11113 = vtanh.f32 %v6474_v24  ;;  %v9434_v25 = vmul.f32 -1.442695, %v6474_v24  ;;  %v6931_v52 = vld [vmem:[#allocation3 + $0x88] sm:$0xff] }
0x74aa   :  { %11115 = vpow2.f32 %v9434_v25 }
0x74b5   :  { %v11114_v60 = vpop.eup %11113 }
0x74b6   :  { %6484 = vrot.lane.b32.xlu0 %v11114_v60, %s11272_s12 }
0x74b7   :  { %v11116_v16 = vpop.eup %11115 }
0x74b8   :  { %v6478_v26 = vadd.f32 1.0, %v11116_v16 }
0x74ba   :  { %11117 = vrcp.f32 %v6478_v26 }
0x74c7   :  { %v11118_v27 = vpop.eup %11117 }
0x74c8   :  { %v6482_v19 = vmul.f32 %v11118_v27, %v6316_v54 }
0x7528   :  { %v6485_v9 = vpop.permute.xlu0 %6484 }
0x7529   :  { %v6487_v28 = vmul.f32 %v11118_v27, %v6485_v9 }
0x752b   :  { %6489 = vrot.lane.b32.xlu1 %v6487_v28, %s11273_s13 }
0x759d   :  { %v6490_v40 = vpop.permute.xlu1 %6489 }
0x759e   :  { %v6492_v30 = vadd.f32 %v6490_v40, %v6482_v19 }
0x75a0   :  { %11119 = vtanh.f32 %v6492_v30 }
0x75ad   :  { %v11120_v10 = vpop.eup %11119 }
0x75ae   :  { %6495 = vrot.lane.b32.xlu0 %v11120_v10, %s11271_s27 }
0x7620   :  { %v6496_v58 = vpop.permute.xlu0 %6495 }
0x7621   :  { %v6498_v31 = vmul.f32 %v11118_v27, %v6496_v58 }
0x7623   :  { %6503 = vrot.lane.b32.xlu1 %v6498_v31, %s11274_s14 }
0x7695   :  { %v12509_v3 = vpop.permute.xlu1 %6503 }
0x7696   :  { %10557 = vmatmul.mubr.msk.f32.vlgmr.msra.gmra.mxu0 %vm71_vm1, %v12509_v3 }
0x7697   :  { %10567 = vmatpush3.msra.mxu0 %v12478_v7  ;;  %10570 = vmatprep.mubr.msk.f32.mxu0 %vm11269_vm0, %v11268_v0 }
0x7698   :  { %10568 = vmatprep.subr.mxu0 %v11268_v0 }
0x7699   :  { %10569 = vmatpush3.msra.mxu0 %v12487_v41 }
0x769a   :  { %10580 = vmatprep.subr.mxu0 %v11268_v0 }
0x7756   :  { %v6646_v34 = vpop.f32.mrf.mxu0 }
0x7757   :  { %v6650_v35 = vadd.f32 %v6646_v34, %v6579_v33 }
0x7758   :  { %v10558_v36 = vpop.f32.mrf.mxu0 }
0x7759   :  { %11121 = vtanh.f32 %v6650_v35  ;;  %v9439_v57 = vmul.f32 -1.442695, %v6650_v35 }
0x775b   :  { %11123 = vpow2.f32 %v9439_v57 }
0x7766   :  { %v11122_v2 = vpop.eup %11121 }
0x7767   :  { %6660 = vrot.lane.b32.xlu0 %v11122_v2, %s11272_s12  ;;  %v7107_v2 = vld [vmem:[#allocation3 + $0x90] sm:$0xff] }
0x7768   :  { %v11124_v5 = vpop.eup %11123 }
0x7769   :  { %v6654_v37 = vadd.f32 1.0, %v11124_v5 }
0x776b   :  { %11125 = vrcp.f32 %v6654_v37 }
0x7778   :  { %v11126_v38 = vpop.eup %11125 }
0x7779   :  { %v6658_v13 = vmul.f32 %v11126_v38, %v6492_v30 }
0x77d9   :  { %v6661_v63 = vpop.permute.xlu0 %6660 }
0x77da   :  { %v6663_v17 = vmul.f32 %v11126_v38, %v6661_v63 }
0x77dc   :  { %6665 = vrot.lane.b32.xlu1 %v6663_v17, %s11273_s13 }
0x784e   :  { %v6666_v15 = vpop.permute.xlu1 %6665 }
0x784f   :  { %v6668_v56 = vadd.f32 %v6666_v15, %v6658_v13 }
0x7851   :  { %11127 = vtanh.f32 %v6668_v56 }
0x785e   :  { %v11128_v29 = vpop.eup %11127 }
0x785f   :  { %6671 = vrot.lane.b32.xlu0 %v11128_v29, %s11271_s27 }
0x78d1   :  { %v6672_v39 = vpop.permute.xlu0 %6671 }
0x78d2   :  { %v6674_v61 = vmul.f32 %v11126_v38, %v6672_v39 }
0x78d4   :  { %6679 = vrot.lane.b32.xlu1 %v6674_v61, %s11274_s14 }
0x7946   :  { %v12523_v1 = vpop.permute.xlu1 %6679 }
0x7947   :  { %10571 = vmatmul.mubr.msk.f32.vlgmr.msra.gmra.mxu0 %vm71_vm1, %v12523_v1 }
0x7948   :  { %10581 = vmatpush3.msra.mxu0 %v12478_v7  ;;  %10584 = vmatprep.mubr.msk.f32.mxu0 %vm11269_vm0, %v11268_v0 }
0x7949   :  { %10582 = vmatprep.subr.mxu0 %v11268_v0 }
0x794a   :  { %10583 = vmatpush3.msra.mxu0 %v12487_v41 }
0x794b   :  { %10594 = vmatprep.subr.mxu0 %v11268_v0 }
0x7a07   :  { %v6822_v43 = vpop.f32.mrf.mxu0 }
0x7a08   :  { %v6826_v59 = vadd.f32 %v6822_v43, %v6755_v8 }
0x7a09   :  { %v10572_v45 = vpop.f32.mrf.mxu0 }
0x7a0a   :  { %11129 = vtanh.f32 %v6826_v59  ;;  %v9444_v18 = vmul.f32 -1.442695, %v6826_v59 }
0x7a0c   :  { %11131 = vpow2.f32 %v9444_v18  ;;  %v7283_v18 = vld [vmem:[#allocation3 + $0x98] sm:$0xff] }
0x7a17   :  { %v11130_v46 = vpop.eup %11129 }
0x7a18   :  { %6836 = vrot.lane.b32.xlu0 %v11130_v46, %s11272_s12 }
0x7a19   :  { %v11132_v12 = vpop.eup %11131 }
0x7a1a   :  { %v6830_v48 = vadd.f32 1.0, %v11132_v12 }
0x7a1c   :  { %11133 = vrcp.f32 %v6830_v48 }
0x7a29   :  { %v11134_v20 = vpop.eup %11133 }
0x7a2a   :  { %v6834_v54 = vmul.f32 %v11134_v20, %v6668_v56 }
0x7a8a   :  { %v6837_v53 = vpop.permute.xlu0 %6836 }
0x7a8b   :  { %v6839_v62 = vmul.f32 %v11134_v20, %v6837_v53 }
0x7a8d   :  { %6841 = vrot.lane.b32.xlu1 %v6839_v62, %s11273_s13 }
0x7aff   :  { %v6842_v47 = vpop.permute.xlu1 %6841 }
0x7b00   :  { %v6844_v11 = vadd.f32 %v6842_v47, %v6834_v54 }
0x7b02   :  { %11135 = vtanh.f32 %v6844_v11 }
0x7b0f   :  { %v11136_v55 = vpop.eup %11135 }
0x7b10   :  { %6847 = vrot.lane.b32.xlu0 %v11136_v55, %s11271_s27 }
0x7b82   :  { %v6848_v50 = vpop.permute.xlu0 %6847 }
0x7b83   :  { %v6850_v23 = vmul.f32 %v11134_v20, %v6848_v50 }
0x7b85   :  { %6855 = vrot.lane.b32.xlu1 %v6850_v23, %s11274_s14 }
0x7bf7   :  { %v12537_v24 = vpop.permute.xlu1 %6855 }
0x7bf8   :  { %10585 = vmatmul.mubr.msk.f32.vlgmr.msra.gmra.mxu0 %vm71_vm1, %v12537_v24 }
0x7bf9   :  { %10595 = vmatpush3.msra.mxu0 %v12478_v7  ;;  %10598 = vmatprep.mubr.msk.f32.mxu0 %vm11269_vm0, %v11268_v0 }
0x7bfa   :  { %10596 = vmatprep.subr.mxu0 %v11268_v0 }
0x7bfb   :  { %10597 = vmatpush3.msra.mxu0 %v12487_v41 }
0x7bfc   :  { %10608 = vmatprep.subr.mxu0 %v11268_v0 }
0x7cb8   :  { %v6998_v60 = vpop.f32.mrf.mxu0 }
0x7cb9   :  { %v7002_v25 = vadd.f32 %v6998_v60, %v6931_v52 }
0x7cba   :  { %v10586_v16 = vpop.f32.mrf.mxu0 }
0x7cbb   :  { %11137 = vtanh.f32 %v7002_v25  ;;  %v9449_v27 = vmul.f32 -1.442695, %v7002_v25 }
0x7cbd   :  { %11139 = vpow2.f32 %v9449_v27 }
0x7cc8   :  { %v11138_v26 = vpop.eup %11137 }
0x7cc9   :  { %7012 = vrot.lane.b32.xlu0 %v11138_v26, %s11272_s12 }
0x7cca   :  { %v11140_v9 = vpop.eup %11139 }
0x7ccb   :  { %v7006_v28 = vadd.f32 1.0, %v11140_v9  ;;  %v7459_v9 = vld [vmem:[#allocation3 + $0xa0] sm:$0xff] }
0x7ccd   :  { %11141 = vrcp.f32 %v7006_v28 }
0x7cda   :  { %v11142_v19 = vpop.eup %11141 }
0x7cdb   :  { %v7010_v10 = vmul.f32 %v11142_v19, %v6844_v11 }
0x7d3b   :  { %v7013_v40 = vpop.permute.xlu0 %7012 }
0x7d3c   :  { %v7015_v30 = vmul.f32 %v11142_v19, %v7013_v40 }
0x7d3e   :  { %7017 = vrot.lane.b32.xlu1 %v7015_v30, %s11273_s13 }
0x7db0   :  { %v7018_v58 = vpop.permute.xlu1 %7017 }
0x7db1   :  { %v7020_v31 = vadd.f32 %v7018_v58, %v7010_v10 }
0x7db3   :  { %11143 = vtanh.f32 %v7020_v31 }
0x7dc0   :  { %v11144_v33 = vpop.eup %11143 }
0x7dc1   :  { %7023 = vrot.lane.b32.xlu0 %v11144_v33, %s11271_s27 }
0x7e33   :  { %v7024_v34 = vpop.permute.xlu0 %7023 }
0x7e34   :  { %v7026_v35 = vmul.f32 %v11142_v19, %v7024_v34 }
0x7e36   :  { %7031 = vrot.lane.b32.xlu1 %v7026_v35, %s11274_s14 }
0x7ea8   :  { %v12551_v36 = vpop.permute.xlu1 %7031 }
0x7ea9   :  { %10599 = vmatmul.mubr.msk.f32.vlgmr.msra.gmra.mxu0 %vm71_vm1, %v12551_v36 }
0x7eaa   :  { %10609 = vmatpush3.msra.mxu0 %v12478_v7  ;;  %10612 = vmatprep.mubr.msk.f32.mxu0 %vm11269_vm0, %v11268_v0 }
0x7eab   :  { %10610 = vmatprep.subr.mxu0 %v11268_v0 }
0x7eac   :  { %10611 = vmatpush3.msra.mxu0 %v12487_v41 }
0x7ead   :  { %10622 = vmatprep.subr.mxu0 %v11268_v0 }
0x7f69   :  { %v7174_v57 = vpop.f32.mrf.mxu0 }
0x7f6a   :  { %v7178_v5 = vadd.f32 %v7174_v57, %v7107_v2 }
0x7f6b   :  { %v10600_v37 = vpop.f32.mrf.mxu0 }
0x7f6c   :  { %11145 = vtanh.f32 %v7178_v5  ;;  %v9454_v63 = vmul.f32 -1.442695, %v7178_v5 }
0x7f6e   :  { %11147 = vpow2.f32 %v9454_v63 }
0x7f79   :  { %v11146_v38 = vpop.eup %11145 }
0x7f7a   :  { %7188 = vrot.lane.b32.xlu0 %v11146_v38, %s11272_s12 }
0x7f7b   :  { %v11148_v17 = vpop.eup %11147 }
0x7f7c   :  { %v7182_v13 = vadd.f32 1.0, %v11148_v17 }
0x7f7e   :  { %11149 = vrcp.f32 %v7182_v13  ;;  %v7635_v13 = vld [vmem:[#allocation3 + $0xa8] sm:$0xff] }
0x7f8b   :  { %v11150_v15 = vpop.eup %11149 }
0x7f8c   :  { %v7186_v39 = vmul.f32 %v11150_v15, %v7020_v31 }
0x7fec   :  { %v7189_v56 = vpop.permute.xlu0 %7188 }
0x7fed   :  { %v7191_v29 = vmul.f32 %v11150_v15, %v7189_v56 }
0x7fef   :  { %7193 = vrot.lane.b32.xlu1 %v7191_v29, %s11273_s13 }
0x8061   :  { %v7194_v61 = vpop.permute.xlu1 %7193 }
0x8062   :  { %v7196_v8 = vadd.f32 %v7194_v61, %v7186_v39 }
0x8064   :  { %11151 = vtanh.f32 %v7196_v8 }
0x8071   :  { %v11152_v43 = vpop.eup %11151 }
0x8072   :  { %7199 = vrot.lane.b32.xlu0 %v11152_v43, %s11271_s27 }
0x80e4   :  { %v7200_v59 = vpop.permute.xlu0 %7199 }
0x80e5   :  { %v7202_v45 = vmul.f32 %v11150_v15, %v7200_v59 }
0x80e7   :  { %7207 = vrot.lane.b32.xlu1 %v7202_v45, %s11274_s14 }
0x8159   :  { %v12565_v46 = vpop.permute.xlu1 %7207 }
0x815a   :  { %10613 = vmatmul.mubr.msk.f32.vlgmr.msra.gmra.mxu0 %vm71_vm1, %v12565_v46 }
0x815b   :  { %10623 = vmatpush3.msra.mxu0 %v12478_v7  ;;  %10626 = vmatprep.mubr.msk.f32.mxu0 %vm11269_vm0, %v11268_v0 }
0x815c   :  { %10624 = vmatprep.subr.mxu0 %v11268_v0 }
0x815d   :  { %10625 = vmatpush3.msra.mxu0 %v12487_v41 }
0x815e   :  { %10636 = vmatprep.subr.mxu0 %v11268_v0 }
0x821a   :  { %v7350_v12 = vpop.f32.mrf.mxu0 }
0x821b   :  { %v7354_v48 = vadd.f32 %v7350_v12, %v7283_v18 }
0x821c   :  { %v10614_v20 = vpop.f32.mrf.mxu0 }
0x821d   :  { %11153 = vtanh.f32 %v7354_v48  ;;  %v9459_v62 = vmul.f32 -1.442695, %v7354_v48 }
0x821f   :  { %11155 = vpow2.f32 %v9459_v62 }
0x822a   :  { %v11154_v53 = vpop.eup %11153 }
0x822b   :  { %7364 = vrot.lane.b32.xlu0 %v11154_v53, %s11272_s12 }
0x822c   :  { %v11156_v54 = vpop.eup %11155 }
0x822d   :  { %v7358_v47 = vadd.f32 1.0, %v11156_v54 }
0x822f   :  { %11157 = vrcp.f32 %v7358_v47 }
0x823c   :  { %v11158_v11 = vpop.eup %11157 }
0x823d   :  { %v7362_v23 = vmul.f32 %v11158_v11, %v7196_v8 }
0x829d   :  { %v7365_v55 = vpop.permute.xlu0 %7364 }
0x829e   :  { %v7367_v50 = vmul.f32 %v11158_v11, %v7365_v55 }
0x82a0   :  { %7369 = vrot.lane.b32.xlu1 %v7367_v50, %s11273_s13 }
0x8312   :  { %v7370_v52 = vpop.permute.xlu1 %7369 }
0x8313   :  { %v7372_v60 = vadd.f32 %v7370_v52, %v7362_v23 }
0x8315   :  { %11159 = vtanh.f32 %v7372_v60 }
0x8322   :  { %v11160_v25 = vpop.eup %11159 }
0x8323   :  { %7375 = vrot.lane.b32.xlu0 %v11160_v25, %s11271_s27 }
0x8395   :  { %v7376_v16 = vpop.permute.xlu0 %7375 }
0x8396   :  { %v7378_v26 = vmul.f32 %v11158_v11, %v7376_v16  ;;  %v7811_v11 = vld [vmem:[#allocation3 + $0xb0] sm:$0xff] }
0x8398   :  { %7383 = vrot.lane.b32.xlu1 %v7378_v26, %s11274_s14 }
0x840a   :  { %v12579_v27 = vpop.permute.xlu1 %7383 }
0x840b   :  { %10627 = vmatmul.mubr.msk.f32.vlgmr.msra.gmra.mxu0 %vm71_vm1, %v12579_v27 }
0x840c   :  { %10637 = vmatpush3.msra.mxu0 %v12478_v7  ;;  %10640 = vmatprep.mubr.msk.f32.mxu0 %vm11269_vm0, %v11268_v0 }
0x840d   :  { %10638 = vmatprep.subr.mxu0 %v11268_v0 }
0x840e   :  { %10639 = vmatpush3.msra.mxu0 %v12487_v41 }
0x840f   :  { %10650 = vmatprep.subr.mxu0 %v11268_v0 }
0x84cb   :  { %v7526_v28 = vpop.f32.mrf.mxu0 }
0x84cc   :  { %v7530_v19 = vadd.f32 %v7526_v28, %v7459_v9 }
0x84cd   :  { %v10628_v40 = vpop.f32.mrf.mxu0 }
0x84ce   :  { %11161 = vtanh.f32 %v7530_v19  ;;  %v9464_v10 = vmul.f32 -1.442695, %v7530_v19 }
0x84d0   :  { %11163 = vpow2.f32 %v9464_v10 }
0x84db   :  { %v11162_v30 = vpop.eup %11161 }
0x84dc   :  { %7540 = vrot.lane.b32.xlu0 %v11162_v30, %s11272_s12 }
0x84dd   :  { %v11164_v58 = vpop.eup %11163 }
0x84de   :  { %v7534_v31 = vadd.f32 1.0, %v11164_v58 }
0x84e0   :  { %11165 = vrcp.f32 %v7534_v31 }
0x84ed   :  { %v11166_v33 = vpop.eup %11165 }
0x84ee   :  { %v7538_v2 = vmul.f32 %v11166_v33, %v7372_v60 }
0x854e   :  { %v7541_v34 = vpop.permute.xlu0 %7540 }
0x854f   :  { %v7543_v35 = vmul.f32 %v11166_v33, %v7541_v34  ;;  %v7987_v34 = vld [vmem:[#allocation3 + $0xb8] sm:$0xff] }
0x8551   :  { %7545 = vrot.lane.b32.xlu1 %v7543_v35, %s11273_s13 }
0x85c3   :  { %v7546_v57 = vpop.permute.xlu1 %7545 }
0x85c4   :  { %v7548_v5 = vadd.f32 %v7546_v57, %v7538_v2 }
0x85c6   :  { %11167 = vtanh.f32 %v7548_v5 }
0x85d3   :  { %v11168_v37 = vpop.eup %11167 }
0x85d4   :  { %7551 = vrot.lane.b32.xlu0 %v11168_v37, %s11271_s27 }
0x8646   :  { %v7552_v38 = vpop.permute.xlu0 %7551 }
0x8647   :  { %v7554_v63 = vmul.f32 %v11166_v33, %v7552_v38 }
0x8649   :  { %7559 = vrot.lane.b32.xlu1 %v7554_v63, %s11274_s14 }
0x86bb   :  { %v12593_v17 = vpop.permute.xlu1 %7559 }
0x86bc   :  { %10641 = vmatmul.mubr.msk.f32.vlgmr.msra.gmra.mxu0 %vm71_vm1, %v12593_v17 }
0x86bd   :  { %10651 = vmatpush3.msra.mxu0 %v12478_v7  ;;  %10654 = vmatprep.mubr.msk.f32.mxu0 %vm11269_vm0, %v11268_v0 }
0x86be   :  { %10652 = vmatprep.subr.mxu0 %v11268_v0 }
0x86bf   :  { %10653 = vmatpush3.msra.mxu0 %v12487_v41 }
0x86c0   :  { %10664 = vmatprep.subr.mxu0 %v11268_v0 }
0x877c   :  { %v7702_v15 = vpop.f32.mrf.mxu0 }
0x877d   :  { %v7706_v56 = vadd.f32 %v7702_v15, %v7635_v13 }
0x877e   :  { %v10642_v29 = vpop.f32.mrf.mxu0 }
0x877f   :  { %11169 = vtanh.f32 %v7706_v56  ;;  %v9469_v61 = vmul.f32 -1.442695, %v7706_v56 }
0x8781   :  { %11171 = vpow2.f32 %v9469_v61 }
0x878c   :  { %v11170_v39 = vpop.eup %11169 }
0x878d   :  { %7716 = vrot.lane.b32.xlu0 %v11170_v39, %s11272_s12 }
0x878e   :  { %v11172_v8 = vpop.eup %11171 }
0x878f   :  { %v7710_v43 = vadd.f32 1.0, %v11172_v8 }
0x8791   :  { %11173 = vrcp.f32 %v7710_v43 }
0x879e   :  { %v11174_v59 = vpop.eup %11173 }
0x879f   :  { %v7714_v12 = vmul.f32 %v11174_v59, %v7548_v5 }
0x87ff   :  { %v7717_v45 = vpop.permute.xlu0 %7716 }
0x8800   :  { %v7719_v18 = vmul.f32 %v11174_v59, %v7717_v45 }
0x8802   :  { %7721 = vrot.lane.b32.xlu1 %v7719_v18, %s11273_s13  ;;  %v8163_v18 = vld [vmem:[#allocation3 + $0xc0] sm:$0xff] }
0x8874   :  { %v7722_v48 = vpop.permute.xlu1 %7721 }
0x8875   :  { %v7724_v20 = vadd.f32 %v7722_v48, %v7714_v12 }
0x8877   :  { %11175 = vtanh.f32 %v7724_v20 }
0x8884   :  { %v11176_v53 = vpop.eup %11175 }
0x8885   :  { %7727 = vrot.lane.b32.xlu0 %v11176_v53, %s11271_s27 }
0x88f7   :  { %v7728_v62 = vpop.permute.xlu0 %7727 }
0x88f8   :  { %v7730_v54 = vmul.f32 %v11174_v59, %v7728_v62 }
0x88fa   :  { %7735 = vrot.lane.b32.xlu1 %v7730_v54, %s11274_s14 }
0x896c   :  { %v12607_v47 = vpop.permute.xlu1 %7735 }
0x896d   :  { %10655 = vmatmul.mubr.msk.f32.vlgmr.msra.gmra.mxu0 %vm71_vm1, %v12607_v47 }
0x896e   :  { %10665 = vmatpush3.msra.mxu0 %v12478_v7  ;;  %10668 = vmatprep.mubr.msk.f32.mxu0 %vm11269_vm0, %v11268_v0 }
0x896f   :  { %10666 = vmatprep.subr.mxu0 %v11268_v0 }
0x8970   :  { %10667 = vmatpush3.msra.mxu0 %v12487_v41 }
0x8971   :  { %10678 = vmatprep.subr.mxu0 %v11268_v0 }
0x8a2d   :  { %v7878_v55 = vpop.f32.mrf.mxu0 }
0x8a2e   :  { %v7882_v50 = vadd.f32 %v7878_v55, %v7811_v11 }
0x8a2f   :  { %v10656_v23 = vpop.f32.mrf.mxu0 }
0x8a30   :  { %11177 = vtanh.f32 %v7882_v50  ;;  %v9474_v60 = vmul.f32 -1.442695, %v7882_v50 }
0x8a32   :  { %11179 = vpow2.f32 %v9474_v60 }
0x8a3d   :  { %v11178_v52 = vpop.eup %11177 }
0x8a3e   :  { %7892 = vrot.lane.b32.xlu0 %v11178_v52, %s11272_s12 }
0x8a3f   :  { %v11180_v25 = vpop.eup %11179 }
0x8a40   :  { %v7886_v16 = vadd.f32 1.0, %v11180_v25 }
0x8a42   :  { %11181 = vrcp.f32 %v7886_v16 }
0x8a4f   :  { %v11182_v26 = vpop.eup %11181 }
0x8a50   :  { %v7890_v19 = vmul.f32 %v11182_v26, %v7724_v20 }
0x8ab0   :  { %v7893_v9 = vpop.permute.xlu0 %7892 }
0x8ab1   :  { %v7895_v28 = vmul.f32 %v11182_v26, %v7893_v9 }
0x8ab3   :  { %7897 = vrot.lane.b32.xlu1 %v7895_v28, %s11273_s13 }
0x8b25   :  { %v7898_v40 = vpop.permute.xlu1 %7897 }
0x8b26   :  { %v7900_v30 = vadd.f32 %v7898_v40, %v7890_v19  ;;  %v8339_v19 = vld [vmem:[#allocation3 + $0xc8] sm:$0xff] }
0x8b28   :  { %11183 = vtanh.f32 %v7900_v30 }
0x8b35   :  { %v11184_v10 = vpop.eup %11183 }
0x8b36   :  { %7903 = vrot.lane.b32.xlu0 %v11184_v10, %s11271_s27 }
0x8ba8   :  { %v7904_v58 = vpop.permute.xlu0 %7903 }
0x8ba9   :  { %v7906_v31 = vmul.f32 %v11182_v26, %v7904_v58 }
0x8bab   :  { %7911 = vrot.lane.b32.xlu1 %v7906_v31, %s11274_s14 }
0x8c1d   :  { %v12621_v33 = vpop.permute.xlu1 %7911 }
0x8c1e   :  { %10669 = vmatmul.mubr.msk.f32.vlgmr.msra.gmra.mxu0 %vm71_vm1, %v12621_v33 }
0x8c1f   :  { %10679 = vmatpush3.msra.mxu0 %v12478_v7  ;;  %10682 = vmatprep.mubr.msk.f32.mxu0 %vm11269_vm0, %v11268_v0 }
0x8c20   :  { %10680 = vmatprep.subr.mxu0 %v11268_v0 }
0x8c21   :  { %10681 = vmatpush3.msra.mxu0 %v12487_v41 }
0x8c22   :  { %10692 = vmatprep.subr.mxu0 %v11268_v0 }
0x8cde   :  { %v8054_v35 = vpop.f32.mrf.mxu0 }
0x8cdf   :  { %v8058_v2 = vadd.f32 %v8054_v35, %v7987_v34 }
0x8ce0   :  { %v10670_v57 = vpop.f32.mrf.mxu0 }
0x8ce1   :  { %11185 = vtanh.f32 %v8058_v2  ;;  %v9479_v37 = vmul.f32 -1.442695, %v8058_v2 }
0x8ce3   :  { %11187 = vpow2.f32 %v9479_v37 }
0x8cee   :  { %v11186_v5 = vpop.eup %11185 }
0x8cef   :  { %8068 = vrot.lane.b32.xlu0 %v11186_v5, %s11272_s12 }
0x8cf0   :  { %v11188_v38 = vpop.eup %11187 }
0x8cf1   :  { %v8062_v63 = vadd.f32 1.0, %v11188_v38 }
0x8cf3   :  { %11189 = vrcp.f32 %v8062_v63 }
0x8d00   :  { %v11190_v13 = vpop.eup %11189 }
0x8d01   :  { %v8066_v29 = vmul.f32 %v11190_v13, %v7900_v30 }
0x8d61   :  { %v8069_v15 = vpop.permute.xlu0 %8068 }
0x8d62   :  { %v8071_v56 = vmul.f32 %v11190_v13, %v8069_v15 }
0x8d64   :  { %8073 = vrot.lane.b32.xlu1 %v8071_v56, %s11273_s13 }
0x8dd6   :  { %v8074_v39 = vpop.permute.xlu1 %8073 }
0x8dd7   :  { %v8076_v61 = vadd.f32 %v8074_v39, %v8066_v29  ;;  %v8515_v39 = vld [vmem:[#allocation3 + $0xd0] sm:$0xff] }
0x8dd9   :  { %11191 = vtanh.f32 %v8076_v61 }
0x8de6   :  { %v11192_v8 = vpop.eup %11191 }
0x8de7   :  { %8079 = vrot.lane.b32.xlu0 %v11192_v8, %s11271_s27 }
0x8e59   :  { %v8080_v43 = vpop.permute.xlu0 %8079 }
0x8e5a   :  { %v8082_v59 = vmul.f32 %v11190_v13, %v8080_v43 }
0x8e5c   :  { %8087 = vrot.lane.b32.xlu1 %v8082_v59, %s11274_s14 }
0x8ece   :  { %v12635_v45 = vpop.permute.xlu1 %8087 }
0x8ecf   :  { %10683 = vmatmul.mubr.msk.f32.vlgmr.msra.gmra.mxu0 %vm71_vm1, %v12635_v45 }
0x8ed0   :  { %10693 = vmatpush3.msra.mxu0 %v12478_v7  ;;  %10696 = vmatprep.mubr.msk.f32.mxu0 %vm11269_vm0, %v11268_v0 }
0x8ed1   :  { %10694 = vmatprep.subr.mxu0 %v11268_v0 }
0x8ed2   :  { %10695 = vmatpush3.msra.mxu0 %v12487_v41 }
0x8ed3   :  { %10706 = vmatprep.subr.mxu0 %v11268_v0 }
0x8f8f   :  { %v8230_v12 = vpop.f32.mrf.mxu0 }
0x8f90   :  { %v8234_v48 = vadd.f32 %v8230_v12, %v8163_v18 }
0x8f91   :  { %v10684_v20 = vpop.f32.mrf.mxu0 }
0x8f92   :  { %11193 = vtanh.f32 %v8234_v48  ;;  %v9484_v62 = vmul.f32 -1.442695, %v8234_v48 }
0x8f94   :  { %11195 = vpow2.f32 %v9484_v62 }
0x8f9f   :  { %v11194_v53 = vpop.eup %11193 }
0x8fa0   :  { %8244 = vrot.lane.b32.xlu0 %v11194_v53, %s11272_s12 }
0x8fa1   :  { %v11196_v54 = vpop.eup %11195 }
0x8fa2   :  { %v8238_v11 = vadd.f32 1.0, %v11196_v54 }
0x8fa4   :  { %11197 = vrcp.f32 %v8238_v11 }
0x8fb1   :  { %v11198_v55 = vpop.eup %11197 }
0x8fb2   :  { %v8242_v52 = vmul.f32 %v11198_v55, %v8076_v61 }
0x9012   :  { %v8245_v50 = vpop.permute.xlu0 %8244 }
0x9013   :  { %v8247_v23 = vmul.f32 %v11198_v55, %v8245_v50 }
0x9015   :  { %8249 = vrot.lane.b32.xlu1 %v8247_v23, %s11273_s13 }
0x9087   :  { %v8250_v60 = vpop.permute.xlu1 %8249 }
0x9088   :  { %v8252_v25 = vadd.f32 %v8250_v60, %v8242_v52  ;;  %v9334_v52 = vmul.f32 -1.442695, %v12239_v51 }
0x908a   :  { %11199 = vtanh.f32 %v8252_v25 }
0x9097   :  { %v11200_v16 = vpop.eup %11199 }
0x9098   :  { %8255 = vrot.lane.b32.xlu0 %v11200_v16, %s11271_s27 }
0x910a   :  { %v8256_v26 = vpop.permute.xlu0 %8255 }
0x910b   :  { %v8258_v9 = vmul.f32 %v11198_v55, %v8256_v26 }
0x910d   :  { %8263 = vrot.lane.b32.xlu1 %v8258_v9, %s11274_s14 }
0x917f   :  { %v12649_v28 = vpop.permute.xlu1 %8263 }
0x9180   :  { %10697 = vmatmul.mubr.msk.f32.vlgmr.msra.gmra.mxu0 %vm71_vm1, %v12649_v28 }
0x9181   :  { %10707 = vmatpush3.msra.mxu0 %v12478_v7  ;;  %10710 = vmatprep.mubr.msk.f32.mxu0 %vm11269_vm0, %v11268_v0 }
0x9182   :  { %10708 = vmatprep.subr.mxu0 %v11268_v0 }
0x9183   :  { %10709 = vmatpush3.msra.mxu0 %v12487_v41 }
0x9184   :  { %10720 = vmatprep.subr.mxu0 %v11268_v0 }
0x9240   :  { %v8406_v40 = vpop.f32.mrf.mxu0 }
0x9241   :  { %v8410_v30 = vadd.f32 %v8406_v40, %v8339_v19 }
0x9242   :  { %v10698_v10 = vpop.f32.mrf.mxu0 }
0x9243   :  { %11201 = vtanh.f32 %v8410_v30  ;;  %v9489_v31 = vmul.f32 -1.442695, %v8410_v30 }
0x9245   :  { %11203 = vpow2.f32 %v9489_v31 }
0x9250   :  { %v11202_v58 = vpop.eup %11201 }
0x9251   :  { %8420 = vrot.lane.b32.xlu0 %v11202_v58, %s11272_s12 }
0x9252   :  { %v11204_v34 = vpop.eup %11203 }
0x9253   :  { %v8414_v35 = vadd.f32 1.0, %v11204_v34 }
0x9255   :  { %11205 = vrcp.f32 %v8414_v35  ;;  %v8691_v35 = vld [vmem:[#allocation3 + $0xd8] sm:$0xff] }
0x9262   :  { %v11206_v2 = vpop.eup %11205 }
0x9263   :  { %v8418_v37 = vmul.f32 %v11206_v2, %v8252_v25 }
0x92c3   :  { %v8421_v57 = vpop.permute.xlu0 %8420 }
0x92c4   :  { %v8423_v5 = vmul.f32 %v11206_v2, %v8421_v57 }
0x92c6   :  { %8425 = vrot.lane.b32.xlu1 %v8423_v5, %s11273_s13 }
0x9338   :  { %v8426_v38 = vpop.permute.xlu1 %8425 }
0x9339   :  { %v8428_v63 = vadd.f32 %v8426_v38, %v8418_v37 }
0x933b   :  { %11207 = vtanh.f32 %v8428_v63 }
0x9348   :  { %v11208_v13 = vpop.eup %11207 }
0x9349   :  { %8431 = vrot.lane.b32.xlu0 %v11208_v13, %s11271_s27  ;;  %v9406_v13 = vld [vmem:[%s13023_s7 + $0x88] sm:$0xff] }
0x93bb   :  { %v8432_v15 = vpop.permute.xlu0 %8431 }
0x93bc   :  { %v8434_v56 = vmul.f32 %v11206_v2, %v8432_v15  ;;  %v9405_v15 = vld [vmem:[%s13023_s7 + $0x80] sm:$0xff] }
0x93be   :  { %8439 = vrot.lane.b32.xlu1 %v8434_v56, %s11274_s14  ;;  %v9411_v56 = vld [vmem:[%s13023_s7 + $0x98] sm:$0xff] }
0x9430   :  { %v12663_v29 = vpop.permute.xlu1 %8439 }
0x9431   :  { %10711 = vmatmul.mubr.msk.f32.vlgmr.msra.gmra.mxu0 %vm71_vm1, %v12663_v29 }
0x9432   :  { %10721 = vmatpush3.msra.mxu0 %v12478_v7  ;;  %10724 = vmatprep.mubr.msk.f32.mxu0 %vm11269_vm0, %v11268_v0 }
0x9433   :  { %10722 = vmatprep.subr.mxu0 %v11268_v0 }
0x9434   :  { %10723 = vmatpush3.msra.mxu0 %v12487_v41 }
0x9435   :  { %10734 = vmatprep.subr.mxu0 %v11268_v0 }
0x94f1   :  { %v8582_v61 = vpop.f32.mrf.mxu0 }
0x94f2   :  { %v8586_v8 = vadd.f32 %v8582_v61, %v8515_v39  ;;  %v9416_v39 = vld [vmem:[%s13023_s7 + $0xa8] sm:$0xff]  ;;  %v9421_v61 = vld [vmem:[%s13023_s7 + $0xb8] sm:$0xff] }
0x94f3   :  { %v10712_v43 = vpop.f32.mrf.mxu0 }
0x94f4   :  { %11209 = vtanh.f32 %v8586_v8  ;;  %v9494_v18 = vmul.f32 -1.442695, %v8586_v8  ;;  %v9426_v8 = vld [vmem:[%s13023_s7 + $0xc8] sm:$0xff]  ;;  %v9431_v43 = vld [vmem:[%s13023_s7 + $0xd8] sm:$0xff] }
0x94f6   :  { %11211 = vpow2.f32 %v9494_v18  ;;  %v9436_v18 = vld [vmem:[%s13023_s7 + $0xe8] sm:$0xff] }
0x9501   :  { %v11210_v59 = vpop.eup %11209 }
0x9502   :  { %8596 = vrot.lane.b32.xlu0 %v11210_v59, %s11272_s12 }
0x9503   :  { %v11212_v12 = vpop.eup %11211 }
0x9504   :  { %v8590_v48 = vadd.f32 1.0, %v11212_v12  ;;  %v9441_v12 = vld [vmem:[%s13023_s7 + $0xf8] sm:$0xff] }
0x9506   :  { %11213 = vrcp.f32 %v8590_v48  ;;  %v9446_v48 = vld [vmem:[%s13023_s7 + $0x108] sm:$0xff] }
0x9513   :  { %v11214_v20 = vpop.eup %11213 }
0x9514   :  { %v8594_v54 = vmul.f32 %v11214_v20, %v8428_v63 }
0x9574   :  { %v8597_v53 = vpop.permute.xlu0 %8596 }
0x9575   :  { %v8599_v62 = vmul.f32 %v11214_v20, %v8597_v53  ;;  %v9456_v53 = vld [vmem:[%s13023_s7 + $0x128] sm:$0xff] }
0x9577   :  { %8601 = vrot.lane.b32.xlu1 %v8599_v62, %s11273_s13 }
0x95e9   :  { %v8602_v11 = vpop.permute.xlu1 %8601 }
0x95ea   :  { %v12675_v55 = vadd.f32 %v8602_v11, %v8594_v54  ;;  %v9461_v11 = vld [vmem:[%s13023_s7 + $0x138] sm:$0xff] }
0x95ec   :  { %11215 = vtanh.f32 %v12675_v55 }
0x95ed   :  { %11217 = vtanh.f32 %v12239_v51 }
0x95ee   :  { %11219 = vpow2.f32 %v9334_v52  ;;  %v9476_v52 = vld [vmem:[%s13023_s7 + $0x168] sm:$0xff] }
0x95f9   :  { %v11216_v50 = vpop.eup %11215 }
0x95fa   :  { %8607 = vrot.lane.b32.xlu0 %v11216_v50, %s11271_s27  ;;  %v11218_v23 = vpop.eup %11217  ;;  %v9466_v50 = vld [vmem:[%s13023_s7 + $0x148] sm:$0xff] }
0x95fb   :  { %v11220_v60 = vpop.eup %11219 }
0x95fc   :  { %v3534_v25 = vadd.f32 1.0, %v11220_v60  ;;  %v9481_v60 = vld [vmem:[%s13023_s7 + $0x178] sm:$0xff] }
0x95fe   :  { %3540 = vrot.lane.b32.xlu0 %v11218_v23, %s11270_s26  ;;  %11221 = vrcp.f32 %v3534_v25  ;;  %v9471_v23 = vld [vmem:[%s13023_s7 + $0x158] sm:$0xff] }
0x960b   :  { %v11222_v9 = vpop.eup %11221 }
0x960c   :  { %v3538_v51 = vmul.f32 %v11222_v9, %v12206_v49  ;;  %v9400_v49 = vld [vmem:[%s13023_s7 + $0x70] sm:$0xff] }
0x966c   :  { %v8608_v16 = vpop.permute.xlu0 %8607 }
0x966d   :  { %v8610_v26 = vmul.f32 %v11214_v20, %v8608_v16  ;;  %v9451_v20 = vld [vmem:[%s13023_s7 + $0x118] sm:$0xff] }
0x966f   :  { %8615 = vrot.lane.b32.xlu1 %v8610_v26, %s11274_s14  ;;  %v9480_v26 = vld [vmem:[%s13023_s7 + $0x170] sm:$0xff] }
0x9670   :  { %v3541_v19 = vpop.permute.xlu0 %3540 }
0x9671   :  { %v3543_v40 = vmul.f32 %v11222_v9, %v3541_v19  ;;  %v9491_v19 = vld [vmem:[%s13023_s7 + $0x198] sm:$0xff] }
0x9673   :  { %3545 = vrot.lane.b32.xlu0 %v3543_v40, %s11271_s27  ;;  %v9496_v40 = vld [vmem:[%s13023_s7 + $0x1a8] sm:$0xff] }
0x96e1   :  { %v12684_v30 = vpop.permute.xlu1 %8615 }
0x96e2   :  { %10725 = vmatmul.mubr.msk.f32.vlgmr.msra.gmra.mxu0 %vm71_vm1, %v12684_v30 }
0x96e3   :  { %10735 = vmatpush3.msra.mxu0 %v12478_v7  ;;  %10738 = vmatprep.mubr.msk.f32.mxu0 %vm11269_vm0, %v11268_v0  ;;  %v9401_v7 = vld [vmem:[%s13023_s7 + $0x78] sm:$0xff] }
0x96e4   :  { %10736 = vmatprep.subr.mxu0 %v11268_v0  ;;  %10448 = vmatpush3.msra.mxu1 %v9401_v7 }
0x96e5   :  { %v3546_v10 = vpop.permute.xlu0 %3545  ;;  %10737 = vmatpush3.msra.mxu0 %v12487_v41  ;;  %10449 = vmatprep.subr.mxu1 %v11268_v0 }
0x96e6   :  { %v3548_v58 = vadd.f32 %v3546_v10, %v3538_v51  ;;  %10748 = vmatprep.subr.mxu0 %v11268_v0  ;;  %10450 = vmatpush3.msra.mxu1 %v9400_v49 }
0x96e7   :  { %10461 = vmatprep.subr.mxu1 %v11268_v0 }
0x96e8   :  { %11223 = vtanh.f32 %v3548_v58  ;;  %v9501_v58 = vld [vmem:[%s13023_s7 + $0x1b8] sm:$0xff] }
0x96f5   :  { %v11224_v31 = vpop.eup %11223 }
0x96f6   :  { %3551 = vrot.lane.b32.xlu0 %v11224_v31, %s11270_s26  ;;  %v11265_v31 = vld [vmem:[%s13021_s6] ss:$0 sm:$0xff] }
0x9768   :  { %v3552_v34 = vpop.permute.xlu0 %3551 }
0x9769   :  { %v3554_v41 = vmul.f32 %v11222_v9, %v3552_v34  ;;  %v9486_v9 = vld [vmem:[%s13023_s7 + $0x188] sm:$0xff] }
0x976b   :  { %3556 = vrot.lane.b32.xlu0 %v3554_v41, %s11271_s27 }
0x97a2   :  { %v8758_v2 = vpop.f32.mrf.mxu0 }
0x97a3   :  { %v8762_v57 = vadd.f32 %v8758_v2, %v8691_v35 }
0x97a4   :  { %v10726_v5 = vpop.f32.mrf.mxu0 }
0x97a5   :  { %11225 = vtanh.f32 %v8762_v57  ;;  %v9499_v59 = vmul.f32 -1.442695, %v8762_v57 }
0x97a7   :  { %11227 = vpow2.f32 %v9499_v59 }
0x97b2   :  { %v11226_v37 = vpop.eup %11225 }
0x97b3   :  { %8772 = vrot.lane.b32.xlu1 %v11226_v37, %s11272_s12 }
0x97b4   :  { %v11228_v62 = vpop.eup %11227 }
0x97b5   :  { %v8766_v54 = vadd.f32 1.0, %v11228_v62 }
0x97b7   :  { %11229 = vrcp.f32 %v8766_v54 }
0x97c4   :  { %v12892_v25 = vpop.eup %11229 }
0x97dd   :  { %v3557_v38 = vpop.permute.xlu0 %3556 }
0x97de   :  { %3560 = vst.msk [vmem:[#allocation4 + $0xe8] sm:$0xff] %vm412_vm2, %v3557_v38 }
0x97e5   :  { %v3590_v63 = vld [vmem:[#allocation4 + $0xe8] sm:$0xff] }
0x97e6   :  { %10340 = vmatmul.mubr.msk.f32.gmra.mxu1 %vm412_vm2, %v3590_v63 }
0x97e7   :  { %10451 = vmatprep.mubr.msk.f32.mxu1 %vm11269_vm0, %v11268_v0 }
0x97ea   :  { %10452 = vmatmul.mubr.msk.f32.vlgmr.msra.gmra.mxu1 %vm71_vm1, %v12401_v6  ;;  %v9410_v6 = vld [vmem:[%s13023_s7 + $0x90] sm:$0xff] }
0x97eb   :  { %10462 = vmatpush3.msra.mxu1 %v9406_v13  ;;  %10465 = vmatprep.mubr.msk.f32.mxu1 %vm11269_vm0, %v11268_v0 }
0x97ec   :  { %10463 = vmatprep.subr.mxu1 %v11268_v0 }
0x97ed   :  { %10464 = vmatpush3.msra.mxu1 %v9405_v15 }
0x97ee   :  { %10466 = vmatmul.mubr.msk.f32.vlgmr.msra.gmra.mxu1 %vm71_vm1, %v12415_v14  ;;  %10475 = vmatprep.subr.mxu1 %v11268_v0  ;;  %v9415_v14 = vld [vmem:[%s13023_s7 + $0xa0] sm:$0xff] }
0x97ef   :  { %10476 = vmatpush3.msra.mxu1 %v9411_v56  ;;  %10479 = vmatprep.mubr.msk.f32.mxu1 %vm11269_vm0, %v11268_v0 }
0x97f0   :  { %10477 = vmatprep.subr.mxu1 %v11268_v0 }
0x97f1   :  { %10478 = vmatpush3.msra.mxu1 %v9410_v6 }
0x97f2   :  { %10480 = vmatmul.mubr.msk.f32.vlgmr.msra.gmra.mxu1 %vm71_vm1, %v12429_v42  ;;  %10489 = vmatprep.subr.mxu1 %v11268_v0  ;;  %v9420_v42 = vld [vmem:[%s13023_s7 + $0xb0] sm:$0xff] }
0x97f3   :  { %10490 = vmatpush3.msra.mxu1 %v9416_v39  ;;  %10493 = vmatprep.mubr.msk.f32.mxu1 %vm11269_vm0, %v11268_v0 }
0x97f4   :  { %10491 = vmatprep.subr.mxu1 %v11268_v0 }
0x97f5   :  { %10492 = vmatpush3.msra.mxu1 %v9415_v14 }
0x97f6   :  { %10494 = vmatmul.mubr.msk.f32.vlgmr.msra.gmra.mxu1 %vm71_vm1, %v12443_v22  ;;  %10503 = vmatprep.subr.mxu1 %v11268_v0  ;;  %v9425_v22 = vld [vmem:[%s13023_s7 + $0xc0] sm:$0xff] }
0x97f7   :  { %10504 = vmatpush3.msra.mxu1 %v9421_v61  ;;  %10507 = vmatprep.mubr.msk.f32.mxu1 %vm11269_vm0, %v11268_v0 }
0x97f8   :  { %10505 = vmatprep.subr.mxu1 %v11268_v0 }
0x97f9   :  { %10506 = vmatpush3.msra.mxu1 %v9420_v42 }
0x97fa   :  { %10508 = vmatmul.mubr.msk.f32.vlgmr.msra.gmra.mxu1 %vm71_vm1, %v12457_v32  ;;  %10517 = vmatprep.subr.mxu1 %v11268_v0  ;;  %v9430_v32 = vld [vmem:[%s13023_s7 + $0xd0] sm:$0xff] }
0x97fb   :  { %10518 = vmatpush3.msra.mxu1 %v9426_v8  ;;  %10521 = vmatprep.mubr.msk.f32.mxu1 %vm11269_vm0, %v11268_v0 }
0x97fc   :  { %10519 = vmatprep.subr.mxu1 %v11268_v0 }
0x97fd   :  { %10520 = vmatpush3.msra.mxu1 %v9425_v22 }
0x97fe   :  { %10522 = vmatmul.mubr.msk.f32.vlgmr.msra.gmra.mxu1 %vm71_vm1, %v12471_v4  ;;  %10531 = vmatprep.subr.mxu1 %v11268_v0  ;;  %v9435_v4 = vld [vmem:[%s13023_s7 + $0xe0] sm:$0xff] }
0x97ff   :  { %10532 = vmatpush3.msra.mxu1 %v9431_v43  ;;  %10535 = vmatprep.mubr.msk.f32.mxu1 %vm11269_vm0, %v11268_v0 }
0x9800   :  { %10533 = vmatprep.subr.mxu1 %v11268_v0 }
0x9801   :  { %10534 = vmatpush3.msra.mxu1 %v9430_v32 }
0x9802   :  { %10536 = vmatmul.mubr.msk.f32.vlgmr.msra.gmra.mxu1 %vm71_vm1, %v12495_v21  ;;  %10545 = vmatprep.subr.mxu1 %v11268_v0  ;;  %v9440_v21 = vld [vmem:[%s13023_s7 + $0xf0] sm:$0xff] }
0x9803   :  { %10546 = vmatpush3.msra.mxu1 %v9436_v18  ;;  %10549 = vmatprep.mubr.msk.f32.mxu1 %vm11269_vm0, %v11268_v0 }
0x9804   :  { %10547 = vmatprep.subr.mxu1 %v11268_v0 }
0x9805   :  { %10548 = vmatpush3.msra.mxu1 %v9435_v4 }
0x9806   :  { %10550 = vmatmul.mubr.msk.f32.vlgmr.msra.gmra.mxu1 %vm71_vm1, %v12509_v3  ;;  %10559 = vmatprep.subr.mxu1 %v11268_v0  ;;  %v9445_v3 = vld [vmem:[%s13023_s7 + $0x100] sm:$0xff] }
0x9807   :  { %10560 = vmatpush3.msra.mxu1 %v9441_v12  ;;  %10563 = vmatprep.mubr.msk.f32.mxu1 %vm11269_vm0, %v11268_v0 }
0x9808   :  { %10561 = vmatprep.subr.mxu1 %v11268_v0 }
0x9809   :  { %10562 = vmatpush3.msra.mxu1 %v9440_v21 }
0x980a   :  { %10564 = vmatmul.mubr.msk.f32.vlgmr.msra.gmra.mxu1 %vm71_vm1, %v12523_v1  ;;  %10573 = vmatprep.subr.mxu1 %v11268_v0  ;;  %v9450_v1 = vld [vmem:[%s13023_s7 + $0x110] sm:$0xff] }
0x980b   :  { %10574 = vmatpush3.msra.mxu1 %v9446_v48  ;;  %10577 = vmatprep.mubr.msk.f32.mxu1 %vm11269_vm0, %v11268_v0 }
0x980c   :  { %10575 = vmatprep.subr.mxu1 %v11268_v0 }
0x980d   :  { %10576 = vmatpush3.msra.mxu1 %v9445_v3 }
0x980e   :  { %10578 = vmatmul.mubr.msk.f32.vlgmr.msra.gmra.mxu1 %vm71_vm1, %v12537_v24  ;;  %10587 = vmatprep.subr.mxu1 %v11268_v0  ;;  %v9455_v24 = vld [vmem:[%s13023_s7 + $0x120] sm:$0xff] }
0x980f   :  { %10588 = vmatpush3.msra.mxu1 %v9451_v20  ;;  %10591 = vmatprep.mubr.msk.f32.mxu1 %vm11269_vm0, %v11268_v0 }
0x9810   :  { %10589 = vmatprep.subr.mxu1 %v11268_v0 }
0x9811   :  { %10590 = vmatpush3.msra.mxu1 %v9450_v1 }
0x9812   :  { %10592 = vmatmul.mubr.msk.f32.vlgmr.msra.gmra.mxu1 %vm71_vm1, %v12551_v36  ;;  %10601 = vmatprep.subr.mxu1 %v11268_v0  ;;  %v9460_v36 = vld [vmem:[%s13023_s7 + $0x130] sm:$0xff] }
0x9813   :  { %10602 = vmatpush3.msra.mxu1 %v9456_v53  ;;  %10605 = vmatprep.mubr.msk.f32.mxu1 %vm11269_vm0, %v11268_v0 }
0x9814   :  { %10603 = vmatprep.subr.mxu1 %v11268_v0 }
0x9815   :  { %10604 = vmatpush3.msra.mxu1 %v9455_v24 }
0x9816   :  { %10606 = vmatmul.mubr.msk.f32.vlgmr.msra.gmra.mxu1 %vm71_vm1, %v12565_v46  ;;  %10615 = vmatprep.subr.mxu1 %v11268_v0  ;;  %v9465_v46 = vld [vmem:[%s13023_s7 + $0x140] sm:$0xff] }
0x9817   :  { %10616 = vmatpush3.msra.mxu1 %v9461_v11  ;;  %10619 = vmatprep.mubr.msk.f32.mxu1 %vm11269_vm0, %v11268_v0 }
0x9818   :  { %10617 = vmatprep.subr.mxu1 %v11268_v0 }
0x9819   :  { %10618 = vmatpush3.msra.mxu1 %v9460_v36 }
0x981a   :  { %10620 = vmatmul.mubr.msk.f32.vlgmr.msra.gmra.mxu1 %vm71_vm1, %v12579_v27  ;;  %10629 = vmatprep.subr.mxu1 %v11268_v0  ;;  %v9470_v27 = vld [vmem:[%s13023_s7 + $0x150] sm:$0xff] }
0x981b   :  { %10630 = vmatpush3.msra.mxu1 %v9466_v50  ;;  %10633 = vmatprep.mubr.msk.f32.mxu1 %vm11269_vm0, %v11268_v0 }
0x981c   :  { %10631 = vmatprep.subr.mxu1 %v11268_v0 }
0x981d   :  { %10632 = vmatpush3.msra.mxu1 %v9465_v46 }
0x981e   :  { %10634 = vmatmul.mubr.msk.f32.vlgmr.msra.gmra.mxu1 %vm71_vm1, %v12593_v17  ;;  %10643 = vmatprep.subr.mxu1 %v11268_v0  ;;  %v9475_v17 = vld [vmem:[%s13023_s7 + $0x160] sm:$0xff] }
0x981f   :  { %10644 = vmatpush3.msra.mxu1 %v9471_v23  ;;  %10647 = vmatprep.mubr.msk.f32.mxu1 %vm11269_vm0, %v11268_v0 }
0x9820   :  { %10645 = vmatprep.subr.mxu1 %v11268_v0 }
0x9821   :  { %10646 = vmatpush3.msra.mxu1 %v9470_v27 }
0x9822   :  { %10648 = vmatmul.mubr.msk.f32.vlgmr.msra.gmra.mxu1 %vm71_vm1, %v12607_v47  ;;  %10657 = vmatprep.subr.mxu1 %v11268_v0 }
0x9823   :  { %10658 = vmatpush3.msra.mxu1 %v9476_v52  ;;  %10661 = vmatprep.mubr.msk.f32.mxu1 %vm11269_vm0, %v11268_v0 }
0x9824   :  { %10659 = vmatprep.subr.mxu1 %v11268_v0 }
0x9825   :  { %10660 = vmatpush3.msra.mxu1 %v9475_v17  ;;  %v8773_v47 = vpop.permute.xlu1 %8772 }
0x9826   :  { %v8775_v16 = vmul.f32 %v12892_v25, %v8773_v47  ;;  %10662 = vmatmul.mubr.msk.f32.vlgmr.msra.gmra.mxu1 %vm71_vm1, %v12621_v33  ;;  %10671 = vmatprep.subr.mxu1 %v11268_v0  ;;  %v9485_v33 = vld [vmem:[%s13023_s7 + $0x180] sm:$0xff] }
0x9827   :  { %10672 = vmatpush3.msra.mxu1 %v9481_v60  ;;  %10675 = vmatprep.mubr.msk.f32.mxu1 %vm11269_vm0, %v11268_v0 }
0x9828   :  { %10673 = vmatprep.subr.mxu1 %v11268_v0  ;;  %8777 = vrot.lane.b32.xlu1 %v8775_v16, %s11273_s13 }
0x9829   :  { %10674 = vmatpush3.msra.mxu1 %v9480_v26 }
0x982a   :  { %10676 = vmatmul.mubr.msk.f32.vlgmr.msra.gmra.mxu1 %vm71_vm1, %v12635_v45  ;;  %10685 = vmatprep.subr.mxu1 %v11268_v0  ;;  %v9490_v45 = vld [vmem:[%s13023_s7 + $0x190] sm:$0xff] }
0x982b   :  { %10686 = vmatpush3.msra.mxu1 %v9486_v9  ;;  %10689 = vmatprep.mubr.msk.f32.mxu1 %vm11269_vm0, %v11268_v0 }
0x982c   :  { %10687 = vmatprep.subr.mxu1 %v11268_v0 }
0x982d   :  { %10688 = vmatpush3.msra.mxu1 %v9485_v33 }
0x982e   :  { %10690 = vmatmul.mubr.msk.f32.vlgmr.msra.gmra.mxu1 %vm71_vm1, %v12649_v28  ;;  %10699 = vmatprep.subr.mxu1 %v11268_v0  ;;  %v9495_v28 = vld [vmem:[%s13023_s7 + $0x1a0] sm:$0xff] }
0x982f   :  { %10700 = vmatpush3.msra.mxu1 %v9491_v19  ;;  %10703 = vmatprep.mubr.msk.f32.mxu1 %vm11269_vm0, %v11268_v0 }
0x9830   :  { %10701 = vmatprep.subr.mxu1 %v11268_v0 }
0x9831   :  { %10702 = vmatpush3.msra.mxu1 %v9490_v45 }
0x9832   :  { %10704 = vmatmul.mubr.msk.f32.vlgmr.msra.gmra.mxu1 %vm71_vm1, %v12663_v29  ;;  %10713 = vmatprep.subr.mxu1 %v11268_v0  ;;  %v8770_v29 = vmul.f32 %v12892_v25, %v12675_v55 }
0x9833   :  { %10714 = vmatpush3.msra.mxu1 %v9496_v40  ;;  %10717 = vmatprep.mubr.msk.f32.mxu1 %vm11269_vm0, %v11268_v0 }
0x9834   :  { %10715 = vmatprep.subr.mxu1 %v11268_v0 }
0x9835   :  { %10716 = vmatpush3.msra.mxu1 %v9495_v28 }
0x9836   :  { %10718 = vmatmul.mubr.msk.f32.vlgmr.msra.gmra.mxu1 %vm71_vm1, %v12684_v30  ;;  %10727 = vmatprep.subr.mxu1 %v11268_v0  ;;  %v9500_v30 = vld [vmem:[%s13023_s7 + $0x1b0] sm:$0xff] }
0x9837   :  { %10731 = vmatprep.mubr.msk.f32.mxu1 %vm11269_vm0, %v11268_v0  ;;  %10728 = vmatpush3.msra.mxu1 %v9501_v58 }
0x9838   :  { %10729 = vmatprep.subr.mxu1 %v11268_v0 }
0x9839   :  { %10730 = vmatpush3.msra.mxu1 %v9500_v30 }
0x983a   :  { %10741 = vmatprep.subr.mxu1 %v11268_v0 }
0x989a   :  { %v8778_v51 = vpop.permute.xlu1 %8777 }
0x989b   :  { %v12948_v10 = vadd.f32 %v8778_v51, %v8770_v29 }
0x989d   :  { %11231 = vtanh.f32 %v12948_v10 }
0x98a6   :  { %v10341_v55 = vpop.f32.mrf.mxu1 }
0x98a7   :  { %v3904_v7 = vadd.f32 %v11265_v31, %v10341_v55 }
0x98a8   :  { %v3898_v49 = vpop.f32.mrf.mxu1 }
0x98a9   :  { %3937 = vst.msk [vmem:[#allocation3 + $0xe8] sm:$0xff] %vm3907_vm3, %v3904_v7  ;;  %v3899_v34 = vadd.f32 %v11265_v31, %v3898_v49 }
0x98aa   :  { %v11232_v41 = vpop.eup %11231  ;;  %v5341_v35 = vpop.f32.mrf.mxu1 }
0x98ab   :  { %3936 = vst.msk [vmem:[#allocation3 + $0xe0] sm:$0xff] %vm3907_vm3, %v3899_v34  ;;  %v5345_v2 = vadd.f32 %v5341_v35, %v12395_v44  ;;  %8783 = vrot.lane.b32.xlu1 %v11232_v41, %s11271_s27 }
0x98ac   :  { %v10453_v57 = vpop.f32.mrf.mxu1 }
0x98ad   :  { %v11266_v57 = vld [vmem:[%s13022_s5 + $0x8] sm:$0xff] }
0x98ae   :  { %v5517_v5 = vpop.f32.mrf.mxu1 }
0x98af   :  { %v5521_v37 = vadd.f32 %v5517_v5, %v5345_v2 }
0x98b0   :  { %v10467_v38 = vpop.f32.mrf.mxu1 }
0x98b2   :  { %v5693_v63 = vpop.f32.mrf.mxu1 }
0x98b3   :  { %v5697_v13 = vadd.f32 %v5693_v63, %v5521_v37  ;;  %v8867_v37 = vld [vmem:[#allocation3 + $0xe0] sm:$0xff] }
0x98b4   :  { %v10481_v15 = vpop.f32.mrf.mxu1 }
0x98b6   :  { %v5869_v56 = vpop.f32.mrf.mxu1 }
0x98b7   :  { %v5873_v6 = vadd.f32 %v5869_v56, %v5697_v13 }
0x98b8   :  { %v10495_v39 = vpop.f32.mrf.mxu1 }
0x98ba   :  { %v6045_v14 = vpop.f32.mrf.mxu1 }
0x98bb   :  { %v6049_v61 = vadd.f32 %v6045_v14, %v5873_v6 }
0x98bc   :  { %v10509_v42 = vpop.f32.mrf.mxu1 }
0x98be   :  { %v6221_v8 = vpop.f32.mrf.mxu1 }
0x98bf   :  { %v6225_v22 = vadd.f32 %v6221_v8, %v6049_v61 }
0x98c0   :  { %v10523_v43 = vpop.f32.mrf.mxu1 }
0x98c2   :  { %v6397_v32 = vpop.f32.mrf.mxu1 }
0x98c3   :  { %v6401_v44 = vadd.f32 %v6397_v32, %v6225_v22 }
0x98c4   :  { %v10537_v59 = vpop.f32.mrf.mxu1 }
0x98c5   :  { %v9506_v59 = vld [vmem:[%s13023_s7 + $0x1c8] sm:$0xff] }
0x98c6   :  { %v6573_v18 = vpop.f32.mrf.mxu1 }
0x98c7   :  { %v6577_v4 = vadd.f32 %v6573_v18, %v6401_v44  ;;  %v9505_v18 = vld [vmem:[%s13023_s7 + $0x1c0] sm:$0xff] }
0x98c8   :  { %v10551_v12 = vpop.f32.mrf.mxu1 }
0x98ca   :  { %v6749_v21 = vpop.f32.mrf.mxu1 }
0x98cb   :  { %v6753_v48 = vadd.f32 %v6749_v21, %v6577_v4 }
0x98cc   :  { %v10565_v3 = vpop.f32.mrf.mxu1 }
0x98cd   :  { %v9043_v3 = vld [vmem:[#allocation3 + $0xe8] sm:$0xff] }
0x98ce   :  { %v6925_v20 = vpop.f32.mrf.mxu1 }
0x98cf   :  { %v6929_v1 = vadd.f32 %v6925_v20, %v6753_v48 }
0x98d0   :  { %v10579_v53 = vpop.f32.mrf.mxu1 }
0x98d2   :  { %v7101_v62 = vpop.f32.mrf.mxu1 }
0x98d3   :  { %v7105_v24 = vadd.f32 %v7101_v62, %v6929_v1 }
0x98d4   :  { %v10593_v54 = vpop.f32.mrf.mxu1 }
0x98d6   :  { %v7277_v11 = vpop.f32.mrf.mxu1 }
0x98d7   :  { %v7281_v36 = vadd.f32 %v7277_v11, %v7105_v24 }
0x98d8   :  { %v10607_v50 = vpop.f32.mrf.mxu1 }
0x98da   :  { %v7453_v46 = vpop.f32.mrf.mxu1 }
0x98db   :  { %v7457_v23 = vadd.f32 %v7453_v46, %v7281_v36 }
0x98dc   :  { %v10621_v27 = vpop.f32.mrf.mxu1 }
0x98de   :  { %v7629_v52 = vpop.f32.mrf.mxu1 }
0x98df   :  { %v7633_v17 = vadd.f32 %v7629_v52, %v7457_v23 }
0x98e0   :  { %v10635_v60 = vpop.f32.mrf.mxu1 }
0x98e2   :  { %v7805_v47 = vpop.f32.mrf.mxu1 }
0x98e3   :  { %v7809_v16 = vadd.f32 %v7805_v47, %v7633_v17  ;;  %v9511_v47 = vld [vmem:[%s13023_s7 + $0x1d8] sm:$0xff] }
0x98e4   :  { %v10649_v26 = vpop.f32.mrf.mxu1 }
0x98e6   :  { %v7981_v9 = vpop.f32.mrf.mxu1 }
0x98e7   :  { %v7985_v33 = vadd.f32 %v7981_v9, %v7809_v16  ;;  %v9510_v16 = vld [vmem:[%s13023_s7 + $0x1d0] sm:$0xff] }
0x98e8   :  { %v10663_v19 = vpop.f32.mrf.mxu1 }
0x98ea   :  { %v8157_v45 = vpop.f32.mrf.mxu1 }
0x98eb   :  { %v8161_v40 = vadd.f32 %v8157_v45, %v7985_v33  ;;  %v9226_v45 = vlaneseq }
0x98ec   :  { %v10677_v28 = vpop.f32.mrf.mxu1 }
0x98ee   :  { %v8333_v29 = vpop.f32.mrf.mxu1 }
0x98ef   :  { %v8337_v51 = vadd.f32 %v8333_v29, %v8161_v40  ;;  %v9227_v40 = vand.u32 127, %v9226_v45  ;;  %v9513_v29 = vld [vmem:[%s13024_s8] ss:$0 sm:$0xff] }
0x98f0   :  { %v10691_v58 = vpop.f32.mrf.mxu1 }
0x98f1   :  { %vm9228_vm4 = vcmp.lt.s32.totalorder %v9227_v40, 50 }
0x98f2   :  { %v8509_v30 = vpop.f32.mrf.mxu1 }
0x98f3   :  { %v8513_v55 = vadd.f32 %v8509_v30, %v8337_v51 }
0x98f4   :  { %v10705_v31 = vpop.f32.mrf.mxu1 }
0x98f6   :  { %v8685_v7 = vpop.f32.mrf.mxu1 }
0x98f7   :  { %v8689_v49 = vadd.f32 %v8685_v7, %v8513_v55 }
0x98f8   :  { %v10719_v34 = vpop.f32.mrf.mxu1 }
0x991d   :  { %v8784_v41 = vpop.permute.xlu1 %8783 }
0x991e   :  { %v8786_v35 = vmul.f32 %v12892_v25, %v8784_v41  ;;  %v11267_v25 = vld [vmem:[%s13022_s5] sm:$0xff] }
0x9920   :  { %8791 = vrot.lane.b32.xlu1 %v8786_v35, %s11274_s14 }
0x9992   :  { %v8792_v2 = vpop.permute.xlu1 %8791 }
0x9993   :  { %10732 = vmatmul.mubr.msk.f32.vlgmr.msra.gmra.mxu1 %vm71_vm1, %v8792_v2  ;;  %10739 = vmatmul.mubr.msk.f32.vlgmr.msra.gmra.mxu0 %vm71_vm1, %v8792_v2 }
0x9994   :  { %10749 = vmatpush3.msra.mxu0 %v11266_v57  ;;  %10745 = vmatprep.mubr.msk.f32.mxu1 %vm11269_vm0, %v11268_v0 }
0x9995   :  { %10750 = vmatprep.subr.mxu0 %v11268_v0  ;;  %10752 = vmatprep.mubr.msk.f32.mxu0 %vm11269_vm0, %v11268_v0 }
0x9996   :  { %10751 = vmatpush3.msra.mxu0 %v11267_v25  ;;  %10742 = vmatpush3.msra.mxu1 %v9506_v59 }
0x9997   :  { %10743 = vmatprep.subr.mxu1 %v11268_v0 }
0x9998   :  { %10744 = vmatpush3.msra.mxu1 %v9505_v18 }
0x9999   :  { %10755 = vmatprep.subr.mxu1 %v11268_v0 }
0x9a53   :  { %v8861_v5 = vpop.f32.mrf.mxu1  ;;  %v8934_v38 = vpop.f32.mrf.mxu0 }
0x9a54   :  { %v8865_v63 = vadd.f32 %v8861_v5, %v8689_v49  ;;  %v8938_v13 = vadd.f32 %v8934_v38, %v8867_v37 }
0x9a55   :  { %v10733_v15 = vpop.f32.mrf.mxu1  ;;  %v10740_v56 = vpop.f32.mrf.mxu0 }
0x9a56   :  { %11233 = vtanh.f32 %v8938_v13  ;;  %v9504_v39 = vmul.f32 -1.442695, %v8938_v13 }
0x9a58   :  { %11235 = vpow2.f32 %v9504_v39 }
0x9a63   :  { %v11234_v6 = vpop.eup %11233 }
0x9a64   :  { %8948 = vrot.lane.b32.xlu0 %v11234_v6, %s11272_s12 }
0x9a65   :  { %v11236_v14 = vpop.eup %11235 }
0x9a66   :  { %v8942_v61 = vadd.f32 1.0, %v11236_v14 }
0x9a68   :  { %11237 = vrcp.f32 %v8942_v61 }
0x9a75   :  { %v11238_v42 = vpop.eup %11237 }
0x9a76   :  { %v8946_v43 = vmul.f32 %v11238_v42, %v12948_v10 }
0x9ad6   :  { %v8949_v8 = vpop.permute.xlu0 %8948 }
0x9ad7   :  { %v8951_v22 = vmul.f32 %v11238_v42, %v8949_v8 }
0x9ad9   :  { %8953 = vrot.lane.b32.xlu1 %v8951_v22, %s11273_s13 }
0x9b4b   :  { %v8954_v32 = vpop.permute.xlu1 %8953 }
0x9b4c   :  { %v8956_v44 = vadd.f32 %v8954_v32, %v8946_v43 }
0x9b4e   :  { %11239 = vtanh.f32 %v8956_v44 }
0x9b5b   :  { %v11240_v4 = vpop.eup %11239 }
0x9b5c   :  { %8959 = vrot.lane.b32.xlu0 %v11240_v4, %s11271_s27 }
0x9bce   :  { %v8960_v10 = vpop.permute.xlu0 %8959 }
0x9bcf   :  { %v8962_v12 = vmul.f32 %v11238_v42, %v8960_v10 }
0x9bd1   :  { %8967 = vrot.lane.b32.xlu1 %v8962_v12, %s11274_s14 }
0x9c43   :  { %v8968_v21 = vpop.permute.xlu1 %8967 }
0x9c44   :  { %10746 = vmatmul.mubr.msk.f32.vlgmr.msra.gmra.mxu1 %vm71_vm1, %v8968_v21  ;;  %10753 = vmatmul.mubr.msk.f32.vlgmr.msra.gmra.mxu0 %vm71_vm1, %v8968_v21 }
0x9c45   :  { %10759 = vmatprep.mubr.msk.f32.mxu1 %vm11269_vm0, %v11268_v0  ;;  %10756 = vmatpush3.msra.mxu1 %v9511_v47 }
0x9c46   :  { %10757 = vmatprep.subr.mxu1 %v11268_v0 }
0x9c47   :  { %10758 = vmatpush3.msra.mxu1 %v9510_v16 }
0x9d04   :  { %v9037_v48 = vpop.f32.mrf.mxu1  ;;  %v9110_v20 = vpop.f32.mrf.mxu0 }
0x9d05   :  { %v9041_v1 = vadd.f32 %v9037_v48, %v8865_v63  ;;  %v9114_v53 = vadd.f32 %v9110_v20, %v9043_v3 }
0x9d06   :  { %v10747_v62 = vpop.f32.mrf.mxu1  ;;  %v10754_v24 = vpop.f32.mrf.mxu0 }
0x9d07   :  { %11241 = vtanh.f32 %v9114_v53  ;;  %v9509_v11 = vmul.f32 -1.442695, %v9114_v53 }
0x9d09   :  { %11243 = vpow2.f32 %v9509_v11 }
0x9d14   :  { %v11242_v54 = vpop.eup %11241 }
0x9d15   :  { %9124 = vrot.lane.b32.xlu0 %v11242_v54, %s11272_s12 }
0x9d16   :  { %v11244_v36 = vpop.eup %11243 }
0x9d17   :  { %v9118_v50 = vadd.f32 1.0, %v11244_v36 }
0x9d19   :  { %11245 = vrcp.f32 %v9118_v50 }
0x9d26   :  { %v11246_v46 = vpop.eup %11245 }
0x9d27   :  { %v9122_v52 = vmul.f32 %v11246_v46, %v8956_v44 }
0x9d87   :  { %v9125_v23 = vpop.permute.xlu0 %9124 }
0x9d88   :  { %v9127_v27 = vmul.f32 %v11246_v46, %v9125_v23 }
0x9d8a   :  { %9129 = vrot.lane.b32.xlu1 %v9127_v27, %s11273_s13 }
0x9dfc   :  { %v9130_v17 = vpop.permute.xlu1 %9129 }
0x9dfd   :  { %v9132_v60 = vadd.f32 %v9130_v17, %v9122_v52 }
0x9dff   :  { %11247 = vtanh.f32 %v9132_v60 }
0x9e0c   :  { %v11248_v26 = vpop.eup %11247 }
0x9e0d   :  { %9135 = vrot.lane.b32.xlu0 %v11248_v26, %s11271_s27 }
0x9e7f   :  { %v9136_v9 = vpop.permute.xlu0 %9135 }
0x9e80   :  { %v9138_v33 = vmul.f32 %v11246_v46, %v9136_v9 }
0x9e82   :  { %9143 = vrot.lane.b32.xlu1 %v9138_v33, %s11274_s14 }
0x9ef4   :  { %v9144_v19 = vpop.permute.xlu1 %9143 }
0x9ef5   :  { %10760 = vmatmul.mubr.msk.f32.vlgmr.msra.gmra.mxu1 %vm71_vm1, %v9144_v19 }
0x9fb5   :  { %v9213_v28 = vpop.f32.mrf.mxu1 }
0x9fb6   :  { %v9217_v51 = vadd.f32 %v9213_v28, %v9041_v1 }
0x9fb7   :  { %v10761_v0 = vpop.f32.mrf.mxu1 }
0x9fb8   :  { %v9225_v58 = vadd.f32 %v9513_v29, %v9217_v51 }
0x9fba   :  { %v9229_v30 = vsel %vm9228_vm4, %v9225_v58, -1e+30 }
0x9fbb   :  { %9230 = vmax.xlane.f32.xlu0 %v9229_v30 }
0xa044   :  { %v9231_v55 = vpop.xlane.xlu0 %9230 }
0xa045   :  { %v9232_v31 = vsub.f32 %v9229_v30, %v9231_v55 }
0xa047   :  { %v9233_v7 = vmul.f32 1.442695, %v9232_v31 }
0xa049   :  { %11249 = vpow2.f32 %v9233_v7 }
0xa056   :  { %v11250_v49 = vpop.eup %11249 }
0xa057   :  { %9235 = vadd.xlane.f32.xlu1 %v11250_v49 }
0xa0e0   :  { %v9236_v34 = vpop.xlane.xlu1 %9235 }
0xa0e1   :  { %11251 = vlog2.f32 %v9236_v34 }
0xa0ee   :  { %v11252_v41 = vpop.eup %11251 }
0xa0ef   :  { %v9238_v35 = vmul.f32 0.6931472, %v11252_v41 }
0xa0f1   :  { %v9239_v2 = vsub.f32 %v9232_v31, %v9238_v35 }
0xa0f3   :  { %9240 = vst [vmem:[%s13025_s9] sm:$0xff] %v9239_v2 }

</bundles_post_ra>
